<compile_context>
chip_gen: v7x
topology: tpu7x:2x2x1
jax: 0.10.0
libtpu: 0.0.40
codegen_flags: <defaults>
</compile_context>

<pallas_src>
import jax
import jax.numpy as jnp
from jax.experimental import pallas as pl
from jax.experimental.pallas import tpu as pltpu


def _channel_mix(wmat, x):
    """wmat: [co, ci], x: [ci, M] -> [co, M] (f32). Avoids degenerate MXU shapes."""
    co, ci = wmat.shape
    if ci == 1:
        return wmat * x                                            # [co,1] * [1,M]
    if co == 1:
        return jnp.sum(wmat.reshape(ci, 1) * x, axis=0, keepdims=True)
    return jnp.dot(wmat, x, preferred_element_type=jnp.float32)    # MXU


def _make_stage_kernel(cin, cmid, cout, h, w, k, pad, p):
    """Fused: 1x1 conv + bias + ReLU + ConvTranspose2d(k, stride=2, pad) + bias."""
    t = k // 2
    hp, wp = h + 2 * p, w + 2 * p
    hw = h * w

    def kernel(x_ref, w1_ref, b1_ref, wph_ref, bd_ref, o_ref, yp_ref):
        # --- 1x1 conv + bias + ReLU, lane-dense [cmid, H*W] ---
        y = _channel_mix(w1_ref[...], x_ref[0]) + b1_ref[...]
        y = jnp.maximum(y, 0.0)

        # --- zero-padded conv output held entirely in VMEM ---
        yp_ref[...] = jnp.zeros((cmid, hp, wp), jnp.float32)
        yp_ref[:, p:p + h, p:p + w] = y.reshape(cmid, h, w)

        # --- transposed conv: 4 sub-pixel phases, (K/2)^2 taps each ---
        bias = bd_ref[...]                                   # [cout, 1]
        for ry in range(2):
            base_y = (ry + pad - ((ry + pad) % 2)) // 2
            for rx in range(2):
                base_x = (rx + pad - ((rx + pad) % 2)) // 2
                acc = jnp.zeros((cout, hw), jnp.float32)
                for ty in range(t):
                    sy = p + base_y - ty
                    for tx in range(t):
                        sx = p + base_x - tx
                        win = yp_ref[:, sy:sy + h, sx:sx + w].reshape(cmid, hw)
                        acc = acc + _channel_mix(wph_ref[ry, rx, ty, tx], win)
                o_ref[0, ry, rx] = acc + bias                # lane-dense [cout, H*W]

    return kernel


def _phase_weights(wd, pad):
    """wd: [cmid, cout, K, K] (PyTorch ConvTranspose2d layout) ->
       [2, 2, K//2, K//2, cout, cmid] per-sub-pixel-phase channel-mix matrices."""
    rows = []
    for ry in range(2):
        p0y = (ry + pad) % 2
        cols = []
        for rx in range(2):
            p0x = (rx + pad) % 2
            sub = wd[:, :, p0y::2, p0x::2]                   # [cmid, cout, T, T]
            cols.append(jnp.transpose(sub, (2, 3, 1, 0)))    # [T, T, cout, cmid]
        rows.append(jnp.stack(cols, axis=0))
    return jnp.stack(rows, axis=0)


def upconv_stage(x, w1, b1, wd, bd, k, pad):
    """One stage: Conv2d(1x1)+ReLU+ConvTranspose2d(k, stride=2, padding=pad).

    x: [N, cin, H, W]; w1: [cmid, cin]; b1: [cmid];
    wd: [cmid, cout, K, K] (PyTorch ConvTranspose2d layout); bd: [cout].
    Returns [N, cout, 2H, 2W].
    """
    n, cin, h, w = x.shape
    cmid = w1.shape[0]
    cout = wd.shape[1]
    t = k // 2
    p = (pad + 1) // 2            # halo needed by the sub-pixel decomposition
    hw = h * w

    x_flat = x.reshape(n, cin, hw)                       # free reshape, NCHW kept
    wph = _phase_weights(wd.astype(jnp.float32), pad)    # [2,2,T,T,cout,cmid]
    w1f = w1.astype(jnp.float32)
    b1c = b1.reshape(cmid, 1).astype(jnp.float32)
    bdc = bd.reshape(cout, 1).astype(jnp.float32)

    flops = n * (2 * hw * cin * cmid + 2 * hw * cmid * cout * k * k)
    bytes_accessed = 4 * (x_flat.size + w1f.size + b1c.size + wph.size + bdc.size
                          + n * 4 * cout * hw)

    kernel = _make_stage_kernel(cin, cmid, cout, h, w, k, pad, p)

    out_ph = pl.pallas_call(
        kernel,
        out_shape=jax.ShapeDtypeStruct((n, 2, 2, cout, hw), jnp.float32),
        grid=(n,),
        in_specs=[
            pl.BlockSpec((1, cin, hw), lambda i: (i, 0, 0)),
            pl.BlockSpec((cmid, cin), lambda i: (0, 0)),
            pl.BlockSpec((cmid, 1), lambda i: (0, 0)),
            pl.BlockSpec((2, 2, t, t, cout, cmid), lambda i: (0, 0, 0, 0, 0, 0)),
            pl.BlockSpec((cout, 1), lambda i: (0, 0)),
        ],
        out_specs=pl.BlockSpec((1, 2, 2, cout, hw), lambda i: (i, 0, 0, 0, 0)),
        scratch_shapes=[pltpu.VMEM((cmid, h + 2 * p, w + 2 * p), jnp.float32)],
        compiler_params=pltpu.CompilerParams(dimension_semantics=("parallel",)),
        cost_estimate=pl.CostEstimate(flops=int(flops), transcendentals=0,
                                      bytes_accessed=int(bytes_accessed)),
    )(x_flat, w1f, b1c, wph, bdc)

    # Pixel shuffle: [N, ry, rx, cout, H*W] -> [N, cout, 2H, 2W]
    out = out_ph.reshape(n, 2, 2, cout, h, w)
    out = out.transpose(0, 3, 4, 1, 5, 2).reshape(n, cout, 2 * h, 2 * w)
    return out


def upconv_block_forward(x, params, k, pad):
    h = x
    for (w1, b1, wd, bd) in params:
        h = upconv_stage(h, w1, b1, wd, bd, k, pad)
    return h


# ----------------------------- pure-JAX reference -----------------------------

def _ref_conv_transpose(x, w, b, stride, pad):
    """PyTorch ConvTranspose2d forward. w: [cin, cout, K, K]."""
    kk = w.shape[2]
    w_flip = jnp.flip(w, axis=(2, 3)).transpose(1, 0, 2, 3)   # OIHW
    out = jax.lax.conv_general_dilated(
        x, w_flip,
        window_strides=(1, 1),
        padding=[(kk - 1 - pad, kk - 1 - pad)] * 2,
        lhs_dilation=(stride, stride),
        rhs_dilation=(1, 1),
        dimension_numbers=("NCHW", "OIHW", "NCHW"),
        precision=jax.lax.Precision.HIGHEST)
    return out + b[None, :, None, None]


def ref_forward(x, params, k, pad):
    h = x
    for (w1, b1, wd, bd) in params:
        y = jnp.einsum("oc,nchw->nohw", w1, h,
                       precision=jax.lax.Precision.HIGHEST) + b1[None, :, None, None]
        y = jnp.maximum(y, 0.0)
        h = _ref_conv_transpose(y, wd, bd, 2, pad)
    return h


# ------------------------------------ main ------------------------------------

if __name__ == "__main__":
    N, IN_FEATURES, H, W = 2, 4, 16, 16
    UP_SCALE = 2
    CONST_FEATURES = 16
    K = 2 ** UP_SCALE                       # 4
    PAD = [0, 0, 1, 3, 7][UP_SCALE]         # 1

    key = jax.random.PRNGKey(0)
    keys = jax.random.split(key, 1 + 4 * UP_SCALE)
    x = jax.random.normal(keys[0], (N, IN_FEATURES, H, W), dtype=jnp.float32)

    params = []
    cin = IN_FEATURES
    ki = 1
    for i in range(UP_SCALE):
        cout = 1 if i == UP_SCALE - 1 else CONST_FEATURES
        w1 = 0.5 * jax.random.normal(keys[ki], (cout, cin), jnp.float32); ki += 1
        b1 = 0.5 * jax.random.normal(keys[ki], (cout,), jnp.float32); ki += 1
        wd = 0.5 * jax.random.normal(keys[ki], (cout, cout, K, K), jnp.float32); ki += 1
        bd = 0.5 * jax.random.normal(keys[ki], (cout,), jnp.float32); ki += 1
        params.append((w1, b1, wd, bd))
        cin = cout

    out = upconv_block_forward(x, params, K, PAD)
    jax.block_until_ready(out)

    expected_shape = (N, 1, H * (2 ** UP_SCALE), W * (2 ** UP_SCALE))
    assert out.shape == expected_shape, out.shape

    ref = ref_forward(x, params, K, PAD)
    max_err = float(jnp.max(jnp.abs(out - ref)))
    assert jnp.allclose(out, ref, atol=1e-3, rtol=1e-3), f"mismatch, max_err={max_err}"

    print("KERNEL_OK")
</pallas_src>

<mosaic_0001>
module attributes {stable_mosaic.version = 11 : i64} {
  func.func @kernel(%arg0: i32, %arg1: memref<1x4x256xf32, #tpu.memory_space<vmem>>, %arg2: memref<16x4xf32, #tpu.memory_space<vmem>>, %arg3: memref<16x1xf32, #tpu.memory_space<vmem>>, %arg4: memref<2x2x2x2x16x16xf32, #tpu.memory_space<vmem>>, %arg5: memref<16x1xf32, #tpu.memory_space<vmem>>, %arg6: memref<1x2x2x16x256xf32, #tpu.memory_space<vmem>>, %arg7: memref<16x18x18xf32, #tpu.memory_space<vmem>>) attributes {dimension_semantics = [#tpu.dimension_semantics<parallel>], iteration_bounds = array<i64: 2>, scalar_prefetch = 0 : i64, scratch_operands = 1 : i64, tpu.core_type = #tpu.core_type<tc>, window_params = [{transform_indices = @transform_0, window_bounds = array<i64: 1, 4, 256>}, {pipeline_mode = #tpu.pipeline_mode<synchronous>, transform_indices = @transform_1, window_bounds = array<i64: 16, 4>}, {pipeline_mode = #tpu.pipeline_mode<synchronous>, transform_indices = @transform_2, window_bounds = array<i64: 16, 1>}, {pipeline_mode = #tpu.pipeline_mode<synchronous>, transform_indices = @transform_3, window_bounds = array<i64: 2, 2, 2, 2, 16, 16>}, {pipeline_mode = #tpu.pipeline_mode<synchronous>, transform_indices = @transform_4, window_bounds = array<i64: 16, 1>}, {transform_indices = @transform_5, window_bounds = array<i64: 1, 2, 2, 16, 256>}]} {
    %c0 = arith.constant 0 : index
    %c0_0 = arith.constant 0 : index
    %0 = vector.load %arg2[%c0, %c0_0] : memref<16x4xf32, #tpu.memory_space<vmem>>, vector<16x4xf32>
    %c0_1 = arith.constant 0 : index
    %c0_2 = arith.constant 0 : index
    %c0_3 = arith.constant 0 : index
    %1 = vector.load %arg1[%c0_1, %c0_2, %c0_3] : memref<1x4x256xf32, #tpu.memory_space<vmem>>, vector<1x4x256xf32>
    %2 = vector.shape_cast %1 : vector<1x4x256xf32> to vector<4x256xf32>
    %cst = arith.constant dense<0.000000e+00> : vector<16x256xf32>
    %3 = tpu.matmul %0, %2, %cst {dimension_numbers = #tpu.dot_dimension_numbers<[1], [0], [0], [1], [0, 0, 1, 1], [], []>} : vector<16x4xf32>, vector<4x256xf32>, vector<16x256xf32> -> vector<16x256xf32>
    %c0_4 = arith.constant 0 : index
    %c0_5 = arith.constant 0 : index
    %4 = vector.load %arg3[%c0_4, %c0_5] : memref<16x1xf32, #tpu.memory_space<vmem>>, vector<16x1xf32>
    %5 = vector.broadcast %4 : vector<16x1xf32> to vector<16x256xf32>
    %6 = arith.addf %3, %5 : vector<16x256xf32>
    %cst_6 = arith.constant 0.000000e+00 : f32
    %7 = vector.broadcast %cst_6 : f32 to vector<16x256xf32>
    %8 = arith.maximumf %6, %7 : vector<16x256xf32>
    %cst_7 = arith.constant 0.000000e+00 : f32
    %9 = vector.broadcast %cst_7 : f32 to vector<16x18x18xf32>
    %c0_8 = arith.constant 0 : index
    %c0_9 = arith.constant 0 : index
    %c0_10 = arith.constant 0 : index
    %10 = vector.load %arg7[%c0_8, %c0_9, %c0_10] : memref<16x18x18xf32, #tpu.memory_space<vmem>>, vector<16x18x18xf32>
    tpu.vector_store %arg7[%c0_8, %c0_9, %c0_10], %9 {strides = array<i32>} : memref<16x18x18xf32, #tpu.memory_space<vmem>>, vector<16x18x18xf32>,
    %11 = vector.shape_cast %8 : vector<16x256xf32> to vector<16x16x16xf32>
    %c0_11 = arith.constant 0 : index
    %c1 = arith.constant 1 : index
    %c1_12 = arith.constant 1 : index
    %12 = vector.load %arg7[%c0_11, %c1, %c1_12] : memref<16x18x18xf32, #tpu.memory_space<vmem>>, vector<16x16x16xf32>
    tpu.vector_store %arg7[%c0_11, %c1, %c1_12], %11 {strides = array<i32>} : memref<16x18x18xf32, #tpu.memory_space<vmem>>, vector<16x16x16xf32>,
    %c0_13 = arith.constant 0 : index
    %c0_14 = arith.constant 0 : index
    %13 = vector.load %arg5[%c0_13, %c0_14] : memref<16x1xf32, #tpu.memory_space<vmem>>, vector<16x1xf32>
    %cst_15 = arith.constant 0.000000e+00 : f32
    %14 = vector.broadcast %cst_15 : f32 to vector<16x256xf32>
    %c0_16 = arith.constant 0 : index
    %c1_17 = arith.constant 1 : index
    %c1_18 = arith.constant 1 : index
    %15 = vector.load %arg7[%c0_16, %c1_17, %c1_18] : memref<16x18x18xf32, #tpu.memory_space<vmem>>, vector<16x16x16xf32>
    %16 = vector.shape_cast %15 : vector<16x16x16xf32> to vector<16x256xf32>
    %c0_19 = arith.constant 0 : index
    %c0_20 = arith.constant 0 : index
    %c0_21 = arith.constant 0 : index
    %c0_22 = arith.constant 0 : index
    %c0_23 = arith.constant 0 : index
    %c0_24 = arith.constant 0 : index
    %17 = vector.load %arg4[%c0_19, %c0_20, %c0_21, %c0_22, %c0_23, %c0_24] : memref<2x2x2x2x16x16xf32, #tpu.memory_space<vmem>>, vector<1x1x1x1x16x16xf32>
    %18 = vector.shape_cast %17 : vector<1x1x1x1x16x16xf32> to vector<16x16xf32>
    %cst_25 = arith.constant dense<0.000000e+00> : vector<16x256xf32>
    %19 = tpu.matmul %18, %16, %cst_25 {dimension_numbers = #tpu.dot_dimension_numbers<[1], [0], [0], [1], [0, 0, 1, 1], [], []>} : vector<16x16xf32>, vector<16x256xf32>, vector<16x256xf32> -> vector<16x256xf32>
    %20 = arith.addf %14, %19 : vector<16x256xf32>
    %c0_26 = arith.constant 0 : index
    %c1_27 = arith.constant 1 : index
    %c0_28 = arith.constant 0 : index
    %21 = vector.load %arg7[%c0_26, %c1_27, %c0_28] : memref<16x18x18xf32, #tpu.memory_space<vmem>>, vector<16x16x16xf32>
    %22 = vector.shape_cast %21 : vector<16x16x16xf32> to vector<16x256xf32>
    %c0_29 = arith.constant 0 : index
    %c0_30 = arith.constant 0 : index
    %c0_31 = arith.constant 0 : index
    %c1_32 = arith.constant 1 : index
    %c0_33 = arith.constant 0 : index
    %c0_34 = arith.constant 0 : index
    %23 = vector.load %arg4[%c0_29, %c0_30, %c0_31, %c1_32, %c0_33, %c0_34] : memref<2x2x2x2x16x16xf32, #tpu.memory_space<vmem>>, vector<1x1x1x1x16x16xf32>
    %24 = vector.shape_cast %23 : vector<1x1x1x1x16x16xf32> to vector<16x16xf32>
    %cst_35 = arith.constant dense<0.000000e+00> : vector<16x256xf32>
    %25 = tpu.matmul %24, %22, %cst_35 {dimension_numbers = #tpu.dot_dimension_numbers<[1], [0], [0], [1], [0, 0, 1, 1], [], []>} : vector<16x16xf32>, vector<16x256xf32>, vector<16x256xf32> -> vector<16x256xf32>
    %26 = arith.addf %20, %25 : vector<16x256xf32>
    %c0_36 = arith.constant 0 : index
    %c0_37 = arith.constant 0 : index
    %c1_38 = arith.constant 1 : index
    %27 = vector.load %arg7[%c0_36, %c0_37, %c1_38] : memref<16x18x18xf32, #tpu.memory_space<vmem>>, vector<16x16x16xf32>
    %28 = vector.shape_cast %27 : vector<16x16x16xf32> to vector<16x256xf32>
    %c0_39 = arith.constant 0 : index
    %c0_40 = arith.constant 0 : index
    %c1_41 = arith.constant 1 : index
    %c0_42 = arith.constant 0 : index
    %c0_43 = arith.constant 0 : index
    %c0_44 = arith.constant 0 : index
    %29 = vector.load %arg4[%c0_39, %c0_40, %c1_41, %c0_42, %c0_43, %c0_44] : memref<2x2x2x2x16x16xf32, #tpu.memory_space<vmem>>, vector<1x1x1x1x16x16xf32>
    %30 = vector.shape_cast %29 : vector<1x1x1x1x16x16xf32> to vector<16x16xf32>
    %cst_45 = arith.constant dense<0.000000e+00> : vector<16x256xf32>
    %31 = tpu.matmul %30, %28, %cst_45 {dimension_numbers = #tpu.dot_dimension_numbers<[1], [0], [0], [1], [0, 0, 1, 1], [], []>} : vector<16x16xf32>, vector<16x256xf32>, vector<16x256xf32> -> vector<16x256xf32>
    %32 = arith.addf %26, %31 : vector<16x256xf32>
    %c0_46 = arith.constant 0 : index
    %c0_47 = arith.constant 0 : index
    %c0_48 = arith.constant 0 : index
    %33 = vector.load %arg7[%c0_46, %c0_47, %c0_48] : memref<16x18x18xf32, #tpu.memory_space<vmem>>, vector<16x16x16xf32>
    %34 = vector.shape_cast %33 : vector<16x16x16xf32> to vector<16x256xf32>
    %c0_49 = arith.constant 0 : index
    %c0_50 = arith.constant 0 : index
    %c1_51 = arith.constant 1 : index
    %c1_52 = arith.constant 1 : index
    %c0_53 = arith.constant 0 : index
    %c0_54 = arith.constant 0 : index
    %35 = vector.load %arg4[%c0_49, %c0_50, %c1_51, %c1_52, %c0_53, %c0_54] : memref<2x2x2x2x16x16xf32, #tpu.memory_space<vmem>>, vector<1x1x1x1x16x16xf32>
    %36 = vector.shape_cast %35 : vector<1x1x1x1x16x16xf32> to vector<16x16xf32>
    %cst_55 = arith.constant dense<0.000000e+00> : vector<16x256xf32>
    %37 = tpu.matmul %36, %34, %cst_55 {dimension_numbers = #tpu.dot_dimension_numbers<[1], [0], [0], [1], [0, 0, 1, 1], [], []>} : vector<16x16xf32>, vector<16x256xf32>, vector<16x256xf32> -> vector<16x256xf32>
    %38 = arith.addf %32, %37 : vector<16x256xf32>
    %39 = vector.broadcast %13 : vector<16x1xf32> to vector<16x256xf32>
    %40 = arith.addf %38, %39 : vector<16x256xf32>
    %c0_56 = arith.constant 0 : index
    %c0_57 = arith.constant 0 : index
    %c0_58 = arith.constant 0 : index
    %c0_59 = arith.constant 0 : index
    %c0_60 = arith.constant 0 : index
    %41 = vector.load %arg6[%c0_56, %c0_57, %c0_58, %c0_59, %c0_60] : memref<1x2x2x16x256xf32, #tpu.memory_space<vmem>>, vector<1x1x1x16x256xf32>
    %42 = vector.shape_cast %41 : vector<1x1x1x16x256xf32> to vector<16x256xf32>
    %43 = vector.shape_cast %40 : vector<16x256xf32> to vector<1x1x1x16x256xf32>
    tpu.vector_store %arg6[%c0_56, %c0_57, %c0_58, %c0_59, %c0_60], %43 {strides = array<i32>} : memref<1x2x2x16x256xf32, #tpu.memory_space<vmem>>, vector<1x1x1x16x256xf32>,
    %cst_61 = arith.constant 0.000000e+00 : f32
    %44 = vector.broadcast %cst_61 : f32 to vector<16x256xf32>
    %c0_62 = arith.constant 0 : index
    %c1_63 = arith.constant 1 : index
    %c2 = arith.constant 2 : index
    %45 = vector.load %arg7[%c0_62, %c1_63, %c2] : memref<16x18x18xf32, #tpu.memory_space<vmem>>, vector<16x16x16xf32>
    %46 = vector.shape_cast %45 : vector<16x16x16xf32> to vector<16x256xf32>
    %c0_64 = arith.constant 0 : index
    %c1_65 = arith.constant 1 : index
    %c0_66 = arith.constant 0 : index
    %c0_67 = arith.constant 0 : index
    %c0_68 = arith.constant 0 : index
    %c0_69 = arith.constant 0 : index
    %47 = vector.load %arg4[%c0_64, %c1_65, %c0_66, %c0_67, %c0_68, %c0_69] : memref<2x2x2x2x16x16xf32, #tpu.memory_space<vmem>>, vector<1x1x1x1x16x16xf32>
    %48 = vector.shape_cast %47 : vector<1x1x1x1x16x16xf32> to vector<16x16xf32>
    %cst_70 = arith.constant dense<0.000000e+00> : vector<16x256xf32>
    %49 = tpu.matmul %48, %46, %cst_70 {dimension_numbers = #tpu.dot_dimension_numbers<[1], [0], [0], [1], [0, 0, 1, 1], [], []>} : vector<16x16xf32>, vector<16x256xf32>, vector<16x256xf32> -> vector<16x256xf32>
    %50 = arith.addf %44, %49 : vector<16x256xf32>
    %c0_71 = arith.constant 0 : index
    %c1_72 = arith.constant 1 : index
    %c1_73 = arith.constant 1 : index
    %51 = vector.load %arg7[%c0_71, %c1_72, %c1_73] : memref<16x18x18xf32, #tpu.memory_space<vmem>>, vector<16x16x16xf32>
    %52 = vector.shape_cast %51 : vector<16x16x16xf32> to vector<16x256xf32>
    %c0_74 = arith.constant 0 : index
    %c1_75 = arith.constant 1 : index
    %c0_76 = arith.constant 0 : index
    %c1_77 = arith.constant 1 : index
    %c0_78 = arith.constant 0 : index
    %c0_79 = arith.constant 0 : index
    %53 = vector.load %arg4[%c0_74, %c1_75, %c0_76, %c1_77, %c0_78, %c0_79] : memref<2x2x2x2x16x16xf32, #tpu.memory_space<vmem>>, vector<1x1x1x1x16x16xf32>
    %54 = vector.shape_cast %53 : vector<1x1x1x1x16x16xf32> to vector<16x16xf32>
    %cst_80 = arith.constant dense<0.000000e+00> : vector<16x256xf32>
    %55 = tpu.matmul %54, %52, %cst_80 {dimension_numbers = #tpu.dot_dimension_numbers<[1], [0], [0], [1], [0, 0, 1, 1], [], []>} : vector<16x16xf32>, vector<16x256xf32>, vector<16x256xf32> -> vector<16x256xf32>
    %56 = arith.addf %50, %55 : vector<16x256xf32>
    %c0_81 = arith.constant 0 : index
    %c0_82 = arith.constant 0 : index
    %c2_83 = arith.constant 2 : index
    %57 = vector.load %arg7[%c0_81, %c0_82, %c2_83] : memref<16x18x18xf32, #tpu.memory_space<vmem>>, vector<16x16x16xf32>
    %58 = vector.shape_cast %57 : vector<16x16x16xf32> to vector<16x256xf32>
    %c0_84 = arith.constant 0 : index
    %c1_85 = arith.constant 1 : index
    %c1_86 = arith.constant 1 : index
    %c0_87 = arith.constant 0 : index
    %c0_88 = arith.constant 0 : index
    %c0_89 = arith.constant 0 : index
    %59 = vector.load %arg4[%c0_84, %c1_85, %c1_86, %c0_87, %c0_88, %c0_89] : memref<2x2x2x2x16x16xf32, #tpu.memory_space<vmem>>, vector<1x1x1x1x16x16xf32>
    %60 = vector.shape_cast %59 : vector<1x1x1x1x16x16xf32> to vector<16x16xf32>
    %cst_90 = arith.constant dense<0.000000e+00> : vector<16x256xf32>
    %61 = tpu.matmul %60, %58, %cst_90 {dimension_numbers = #tpu.dot_dimension_numbers<[1], [0], [0], [1], [0, 0, 1, 1], [], []>} : vector<16x16xf32>, vector<16x256xf32>, vector<16x256xf32> -> vector<16x256xf32>
    %62 = arith.addf %56, %61 : vector<16x256xf32>
    %c0_91 = arith.constant 0 : index
    %c0_92 = arith.constant 0 : index
    %c1_93 = arith.constant 1 : index
    %63 = vector.load %arg7[%c0_91, %c0_92, %c1_93] : memref<16x18x18xf32, #tpu.memory_space<vmem>>, vector<16x16x16xf32>
    %64 = vector.shape_cast %63 : vector<16x16x16xf32> to vector<16x256xf32>
    %c0_94 = arith.constant 0 : index
    %c1_95 = arith.constant 1 : index
    %c1_96 = arith.constant 1 : index
    %c1_97 = arith.constant 1 : index
    %c0_98 = arith.constant 0 : index
    %c0_99 = arith.constant 0 : index
    %65 = vector.load %arg4[%c0_94, %c1_95, %c1_96, %c1_97, %c0_98, %c0_99] : memref<2x2x2x2x16x16xf32, #tpu.memory_space<vmem>>, vector<1x1x1x1x16x16xf32>
    %66 = vector.shape_cast %65 : vector<1x1x1x1x16x16xf32> to vector<16x16xf32>
    %cst_100 = arith.constant dense<0.000000e+00> : vector<16x256xf32>
    %67 = tpu.matmul %66, %64, %cst_100 {dimension_numbers = #tpu.dot_dimension_numbers<[1], [0], [0], [1], [0, 0, 1, 1], [], []>} : vector<16x16xf32>, vector<16x256xf32>, vector<16x256xf32> -> vector<16x256xf32>
    %68 = arith.addf %62, %67 : vector<16x256xf32>
    %69 = vector.broadcast %13 : vector<16x1xf32> to vector<16x256xf32>
    %70 = arith.addf %68, %69 : vector<16x256xf32>
    %c0_101 = arith.constant 0 : index
    %c0_102 = arith.constant 0 : index
    %c1_103 = arith.constant 1 : index
    %c0_104 = arith.constant 0 : index
    %c0_105 = arith.constant 0 : index
    %71 = vector.load %arg6[%c0_101, %c0_102, %c1_103, %c0_104, %c0_105] : memref<1x2x2x16x256xf32, #tpu.memory_space<vmem>>, vector<1x1x1x16x256xf32>
    %72 = vector.shape_cast %71 : vector<1x1x1x16x256xf32> to vector<16x256xf32>
    %73 = vector.shape_cast %70 : vector<16x256xf32> to vector<1x1x1x16x256xf32>
    tpu.vector_store %arg6[%c0_101, %c0_102, %c1_103, %c0_104, %c0_105], %73 {strides = array<i32>} : memref<1x2x2x16x256xf32, #tpu.memory_space<vmem>>, vector<1x1x1x16x256xf32>,
    %cst_106 = arith.constant 0.000000e+00 : f32
    %74 = vector.broadcast %cst_106 : f32 to vector<16x256xf32>
    %c0_107 = arith.constant 0 : index
    %c2_108 = arith.constant 2 : index
    %c1_109 = arith.constant 1 : index
    %75 = vector.load %arg7[%c0_107, %c2_108, %c1_109] : memref<16x18x18xf32, #tpu.memory_space<vmem>>, vector<16x16x16xf32>
    %76 = vector.shape_cast %75 : vector<16x16x16xf32> to vector<16x256xf32>
    %c1_110 = arith.constant 1 : index
    %c0_111 = arith.constant 0 : index
    %c0_112 = arith.constant 0 : index
    %c0_113 = arith.constant 0 : index
    %c0_114 = arith.constant 0 : index
    %c0_115 = arith.constant 0 : index
    %77 = vector.load %arg4[%c1_110, %c0_111, %c0_112, %c0_113, %c0_114, %c0_115] : memref<2x2x2x2x16x16xf32, #tpu.memory_space<vmem>>, vector<1x1x1x1x16x16xf32>
    %78 = vector.shape_cast %77 : vector<1x1x1x1x16x16xf32> to vector<16x16xf32>
    %cst_116 = arith.constant dense<0.000000e+00> : vector<16x256xf32>
    %79 = tpu.matmul %78, %76, %cst_116 {dimension_numbers = #tpu.dot_dimension_numbers<[1], [0], [0], [1], [0, 0, 1, 1], [], []>} : vector<16x16xf32>, vector<16x256xf32>, vector<16x256xf32> -> vector<16x256xf32>
    %80 = arith.addf %74, %79 : vector<16x256xf32>
    %c0_117 = arith.constant 0 : index
    %c2_118 = arith.constant 2 : index
    %c0_119 = arith.constant 0 : index
    %81 = vector.load %arg7[%c0_117, %c2_118, %c0_119] : memref<16x18x18xf32, #tpu.memory_space<vmem>>, vector<16x16x16xf32>
    %82 = vector.shape_cast %81 : vector<16x16x16xf32> to vector<16x256xf32>
    %c1_120 = arith.constant 1 : index
    %c0_121 = arith.constant 0 : index
    %c0_122 = arith.constant 0 : index
    %c1_123 = arith.constant 1 : index
    %c0_124 = arith.constant 0 : index
    %c0_125 = arith.constant 0 : index
    %83 = vector.load %arg4[%c1_120, %c0_121, %c0_122, %c1_123, %c0_124, %c0_125] : memref<2x2x2x2x16x16xf32, #tpu.memory_space<vmem>>, vector<1x1x1x1x16x16xf32>
    %84 = vector.shape_cast %83 : vector<1x1x1x1x16x16xf32> to vector<16x16xf32>
    %cst_126 = arith.constant dense<0.000000e+00> : vector<16x256xf32>
    %85 = tpu.matmul %84, %82, %cst_126 {dimension_numbers = #tpu.dot_dimension_numbers<[1], [0], [0], [1], [0, 0, 1, 1], [], []>} : vector<16x16xf32>, vector<16x256xf32>, vector<16x256xf32> -> vector<16x256xf32>
    %86 = arith.addf %80, %85 : vector<16x256xf32>
    %c0_127 = arith.constant 0 : index
    %c1_128 = arith.constant 1 : index
    %c1_129 = arith.constant 1 : index
    %87 = vector.load %arg7[%c0_127, %c1_128, %c1_129] : memref<16x18x18xf32, #tpu.memory_space<vmem>>, vector<16x16x16xf32>
    %88 = vector.shape_cast %87 : vector<16x16x16xf32> to vector<16x256xf32>
    %c1_130 = arith.constant 1 : index
    %c0_131 = arith.constant 0 : index
    %c1_132 = arith.constant 1 : index
    %c0_133 = arith.constant 0 : index
    %c0_134 = arith.constant 0 : index
    %c0_135 = arith.constant 0 : index
    %89 = vector.load %arg4[%c1_130, %c0_131, %c1_132, %c0_133, %c0_134, %c0_135] : memref<2x2x2x2x16x16xf32, #tpu.memory_space<vmem>>, vector<1x1x1x1x16x16xf32>
    %90 = vector.shape_cast %89 : vector<1x1x1x1x16x16xf32> to vector<16x16xf32>
    %cst_136 = arith.constant dense<0.000000e+00> : vector<16x256xf32>
    %91 = tpu.matmul %90, %88, %cst_136 {dimension_numbers = #tpu.dot_dimension_numbers<[1], [0], [0], [1], [0, 0, 1, 1], [], []>} : vector<16x16xf32>, vector<16x256xf32>, vector<16x256xf32> -> vector<16x256xf32>
    %92 = arith.addf %86, %91 : vector<16x256xf32>
    %c0_137 = arith.constant 0 : index
    %c1_138 = arith.constant 1 : index
    %c0_139 = arith.constant 0 : index
    %93 = vector.load %arg7[%c0_137, %c1_138, %c0_139] : memref<16x18x18xf32, #tpu.memory_space<vmem>>, vector<16x16x16xf32>
    %94 = vector.shape_cast %93 : vector<16x16x16xf32> to vector<16x256xf32>
    %c1_140 = arith.constant 1 : index
    %c0_141 = arith.constant 0 : index
    %c1_142 = arith.constant 1 : index
    %c1_143 = arith.constant 1 : index
    %c0_144 = arith.constant 0 : index
    %c0_145 = arith.constant 0 : index
    %95 = vector.load %arg4[%c1_140, %c0_141, %c1_142, %c1_143, %c0_144, %c0_145] : memref<2x2x2x2x16x16xf32, #tpu.memory_space<vmem>>, vector<1x1x1x1x16x16xf32>
    %96 = vector.shape_cast %95 : vector<1x1x1x1x16x16xf32> to vector<16x16xf32>
    %cst_146 = arith.constant dense<0.000000e+00> : vector<16x256xf32>
    %97 = tpu.matmul %96, %94, %cst_146 {dimension_numbers = #tpu.dot_dimension_numbers<[1], [0], [0], [1], [0, 0, 1, 1], [], []>} : vector<16x16xf32>, vector<16x256xf32>, vector<16x256xf32> -> vector<16x256xf32>
    %98 = arith.addf %92, %97 : vector<16x256xf32>
    %99 = vector.broadcast %13 : vector<16x1xf32> to vector<16x256xf32>
    %100 = arith.addf %98, %99 : vector<16x256xf32>
    %c0_147 = arith.constant 0 : index
    %c1_148 = arith.constant 1 : index
    %c0_149 = arith.constant 0 : index
    %c0_150 = arith.constant 0 : index
    %c0_151 = arith.constant 0 : index
    %101 = vector.load %arg6[%c0_147, %c1_148, %c0_149, %c0_150, %c0_151] : memref<1x2x2x16x256xf32, #tpu.memory_space<vmem>>, vector<1x1x1x16x256xf32>
    %102 = vector.shape_cast %101 : vector<1x1x1x16x256xf32> to vector<16x256xf32>
    %103 = vector.shape_cast %100 : vector<16x256xf32> to vector<1x1x1x16x256xf32>
    tpu.vector_store %arg6[%c0_147, %c1_148, %c0_149, %c0_150, %c0_151], %103 {strides = array<i32>} : memref<1x2x2x16x256xf32, #tpu.memory_space<vmem>>, vector<1x1x1x16x256xf32>,
    %cst_152 = arith.constant 0.000000e+00 : f32
    %104 = vector.broadcast %cst_152 : f32 to vector<16x256xf32>
    %c0_153 = arith.constant 0 : index
    %c2_154 = arith.constant 2 : index
    %c2_155 = arith.constant 2 : index
    %105 = vector.load %arg7[%c0_153, %c2_154, %c2_155] : memref<16x18x18xf32, #tpu.memory_space<vmem>>, vector<16x16x16xf32>
    %106 = vector.shape_cast %105 : vector<16x16x16xf32> to vector<16x256xf32>
    %c1_156 = arith.constant 1 : index
    %c1_157 = arith.constant 1 : index
    %c0_158 = arith.constant 0 : index
    %c0_159 = arith.constant 0 : index
    %c0_160 = arith.constant 0 : index
    %c0_161 = arith.constant 0 : index
    %107 = vector.load %arg4[%c1_156, %c1_157, %c0_158, %c0_159, %c0_160, %c0_161] : memref<2x2x2x2x16x16xf32, #tpu.memory_space<vmem>>, vector<1x1x1x1x16x16xf32>
    %108 = vector.shape_cast %107 : vector<1x1x1x1x16x16xf32> to vector<16x16xf32>
    %cst_162 = arith.constant dense<0.000000e+00> : vector<16x256xf32>
    %109 = tpu.matmul %108, %106, %cst_162 {dimension_numbers = #tpu.dot_dimension_numbers<[1], [0], [0], [1], [0, 0, 1, 1], [], []>} : vector<16x16xf32>, vector<16x256xf32>, vector<16x256xf32> -> vector<16x256xf32>
    %110 = arith.addf %104, %109 : vector<16x256xf32>
    %c0_163 = arith.constant 0 : index
    %c2_164 = arith.constant 2 : index
    %c1_165 = arith.constant 1 : index
    %111 = vector.load %arg7[%c0_163, %c2_164, %c1_165] : memref<16x18x18xf32, #tpu.memory_space<vmem>>, vector<16x16x16xf32>
    %112 = vector.shape_cast %111 : vector<16x16x16xf32> to vector<16x256xf32>
    %c1_166 = arith.constant 1 : index
    %c1_167 = arith.constant 1 : index
    %c0_168 = arith.constant 0 : index
    %c1_169 = arith.constant 1 : index
    %c0_170 = arith.constant 0 : index
    %c0_171 = arith.constant 0 : index
    %113 = vector.load %arg4[%c1_166, %c1_167, %c0_168, %c1_169, %c0_170, %c0_171] : memref<2x2x2x2x16x16xf32, #tpu.memory_space<vmem>>, vector<1x1x1x1x16x16xf32>
    %114 = vector.shape_cast %113 : vector<1x1x1x1x16x16xf32> to vector<16x16xf32>
    %cst_172 = arith.constant dense<0.000000e+00> : vector<16x256xf32>
    %115 = tpu.matmul %114, %112, %cst_172 {dimension_numbers = #tpu.dot_dimension_numbers<[1], [0], [0], [1], [0, 0, 1, 1], [], []>} : vector<16x16xf32>, vector<16x256xf32>, vector<16x256xf32> -> vector<16x256xf32>
    %116 = arith.addf %110, %115 : vector<16x256xf32>
    %c0_173 = arith.constant 0 : index
    %c1_174 = arith.constant 1 : index
    %c2_175 = arith.constant 2 : index
    %117 = vector.load %arg7[%c0_173, %c1_174, %c2_175] : memref<16x18x18xf32, #tpu.memory_space<vmem>>, vector<16x16x16xf32>
    %118 = vector.shape_cast %117 : vector<16x16x16xf32> to vector<16x256xf32>
    %c1_176 = arith.constant 1 : index
    %c1_177 = arith.constant 1 : index
    %c1_178 = arith.constant 1 : index
    %c0_179 = arith.constant 0 : index
    %c0_180 = arith.constant 0 : index
    %c0_181 = arith.constant 0 : index
    %119 = vector.load %arg4[%c1_176, %c1_177, %c1_178, %c0_179, %c0_180, %c0_181] : memref<2x2x2x2x16x16xf32, #tpu.memory_space<vmem>>, vector<1x1x1x1x16x16xf32>
    %120 = vector.shape_cast %119 : vector<1x1x1x1x16x16xf32> to vector<16x16xf32>
    %cst_182 = arith.constant dense<0.000000e+00> : vector<16x256xf32>
    %121 = tpu.matmul %120, %118, %cst_182 {dimension_numbers = #tpu.dot_dimension_numbers<[1], [0], [0], [1], [0, 0, 1, 1], [], []>} : vector<16x16xf32>, vector<16x256xf32>, vector<16x256xf32> -> vector<16x256xf32>
    %122 = arith.addf %116, %121 : vector<16x256xf32>
    %c0_183 = arith.constant 0 : index
    %c1_184 = arith.constant 1 : index
    %c1_185 = arith.constant 1 : index
    %123 = vector.load %arg7[%c0_183, %c1_184, %c1_185] : memref<16x18x18xf32, #tpu.memory_space<vmem>>, vector<16x16x16xf32>
    %124 = vector.shape_cast %123 : vector<16x16x16xf32> to vector<16x256xf32>
    %c1_186 = arith.constant 1 : index
    %c1_187 = arith.constant 1 : index
    %c1_188 = arith.constant 1 : index
    %c1_189 = arith.constant 1 : index
    %c0_190 = arith.constant 0 : index
    %c0_191 = arith.constant 0 : index
    %125 = vector.load %arg4[%c1_186, %c1_187, %c1_188, %c1_189, %c0_190, %c0_191] : memref<2x2x2x2x16x16xf32, #tpu.memory_space<vmem>>, vector<1x1x1x1x16x16xf32>
    %126 = vector.shape_cast %125 : vector<1x1x1x1x16x16xf32> to vector<16x16xf32>
    %cst_192 = arith.constant dense<0.000000e+00> : vector<16x256xf32>
    %127 = tpu.matmul %126, %124, %cst_192 {dimension_numbers = #tpu.dot_dimension_numbers<[1], [0], [0], [1], [0, 0, 1, 1], [], []>} : vector<16x16xf32>, vector<16x256xf32>, vector<16x256xf32> -> vector<16x256xf32>
    %128 = arith.addf %122, %127 : vector<16x256xf32>
    %129 = vector.broadcast %13 : vector<16x1xf32> to vector<16x256xf32>
    %130 = arith.addf %128, %129 : vector<16x256xf32>
    %c0_193 = arith.constant 0 : index
    %c1_194 = arith.constant 1 : index
    %c1_195 = arith.constant 1 : index
    %c0_196 = arith.constant 0 : index
    %c0_197 = arith.constant 0 : index
    %131 = vector.load %arg6[%c0_193, %c1_194, %c1_195, %c0_196, %c0_197] : memref<1x2x2x16x256xf32, #tpu.memory_space<vmem>>, vector<1x1x1x16x256xf32>
    %132 = vector.shape_cast %131 : vector<1x1x1x16x256xf32> to vector<16x256xf32>
    %133 = vector.shape_cast %130 : vector<16x256xf32> to vector<1x1x1x16x256xf32>
    tpu.vector_store %arg6[%c0_193, %c1_194, %c1_195, %c0_196, %c0_197], %133 {strides = array<i32>} : memref<1x2x2x16x256xf32, #tpu.memory_space<vmem>>, vector<1x1x1x16x256xf32>,
    return
  }
  func.func @transform_0(%arg0: i32) -> (i32, i32, i32) {
    %c0_i32 = arith.constant 0 : i32
    %c0_i32_0 = arith.constant 0 : i32
    %c0_i32_1 = arith.constant 0 : i32
    return %arg0, %c0_i32, %c0_i32_0 : i32, i32, i32
  }
  func.func @transform_1(%arg0: i32) -> (i32, i32) {
    %c0_i32 = arith.constant 0 : i32
    %c0_i32_0 = arith.constant 0 : i32
    %c0_i32_1 = arith.constant 0 : i32
    return %c0_i32, %c0_i32_0 : i32, i32
  }
  func.func @transform_2(%arg0: i32) -> (i32, i32) {
    %c0_i32 = arith.constant 0 : i32
    %c0_i32_0 = arith.constant 0 : i32
    %c0_i32_1 = arith.constant 0 : i32
    return %c0_i32, %c0_i32_0 : i32, i32
  }
  func.func @transform_3(%arg0: i32) -> (i32, i32, i32, i32, i32, i32) {
    %c0_i32 = arith.constant 0 : i32
    %c0_i32_0 = arith.constant 0 : i32
    %c0_i32_1 = arith.constant 0 : i32
    %c0_i32_2 = arith.constant 0 : i32
    %c0_i32_3 = arith.constant 0 : i32
    %c0_i32_4 = arith.constant 0 : i32
    %c0_i32_5 = arith.constant 0 : i32
    return %c0_i32, %c0_i32_0, %c0_i32_1, %c0_i32_2, %c0_i32_3, %c0_i32_4 : i32, i32, i32, i32, i32, i32
  }
  func.func @transform_4(%arg0: i32) -> (i32, i32) {
    %c0_i32 = arith.constant 0 : i32
    %c0_i32_0 = arith.constant 0 : i32
    %c0_i32_1 = arith.constant 0 : i32
    return %c0_i32, %c0_i32_0 : i32, i32
  }
  func.func @transform_5(%arg0: i32) -> (i32, i32, i32, i32, i32) {
    %c0_i32 = arith.constant 0 : i32
    %c0_i32_0 = arith.constant 0 : i32
    %c0_i32_1 = arith.constant 0 : i32
    %c0_i32_2 = arith.constant 0 : i32
    %c0_i32_3 = arith.constant 0 : i32
    return %arg0, %c0_i32, %c0_i32_0, %c0_i32_1, %c0_i32_2 : i32, i32, i32, i32, i32
  }
}

</mosaic_0001>

<bundles_post_ra>
// kernel: tpu_custom_call.1
= control target key start
LH: loop header
LB: loop body
LE: loop exit
PB: predicated region body
PF: predicated region fallthrough
CT: control target
= control target key end

     0   :  { %10 = vsyncpa [#allocation4], 0  ;;  %s25354_s0 = inlined_call_operand.vmem [shape: f32[2,4,256], index: 0, kind: input, shape index: {}]   ;;  %s25355_s1 = inlined_call_operand.vmem [shape: f32[16,4], index: 1, kind: input, shape index: {}]   ;;  %s25356_s2 = inlined_call_operand.vmem [shape: f32[16,1], index: 2, kind: input, shape index: {}]   ;;  %s25357_s3 = inlined_call_operand.hbm [shape: f32[2,2,2,2,16,16], index: 3, kind: input, shape index: {}]   ;;  %s25358_s4 = inlined_call_operand.vmem [shape: f32[16,1], index: 4, kind: input, shape index: {}]   ;;  %s25359_s5 = inlined_call_operand.hbm [shape: f32[2,2,2,16,256], index: 5, kind: output, shape index: {}]  }
   0x1   :  { %11 = vsyncpa [#allocation5], 0 }
   0x2   :  { %13 = vsyncpa [#allocation5 + $0x1], 0  ;;  %s17244_s18 = smov 0   ;;  %s17246_s19 = smov 0  }
   0x3   :  { %s17248_s20 = smov 0   ;;  %s17250_s21 = smov 0  }
   0x4 LB: > { %s17265_s22 = sadd.s32 4294967295, %s17193_s21   ;;  %s15540_s23 = sadd.s32 4294967294, %s17193_s21   ;;  %s17193_s21 = sphi %s17250_s21, %s27123_s21   ;;  %s17189_s20 = sphi %s17248_s20, %s27122_s20   ;;  %s17185_s19 = sphi %s17246_s19, %s27121_s19   ;;  %s17181_s18 = sphi %s17244_s18, %s27120_s18  }
   0x5   : > { %s17269_s24 = sadd.s32 1, %s17193_s21   ;;  %s136_s25 = sadd.s32 1, %s17189_s20 }
   0x6   : > { %s133_s26 = ssub.s32 %s17193_s21, %s17269_s24  ;;  %p146_p0 = scmp.ne.s32.totalorder %s17189_s20, %s17185_s19 }
   0x7   : > { %p134_p1 = scmp.eq.s32.totalorder %s133_s26, 0  ;;  %p147_p2 = scmp.eq.s32.totalorder %s17265_s22, 1 }
   0x8   : > { %p152_p3 = scmp.ne.s32.totalorder %s17185_s19, %s17181_s18  ;;  %p153_p4 = scmp.eq.s32.totalorder %s15540_s23, 1 }
   0x9   : > { %s17280_s27 = scalar_select %p134_p1, %s17189_s20, %s136_s25  }
   0xa   : > { %p17282_p5 = por %p147_p2, %p146_p0  ;;  %p17286_p6 = por %p153_p4, %p152_p3 }
   0xb   : > { %p15541_p7 = scmp.ge.s32.totalorder %s17193_s21, 1  ;;  %p160_p8 = scmp.lt.s32.totalorder %s17193_s21, 3 }
   0xc   : > { %s25940_s28 = scalar_select %p17282_p5, 1, 0 }
   0xd   : > { %s25941_s29 = scalar_select %p17286_p6, 1, 0 }
   0xe   : > { %p25360_p9 = scmp.eq.s32.totalorder %s17265_s22, 0  ;;  %p17293_p10 = pnand %p15541_p7, %p160_p8 }
   0xf   : > { %s17195_s6 = smov [#allocation3]   ;;  %s17099_s11 = scalar_lea.hbm %s25357_s3, 4096 }
  0x10   : > { %s25942_s30 = scalar_select %p17293_p10, 1, 0 }
  0x11   : > { %s178_s7 = sshll.u32 %s17195_s6, 4  ;;  %p15724_p11 = pneg %p17293_p10  ;;  %s179_s7 = int_to_ptr.vmem [resolvable:$true] %s178_s7 }
  0x12   : > { %p17100_p13 = scmp.ne.s32.totalorder %s25357_s3, %s17099_s11  ;;  %p17106_p3 = scmp.lt.u32.totalorder %s17099_s11, %s25357_s3 }
  0x13   : > { %p17301_p12 = pnand %p25360_p9, %p15724_p11 }
  0x15   : > { %p17101_p0 = pneg %p17301_p12 }
  0x17   : > { %p17102_p1 = pnand %p17101_p0, %p17100_p13 }
  0x19   : > { %p17103_p2 = pneg %p17102_p1 }
  0x1b   : > { %p17108_p4 = pnand %p17106_p3, %p17103_p2 }
  0x1d   : > { %17111 = shalt.err (!%p17108_p4)
}
  0x1e   : > { %s17112_s16 = scalar_lea.vmem %s179_s7, 4096  ;;  %p17120_p9 = scmp.lt.s32.totalorder %s179_s7, %s179_s7 }
  0x1f   : > { %p17113_p7 = scmp.ne.s32.totalorder %s179_s7, %s17112_s16  ;;  %p17121_p6 = scmp.lt.s32.totalorder %s17112_s16, %s17112_s16 }
  0x21   : > { %p17115_p8 = pnand %p17113_p7, %p17101_p0  ;;  %p17122_p5 = por %p17121_p6, %p17120_p9 }
  0x23   : > { %p17116_p11 = pneg %p17115_p8 }
  0x25   : > { %p17123_p10 = pnand %p17122_p5, %p17116_p11 }
  0x27   : > { %17126 = shalt.err (!%p17123_p10)
}
  0x28   : > { %s17196_s17 = smov 128   ;;  %s17197_s23 = smov 8  }
  0x29   : > { %15727 = dma.hbm_to_vmem [thread:$0]  (!%p17301_p12), %s25357_s3, 4096, %s179_s7, [#allocation4], %s17196_s17, %s17196_s17, %s17197_s23  }
  0x2a   : > { %p25944_p13 = scmp.ne.s32.totalorder %s25942_s30, 0 }
  0x2c   : > { %205 = sbr.rel (%p25944_p13) target bundleno = 2820 (0xb04), region = 40 }
  0x33   : > { %p25945_p1 = scmp.eq.s32.totalorder %s17265_s22, 0 }
  0x35   : > { %17172 = dma.done.wait (%p25945_p1), [#allocation4], 4096   ;;  %p25946_p0 = pmov %p25945_p1 }
  0x36   : > { %p233_p5 = scmp.lt.s32.totalorder %s17265_s22, 1  ;;  %v25363_v0 = vmov 0.0   ;;  %v17199_v1 = vmov 0   ;;  %vm262_vm0 = vcmask 1043456   ;;  %v241_v4 = vld [vmem:[%s25356_s2] sm:$0xff]  ;;  %vm255_vm1 = vcmask 31744  }
  0x37   : > { %17174 = vsyncadd (%p25946_p0), [#allocation4], 4294963200  ;;  %331 = vmatprep.mubr.f32.mxu0 %v25363_v0  ;;  %337 = vmatprep.mubr.f32.mxu1 %v25363_v0  ;;  %v238_v5 = vld [vmem:[%s25355_s1] sm:$0xff]  ;;  %v239_v6 = vld [vmem:[%s25355_s1 + $0x8] sm:$0xff]  ;;  %s17201_s7 = smov 112   ;;  %s17202_s8 = smov 80   ;;  %v491_v34 = vlaneseq }
  0x38   : > { %s234_s6 = scalar_select %p233_p5, %s17265_s22, 1  ;;  %15785 = vset.pattern.permute.xlu0 %v17199_v1  ;;  %15786 = vset.pattern.permute.xlu1 %v17199_v1  ;;  %v242_v7 = vld [vmem:[%s25356_s2 + $0x8] sm:$0xff]  ;;  %v1191_v9 = vld [vmem:[%s25358_s4] sm:$0xff]  ;;  %vm348_vm2 = vcmask 146432   ;;  %v17207_v32 = vmov 1983009808  }
  0x39   : > { %245 = vperm.xlu0 %15785, %v241_v4   ;;  %v1192_v8 = vld [vmem:[%s25358_s4 + $0x8] sm:$0xff]  ;;  %s17204_s10 = smov 48   ;;  %s17205_s11 = smov 32   ;;  %349 = vst.msk [vmem:[#allocation2] sm:$0xff] %vm348_vm2, %v25363_v0  ;;  %350 = vst.msk [vmem:[#allocation2 + $0x8] sm:$0xff] %vm348_vm2, %v25363_v0  ;;  %v489_v33 = vunpack.c.l.s4 %v17207_v32  ;;  %v492_v38 = vshrl.u32 %v491_v34, 7 }
  0x3a   : > { %s15602_s30 = sshll.u32 %s234_s6, 3  ;;  %4646 = vperm.xlu1 %15786, %v1192_v8   ;;  %s17206_s12 = smov 16   ;;  %353 = vst.msk [vmem:[#allocation2 + $0x18] sm:$0xff] %vm348_vm2, %v25363_v0  ;;  %354 = vst.msk [vmem:[#allocation2 + $0x20] sm:$0xff] %vm348_vm2, %v25363_v0  ;;  %v17208_v42 = vmov 1934713408  }
  0x3b   : > { %s237_s9 = scalar_lea.vmem %s25354_s0, %s15602_s30  ;;  %s17200_s30 = smov 96   ;;  %356 = vst.msk [vmem:[#allocation2 + $0x30] sm:$0xff] %vm348_vm2, %v25363_v0  ;;  %357 = vst.msk [vmem:[#allocation2 + $0x38] sm:$0xff] %vm348_vm2, %v25363_v0  ;;  %v490_v37 = vunpack.c.0.s8 %v489_v33  ;;  %v553_v43 = vunpack.c.l.s4 %v17208_v42  ;;  %vm351_vm3 = vcmask 140288   ;;  %vm1158_vm4 = vcmask 138248  }
  0x3c   : > { %v240_v2 = vld [vmem:[%s237_s9] sm:$0xff]  ;;  %s17203_s9 = smov 64   ;;  %359 = vst.msk [vmem:[#allocation2 + $0x48] sm:$0xff] %vm348_vm2, %v25363_v0  ;;  %360 = vst.msk [vmem:[#allocation2 + $0x50] sm:$0xff] %vm348_vm2, %v25363_v0  ;;  %s17209_s13 = smov 1   ;;  %vm2009_vm5 = vcmask 130048  }
  0x3d   : > { %v254_v3 = vcombine.high %v240_v2, %v240_v2  ;;  %250 = vperm.xlu0 %15785, %v242_v7   ;;  %362 = vst.msk [vmem:[#allocation2 + $0x60] sm:$0xff] %vm348_vm2, %v25363_v0  ;;  %363 = vst.msk [vmem:[#allocation2 + $0x68] sm:$0xff] %vm348_vm2, %v25363_v0  ;;  %v17494_v44 = vsub.s32 %v490_v37, %v492_v38  ;;  %v554_v50 = vunpack.c.0.s8 %v553_v43  ;;  %s17210_s14 = smov 127   ;;  %s17211_s15 = smov 126   ;;  %vm2012_vm6 = vcmask 261120  }
  0x3e   : > { %365 = vst.msk [vmem:[#allocation2 + $0x78] sm:$0xff] %vm348_vm2, %v25363_v0  ;;  %366 = vst.msk [vmem:[#allocation2 + $0x80] sm:$0xff] %vm348_vm2, %v25363_v0  ;;  %vm2015_vm7 = vcmask 392192   ;;  %vm2018_vm8 = vcmask 523264   ;;  %vm2021_vm9 = vcmask 654336   ;;  %vm2024_vm10 = vcmask 785408  }
  0x3f   : > { %15549 = vmatprep.subr.msk.mxu0 %vm262_vm0, %v254_v3  ;;  %15668 = vmatprep.subr.msk.mxu1 %vm262_vm0, %v254_v3  ;;  %368 = vst.msk [vmem:[#allocation2 + $0x90] sm:$0xff] %vm348_vm2, %v25363_v0  ;;  %369 = vst.msk [vmem:[#allocation2 + $0x98] sm:$0xff] %vm348_vm2, %v25363_v0  ;;  %v17507_v58 = vsub.s32 %v554_v50, %v492_v38  ;;  %vm2027_vm11 = vcmask 916480   ;;  %s230_s16 = sand.u32 1, %s17185_s19   ;;  %s15603_s25 = sshll.u32 %s17265_s22, 11 }
  0x40   : > { %15550 = vmatpush1.msk.msra.mxu0 %vm262_vm0, %v240_v2  ;;  %15669 = vmatpush1.msk.msra.mxu1 %vm262_vm0, %v240_v2  ;;  %371 = vst.msk [vmem:[#allocation2 + $0xa8] sm:$0xff] %vm348_vm2, %v25363_v0  ;;  %372 = vst.msk [vmem:[#allocation2 + $0xb0] sm:$0xff] %vm348_vm2, %v25363_v0  ;;  %s15546_s17 = sshll.u32 %s230_s16, 7  ;;  %s25312_s22 = scalar_lea.sflag [#allocation5], %s230_s16 }
  0x41   : > { %15551 = vmatmul.mubr.msk.f32.vlgmr.msra.gmra.mrb[0].mxu0 %vm255_vm1, %v238_v5  ;;  %15552 = vmatmul.mubr.msk.f32.vlgmr.msra.gmra.mrb[0].mxu1 %vm255_vm1, %v239_v6  ;;  %374 = vst.msk [vmem:[#allocation2 + $0xc0] sm:$0xff] %vm348_vm2, %v25363_v0  ;;  %375 = vst.msk [vmem:[#allocation2 + $0xc8] sm:$0xff] %vm348_vm2, %v25363_v0  ;;  %s21863_s23 = scalar_lea.vmem [#allocation6], %s15546_s17  ;;  %p27118_p9 = scmp.ne.s32.totalorder %s25940_s28, 0 }
  0x42   : > { %2803 = vmatprep.mubr.f32.mxu1 %v25363_v0  ;;  %6357 = vmatprep.mubr.f32.mxu0 %v25363_v0  ;;  %377 = vst.msk [vmem:[#allocation2 + $0xd8] sm:$0xff] %vm348_vm2, %v25363_v0  ;;  %378 = vst.msk [vmem:[#allocation2 + $0xe0] sm:$0xff] %vm348_vm2, %v25363_v0  ;;  %s15466_s26 = sshll.u32 %s21863_s23, 4  ;;  %s25306_s26 = int_to_ptr.vmem [resolvable:$true] %s15466_s26 }
  0x43   : > { %4641 = vperm.xlu0 %15785, %v1191_v9   ;;  %380 = vst.msk [vmem:[#allocation2 + $0xf0] sm:$0xff] %vm348_vm2, %v25363_v0  ;;  %381 = vst.msk [vmem:[#allocation2 + $0xf8] sm:$0xff] %vm348_vm2, %v25363_v0 }
  0x44   : > { %383 = vst.msk [vmem:[#allocation2 + $0x108] sm:$0xff] %vm348_vm2, %v25363_v0  ;;  %384 = vst.msk [vmem:[#allocation2 + $0x110] sm:$0xff] %vm348_vm2, %v25363_v0 }
  0x45   : > { %386 = vst.msk [vmem:[#allocation2 + $0x120] sm:$0xff] %vm348_vm2, %v25363_v0  ;;  %387 = vst.msk [vmem:[#allocation2 + $0x128] sm:$0xff] %vm348_vm2, %v25363_v0 }
  0x46   : > { %389 = vst.msk [vmem:[#allocation2 + $0x138] sm:$0xff] %vm348_vm2, %v25363_v0  ;;  %390 = vst.msk [vmem:[#allocation2 + $0x140] sm:$0xff] %vm348_vm2, %v25363_v0 }
  0x47   : > { %392 = vst.msk [vmem:[#allocation2 + $0x150] sm:$0xff] %vm348_vm2, %v25363_v0  ;;  %393 = vst.msk [vmem:[#allocation2 + $0x158] sm:$0xff] %vm348_vm2, %v25363_v0 }
  0x48   : > { %395 = vst.msk [vmem:[#allocation2 + $0x168] sm:$0xff] %vm348_vm2, %v25363_v0  ;;  %396 = vst.msk [vmem:[#allocation2 + $0x170] sm:$0xff] %vm348_vm2, %v25363_v0 }
  0x49   : > { %352 = vst.msk [vmem:[#allocation2 + $0x10] sm:$0x3] %vm351_vm3, %v25363_v0  ;;  %355 = vst.msk [vmem:[#allocation2 + $0x28] sm:$0x3] %vm351_vm3, %v25363_v0 }
  0x4a   : > { %358 = vst.msk [vmem:[#allocation2 + $0x40] sm:$0x3] %vm351_vm3, %v25363_v0  ;;  %361 = vst.msk [vmem:[#allocation2 + $0x58] sm:$0x3] %vm351_vm3, %v25363_v0 }
  0x4b   : > { %364 = vst.msk [vmem:[#allocation2 + $0x70] sm:$0x3] %vm351_vm3, %v25363_v0  ;;  %367 = vst.msk [vmem:[#allocation2 + $0x88] sm:$0x3] %vm351_vm3, %v25363_v0 }
  0x4c   : > { %370 = vst.msk [vmem:[#allocation2 + $0xa0] sm:$0x3] %vm351_vm3, %v25363_v0  ;;  %373 = vst.msk [vmem:[#allocation2 + $0xb8] sm:$0x3] %vm351_vm3, %v25363_v0 }
  0x4d   : > { %376 = vst.msk [vmem:[#allocation2 + $0xd0] sm:$0x3] %vm351_vm3, %v25363_v0  ;;  %379 = vst.msk [vmem:[#allocation2 + $0xe8] sm:$0x3] %vm351_vm3, %v25363_v0 }
  0x4e   : > { %382 = vst.msk [vmem:[#allocation2 + $0x100] sm:$0x3] %vm351_vm3, %v25363_v0  ;;  %385 = vst.msk [vmem:[#allocation2 + $0x118] sm:$0x3] %vm351_vm3, %v25363_v0 }
  0x4f   : > { %388 = vst.msk [vmem:[#allocation2 + $0x130] sm:$0x3] %vm351_vm3, %v25363_v0  ;;  %391 = vst.msk [vmem:[#allocation2 + $0x148] sm:$0x3] %vm351_vm3, %v25363_v0 }
  0x50   : > { %394 = vst.msk [vmem:[#allocation2 + $0x160] sm:$0x3] %vm351_vm3, %v25363_v0  ;;  %397 = vst.msk [vmem:[#allocation2 + $0x178] sm:$0x3] %vm351_vm3, %v25363_v0 }
  0xb8   : > { %v246_v10 = vpop.permute.xlu0 %245 }
  0xb9   : > { %v17482_v24 = vpop.permute.xlu1 %4646 }
  0xba   : > { %25947 = vst [vmem:[#allocation9_spill] sm:$0xff] %v17482_v24 }
  0xbc   : > { %v251_v16 = vpop.permute.xlu0 %250 }
  0xc2   : > { %v17484_v25 = vpop.permute.xlu0 %4641 }
  0xc3   : > { %25948 = vst [vmem:[#allocation10_spill] sm:$0xff] %v17484_v25 }
 0x114   : > { %v333_v11 = vpop.f32.mrb[0].mxu0  ;;  %v339_v12 = vpop.f32.mrb[0].mxu1 }
 0x115   : > { %v334_v13 = vadd.f32 %v333_v11, %v246_v10  ;;  %v335_v14 = vpop.f32.mrb[1].mxu0  ;;  %v341_v15 = vpop.f32.mrb[1].mxu1  ;;  %v340_v18 = vadd.f32 %v339_v12, %v251_v16 }
 0x116   : > { %v336_v20 = vadd.f32 %v335_v14, %v246_v10  ;;  %v342_v22 = vadd.f32 %v341_v15, %v251_v16 }
 0x117   : > { %v17354_v17 = vmax.f32 %v334_v13, 0.0  ;;  %v17360_v19 = vmax.f32 %v340_v18, 0.0 }
 0x118   : > { %v17382_v21 = vmax.f32 %v336_v20, 0.0  ;;  %v17392_v23 = vmax.f32 %v342_v22, 0.0 }
 0x119   : > { %406 = vrot.lane.b32.xlu0 %v17354_v17, %s17200_s30  ;;  %400 = vrot.lane.b32.xlu1 %v17354_v17, %s17201_s7 }
 0x11d   : > { %412 = vrot.lane.b32.xlu0 %v17354_v17, %s17202_s8  ;;  %402 = vrot.lane.b32.xlu1 %v17360_v19, %s17201_s7 }
 0x121   : > { %418 = vrot.lane.b32.xlu0 %v17354_v17, %s17203_s9  ;;  %408 = vrot.lane.b32.xlu1 %v17360_v19, %s17200_s30 }
 0x125   : > { %424 = vrot.lane.b32.xlu0 %v17354_v17, %s17204_s10  ;;  %414 = vrot.lane.b32.xlu1 %v17360_v19, %s17202_s8 }
 0x129   : > { %430 = vrot.lane.b32.xlu0 %v17354_v17, %s17205_s11  ;;  %420 = vrot.lane.b32.xlu1 %v17360_v19, %s17203_s9 }
 0x12d   : > { %436 = vrot.lane.b32.xlu0 %v17354_v17, %s17206_s12  ;;  %426 = vrot.lane.b32.xlu1 %v17360_v19, %s17204_s10 }
 0x131   : > { %444 = vrot.lane.b32.xlu0 %v17382_v21, %s17201_s7  ;;  %432 = vrot.lane.b32.xlu1 %v17360_v19, %s17205_s11 }
 0x135   : > { %450 = vrot.lane.b32.xlu0 %v17382_v21, %s17200_s30  ;;  %438 = vrot.lane.b32.xlu1 %v17360_v19, %s17206_s12 }
 0x139   : > { %456 = vrot.lane.b32.xlu0 %v17382_v21, %s17202_s8  ;;  %446 = vrot.lane.b32.xlu1 %v17392_v23, %s17201_s7 }
 0x13d   : > { %462 = vrot.lane.b32.xlu0 %v17382_v21, %s17203_s9  ;;  %452 = vrot.lane.b32.xlu1 %v17392_v23, %s17200_s30 }
 0x141   : > { %468 = vrot.lane.b32.xlu0 %v17382_v21, %s17204_s10  ;;  %458 = vrot.lane.b32.xlu1 %v17392_v23, %s17202_s8 }
 0x145   : > { %474 = vrot.lane.b32.xlu0 %v17382_v21, %s17205_s11  ;;  %464 = vrot.lane.b32.xlu1 %v17392_v23, %s17203_s9 }
 0x149   : > { %480 = vrot.lane.b32.xlu0 %v17382_v21, %s17206_s12  ;;  %470 = vrot.lane.b32.xlu1 %v17392_v23, %s17204_s10 }
 0x14d   : > { %476 = vrot.lane.b32.xlu1 %v17392_v23, %s17205_s11 }
 0x151   : > { %482 = vrot.lane.b32.xlu1 %v17392_v23, %s17206_s12 }
 0x18b   : > { %v407_v26 = vpop.permute.xlu0 %406  ;;  %v401_v27 = vpop.permute.xlu1 %400 }
 0x18c   : > { %v486_v45 = vcombine.low %v17354_v17, %v407_v26  ;;  %v487_v8 = vcombine.high %v17354_v17, %v407_v26 }
 0x18e   : > { %v494_v52 = vrot.slane %v486_v45, %v17494_v44  ;;  %v501_v18 = vrot.slane %v487_v8, %v17494_v44 }
 0x18f   : > { %v413_v28 = vpop.permute.xlu0 %412  ;;  %v17486_v29 = vpop.permute.xlu1 %402 }
 0x190   : > { %v502_v39 = vcombine.low %v401_v27, %v413_v28  ;;  %v503_v4 = vcombine.high %v401_v27, %v413_v28 }
 0x192   : > { %v510_v47 = vrot.slane %v502_v39, %v17494_v44  ;;  %v517_v13 = vrot.slane %v503_v4, %v17494_v44 }
 0x193   : > { %v419_v30 = vpop.permute.xlu0 %418  ;;  %v17488_v31 = vpop.permute.xlu1 %408 }
 0x194   : > { %v550_v55 = vcombine.low %v494_v52, %v510_v47  ;;  %v551_v5 = vcombine.high %v494_v52, %v510_v47  ;;  %v566_v22 = vcombine.low %v501_v18, %v517_v13  ;;  %v567_v45 = vcombine.high %v501_v18, %v517_v13 }
 0x195   : > { %v758_v52 = vcombine.low %v17360_v19, %v17488_v31 }
 0x196   : > { %v558_v63 = vrot.slane %v550_v55, %v17507_v58  ;;  %v565_v16 = vrot.slane %v551_v5, %v17507_v58  ;;  %v574_v34 = vrot.slane %v566_v22, %v17507_v58  ;;  %v581_v4 = vrot.slane %v567_v45, %v17507_v58 }
 0x197   : > { %v425_v35 = vpop.permute.xlu0 %424  ;;  %v17490_v36 = vpop.permute.xlu1 %414 }
 0x19b   : > { %v431_v40 = vpop.permute.xlu0 %430  ;;  %v17492_v41 = vpop.permute.xlu1 %420 }
 0x19c   : > { %v518_v46 = vcombine.low %v419_v30, %v431_v40  ;;  %v519_v6 = vcombine.high %v419_v30, %v431_v40 }
 0x19e   : > { %v526_v53 = vrot.slane %v518_v46, %v17494_v44  ;;  %v533_v14 = vrot.slane %v519_v6, %v17494_v44  ;;  %v774_v46 = vcombine.low %v17486_v29, %v17490_v36  ;;  %v766_v6 = vrot.slane %v758_v52, %v17494_v44 }
 0x19f   : > { %v437_v48 = vpop.permute.xlu0 %436  ;;  %v17498_v49 = vpop.permute.xlu1 %426 }
 0x1a0   : > { %v534_v51 = vcombine.low %v425_v35, %v437_v48  ;;  %v535_v1 = vcombine.high %v425_v35, %v437_v48 }
 0x1a2   : > { %v542_v54 = vrot.slane %v534_v51, %v17494_v44  ;;  %v549_v9 = vrot.slane %v535_v1, %v17494_v44  ;;  %v782_v1 = vrot.slane %v774_v46, %v17494_v44 }
 0x1a3   : > { %v17503_v56 = vpop.permute.xlu0 %444  ;;  %v17505_v57 = vpop.permute.xlu1 %432 }
 0x1a4   : > { %v582_v59 = vcombine.low %v526_v53, %v542_v54  ;;  %v583_v2 = vcombine.high %v526_v53, %v542_v54  ;;  %v598_v17 = vcombine.low %v533_v14, %v549_v9  ;;  %v599_v37 = vcombine.high %v533_v14, %v549_v9 }
 0x1a5   : > { %v790_v47 = vcombine.low %v17492_v41, %v17505_v57  ;;  %v822_v13 = vcombine.low %v766_v6, %v782_v1 }
 0x1a6   : > { %v590_v60 = vrot.slane %v582_v59, %v17507_v58  ;;  %v597_v12 = vrot.slane %v583_v2, %v17507_v58  ;;  %v606_v30 = vrot.slane %v598_v17, %v17507_v58  ;;  %v613_v55 = vrot.slane %v599_v37, %v17507_v58 }
 0x1a7   : > { %v17510_v61 = vpop.permute.xlu0 %450  ;;  %v17512_v62 = vpop.permute.xlu1 %438  ;;  %v798_v2 = vrot.slane %v790_v47, %v17494_v44  ;;  %v759_v47 = vcombine.high %v17360_v19, %v17488_v31 }
 0x1a8   : > { %v614_v3 = vcombine.low %v558_v63, %v590_v60  ;;  %v615_v11 = vcombine.high %v558_v63, %v590_v60  ;;  %v616_v20 = vcombine.low %v565_v16, %v597_v12  ;;  %v617_v28 = vcombine.high %v565_v16, %v597_v12 }
 0x1a9   : > { %v622_v35 = vcombine.low %v17382_v21, %v17510_v61  ;;  %v806_v38 = vcombine.low %v17498_v49, %v17512_v62  ;;  %v618_v40 = vcombine.low %v574_v34, %v606_v30  ;;  %v619_v54 = vcombine.high %v574_v34, %v606_v30 }
 0x1aa   : > { %1062 = vrot.lane.b32.xlu0 %v614_v3, %s17209_s13  ;;  %v620_v9 = vcombine.low %v581_v4, %v613_v55  ;;  %v623_v34 = vcombine.high %v17382_v21, %v17510_v61  ;;  %v775_v21 = vcombine.high %v17486_v29, %v17490_v36  ;;  %v823_v61 = vcombine.high %v766_v6, %v782_v1 }
 0x1ab   : > { %v17516_v7 = vpop.permute.xlu0 %456  ;;  %v17520_v10 = vpop.permute.xlu1 %446  ;;  %v630_v50 = vrot.slane %v622_v35, %v17494_v44  ;;  %v814_v53 = vrot.slane %v806_v38, %v17494_v44  ;;  %v773_v19 = vrot.slane %v759_v47, %v17494_v44 }
 0x1ac   : > { %v638_v32 = vcombine.low %v17503_v56, %v17516_v7 }
 0x1ad   : > { %v854_v8 = vcombine.low %v798_v2, %v814_v53 }
 0x1ae   : > { %1066 = vrot.lane.b32.xlu0 %v615_v11, %s17209_s13  ;;  %v17549_v42 = vrot.slane %v638_v32, %v17494_v44 }
 0x1af   : > { %v17526_v15 = vpop.permute.xlu0 %462  ;;  %v17530_v26 = vpop.permute.xlu1 %452  ;;  %v862_v22 = vrot.slane %v854_v8, %v17507_v58 }
 0x1b0   : > { %v686_v59 = vcombine.low %v630_v50, %v17549_v42  ;;  %v687_v30 = vcombine.high %v630_v50, %v17549_v42 }
 0x1b2   : > { %1070 = vrot.lane.b32.xlu0 %v616_v20, %s17209_s13  ;;  %v694_v11 = vrot.slane %v686_v59, %v17507_v58  ;;  %v621_v20 = vcombine.high %v581_v4, %v613_v55  ;;  %v701_v42 = vrot.slane %v687_v30, %v17507_v58 }
 0x1b3   : > { %v17533_v27 = vpop.permute.xlu0 %468  ;;  %v17546_v39 = vpop.permute.xlu1 %458 }
 0x1b4   : > { %v910_v8 = vcombine.low %v17520_v10, %v17546_v39 }
 0x1b6   : > { %1074 = vrot.lane.b32.xlu0 %v617_v28, %s17209_s13  ;;  %v639_v28 = vcombine.high %v17503_v56, %v17516_v7  ;;  %v807_v56 = vcombine.high %v17498_v49, %v17512_v62  ;;  %v855_v7 = vcombine.high %v798_v2, %v814_v53  ;;  %v637_v49 = vrot.slane %v623_v34, %v17494_v44 }
 0x1b7   : > { %v17539_v33 = vpop.permute.xlu0 %474  ;;  %v17601_v3 = vpop.permute.xlu1 %464 }
 0x1b8   : > { %v654_v43 = vcombine.low %v17526_v15, %v17539_v33  ;;  %v655_v32 = vcombine.high %v17526_v15, %v17539_v33  ;;  %v653_v15 = vrot.slane %v639_v28, %v17494_v44  ;;  %v869_v29 = vrot.slane %v855_v7, %v17507_v58 }
 0x1ba   : > { %1078 = vrot.lane.b32.xlu0 %v618_v40, %s17209_s13  ;;  %v662_v60 = vrot.slane %v654_v43, %v17494_v44  ;;  %v669_v33 = vrot.slane %v655_v32, %v17494_v44  ;;  %v791_v43 = vcombine.high %v17492_v41, %v17505_v57  ;;  %v702_v36 = vcombine.low %v637_v49, %v653_v15 }
 0x1bb   : > { %v481_v48 = vpop.permute.xlu0 %480  ;;  %v17610_v17 = vpop.permute.xlu1 %470  ;;  %v789_v41 = vrot.slane %v775_v21, %v17494_v44  ;;  %v703_v6 = vcombine.high %v637_v49, %v653_v15 }
 0x1bc   : > { %v670_v51 = vcombine.low %v17533_v27, %v481_v48  ;;  %v671_v14 = vcombine.high %v17533_v27, %v481_v48  ;;  %v830_v27 = vrot.slane %v822_v13, %v17507_v58  ;;  %v821_v48 = vrot.slane %v807_v56, %v17494_v44 }
 0x1bd   : > { %v805_v57 = vrot.slane %v791_v43, %v17494_v44  ;;  %v710_v59 = vrot.slane %v702_v36, %v17507_v58  ;;  %v717_v30 = vrot.slane %v703_v6, %v17507_v58  ;;  %v839_v32 = vcombine.high %v773_v19, %v789_v41 }
 0x1be   : > { %v678_v63 = vrot.slane %v670_v51, %v17494_v44  ;;  %1082 = vrot.lane.b32.xlu0 %v619_v54, %s17209_s13  ;;  %v685_v35 = vrot.slane %v671_v14, %v17494_v44  ;;  %v886_v40 = vcombine.low %v830_v27, %v862_v22  ;;  %v887_v50 = vcombine.high %v830_v27, %v862_v22 }
 0x1bf   : > { %v17635_v45 = vpop.permute.xlu1 %476  ;;  %v837_v51 = vrot.slane %v823_v61, %v17507_v58  ;;  %v870_v31 = vcombine.low %v805_v57, %v821_v48  ;;  %v918_v22 = vrot.slane %v910_v8, %v17494_v44  ;;  %v853_v7 = vrot.slane %v839_v32, %v17507_v58 }
 0x1c0   : > { %v718_v5 = vcombine.low %v662_v60, %v678_v63  ;;  %v719_v16 = vcombine.high %v662_v60, %v678_v63  ;;  %v734_v62 = vcombine.low %v669_v33, %v685_v35  ;;  %v838_v60 = vcombine.low %v773_v19, %v789_v41 }
 0x1c1   : > { %v888_v55 = vcombine.low %v837_v51, %v869_v29  ;;  %v735_v63 = vcombine.high %v669_v33, %v685_v35  ;;  %v889_v4 = vcombine.high %v837_v51, %v869_v29  ;;  %v927_v47 = vcombine.high %v17601_v3, %v17635_v45 }
 0x1c2   : > { %v726_v12 = vrot.slane %v718_v5, %v17507_v58  ;;  %1086 = vrot.lane.b32.xlu0 %v620_v9, %s17209_s13  ;;  %v733_v38 = vrot.slane %v719_v16, %v17507_v58  ;;  %v742_v53 = vrot.slane %v734_v62, %v17507_v58  ;;  %v878_v5 = vrot.slane %v870_v31, %v17507_v58 }
 0x1c3   : > { %v483_v54 = vpop.permute.xlu1 %482  ;;  %v926_v9 = vcombine.low %v17601_v3, %v17635_v45  ;;  %v749_v16 = vrot.slane %v735_v63, %v17507_v58  ;;  %v911_v62 = vcombine.high %v17520_v10, %v17546_v39  ;;  %v941_v10 = vrot.slane %v927_v47, %v17494_v44 }
 0x1c4   : > { %v750_v18 = vcombine.low %v694_v11, %v726_v12  ;;  %v751_v37 = vcombine.high %v694_v11, %v726_v12  ;;  %v752_v46 = vcombine.low %v701_v42, %v733_v38  ;;  %v753_v52 = vcombine.high %v701_v42, %v733_v38 }
 0x1c5   : > { %v942_v1 = vcombine.low %v17610_v17, %v483_v54  ;;  %v754_v2 = vcombine.low %v710_v59, %v742_v53  ;;  %v846_v11 = vrot.slane %v838_v60, %v17507_v58  ;;  %v894_v12 = vcombine.low %v17392_v23, %v17530_v26 }
 0x1c6   : > { %1064 = vrot.lane.b32.xlu1 %v750_v18, %s17209_s13  ;;  %1090 = vrot.lane.b32.xlu0 %v621_v20, %s17209_s13  ;;  %v755_v14 = vcombine.high %v710_v59, %v742_v53  ;;  %v871_v18 = vcombine.high %v805_v57, %v821_v48  ;;  %v934_v28 = vrot.slane %v926_v9, %v17494_v44 }
 0x1c7   : > { %v950_v13 = vrot.slane %v942_v1, %v17494_v44  ;;  %v890_v20 = vcombine.low %v846_v11, %v878_v5  ;;  %v902_v27 = vrot.slane %v894_v12, %v17494_v44  ;;  %v756_v35 = vcombine.low %v717_v30, %v749_v16 }
 0x1c8   : > { %v885_v38 = vrot.slane %v871_v18, %v17507_v58  ;;  %v943_v21 = vcombine.high %v17610_v17, %v483_v54  ;;  %v895_v48 = vcombine.high %v17392_v23, %v17530_v26  ;;  %v925_v36 = vrot.slane %v911_v62, %v17494_v44 }
 0x1c9   : > { %v990_v34 = vcombine.low %v934_v28, %v950_v13  ;;  %v958_v56 = vcombine.low %v902_v27, %v918_v22  ;;  %v991_v61 = vcombine.high %v934_v28, %v950_v13 }
 0x1ca   : > { %1068 = vrot.lane.b32.xlu1 %v751_v37, %s17209_s13  ;;  %1094 = vrot.lane.b32.xlu0 %v886_v40, %s17209_s13  ;;  %v891_v37 = vcombine.high %v846_v11, %v878_v5  ;;  %v757_v40 = vcombine.high %v717_v30, %v749_v16  ;;  %v892_v33 = vcombine.low %v853_v7, %v885_v38 }
 0x1cb   : > { %v998_v15 = vrot.slane %v990_v34, %v17507_v58  ;;  %v966_v42 = vrot.slane %v958_v56, %v17507_v58  ;;  %v893_v49 = vcombine.high %v853_v7, %v885_v38  ;;  %v1005_v29 = vrot.slane %v991_v61, %v17507_v58 }
 0x1cc   : > { %v909_v3 = vrot.slane %v895_v48, %v17494_v44 }
 0x1cd   : > { %v1022_v43 = vcombine.low %v966_v42, %v998_v15  ;;  %v1023_v17 = vcombine.high %v966_v42, %v998_v15 }
 0x1ce   : > { %1072 = vrot.lane.b32.xlu1 %v752_v46, %s17209_s13  ;;  %1098 = vrot.lane.b32.xlu0 %v887_v50, %s17209_s13  ;;  %v959_v46 = vcombine.high %v902_v27, %v918_v22  ;;  %v957_v50 = vrot.slane %v943_v21, %v17494_v44  ;;  %v974_v57 = vcombine.low %v909_v3, %v925_v36 }
 0x1cf   : > { %v975_v19 = vcombine.high %v909_v3, %v925_v36 }
 0x1d0   : > { %v973_v39 = vrot.slane %v959_v46, %v17507_v58  ;;  %v1006_v45 = vcombine.low %v941_v10, %v957_v50  ;;  %v982_v51 = vrot.slane %v974_v57, %v17507_v58 }
 0x1d2   : > { %1076 = vrot.lane.b32.xlu1 %v753_v52, %s17209_s13  ;;  %1102 = vrot.lane.b32.xlu0 %v888_v55, %s17209_s13  ;;  %v1024_v41 = vcombine.low %v973_v39, %v1005_v29  ;;  %v1025_v23 = vcombine.high %v973_v39, %v1005_v29  ;;  %v1014_v26 = vrot.slane %v1006_v45, %v17507_v58 }
 0x1d3   : > { %v1007_v52 = vcombine.high %v941_v10, %v957_v50  ;;  %v989_v55 = vrot.slane %v975_v19, %v17507_v58 }
 0x1d4   : > { %v1026_v53 = vcombine.low %v982_v51, %v1014_v26  ;;  %v1027_v31 = vcombine.high %v982_v51, %v1014_v26 }
 0x1d5   : > { %v1021_v54 = vrot.slane %v1007_v52, %v17507_v58 }
 0x1d6   : > { %1080 = vrot.lane.b32.xlu1 %v754_v2, %s17209_s13  ;;  %1106 = vrot.lane.b32.xlu0 %v889_v4, %s17209_s13 }
 0x1d7   : > { %v1028_v59 = vcombine.low %v989_v55, %v1021_v54  ;;  %v1029_v60 = vcombine.high %v989_v55, %v1021_v54 }
 0x1da   : > { %1084 = vrot.lane.b32.xlu1 %v755_v14, %s17209_s13  ;;  %1110 = vrot.lane.b32.xlu0 %v890_v20, %s17209_s13 }
 0x1de   : > { %1088 = vrot.lane.b32.xlu1 %v756_v35, %s17209_s13  ;;  %1114 = vrot.lane.b32.xlu0 %v891_v37, %s17209_s13 }
 0x1e2   : > { %1092 = vrot.lane.b32.xlu1 %v757_v40, %s17209_s13  ;;  %1118 = vrot.lane.b32.xlu0 %v892_v33, %s17209_s13 }
 0x1e6   : > { %1096 = vrot.lane.b32.xlu1 %v1022_v43, %s17209_s13  ;;  %1122 = vrot.lane.b32.xlu0 %v893_v49, %s17209_s13 }
 0x1ea   : > { %1100 = vrot.lane.b32.xlu1 %v1023_v17, %s17209_s13 }
 0x1ee   : > { %1104 = vrot.lane.b32.xlu1 %v1024_v41, %s17209_s13 }
 0x1f2   : > { %1108 = vrot.lane.b32.xlu1 %v1025_v23, %s17209_s13 }
 0x1f6   : > { %1112 = vrot.lane.b32.xlu1 %v1026_v53, %s17209_s13 }
 0x1fa   : > { %1116 = vrot.lane.b32.xlu1 %v1027_v31, %s17209_s13 }
 0x1fe   : > { %1120 = vrot.lane.b32.xlu1 %v1028_v59, %s17209_s13 }
 0x202   : > { %1124 = vrot.lane.b32.xlu1 %v1029_v60, %s17209_s13 }
 0x21c   : > { %v1063_v63 = vpop.permute.xlu0 %1062 }
 0x21d   : > { %1159 = vst.msk [vmem:[#allocation2 + $0x1] sm:$0xff] %vm1158_vm4, %v1063_v63 }
 0x220   : > { %v1067_v1 = vpop.permute.xlu0 %1066 }
 0x221   : > { %1161 = vst.msk [vmem:[#allocation2 + $0x19] sm:$0xff] %vm1158_vm4, %v1067_v1 }
 0x224   : > { %v1071_v2 = vpop.permute.xlu0 %1070  ;;  %v17708_v4 = vld [vmem:[#allocation2 + $0x1] sm:$0xff] }
 0x225   : > { %25949 = vst [vmem:[#allocation11_spill] sm:$0xff] %v17708_v4  ;;  %1163 = vst.msk [vmem:[#allocation2 + $0x31] sm:$0xff] %vm1158_vm4, %v1071_v2  ;;  %1257 = vrot.lane.b32.xlu0 %v17708_v4, %s17210_s14 }
 0x228   : > { %v1075_v5 = vpop.permute.xlu0 %1074  ;;  %v17713_v6 = vld [vmem:[#allocation2 + $0x19] sm:$0xff] }
 0x229   : > { %25950 = vst [vmem:[#allocation12_spill] sm:$0xff] %v17713_v6  ;;  %1165 = vst.msk [vmem:[#allocation2 + $0x49] sm:$0xff] %vm1158_vm4, %v1075_v5  ;;  %1261 = vrot.lane.b32.xlu0 %v17713_v6, %s17210_s14 }
 0x22c   : > { %v1079_v8 = vpop.permute.xlu0 %1078  ;;  %v17718_v9 = vld [vmem:[#allocation2 + $0x31] sm:$0xff] }
 0x22d   : > { %25951 = vst [vmem:[#allocation13_spill] sm:$0xff] %v17718_v9  ;;  %1167 = vst.msk [vmem:[#allocation2 + $0x61] sm:$0xff] %vm1158_vm4, %v1079_v8  ;;  %1265 = vrot.lane.b32.xlu0 %v17718_v9, %s17210_s14  ;;  %v2046_v27 = vcombine.low %v17708_v4, %v17718_v9 }
 0x22f   : > { %v17762_v40 = vrot.slane %v2046_v27, %v17494_v44 }
 0x230   : > { %v1083_v11 = vpop.permute.xlu0 %1082  ;;  %v17723_v12 = vld [vmem:[#allocation2 + $0x49] sm:$0xff] }
 0x231   : > { %25952 = vst [vmem:[#allocation14_spill] sm:$0xff] %v17723_v12  ;;  %1169 = vst.msk [vmem:[#allocation2 + $0x79] sm:$0xff] %vm1158_vm4, %v1083_v11  ;;  %1269 = vrot.lane.b32.xlu0 %v17723_v12, %s17210_s14  ;;  %v2062_v22 = vcombine.low %v17713_v6, %v17723_v12 }
 0x232   : > { %25954 = vst [vmem:[#allocation16_spill] sm:$0xff] %v17762_v40 }
 0x233   : > { %v17750_v34 = vrot.slane %v2062_v22, %v17494_v44 }
 0x234   : > { %v1087_v13 = vpop.permute.xlu0 %1086  ;;  %v17728_v14 = vld [vmem:[#allocation2 + $0x61] sm:$0xff] }
 0x235   : > { %1171 = vst.msk [vmem:[#allocation2 + $0x91] sm:$0xff] %vm1158_vm4, %v1087_v13  ;;  %1273 = vrot.lane.b32.xlu0 %v17728_v14, %s17210_s14  ;;  %25953 = vst [vmem:[#allocation15_spill] sm:$0xff] %v17750_v34  ;;  %v2110_v33 = vcombine.low %v17762_v40, %v17750_v34 }
 0x237   : > { %v17790_v47 = vrot.slane %v2110_v33, %v17507_v58 }
 0x238   : > { %v1065_v16 = vpop.permute.xlu1 %1064  ;;  %v1091_v18 = vpop.permute.xlu0 %1090  ;;  %v17734_v20 = vld [vmem:[#allocation2 + $0x79] sm:$0xff] }
 0x239   : > { %1160 = vst.msk [vmem:[#allocation2 + $0x9] sm:$0xff] %vm1158_vm4, %v1065_v16  ;;  %1173 = vst.msk [vmem:[#allocation2 + $0xa9] sm:$0xff] %vm1158_vm4, %v1091_v18  ;;  %1277 = vrot.lane.b32.xlu0 %v17734_v20, %s17210_s14 }
 0x23a   : > { %25957 = vst [vmem:[#allocation19_spill] sm:$0xff] %v17790_v47 }
 0x23c   : > { %v1069_v28 = vpop.permute.xlu1 %1068  ;;  %v1095_v30 = vpop.permute.xlu0 %1094  ;;  %v17742_v32 = vld [vmem:[#allocation2 + $0x91] sm:$0xff] }
 0x23d   : > { %1162 = vst.msk [vmem:[#allocation2 + $0x21] sm:$0xff] %vm1158_vm4, %v1069_v28  ;;  %1175 = vst.msk [vmem:[#allocation2 + $0xc1] sm:$0xff] %vm1158_vm4, %v1095_v30  ;;  %1281 = vrot.lane.b32.xlu0 %v17742_v32, %s17210_s14  ;;  %v2078_v35 = vcombine.low %v17728_v14, %v17742_v32 }
 0x23f   : > { %v17772_v42 = vrot.slane %v2078_v35, %v17494_v44 }
 0x240   : > { %v1073_v37 = vpop.permute.xlu1 %1072  ;;  %v17754_v38 = vld [vmem:[#allocation2 + $0x9] sm:$0xff]  ;;  %v1099_v56 = vpop.permute.xlu0 %1098 }
 0x241   : > { %1164 = vst.msk [vmem:[#allocation2 + $0x39] sm:$0xff] %vm1158_vm4, %v1073_v37  ;;  %v17757_v7 = vld [vmem:[#allocation2 + $0xa9] sm:$0xff]  ;;  %1259 = vrot.lane.b32.xlu1 %v17754_v38, %s17210_s14  ;;  %1177 = vst.msk [vmem:[#allocation2 + $0xd9] sm:$0xff] %vm1158_vm4, %v1099_v56 }
 0x242   : > { %v2094_v15 = vcombine.low %v17734_v20, %v17757_v7  ;;  %1285 = vrot.lane.b32.xlu0 %v17757_v7, %s17210_s14  ;;  %25955 = vst [vmem:[#allocation17_spill] sm:$0xff] %v17772_v42 }
 0x244   : > { %v17775_v21 = vrot.slane %v2094_v15, %v17494_v44  ;;  %v1077_v61 = vpop.permute.xlu1 %1076  ;;  %v17777_v43 = vld [vmem:[#allocation2 + $0x21] sm:$0xff]  ;;  %v1103_v49 = vpop.permute.xlu0 %1102 }
 0x245   : > { %1166 = vst.msk [vmem:[#allocation2 + $0x51] sm:$0xff] %vm1158_vm4, %v1077_v61  ;;  %v17780_v62 = vld [vmem:[#allocation2 + $0xc1] sm:$0xff]  ;;  %1263 = vrot.lane.b32.xlu1 %v17777_v43, %s17210_s14  ;;  %1179 = vst.msk [vmem:[#allocation2 + $0xf1] sm:$0xff] %vm1158_vm4, %v1103_v49 }
 0x246   : > { %25956 = vst [vmem:[#allocation18_spill] sm:$0xff] %v17775_v21  ;;  %v2142_v46 = vcombine.low %v17772_v42, %v17775_v21  ;;  %1289 = vrot.lane.b32.xlu0 %v17780_v62, %s17210_s14  ;;  %v17987_v24 = vld [vmem:[#allocation2 + $0xc0] sm:$0xff] }
 0x247   : > { %25981 = vst [vmem:[#allocation43_spill] sm:$0xff] %v17987_v24  ;;  %v6456_v25 = vld [vmem:[#allocation2 + $0x20] sm:$0xff] }
 0x248   : > { %v17793_v48 = vrot.slane %v2142_v46, %v17507_v58  ;;  %v1081_v50 = vpop.permute.xlu1 %1080  ;;  %v17795_v17 = vld [vmem:[#allocation2 + $0x39] sm:$0xff]  ;;  %v1107_v29 = vpop.permute.xlu0 %1106 }
 0x249   : > { %1168 = vst.msk [vmem:[#allocation2 + $0x69] sm:$0xff] %vm1158_vm4, %v1081_v50  ;;  %v17798_v36 = vld [vmem:[#allocation2 + $0xd9] sm:$0xff]  ;;  %1267 = vrot.lane.b32.xlu1 %v17795_v17, %s17210_s14  ;;  %1181 = vst.msk [vmem:[#allocation2 + $0x109] sm:$0xff] %vm1158_vm4, %v1107_v29  ;;  %v2318_v60 = vcombine.low %v17754_v38, %v17795_v17 }
 0x24a   : > { %25958 = vst [vmem:[#allocation20_spill] sm:$0xff] %v17793_v48  ;;  %1293 = vrot.lane.b32.xlu0 %v17798_v36, %s17210_s14  ;;  %v17984_v10 = vld [vmem:[#allocation2 + $0xd8] sm:$0xff] }
 0x24b   : > { %v17861_v16 = vrot.slane %v2318_v60, %v17494_v44  ;;  %25980 = vst [vmem:[#allocation42_spill] sm:$0xff] %v17984_v10 }
 0x24c   : > { %v1085_v39 = vpop.permute.xlu1 %1084  ;;  %v17807_v3 = vld [vmem:[#allocation2 + $0x51] sm:$0xff]  ;;  %v1111_v45 = vpop.permute.xlu0 %1110 }
 0x24d   : > { %1170 = vst.msk [vmem:[#allocation2 + $0x81] sm:$0xff] %vm1158_vm4, %v1085_v39  ;;  %v17810_v41 = vld [vmem:[#allocation2 + $0xf1] sm:$0xff]  ;;  %1271 = vrot.lane.b32.xlu1 %v17807_v3, %s17210_s14  ;;  %1183 = vst.msk [vmem:[#allocation2 + $0x121] sm:$0xff] %vm1158_vm4, %v1111_v45  ;;  %v2334_v54 = vcombine.low %v17777_v43, %v17807_v3 }
 0x24e   : > { %1297 = vrot.lane.b32.xlu0 %v17810_v41, %s17210_s14  ;;  %25960 = vst [vmem:[#allocation22_spill] sm:$0xff] %v17861_v16  ;;  %v2182_v28 = vcombine.low %v17780_v62, %v17810_v41 }
 0x24f   : > { %v17852_v2 = vrot.slane %v2334_v54, %v17494_v44  ;;  %v2911_v54 = vld [vmem:[#allocation2 + $0x90] sm:$0xff] }
 0x250   : > { %v1089_v57 = vpop.permute.xlu1 %1088  ;;  %v17817_v23 = vld [vmem:[#allocation2 + $0x69] sm:$0xff]  ;;  %v1115_v26 = vpop.permute.xlu0 %1114  ;;  %v17897_v46 = vrot.slane %v2182_v28, %v17494_v44 }
 0x251   : > { %1172 = vst.msk [vmem:[#allocation2 + $0x99] sm:$0xff] %vm1158_vm4, %v1089_v57  ;;  %v17820_v51 = vld [vmem:[#allocation2 + $0x109] sm:$0xff]  ;;  %1275 = vrot.lane.b32.xlu1 %v17817_v23, %s17210_s14  ;;  %1185 = vst.msk [vmem:[#allocation2 + $0x139] sm:$0xff] %vm1158_vm4, %v1115_v26  ;;  %v2382_v30 = vcombine.low %v17861_v16, %v17852_v2 }
 0x252   : > { %1301 = vrot.lane.b32.xlu0 %v17820_v51, %s17210_s14  ;;  %25959 = vst [vmem:[#allocation21_spill] sm:$0xff] %v17852_v2  ;;  %v2198_v8 = vcombine.low %v17798_v36, %v17820_v51  ;;  %25964 = vst [vmem:[#allocation26_spill] sm:$0xff] %v17897_v46  ;;  %v2900_v28 = vld [vmem:[#allocation2 + $0x8] sm:$0xff] }
 0x253   : > { %v17904_v29 = vrot.slane %v2382_v30, %v17507_v58 }
 0x254   : > { %v1093_v52 = vpop.permute.xlu1 %1092  ;;  %v17827_v53 = vld [vmem:[#allocation2 + $0x81] sm:$0xff]  ;;  %v1119_v19 = vpop.permute.xlu0 %1118  ;;  %v17883_v37 = vrot.slane %v2198_v8, %v17494_v44 }
 0x255   : > { %1174 = vst.msk [vmem:[#allocation2 + $0xb1] sm:$0xff] %vm1158_vm4, %v1093_v52  ;;  %v17830_v31 = vld [vmem:[#allocation2 + $0x121] sm:$0xff]  ;;  %1279 = vrot.lane.b32.xlu1 %v17827_v53, %s17210_s14  ;;  %1187 = vst.msk [vmem:[#allocation2 + $0x151] sm:$0xff] %vm1158_vm4, %v1119_v19 }
 0x256   : > { %1305 = vrot.lane.b32.xlu0 %v17830_v31, %s17210_s14  ;;  %25963 = vst [vmem:[#allocation25_spill] sm:$0xff] %v17883_v37  ;;  %25965 = vst [vmem:[#allocation27_spill] sm:$0xff] %v17904_v29  ;;  %v2246_v45 = vcombine.low %v17897_v46, %v17883_v37  ;;  %v17989_v29 = vld [vmem:[#allocation2 + $0xf0] sm:$0xff]  ;;  %v18001_v37 = vld [vmem:[#allocation2 + $0x38] sm:$0xff] }
 0x257   : > { %25982 = vst [vmem:[#allocation44_spill] sm:$0xff] %v17989_v29  ;;  %25985 = vst [vmem:[#allocation47_spill] sm:$0xff] %v18001_v37  ;;  %v6464_v16 = vld [vmem:[#allocation2 + $0x80] sm:$0xff] }
 0x258   : > { %v1097_v55 = vpop.permute.xlu1 %1096  ;;  %v17839_v59 = vld [vmem:[#allocation2 + $0x99] sm:$0xff]  ;;  %v1123_v63 = vpop.permute.xlu0 %1122 }
 0x259   : > { %1176 = vst.msk [vmem:[#allocation2 + $0xc9] sm:$0xff] %vm1158_vm4, %v1097_v55  ;;  %v17844_v1 = vld [vmem:[#allocation2 + $0x139] sm:$0xff]  ;;  %1283 = vrot.lane.b32.xlu1 %v17839_v59, %s17210_s14  ;;  %1189 = vst.msk [vmem:[#allocation2 + $0x169] sm:$0xff] %vm1158_vm4, %v1123_v63  ;;  %v2350_v5 = vcombine.low %v17817_v23, %v17839_v59  ;;  %v17928_v63 = vrot.slane %v2246_v45, %v17507_v58  ;;  %v2905_v45 = vld [vmem:[#allocation2 + $0x48] sm:$0xff] }
 0x25a   : > { %1309 = vrot.lane.b32.xlu0 %v17844_v1, %s17210_s14  ;;  %v2899_v55 = vld [vmem:[#allocation2] sm:$0xff]  ;;  %v6466_v2 = vld [vmem:[#allocation2 + $0x98] sm:$0xff] }
 0x25b   : > { %v17877_v27 = vrot.slane %v2350_v5, %v17494_v44  ;;  %25969 = vst [vmem:[#allocation31_spill] sm:$0xff] %v17928_v63 }
 0x25c   : > { %v1101_v11 = vpop.permute.xlu1 %1100  ;;  %v17858_v13 = vld [vmem:[#allocation2 + $0xb1] sm:$0xff] }
 0x25d   : > { %1178 = vst.msk [vmem:[#allocation2 + $0xe1] sm:$0xff] %vm1158_vm4, %v1101_v11  ;;  %v17864_v18 = vld [vmem:[#allocation2 + $0x151] sm:$0xff]  ;;  %1287 = vrot.lane.b32.xlu1 %v17858_v13, %s17210_s14  ;;  %v2366_v22 = vcombine.low %v17827_v53, %v17858_v13  ;;  %25961 = vst [vmem:[#allocation23_spill] sm:$0xff] %v17877_v27 }
 0x25e   : > { %1313 = vrot.lane.b32.xlu0 %v17864_v18, %s17210_s14  ;;  %v2214_v56 = vcombine.low %v17830_v31, %v17864_v18 }
 0x25f   : > { %v17880_v35 = vrot.slane %v2366_v22, %v17494_v44  ;;  %v2901_v22 = vld [vmem:[#allocation2 + $0x18] sm:$0xff] }
 0x260   : > { %v1105_v15 = vpop.permute.xlu1 %1104  ;;  %v17887_v33 = vld [vmem:[#allocation2 + $0xc9] sm:$0xff]  ;;  %v17912_v57 = vrot.slane %v2214_v56, %v17494_v44 }
 0x261   : > { %25962 = vst [vmem:[#allocation24_spill] sm:$0xff] %v17880_v35  ;;  %v2414_v61 = vcombine.low %v17877_v27, %v17880_v35  ;;  %1180 = vst.msk [vmem:[#allocation2 + $0xf9] sm:$0xff] %vm1158_vm4, %v1105_v15  ;;  %v17892_v49 = vld [vmem:[#allocation2 + $0x169] sm:$0xff]  ;;  %1291 = vrot.lane.b32.xlu1 %v17887_v33, %s17210_s14 }
 0x262   : > { %1317 = vrot.lane.b32.xlu0 %v17892_v49, %s17210_s14  ;;  %v2230_v50 = vcombine.low %v17844_v1, %v17892_v49  ;;  %25967 = vst [vmem:[#allocation29_spill] sm:$0xff] %v17912_v57  ;;  %v2903_v15 = vld [vmem:[#allocation2 + $0x30] sm:$0xff] }
 0x263   : > { %v17907_v39 = vrot.slane %v2414_v61, %v17507_v58  ;;  %v6468_v27 = vld [vmem:[#allocation2 + $0xb0] sm:$0xff] }
 0x264   : > { %v17915_v26 = vrot.slane %v2230_v50, %v17494_v44  ;;  %v1109_v52 = vpop.permute.xlu1 %1108  ;;  %v17917_v19 = vld [vmem:[#allocation2 + $0xe1] sm:$0xff] }
 0x265   : > { %25966 = vst [vmem:[#allocation28_spill] sm:$0xff] %v17907_v39  ;;  %1182 = vst.msk [vmem:[#allocation2 + $0x111] sm:$0xff] %vm1158_vm4, %v1109_v52  ;;  %1295 = vrot.lane.b32.xlu1 %v17917_v19, %s17210_s14  ;;  %v16912_v39 = vld [vmem:[#allocation2 + $0x138] ss:$48 sps:$4 sm:$0xff]  }
 0x266   : > { %25968 = vst [vmem:[#allocation30_spill] sm:$0xff] %v17915_v26  ;;  %v2278_v60 = vcombine.low %v17912_v57, %v17915_v26  ;;  %2963 = vrot.lane.b32.xlu0 %v2899_v55, %s17210_s14  ;;  %v2913_v26 = vld [vmem:[#allocation2 + $0xa8] sm:$0xff] }
 0x268   : > { %v17931_v5 = vrot.slane %v2278_v60, %v17507_v58  ;;  %v1113_v8 = vpop.permute.xlu1 %1112  ;;  %v17933_v11 = vld [vmem:[#allocation2 + $0xf9] sm:$0xff] }
 0x269   : > { %25971 = vst [vmem:[#allocation33_spill] sm:$0xff] %v17933_v11  ;;  %1184 = vst.msk [vmem:[#allocation2 + $0x129] sm:$0xff] %vm1158_vm4, %v1113_v8  ;;  %1299 = vrot.lane.b32.xlu1 %v17933_v11, %s17210_s14  ;;  %v2907_v60 = vld [vmem:[#allocation2 + $0x60] sm:$0xff] }
 0x26a   : > { %25970 = vst [vmem:[#allocation32_spill] sm:$0xff] %v17931_v5  ;;  %2967 = vrot.lane.b32.xlu0 %v2901_v22, %s17210_s14 }
 0x26c   : > { %v1117_v30 = vpop.permute.xlu1 %1116  ;;  %v17941_v56 = vld [vmem:[#allocation2 + $0x111] sm:$0xff] }
 0x26d   : > { %25972 = vst [vmem:[#allocation34_spill] sm:$0xff] %v17941_v56  ;;  %1186 = vst.msk [vmem:[#allocation2 + $0x141] sm:$0xff] %vm1158_vm4, %v1117_v30  ;;  %1303 = vrot.lane.b32.xlu1 %v17941_v56, %s17210_s14  ;;  %v2470_v8 = vcombine.low %v17917_v19, %v17941_v56  ;;  %v2454_v30 = vcombine.low %v17887_v33, %v17933_v11  ;;  %v6476_v46 = vld [vmem:[#allocation2 + $0x110] sm:$0xff]  ;;  %v8346_v11 = vld [vmem:[#allocation2 + $0xc2] sm:$0xff] }
 0x26e   : > { %2971 = vrot.lane.b32.xlu0 %v2903_v15, %s17210_s14  ;;  %v2909_v15 = vld [vmem:[#allocation2 + $0x78] sm:$0xff] }
 0x26f   : > { %v17978_v0 = vrot.slane %v2454_v30, %v17494_v44  ;;  %v6460_v30 = vld [vmem:[#allocation2 + $0x50] sm:$0xff] }
 0x270   : > { %v1121_v61 = vpop.permute.xlu1 %1120  ;;  %v17947_v50 = vld [vmem:[#allocation2 + $0x129] sm:$0xff]  ;;  %v4153_v42 = vcombine.low %v6456_v25, %v6460_v30 }
 0x271   : > { %25973 = vst [vmem:[#allocation35_spill] sm:$0xff] %v17947_v50  ;;  %1188 = vst.msk [vmem:[#allocation2 + $0x159] sm:$0xff] %vm1158_vm4, %v1121_v61  ;;  %1307 = vrot.lane.b32.xlu1 %v17947_v50, %s17210_s14  ;;  %v17969_v61 = vrot.slane %v2470_v8, %v17494_v44  ;;  %v3861_v8 = vld [vmem:[#allocation2 + $0x150] sm:$0xff] }
 0x272   : > { %2975 = vrot.lane.b32.xlu0 %v2905_v45, %s17210_s14  ;;  %25979 = vst [vmem:[#allocation41_spill] sm:$0xff] %v17978_v0 }
 0x273   : > { %25976 = vst [vmem:[#allocation38_spill] sm:$0xff] %v17969_v61  ;;  %v2518_v63 = vcombine.low %v17978_v0, %v17969_v61  ;;  %v6474_v61 = vld [vmem:[#allocation2 + $0xf8] sm:$0xff] }
 0x274   : > { %v1125_v52 = vpop.permute.xlu1 %1124  ;;  %v17953_v55 = vld [vmem:[#allocation2 + $0x141] sm:$0xff] }
 0x275   : > { %25974 = vst [vmem:[#allocation36_spill] sm:$0xff] %v17953_v55  ;;  %1190 = vst.msk [vmem:[#allocation2 + $0x171] sm:$0xff] %vm1158_vm4, %v1125_v52  ;;  %1311 = vrot.lane.b32.xlu1 %v17953_v55, %s17210_s14 }
 0x276   : > { %2979 = vrot.lane.b32.xlu0 %v2907_v60, %s17210_s14  ;;  %v17975_v60 = vld [vmem:[#allocation2 + $0x108] sm:$0xff] }
 0x277   : > { %25978 = vst [vmem:[#allocation40_spill] sm:$0xff] %v17975_v60  ;;  %v4017_v35 = vcombine.low %v17984_v10, %v17975_v60  ;;  %v18009_v10 = vld [vmem:[#allocation2 + $0x8] sm:$0xff]  ;;  %v18012_v60 = vrot.slane %v16912_v39, %v17494_v44  ;;  %v2902_v39 = vld [vmem:[#allocation2 + $0x20] sm:$0xff] }
 0x278   : > { %v17961_v22 = vld [vmem:[#allocation2 + $0x159] sm:$0xff]  ;;  %25986 = vst [vmem:[#allocation48_spill] sm:$0xff] %v18009_v10  ;;  %v4137_v30 = vcombine.low %v18009_v10, %v18001_v37  ;;  %v8357_v37 = vld [vmem:[#allocation2 + $0x142] sm:$0xff] }
 0x279   : > { %25975 = vst [vmem:[#allocation37_spill] sm:$0xff] %v17961_v22  ;;  %1315 = vrot.lane.b32.xlu1 %v17961_v22, %s17210_s14  ;;  %v2486_v45 = vcombine.low %v17947_v50, %v17961_v22  ;;  %v3862_v48 = vld [vmem:[#allocation2 + $0x158] sm:$0xff]  ;;  %25987 = vst [vmem:[#allocation49_spill] sm:$0xff] %v18012_v60  ;;  %v18021_v25 = vrot.slane %v4017_v35, %v17494_v44 }
 0x27a   : > { %2983 = vrot.lane.b32.xlu0 %v2909_v15, %s17210_s14  ;;  %v8353_v10 = vld [vmem:[#allocation2 + $0x112] sm:$0xff]  ;;  %v8359_v34 = vld [vmem:[#allocation2 + $0x15a] sm:$0xff] }
 0x27b   : > { %v17994_v5 = vrot.slane %v2486_v45, %v17494_v44  ;;  %v4001_v45 = vcombine.low %v17987_v24, %v17989_v29  ;;  %v6470_v24 = vld [vmem:[#allocation2 + $0xc8] sm:$0xff]  ;;  %25990 = vst [vmem:[#allocation52_spill] sm:$0xff] %v18021_v25  ;;  %v18035_v29 = vrot.slane %v4153_v42, %v17494_v44  ;;  %v8351_v50 = vld [vmem:[#allocation2 + $0xfa] sm:$0xff] }
 0x27c   : > { %v17973_v52 = vld [vmem:[#allocation2 + $0x171] sm:$0xff] }
 0x27d   : > { %25977 = vst [vmem:[#allocation39_spill] sm:$0xff] %v17973_v52  ;;  %1319 = vrot.lane.b32.xlu1 %v17973_v52, %s17210_s14  ;;  %v2502_v15 = vcombine.low %v17953_v55, %v17973_v52  ;;  %25983 = vst [vmem:[#allocation45_spill] sm:$0xff] %v17994_v5  ;;  %v16929_v21 = vld [vmem:[#allocation2 + $0x140] ss:$48 sps:$4 sm:$0xff]   ;;  %v18032_v35 = vrot.slane %v4001_v45, %v17494_v44 }
 0x27e   : > { %2987 = vrot.lane.b32.xlu0 %v2911_v54, %s17210_s14  ;;  %v3857_v54 = vld [vmem:[#allocation2 + $0x120] sm:$0xff]  ;;  %25993 = vst [vmem:[#allocation55_spill] sm:$0xff] %v18035_v29 }
 0x27f   : > { %v17997_v57 = vrot.slane %v2502_v15, %v17494_v44  ;;  %v4033_v47 = vcombine.low %v3857_v54, %v3861_v8  ;;  %v6472_v15 = vld [vmem:[#allocation2 + $0xe0] sm:$0xff]  ;;  %v4185_v8 = vcombine.low %v6464_v16, %v6468_v27  ;;  %25992 = vst [vmem:[#allocation54_spill] sm:$0xff] %v18032_v35  ;;  %v4065_v42 = vcombine.low %v18032_v35, %v18021_v25  ;;  %v2930_v25 = vld [vmem:[#allocation2 + $0x170] sm:$0xff] }
 0x280   : > { %v4289_v54 = vcombine.low %v6472_v15, %v6476_v46  ;;  %v4273_v46 = vcombine.low %v6470_v24, %v6474_v61  ;;  %v2915_v15 = vld [vmem:[#allocation2 + $0xc0] sm:$0xff]  ;;  %v2904_v61 = vld [vmem:[#allocation2 + $0x38] sm:$0xff] }
 0x281   : > { %25984 = vst [vmem:[#allocation46_spill] sm:$0xff] %v17997_v57  ;;  %v2550_v0 = vcombine.low %v17994_v5, %v17997_v57  ;;  %2965 = vrot.lane.b32.xlu1 %v2900_v28, %s17210_s14  ;;  %v18015_v5 = vrot.slane %v2518_v63, %v17507_v58  ;;  %v6462_v57 = vld [vmem:[#allocation2 + $0x68] sm:$0xff]  ;;  %v18026_v16 = vrot.slane %v4033_v47, %v17494_v44  ;;  %v8348_v55 = vld [vmem:[#allocation2 + $0xda] sm:$0xff] }
 0x282   : > { %2991 = vrot.lane.b32.xlu0 %v2913_v26, %s17210_s14  ;;  %v3858_v26 = vld [vmem:[#allocation2 + $0x128] sm:$0xff]  ;;  %v4169_v27 = vcombine.low %v6462_v57, %v6466_v2  ;;  %v18041_v24 = vrot.slane %v4185_v8, %v17494_v44  ;;  %v18047_v2 = vrot.slane %v16929_v21, %v17494_v44  ;;  %v18050_v57 = vrot.slane %v4137_v30, %v17494_v44 }
 0x283   : > { %25988 = vst [vmem:[#allocation50_spill] sm:$0xff] %v18015_v5  ;;  %v18018_v28 = vrot.slane %v2550_v0, %v17507_v58  ;;  %25991 = vst [vmem:[#allocation53_spill] sm:$0xff] %v18026_v16  ;;  %v4305_v63 = vcombine.low %v3858_v26, %v3862_v48  ;;  %v4097_v47 = vcombine.low %v18026_v16, %v18012_v60  ;;  %v8332_v16 = vld [vmem:[#allocation2 + $0x1a] sm:$0xff]  ;;  %v8333_v60 = vld [vmem:[#allocation2 + $0x22] sm:$0xff] }
 0x284   : > { %25994 = vst [vmem:[#allocation56_spill] sm:$0xff] %v18041_v24  ;;  %v18044_v48 = vrot.slane %v4289_v54, %v17494_v44  ;;  %25996 = vst [vmem:[#allocation58_spill] sm:$0xff] %v18047_v2  ;;  %v18055_v45 = vrot.slane %v4169_v27, %v17494_v44  ;;  %v18058_v26 = vrot.slane %v4273_v46, %v17494_v44  ;;  %v2917_v54 = vld [vmem:[#allocation2 + $0xd8] sm:$0xff]  ;;  %v8330_v52 = vld [vmem:[#allocation2 + $0x2] sm:$0xff] }
 0x285   : > { %25989 = vst [vmem:[#allocation51_spill] sm:$0xff] %v18018_v28  ;;  %2969 = vrot.lane.b32.xlu1 %v2902_v39, %s17210_s14  ;;  %25997 = vst [vmem:[#allocation59_spill] sm:$0xff] %v18050_v57  ;;  %v18061_v8 = vrot.slane %v4305_v63, %v17494_v44  ;;  %v4201_v21 = vcombine.low %v18050_v57, %v18035_v29  ;;  %v18068_v30 = vrot.slane %v4097_v47, %v17507_v58  ;;  %v2906_v63 = vld [vmem:[#allocation2 + $0x50] sm:$0xff]  ;;  %v2908_v28 = vld [vmem:[#allocation2 + $0x68] sm:$0xff] }
 0x286   : > { %2995 = vrot.lane.b32.xlu0 %v2915_v15, %s17210_s14  ;;  %25995 = vst [vmem:[#allocation57_spill] sm:$0xff] %v18044_v48  ;;  %25998 = vst [vmem:[#allocation60_spill] sm:$0xff] %v18055_v45  ;;  %v4233_v39 = vcombine.low %v18055_v45, %v18041_v24  ;;  %v4337_v27 = vcombine.low %v18058_v26, %v18044_v48  ;;  %v18077_v15 = vrot.slane %v4065_v42, %v17507_v58  ;;  %v2919_v47 = vld [vmem:[#allocation2 + $0xf0] sm:$0xff]  ;;  %v2925_v42 = vld [vmem:[#allocation2 + $0x138] sm:$0xff] }
 0x287   : > { %25999 = vst [vmem:[#allocation61_spill] sm:$0xff] %v18058_v26  ;;  %26000 = vst [vmem:[#allocation62_spill] sm:$0xff] %v18061_v8  ;;  %v4369_v46 = vcombine.low %v18061_v8, %v18047_v2  ;;  %v18087_v0 = vrot.slane %v4201_v21, %v17507_v58  ;;  %v2921_v8 = vld [vmem:[#allocation2 + $0x108] sm:$0xff]  ;;  %v2910_v21 = vld [vmem:[#allocation2 + $0x80] sm:$0xff] }
 0x288   : > { %26001 = vst [vmem:[#allocation63_spill] sm:$0xff] %v18068_v30  ;;  %26002 = vst [vmem:[#allocation64_spill] sm:$0xff] %v18077_v15  ;;  %v18090_v5 = vrot.slane %v4337_v27, %v17507_v58  ;;  %v2923_v27 = vld [vmem:[#allocation2 + $0x120] sm:$0xff]  ;;  %v8352_v48 = vld [vmem:[#allocation2 + $0x10a] sm:$0xff] }
 0x289   : > { %2973 = vrot.lane.b32.xlu1 %v2904_v61, %s17210_s14  ;;  %v18080_v61 = vrot.slane %v4233_v39, %v17507_v58  ;;  %26005 = vst [vmem:[#allocation67_spill] sm:$0xff] %v18087_v0  ;;  %v8341_v26 = vld [vmem:[#allocation2 + $0x82] sm:$0xff]  ;;  %v8360_v15 = vld [vmem:[#allocation2 + $0x16a] sm:$0xff]  ;;  %v8334_v45 = vld [vmem:[#allocation2 + $0x32] sm:$0xff] }
 0x28a   : > { %2999 = vrot.lane.b32.xlu0 %v2917_v54, %s17210_s14  ;;  %v18083_v54 = vrot.slane %v4369_v46, %v17507_v58  ;;  %26006 = vst [vmem:[#allocation68_spill] sm:$0xff] %v18090_v5  ;;  %v2914_v46 = vld [vmem:[#allocation2 + $0xb0] sm:$0xff]  ;;  %v8335_v24 = vld [vmem:[#allocation2 + $0x3a] sm:$0xff]  ;;  %v8338_v57 = vld [vmem:[#allocation2 + $0x62] sm:$0xff] }
 0x28b   : > { %26003 = vst [vmem:[#allocation65_spill] sm:$0xff] %v18080_v61  ;;  %v2924_v61 = vld [vmem:[#allocation2 + $0x128] sm:$0xff] }
 0x28c   : > { %26004 = vst [vmem:[#allocation66_spill] sm:$0xff] %v18083_v54  ;;  %v8339_v29 = vld [vmem:[#allocation2 + $0x6a] sm:$0xff] }
 0x28d   : > { %2977 = vrot.lane.b32.xlu1 %v2906_v63, %s17210_s14 }
 0x28e   : > { %3003 = vrot.lane.b32.xlu0 %v2919_v47, %s17210_s14  ;;  %v2912_v47 = vld [vmem:[#allocation2 + $0x98] sm:$0xff] }
 0x291   : > { %2981 = vrot.lane.b32.xlu1 %v2908_v28, %s17210_s14  ;;  %v2927_v28 = vld [vmem:[#allocation2 + $0x150] sm:$0xff] }
 0x292   : > { %3007 = vrot.lane.b32.xlu0 %v2921_v8, %s17210_s14 }
 0x295   : > { %2985 = vrot.lane.b32.xlu1 %v2910_v21, %s17210_s14  ;;  %v2916_v21 = vld [vmem:[#allocation2 + $0xc8] sm:$0xff] }
 0x296   : > { %3011 = vrot.lane.b32.xlu0 %v2923_v27, %s17210_s14  ;;  %v2929_v27 = vld [vmem:[#allocation2 + $0x168] sm:$0xff] }
 0x297   : > { %v18103_v63 = vpop.permute.xlu0 %1257 }
 0x298   : > { %26007 = vst [vmem:[#allocation69_spill] sm:$0xff] %v18103_v63 }
 0x299   : > { %2989 = vrot.lane.b32.xlu1 %v2912_v47, %s17210_s14  ;;  %v2918_v47 = vld [vmem:[#allocation2 + $0xe0] sm:$0xff] }
 0x29a   : > { %3015 = vrot.lane.b32.xlu0 %v2925_v42, %s17210_s14 }
 0x29b   : > { %v18107_v39 = vpop.permute.xlu0 %1261 }
 0x29c   : > { %26008 = vst [vmem:[#allocation70_spill] sm:$0xff] %v18107_v39 }
 0x29d   : > { %2993 = vrot.lane.b32.xlu1 %v2914_v46, %s17210_s14  ;;  %v2920_v46 = vld [vmem:[#allocation2 + $0xf8] sm:$0xff] }
 0x29e   : > { %3019 = vrot.lane.b32.xlu0 %v2927_v28, %s17210_s14 }
 0x29f   : > { %v18111_v8 = vpop.permute.xlu0 %1265 }
 0x2a0   : > { %26009 = vst [vmem:[#allocation71_spill] sm:$0xff] %v18111_v8 }
 0x2a1   : > { %2997 = vrot.lane.b32.xlu1 %v2916_v21, %s17210_s14  ;;  %v2922_v21 = vld [vmem:[#allocation2 + $0x110] sm:$0xff] }
 0x2a2   : > { %3023 = vrot.lane.b32.xlu0 %v2929_v27, %s17210_s14 }
 0x2a3   : > { %v18115_v0 = vpop.permute.xlu0 %1269 }
 0x2a4   : > { %26010 = vst [vmem:[#allocation72_spill] sm:$0xff] %v18115_v0  ;;  %v1369_v27 = vcombine.low %v18107_v39, %v18115_v0  ;;  %v2926_v0 = vld [vmem:[#allocation2 + $0x140] sm:$0xff] }
 0x2a5   : > { %3001 = vrot.lane.b32.xlu1 %v2918_v47, %s17210_s14 }
 0x2a6   : > { %4721 = vrot.lane.b32.xlu0 %v17708_v4, %s17211_s15  ;;  %v18140_v5 = vrot.slane %v1369_v27, %v17494_v44 }
 0x2a7   : > { %v18120_v42 = vpop.permute.xlu0 %1273 }
 0x2a8   : > { %26011 = vst [vmem:[#allocation73_spill] sm:$0xff] %v18120_v42  ;;  %26014 = vst [vmem:[#allocation76_spill] sm:$0xff] %v18140_v5 }
 0x2a9   : > { %3005 = vrot.lane.b32.xlu1 %v2920_v46, %s17210_s14  ;;  %v1353_v46 = vcombine.low %v18103_v63, %v18111_v8 }
 0x2aa   : > { %4725 = vrot.lane.b32.xlu0 %v17713_v6, %s17211_s15 }
 0x2ab   : > { %v18125_v28 = vpop.permute.xlu0 %1277  ;;  %v18149_v2 = vrot.slane %v1353_v46, %v17494_v44 }
 0x2ac   : > { %26012 = vst [vmem:[#allocation74_spill] sm:$0xff] %v18125_v28 }
 0x2ad   : > { %3009 = vrot.lane.b32.xlu1 %v2922_v21, %s17210_s14  ;;  %26017 = vst [vmem:[#allocation79_spill] sm:$0xff] %v18149_v2  ;;  %v1417_v27 = vcombine.low %v18149_v2, %v18140_v5  ;;  %v8340_v2 = vld [vmem:[#allocation2 + $0x7a] sm:$0xff] }
 0x2ae   : > { %4729 = vrot.lane.b32.xlu0 %v17718_v9, %s17211_s15  ;;  %v18177_v5 = vld [vmem:[#allocation2 + $0x9a] sm:$0xff] }
 0x2af   : > { %v18132_v47 = vpop.permute.xlu0 %1281 }
 0x2b0   : > { %26013 = vst [vmem:[#allocation75_spill] sm:$0xff] %v18132_v47  ;;  %v1385_v21 = vcombine.low %v18120_v42, %v18132_v47  ;;  %v2928_v47 = vld [vmem:[#allocation2 + $0x158] sm:$0xff] }
 0x2b1   : > { %3013 = vrot.lane.b32.xlu1 %v2924_v61, %s17210_s14 }
 0x2b2   : > { %4733 = vrot.lane.b32.xlu0 %v17723_v12, %s17211_s15  ;;  %v18159_v63 = vrot.slane %v1385_v21, %v17494_v44  ;;  %v18175_v21 = vld [vmem:[#allocation2 + $0x92] sm:$0xff] }
 0x2b3   : > { %v18144_v54 = vpop.permute.xlu1 %1259  ;;  %v8350_v12 = vld [vmem:[#allocation2 + $0xf2] sm:$0xff] }
 0x2b4   : > { %26015 = vst [vmem:[#allocation77_spill] sm:$0xff] %v18144_v54  ;;  %v18146_v39 = vpop.permute.xlu0 %1285  ;;  %26018 = vst [vmem:[#allocation80_spill] sm:$0xff] %v18159_v63 }
 0x2b5   : > { %26016 = vst [vmem:[#allocation78_spill] sm:$0xff] %v18146_v39  ;;  %v1401_v61 = vcombine.low %v18125_v28, %v18146_v39  ;;  %3017 = vrot.lane.b32.xlu1 %v2926_v0, %s17210_s14  ;;  %v18173_v28 = vld [vmem:[#allocation2 + $0x52] sm:$0xff] }
 0x2b6   : > { %4737 = vrot.lane.b32.xlu0 %v17728_v14, %s17211_s15  ;;  %v18171_v14 = vld [vmem:[#allocation2 + $0x4a] sm:$0xff]  ;;  %v8345_v39 = vld [vmem:[#allocation2 + $0xb2] sm:$0xff] }
 0x2b7   : > { %v18162_v8 = vrot.slane %v1401_v61, %v17494_v44  ;;  %v18164_v42 = vpop.permute.xlu1 %1263  ;;  %v8344_v61 = vld [vmem:[#allocation2 + $0xaa] sm:$0xff]  ;;  %v9497_v22 = vcombine.low %v8341_v26, %v8345_v39  ;;  %v9193_v6 = vcombine.low %v8332_v16, %v18171_v14  ;;  %v9177_v16 = vcombine.low %v8330_v52, %v8334_v45 }
 0x2b8   : > { %26020 = vst [vmem:[#allocation82_spill] sm:$0xff] %v18164_v42  ;;  %v18166_v46 = vpop.permute.xlu0 %1289  ;;  %v9225_v40 = vcombine.low %v8340_v2, %v8344_v61  ;;  %v9465_v2 = vcombine.low %v8333_v60, %v18173_v28  ;;  %v9209_v61 = vcombine.low %v8338_v57, %v18175_v21  ;;  %v8331_v39 = vld [vmem:[#allocation2 + $0xa] sm:$0xff]  ;;  %v9313_v28 = vcombine.low %v8346_v11, %v8350_v12 }
 0x2b9   : > { %26019 = vst [vmem:[#allocation81_spill] sm:$0xff] %v18162_v8  ;;  %26021 = vst [vmem:[#allocation83_spill] sm:$0xff] %v18166_v46  ;;  %v1449_v0 = vcombine.low %v18159_v63, %v18162_v8  ;;  %3021 = vrot.lane.b32.xlu1 %v2928_v47, %s17210_s14  ;;  %v8361_v63 = vld [vmem:[#allocation2 + $0x172] sm:$0xff]  ;;  %v18182_v47 = vrot.slane %v1417_v27, %v17507_v58  ;;  %v9449_v60 = vcombine.low %v8331_v39, %v8335_v24 }
 0x2ba   : > { %4741 = vrot.lane.b32.xlu0 %v17734_v20, %s17211_s15  ;;  %v8356_v20 = vld [vmem:[#allocation2 + $0x13a] sm:$0xff]  ;;  %v8358_v27 = vld [vmem:[#allocation2 + $0x152] sm:$0xff]  ;;  %v9633_v56 = vcombine.low %v8357_v37, %v8361_v63  ;;  %v9329_v37 = vcombine.low %v8348_v55, %v8352_v48  ;;  %v18221_v12 = vrot.slane %v9193_v6, %v17494_v44  ;;  %v18255_v24 = vrot.slane %v9313_v28, %v17494_v44 }
 0x2bb   : > { %26022 = vst [vmem:[#allocation84_spill] sm:$0xff] %v18182_v47  ;;  %v18185_v8 = vrot.slane %v1449_v0, %v17507_v58  ;;  %v18187_v30 = vpop.permute.xlu1 %1267  ;;  %v9361_v9 = vcombine.low %v8356_v20, %v8360_v15  ;;  %v9481_v0 = vcombine.low %v8339_v29, %v18177_v5  ;;  %v8349_v47 = vld [vmem:[#allocation2 + $0xe2] sm:$0xff]  ;;  %v8347_v15 = vld [vmem:[#allocation2 + $0xca] sm:$0xff]  ;;  %v18207_v29 = vrot.slane %v9225_v40, %v17494_v44 }
 0x2bc   : > { %26024 = vst [vmem:[#allocation86_spill] sm:$0xff] %v18187_v30  ;;  %v18189_v35 = vpop.permute.xlu0 %1293  ;;  %v9601_v63 = vcombine.low %v8349_v47, %v8353_v10  ;;  %v9585_v57 = vcombine.low %v8347_v15, %v8351_v50  ;;  %v18210_v5 = vrot.slane %v9497_v22, %v17494_v44  ;;  %26032 = vst [vmem:[#allocation94_spill] sm:$0xff] %v18221_v12 }
 0x2bd   : > { %26023 = vst [vmem:[#allocation85_spill] sm:$0xff] %v18185_v8  ;;  %26025 = vst [vmem:[#allocation87_spill] sm:$0xff] %v18189_v35  ;;  %3025 = vrot.lane.b32.xlu1 %v2930_v25, %s17210_s14  ;;  %v8354_v25 = vld [vmem:[#allocation2 + $0x122] sm:$0xff]  ;;  %v8355_v8 = vld [vmem:[#allocation2 + $0x12a] sm:$0xff]  ;;  %v18213_v55 = vrot.slane %v9361_v9, %v17494_v44  ;;  %v18227_v40 = vrot.slane %v9209_v61, %v17494_v44  ;;  %v18230_v10 = vrot.slane %v9481_v0, %v17494_v44 }
 0x2be   : > { %4745 = vrot.lane.b32.xlu0 %v17742_v32, %s17211_s15  ;;  %v9345_v20 = vcombine.low %v8354_v25, %v8358_v27  ;;  %v9617_v32 = vcombine.low %v8355_v8, %v8359_v34  ;;  %26028 = vst [vmem:[#allocation90_spill] sm:$0xff] %v18207_v29  ;;  %26029 = vst [vmem:[#allocation91_spill] sm:$0xff] %v18210_v5  ;;  %v18216_v34 = vrot.slane %v9633_v56, %v17494_v44 }
 0x2bf   : > { %v18200_v26 = vpop.permute.xlu1 %1271  ;;  %26030 = vst [vmem:[#allocation92_spill] sm:$0xff] %v18213_v55  ;;  %26034 = vst [vmem:[#allocation96_spill] sm:$0xff] %v18227_v40  ;;  %v18235_v11 = vrot.slane %v9329_v37, %v17494_v44  ;;  %v18238_v56 = vrot.slane %v9601_v63, %v17494_v44  ;;  %v18249_v22 = vrot.slane %v9177_v16, %v17494_v44 }
 0x2c0   : > { %26026 = vst [vmem:[#allocation88_spill] sm:$0xff] %v18200_v26  ;;  %v18202_v4 = vpop.permute.xlu0 %1297  ;;  %26031 = vst [vmem:[#allocation93_spill] sm:$0xff] %v18216_v34  ;;  %v18241_v6 = vrot.slane %v9345_v20, %v17494_v44  ;;  %v18252_v52 = vrot.slane %v9449_v60, %v17494_v44  ;;  %v18258_v48 = vrot.slane %v9585_v57, %v17494_v44 }
 0x2c1   : > { %26027 = vst [vmem:[#allocation89_spill] sm:$0xff] %v18202_v4  ;;  %4723 = vrot.lane.b32.xlu1 %v17754_v38, %s17211_s15  ;;  %v18224_v38 = vrot.slane %v9465_v2, %v17494_v44  ;;  %26035 = vst [vmem:[#allocation97_spill] sm:$0xff] %v18230_v10  ;;  %v9273_v45 = vcombine.low %v18227_v40, %v18207_v29  ;;  %v9545_v8 = vcombine.low %v18230_v10, %v18210_v5  ;;  %v26098_v29 = vld [vmem:[#allocation14_spill] sm:$0xff] }
 0x2c2   : > { %4749 = vrot.lane.b32.xlu0 %v17757_v7, %s17211_s15  ;;  %26037 = vst [vmem:[#allocation99_spill] sm:$0xff] %v18235_v11  ;;  %26038 = vst [vmem:[#allocation100_spill] sm:$0xff] %v18238_v56  ;;  %v18244_v7 = vrot.slane %v9617_v32, %v17494_v44  ;;  %v9409_v14 = vcombine.low %v18241_v6, %v18213_v55  ;;  %v9241_v27 = vcombine.low %v18249_v22, %v18221_v12  ;;  %v26095_v55 = vld [vmem:[#allocation35_spill] sm:$0xff] }
 0x2c3   : > { %26033 = vst [vmem:[#allocation95_spill] sm:$0xff] %v18224_v38  ;;  %v18232_v9 = vpop.permute.xlu1 %1275  ;;  %26039 = vst [vmem:[#allocation101_spill] sm:$0xff] %v18241_v6  ;;  %v9513_v0 = vcombine.low %v18252_v52, %v18224_v38  ;;  %v9377_v2 = vcombine.low %v18255_v24, %v18235_v11  ;;  %v9649_v61 = vcombine.low %v18258_v48, %v18238_v56  ;;  %v26085_v38 = vld [vmem:[#allocation33_spill] sm:$0xff] }
 0x2c4   : > { %26036 = vst [vmem:[#allocation98_spill] sm:$0xff] %v18232_v9  ;;  %26040 = vst [vmem:[#allocation102_spill] sm:$0xff] %v18244_v7  ;;  %v18246_v50 = vpop.permute.xlu0 %1301  ;;  %v9681_v21 = vcombine.low %v18244_v7, %v18216_v34  ;;  %v18287_v39 = vrot.slane %v9273_v45, %v17507_v58  ;;  %v18290_v15 = vrot.slane %v9409_v14, %v17507_v58 }
 0x2c5   : > { %26041 = vst [vmem:[#allocation103_spill] sm:$0xff] %v18246_v50  ;;  %26042 = vst [vmem:[#allocation104_spill] sm:$0xff] %v18249_v22  ;;  %4727 = vrot.lane.b32.xlu1 %v17777_v43, %s17211_s15  ;;  %v18293_v37 = vrot.slane %v9545_v8, %v17507_v58  ;;  %v1641_v20 = vcombine.low %v18164_v42, %v18200_v26  ;;  %v18305_v16 = vrot.slane %v9241_v27, %v17507_v58  ;;  %v26177_v42 = vld [vmem:[#allocation48_spill] sm:$0xff] }
 0x2c6   : > { %26043 = vst [vmem:[#allocation105_spill] sm:$0xff] %v18252_v52  ;;  %26044 = vst [vmem:[#allocation106_spill] sm:$0xff] %v18255_v24  ;;  %4753 = vrot.lane.b32.xlu0 %v17780_v62, %s17211_s15  ;;  %v18296_v63 = vrot.slane %v9681_v21, %v17507_v58  ;;  %v18308_v60 = vrot.slane %v9377_v2, %v17507_v58  ;;  %v18311_v28 = vrot.slane %v9513_v0, %v17507_v58 }
 0x2c7   : > { %26045 = vst [vmem:[#allocation107_spill] sm:$0xff] %v18258_v48  ;;  %v18272_v47 = vpop.permute.xlu1 %1279  ;;  %26048 = vst [vmem:[#allocation110_spill] sm:$0xff] %v18287_v39  ;;  %v18314_v57 = vrot.slane %v9649_v61, %v17507_v58  ;;  %v1625_v45 = vcombine.low %v18144_v54, %v18187_v30  ;;  %v18331_v2 = vrot.slane %v1641_v20, %v17494_v44 }
 0x2c8   : > { %26046 = vst [vmem:[#allocation108_spill] sm:$0xff] %v18272_v47  ;;  %v18282_v25 = vpop.permute.xlu0 %1305  ;;  %26049 = vst [vmem:[#allocation111_spill] sm:$0xff] %v18290_v15  ;;  %v1505_v14 = vcombine.low %v18189_v35, %v18246_v50  ;;  %v1489_v0 = vcombine.low %v18166_v46, %v18202_v4  ;;  %v26091_v15 = vld [vmem:[#allocation13_spill] sm:$0xff]  ;;  %v18832_v50 = vld [vmem:[#allocation2 + $0xc9] sm:$0xff] }
 0x2c9   : > { %26047 = vst [vmem:[#allocation109_spill] sm:$0xff] %v18282_v25  ;;  %4731 = vrot.lane.b32.xlu1 %v17795_v17, %s17211_s15  ;;  %26050 = vst [vmem:[#allocation112_spill] sm:$0xff] %v18293_v37  ;;  %v18342_v21 = vrot.slane %v1625_v45, %v17494_v44  ;;  %v26175_v46 = vld [vmem:[#allocation54_spill] sm:$0xff] }
 0x2ca   : > { %26051 = vst [vmem:[#allocation113_spill] sm:$0xff] %v18296_v63  ;;  %4757 = vrot.lane.b32.xlu0 %v17798_v36, %s17211_s15  ;;  %26053 = vst [vmem:[#allocation115_spill] sm:$0xff] %v18305_v16 }
 0x2cb   : > { %v18302_v32 = vpop.permute.xlu1 %1283  ;;  %26054 = vst [vmem:[#allocation116_spill] sm:$0xff] %v18308_v60  ;;  %26055 = vst [vmem:[#allocation117_spill] sm:$0xff] %v18311_v28  ;;  %v1689_v28 = vcombine.low %v18342_v21, %v18331_v2 }
 0x2cc   : > { %26052 = vst [vmem:[#allocation114_spill] sm:$0xff] %v18302_v32  ;;  %26056 = vst [vmem:[#allocation118_spill] sm:$0xff] %v18314_v57  ;;  %v18318_v8 = vpop.permute.xlu0 %1309  ;;  %v1657_v61 = vcombine.low %v18232_v9, %v18302_v32  ;;  %v18363_v57 = vrot.slane %v1505_v14, %v17494_v44  ;;  %v17031_v32 = vld [vmem:[#allocation2 + $0xc1] sm:$0xff]  ;;  %v18846_v9 = vld [vmem:[#allocation2 + $0x169] sm:$0xff] }
 0x2cd   : > { %26057 = vst [vmem:[#allocation119_spill] sm:$0xff] %v18318_v8  ;;  %4735 = vrot.lane.b32.xlu1 %v17807_v3, %s17211_s15  ;;  %26058 = vst [vmem:[#allocation120_spill] sm:$0xff] %v18331_v2 }
 0x2ce   : > { %4761 = vrot.lane.b32.xlu0 %v17810_v41, %s17211_s15  ;;  %26060 = vst [vmem:[#allocation122_spill] sm:$0xff] %v18342_v21  ;;  %v18355_v37 = vrot.slane %v1657_v61, %v17494_v44  ;;  %26064 = vst [vmem:[#allocation126_spill] sm:$0xff] %v18363_v57  ;;  %v18374_v61 = vrot.slane %v1489_v0, %v17494_v44  ;;  %v26161_v21 = vld [vmem:[#allocation43_spill] sm:$0xff] }
 0x2cf   : > { %v18339_v48 = vpop.permute.xlu1 %1287 }
 0x2d0   : > { %26059 = vst [vmem:[#allocation121_spill] sm:$0xff] %v18339_v48  ;;  %v18344_v27 = vpop.permute.xlu0 %1313  ;;  %v1673_v20 = vcombine.low %v18272_v47, %v18339_v48  ;;  %26062 = vst [vmem:[#allocation124_spill] sm:$0xff] %v18355_v37  ;;  %v1553_v5 = vcombine.low %v18374_v61, %v18363_v57  ;;  %v26152_v57 = vld [vmem:[#allocation19_spill] sm:$0xff]  ;;  %v26164_v47 = vld [vmem:[#allocation22_spill] sm:$0xff] }
 0x2d1   : > { %26061 = vst [vmem:[#allocation123_spill] sm:$0xff] %v18344_v27  ;;  %4739 = vrot.lane.b32.xlu1 %v17817_v23, %s17211_s15  ;;  %v1521_v63 = vcombine.low %v18282_v25, %v18344_v27  ;;  %26067 = vst [vmem:[#allocation129_spill] sm:$0xff] %v18374_v61  ;;  %v17029_v61 = vld [vmem:[#allocation2 + $0xd9] sm:$0xff] }
 0x2d2   : > { %v18358_v45 = vrot.slane %v1673_v20, %v17494_v44  ;;  %4765 = vrot.lane.b32.xlu0 %v17820_v51, %s17211_s15  ;;  %v18381_v51 = vrot.slane %v1689_v28, %v17507_v58 }
 0x2d3   : > { %v18367_v56 = vpop.permute.xlu1 %1291  ;;  %v18391_v0 = vrot.slane %v1521_v63, %v17494_v44 }
 0x2d4   : > { %26063 = vst [vmem:[#allocation125_spill] sm:$0xff] %v18358_v45  ;;  %26065 = vst [vmem:[#allocation127_spill] sm:$0xff] %v18367_v56  ;;  %v1721_v23 = vcombine.low %v18355_v37, %v18358_v45  ;;  %v18371_v10 = vpop.permute.xlu0 %1317 }
 0x2d5   : > { %26066 = vst [vmem:[#allocation128_spill] sm:$0xff] %v18371_v10  ;;  %v1537_v20 = vcombine.low %v18318_v8, %v18371_v10  ;;  %4743 = vrot.lane.b32.xlu1 %v17827_v53, %s17211_s15  ;;  %26068 = vst [vmem:[#allocation130_spill] sm:$0xff] %v18381_v51  ;;  %v17018_v51 = vld [vmem:[#allocation2 + $0x31] sm:$0xff] }
 0x2d6   : > { %v18384_v14 = vrot.slane %v1721_v23, %v17507_v58  ;;  %4769 = vrot.lane.b32.xlu0 %v17830_v31, %s17211_s15  ;;  %26070 = vst [vmem:[#allocation132_spill] sm:$0xff] %v18391_v0  ;;  %v18409_v31 = vrot.slane %v1553_v5, %v17507_v58 }
 0x2d7   : > { %v18394_v7 = vrot.slane %v1537_v20, %v17494_v44  ;;  %v18396_v34 = vpop.permute.xlu1 %1295 }
 0x2d8   : > { %26069 = vst [vmem:[#allocation131_spill] sm:$0xff] %v18384_v14  ;;  %26072 = vst [vmem:[#allocation134_spill] sm:$0xff] %v18396_v34  ;;  %v18400_v28 = vpop.permute.xlu0 %2963 }
 0x2d9   : > { %26071 = vst [vmem:[#allocation133_spill] sm:$0xff] %v18394_v7  ;;  %26073 = vst [vmem:[#allocation135_spill] sm:$0xff] %v18400_v28  ;;  %v1585_v23 = vcombine.low %v18391_v0, %v18394_v7  ;;  %4747 = vrot.lane.b32.xlu1 %v17839_v59, %s17211_s15  ;;  %v18711_v0 = vld [vmem:[#allocation2 + $0x81] sm:$0xff] }
 0x2da   : > { %4773 = vrot.lane.b32.xlu0 %v17844_v1, %s17211_s15  ;;  %26074 = vst [vmem:[#allocation136_spill] sm:$0xff] %v18409_v31  ;;  %v17015_v31 = vld [vmem:[#allocation2 + $0x19] sm:$0xff] }
 0x2db   : > { %v18412_v63 = vrot.slane %v1585_v23, %v17507_v58  ;;  %v18414_v20 = vpop.permute.xlu1 %1299  ;;  %v26142_v7 = vld [vmem:[#allocation17_spill] sm:$0xff] }
 0x2dc   : > { %26076 = vst [vmem:[#allocation138_spill] sm:$0xff] %v18414_v20  ;;  %v18416_v53 = vpop.permute.xlu0 %2967 }
 0x2dd   : > { %26075 = vst [vmem:[#allocation137_spill] sm:$0xff] %v18412_v63  ;;  %26077 = vst [vmem:[#allocation139_spill] sm:$0xff] %v18416_v53  ;;  %4751 = vrot.lane.b32.xlu1 %v17858_v13, %s17211_s15  ;;  %v26082_v13 = vld [vmem:[#allocation11_spill] sm:$0xff] }
 0x2de   : > { %4777 = vrot.lane.b32.xlu0 %v17864_v18, %s17211_s15  ;;  %v17016_v63 = vld [vmem:[#allocation2 + $0x49] sm:$0xff] }
 0x2df   : > { %v18424_v59 = vpop.permute.xlu1 %1303 }
 0x2e0   : > { %26078 = vst [vmem:[#allocation140_spill] sm:$0xff] %v18424_v59  ;;  %v18426_v1 = vpop.permute.xlu0 %2971 }
 0x2e1   : > { %26079 = vst [vmem:[#allocation141_spill] sm:$0xff] %v18426_v1  ;;  %4755 = vrot.lane.b32.xlu1 %v17887_v33, %s17211_s15  ;;  %v1777_v33 = vcombine.low %v18396_v34, %v18424_v59 }
 0x2e2   : > { %4781 = vrot.lane.b32.xlu0 %v17892_v49, %s17211_s15  ;;  %v26086_v49 = vld [vmem:[#allocation12_spill] sm:$0xff] }
 0x2e3   : > { %v18432_v5 = vpop.permute.xlu1 %1307  ;;  %v18459_v60 = vrot.slane %v1777_v33, %v17494_v44 }
 0x2e4   : > { %26080 = vst [vmem:[#allocation142_spill] sm:$0xff] %v18432_v5  ;;  %v18434_v23 = vpop.permute.xlu0 %2975 }
 0x2e5   : > { %26081 = vst [vmem:[#allocation143_spill] sm:$0xff] %v18434_v23  ;;  %4759 = vrot.lane.b32.xlu1 %v17917_v19, %s17211_s15  ;;  %v1761_v19 = vcombine.low %v18367_v56, %v18414_v20  ;;  %v18594_v56 = vld [vmem:[#allocation2 + $0x18] sm:$0xff] }
 0x2e6   : > { %5504 = vrot.lane.b32.xlu0 %v26082_v13, %s17210_s14  ;;  %v26089_v13 = vld [vmem:[#allocation34_spill] sm:$0xff] }
 0x2e7   : > { %v18440_v18 = vpop.permute.xlu1 %1311  ;;  %26090 = vst [vmem:[#allocation34_spill] sm:$0xff] %v18459_v60  ;;  %v18470_v11 = vrot.slane %v1761_v19, %v17494_v44 }
 0x2e8   : > { %26083 = vst [vmem:[#allocation11_spill] sm:$0xff] %v18440_v18  ;;  %v18442_v52 = vpop.permute.xlu0 %2979 }
 0x2e9   : > { %26084 = vst [vmem:[#allocation144_spill] sm:$0xff] %v18442_v52  ;;  %4763 = vrot.lane.b32.xlu1 %v26085_v38, %s17211_s15  ;;  %26093 = vst [vmem:[#allocation145_spill] sm:$0xff] %v18470_v11 }
 0x2ea   : > { %5508 = vrot.lane.b32.xlu0 %v26086_v49, %s17210_s14  ;;  %v3075_v49 = vcombine.low %v18416_v53, %v18434_v23  ;;  %v18584_v23 = vld [vmem:[#allocation2 + $0x48] sm:$0xff] }
 0x2eb   : > { %v18450_v16 = vpop.permute.xlu1 %1315 }
 0x2ec   : > { %26087 = vst [vmem:[#allocation33_spill] sm:$0xff] %v18450_v16  ;;  %v18454_v39 = vpop.permute.xlu0 %2983  ;;  %v1793_v38 = vcombine.low %v18432_v5, %v18450_v16  ;;  %v18491_v22 = vrot.slane %v3075_v49, %v17494_v44 }
 0x2ed   : > { %26088 = vst [vmem:[#allocation12_spill] sm:$0xff] %v18454_v39  ;;  %4767 = vrot.lane.b32.xlu1 %v26089_v13, %s17211_s15  ;;  %v3059_v13 = vcombine.low %v18400_v28, %v18426_v1  ;;  %v18514_v1 = vld [vmem:[#allocation2 + $0x61] sm:$0xff] }
 0x2ee   : > { %5512 = vrot.lane.b32.xlu0 %v26091_v15, %s17210_s14  ;;  %v1825_v15 = vcombine.low %v18470_v11, %v18459_v60  ;;  %v18483_v40 = vrot.slane %v1793_v38, %v17494_v44  ;;  %26099 = vst [vmem:[#allocation14_spill] sm:$0xff] %v18491_v22 }
 0x2ef   : > { %v18467_v24 = vpop.permute.xlu1 %1319  ;;  %v18502_v38 = vrot.slane %v3059_v13, %v17494_v44 }
 0x2f0   : > { %26092 = vst [vmem:[#allocation13_spill] sm:$0xff] %v18467_v24  ;;  %v18472_v6 = vpop.permute.xlu0 %2987  ;;  %v1809_v33 = vcombine.low %v18440_v18, %v18467_v24  ;;  %26096 = vst [vmem:[#allocation35_spill] sm:$0xff] %v18483_v40  ;;  %v18509_v49 = vrot.slane %v1825_v15, %v17507_v58 }
 0x2f1   : > { %26094 = vst [vmem:[#allocation146_spill] sm:$0xff] %v18472_v6  ;;  %4771 = vrot.lane.b32.xlu1 %v26095_v55, %s17211_s15  ;;  %v3091_v12 = vcombine.low %v18442_v52, %v18472_v6  ;;  %26102 = vst [vmem:[#allocation150_spill] sm:$0xff] %v18502_v38  ;;  %v3123_v13 = vcombine.low %v18502_v38, %v18491_v22  ;;  %v26110_v6 = vld [vmem:[#allocation37_spill] sm:$0xff]  ;;  %v18554_v22 = vld [vmem:[#allocation2 + $0x91] sm:$0xff] }
 0x2f2   : > { %v18486_v19 = vrot.slane %v1809_v33, %v17494_v44  ;;  %5516 = vrot.lane.b32.xlu0 %v26098_v29, %s17210_s14  ;;  %v26103_v29 = vld [vmem:[#allocation36_spill] sm:$0xff] }
 0x2f3   : > { %v18495_v28 = vpop.permute.xlu1 %2965  ;;  %26104 = vst [vmem:[#allocation36_spill] sm:$0xff] %v18509_v49  ;;  %v18536_v38 = vld [vmem:[#allocation2 + $0x79] sm:$0xff] }
 0x2f4   : > { %26097 = vst [vmem:[#allocation147_spill] sm:$0xff] %v18486_v19  ;;  %26100 = vst [vmem:[#allocation148_spill] sm:$0xff] %v18495_v28  ;;  %v1857_v55 = vcombine.low %v18483_v40, %v18486_v19  ;;  %v18499_v11 = vpop.permute.xlu0 %2991  ;;  %v18521_v40 = vrot.slane %v3091_v12, %v17494_v44  ;;  %v18541_v12 = vrot.slane %v3123_v13, %v17507_v58 }
 0x2f5   : > { %26101 = vst [vmem:[#allocation149_spill] sm:$0xff] %v18499_v11  ;;  %v3107_v33 = vcombine.low %v18454_v39, %v18499_v11  ;;  %4775 = vrot.lane.b32.xlu1 %v26103_v29, %s17211_s15  ;;  %v2063_v39 = vcombine.high %v17015_v31, %v17016_v63  ;;  %v18588_v11 = vld [vmem:[#allocation2] sm:$0xff] }
 0x2f6   : > { %v18512_v60 = vrot.slane %v1857_v55, %v17507_v58  ;;  %5520 = vrot.lane.b32.xlu0 %v18514_v1, %s17210_s14  ;;  %26106 = vst [vmem:[#allocation152_spill] sm:$0xff] %v18521_v40  ;;  %26111 = vst [vmem:[#allocation37_spill] sm:$0xff] %v18541_v12 }
 0x2f7   : > { %v18524_v19 = vrot.slane %v3107_v33, %v17494_v44  ;;  %v18526_v29 = vpop.permute.xlu1 %2969 }
 0x2f8   : > { %26105 = vst [vmem:[#allocation151_spill] sm:$0xff] %v18512_v60  ;;  %26108 = vst [vmem:[#allocation154_spill] sm:$0xff] %v18526_v29  ;;  %v18530_v55 = vpop.permute.xlu0 %2995 }
 0x2f9   : > { %26107 = vst [vmem:[#allocation153_spill] sm:$0xff] %v18524_v19  ;;  %26109 = vst [vmem:[#allocation155_spill] sm:$0xff] %v18530_v55  ;;  %v3155_v52 = vcombine.low %v18521_v40, %v18524_v19  ;;  %4779 = vrot.lane.b32.xlu1 %v26110_v6, %s17211_s15  ;;  %v26115_v6 = vld [vmem:[#allocation39_spill] sm:$0xff] }
 0x2fa   : > { %5524 = vrot.lane.b32.xlu0 %v18536_v38, %s17210_s14  ;;  %v18566_v19 = vld [vmem:[#allocation2 + $0xa9] sm:$0xff] }
 0x2fb   : > { %v18544_v33 = vrot.slane %v3155_v52, %v17507_v58  ;;  %v18546_v15 = vpop.permute.xlu1 %2973  ;;  %v18562_v52 = vld [vmem:[#allocation2 + $0x9] sm:$0xff] }
 0x2fc   : > { %26113 = vst [vmem:[#allocation157_spill] sm:$0xff] %v18546_v15  ;;  %v18548_v49 = vpop.permute.xlu0 %2999 }
 0x2fd   : > { %26112 = vst [vmem:[#allocation156_spill] sm:$0xff] %v18544_v33  ;;  %26114 = vst [vmem:[#allocation158_spill] sm:$0xff] %v18548_v49  ;;  %4783 = vrot.lane.b32.xlu1 %v26115_v6, %s17211_s15  ;;  %v18580_v33 = vld [vmem:[#allocation2 + $0x30] sm:$0xff] }
 0x2fe   : > { %5528 = vrot.lane.b32.xlu0 %v18554_v22, %s17210_s14  ;;  %v3865_v20 = vcombine.low %v18588_v11, %v18580_v33  ;;  %v3866_v63 = vcombine.high %v18588_v11, %v18580_v33 }
 0x2ff   : > { %v18558_v13 = vpop.permute.xlu1 %2977 }
 0x300   : > { %26116 = vst [vmem:[#allocation39_spill] sm:$0xff] %v18558_v13  ;;  %v18560_v40 = vpop.permute.xlu0 %3003 }
 0x301   : > { %26117 = vst [vmem:[#allocation159_spill] sm:$0xff] %v18560_v40  ;;  %5506 = vrot.lane.b32.xlu1 %v18562_v52, %s17210_s14 }
 0x302   : > { %5532 = vrot.lane.b32.xlu0 %v18566_v19, %s17210_s14 }
 0x303   : > { %v18570_v6 = vpop.permute.xlu1 %2981 }
 0x304   : > { %26118 = vst [vmem:[#allocation160_spill] sm:$0xff] %v18570_v6  ;;  %v18572_v60 = vpop.permute.xlu0 %3007 }
 0x305   : > { %26119 = vst [vmem:[#allocation161_spill] sm:$0xff] %v18572_v60  ;;  %5510 = vrot.lane.b32.xlu1 %v17777_v43, %s17210_s14  ;;  %v17017_v43 = vld [vmem:[#allocation2 + $0x1] sm:$0xff] }
 0x306   : > { %5536 = vrot.lane.b32.xlu0 %v17780_v62, %s17210_s14  ;;  %v2047_v14 = vcombine.high %v17017_v43, %v17018_v51  ;;  %v3347_v62 = vcombine.low %v18526_v29, %v18558_v13  ;;  %v3882_v51 = vcombine.high %v18594_v56, %v18584_v23  ;;  %v3331_v43 = vcombine.low %v18495_v28, %v18546_v15  ;;  %v18625_v28 = vld [vmem:[#allocation2 + $0xa8] sm:$0xff] }
 0x307   : > { %v18578_v12 = vpop.permute.xlu1 %2985  ;;  %v18611_v29 = vrot.slane %v2063_v39, %v17494_v44  ;;  %v18628_v39 = vrot.slane %v3865_v20, %v17494_v44  ;;  %v2095_v20 = vcombine.high %v18536_v38, %v18566_v19  ;;  %v3195_v19 = vcombine.low %v18530_v55, %v18560_v40  ;;  %v18664_v38 = vld [vmem:[#allocation2 + $0x69] sm:$0xff]  ;;  %v18684_v55 = vld [vmem:[#allocation2 + $0x60] sm:$0xff] }
 0x308   : > { %26120 = vst [vmem:[#allocation162_spill] sm:$0xff] %v18578_v12  ;;  %v18582_v53 = vpop.permute.xlu0 %3011  ;;  %v18616_v13 = vrot.slane %v2047_v14, %v17494_v44  ;;  %v18619_v5 = vrot.slane %v3347_v62, %v17494_v44  ;;  %v18638_v62 = vrot.slane %v3866_v63, %v17494_v44  ;;  %v18648_v59 = vrot.slane %v3331_v43, %v17494_v44  ;;  %v18656_v63 = vld [vmem:[#allocation2 + $0x90] sm:$0xff] }
 0x309   : > { %26121 = vst [vmem:[#allocation163_spill] sm:$0xff] %v18582_v53  ;;  %5514 = vrot.lane.b32.xlu1 %v17795_v17, %s17210_s14  ;;  %v3881_v17 = vcombine.low %v18594_v56, %v18584_v23 }
 0x30a   : > { %5540 = vrot.lane.b32.xlu0 %v17798_v36, %s17210_s14  ;;  %26124 = vst [vmem:[#allocation166_spill] sm:$0xff] %v18619_v5 }
 0x30b   : > { %v18598_v31 = vpop.permute.xlu1 %2989  ;;  %v18635_v14 = vrot.slane %v3881_v17, %v17494_v44 }
 0x30c   : > { %26122 = vst [vmem:[#allocation164_spill] sm:$0xff] %v18598_v31  ;;  %v18608_v36 = vpop.permute.xlu0 %3015  ;;  %v3363_v16 = vcombine.low %v18570_v6, %v18598_v31  ;;  %v18641_v6 = vrot.slane %v3882_v51, %v17494_v44  ;;  %v26127_v31 = vld [vmem:[#allocation16_spill] sm:$0xff]  ;;  %v2126_v51 = vcombine.low %v18616_v13, %v18611_v29 }
 0x30d   : > { %26123 = vst [vmem:[#allocation165_spill] sm:$0xff] %v18608_v36  ;;  %5518 = vrot.lane.b32.xlu1 %v17807_v3, %s17210_s14  ;;  %v3211_v3 = vcombine.low %v18548_v49, %v18572_v60  ;;  %v18654_v60 = vld [vmem:[#allocation2 + $0x78] sm:$0xff] }
 0x30e   : > { %5544 = vrot.lane.b32.xlu0 %v17810_v41, %s17210_s14  ;;  %v26126_v41 = vld [vmem:[#allocation15_spill] sm:$0xff]  ;;  %v3913_v43 = vcombine.low %v18654_v60, %v18625_v28  ;;  %v18761_v8 = vrot.slane %v2126_v51, %v17507_v58 }
 0x30f   : > { %v18632_v15 = vpop.permute.xlu1 %2993  ;;  %v2111_v34 = vcombine.high %v26127_v31, %v26126_v41  ;;  %26128 = vst [vmem:[#allocation15_spill] sm:$0xff] %v18648_v59  ;;  %v2127_v31 = vcombine.high %v18616_v13, %v18611_v29  ;;  %v2079_v41 = vcombine.high %v18514_v1, %v18554_v22  ;;  %v18680_v13 = vld [vmem:[#allocation2 + $0x109] sm:$0xff]  ;;  %v18687_v40 = vrot.slane %v3211_v3, %v17494_v44 }
 0x310   : > { %26125 = vst [vmem:[#allocation167_spill] sm:$0xff] %v18632_v15  ;;  %v18650_v49 = vpop.permute.xlu0 %3019  ;;  %v3379_v17 = vcombine.low %v18578_v12, %v18632_v15  ;;  %v3395_v12 = vcombine.low %v18648_v59, %v18619_v5  ;;  %v18675_v15 = vrot.slane %v3363_v16, %v17494_v44  ;;  %v3897_v16 = vcombine.low %v18684_v55, %v18656_v63 }
 0x311   : > { %26129 = vst [vmem:[#allocation16_spill] sm:$0xff] %v18650_v49  ;;  %5522 = vrot.lane.b32.xlu1 %v18664_v38, %s17210_s14  ;;  %26132 = vst [vmem:[#allocation170_spill] sm:$0xff] %v18687_v40  ;;  %v3227_v22 = vcombine.low %v18582_v53, %v18650_v49  ;;  %v2109_v59 = vrot.slane %v2095_v20, %v17494_v44  ;;  %v3930_v3 = vcombine.high %v18628_v39, %v18635_v14  ;;  %v18725_v53 = vld [vmem:[#allocation2 + $0x121] sm:$0xff] }
 0x312   : > { %26130 = vst [vmem:[#allocation168_spill] sm:$0xff] %v18675_v15  ;;  %v18678_v29 = vrot.slane %v3379_v17, %v17494_v44  ;;  %5548 = vrot.lane.b32.xlu0 %v18680_v13, %s17210_s14  ;;  %v3929_v17 = vcombine.low %v18628_v39, %v18635_v14  ;;  %v18707_v49 = vrot.slane %v3195_v19, %v17494_v44 }
 0x313   : > { %v18691_v1 = vpop.permute.xlu1 %2997  ;;  %v3921_v20 = vrot.slane %v3913_v43, %v17494_v44  ;;  %v2093_v39 = vrot.slane %v2079_v41, %v17494_v44  ;;  %v18720_v14 = vrot.slane %v3395_v12, %v17507_v58 }
 0x314   : > { %26131 = vst [vmem:[#allocation169_spill] sm:$0xff] %v18678_v29  ;;  %26133 = vst [vmem:[#allocation171_spill] sm:$0xff] %v18691_v1  ;;  %v3427_v5 = vcombine.low %v18675_v15, %v18678_v29  ;;  %v18700_v18 = vpop.permute.xlu0 %3023  ;;  %v3914_v15 = vcombine.high %v18654_v60, %v18625_v28  ;;  %v3898_v29 = vcombine.high %v18684_v55, %v18656_v63 }
 0x315   : > { %26134 = vst [vmem:[#allocation172_spill] sm:$0xff] %v18700_v18  ;;  %26135 = vst [vmem:[#allocation173_spill] sm:$0xff] %v18707_v49  ;;  %v3243_v24 = vcombine.low %v18608_v36, %v18700_v18  ;;  %5526 = vrot.lane.b32.xlu1 %v18711_v0, %s17210_s14  ;;  %v3259_v43 = vcombine.low %v18707_v49, %v18687_v40  ;;  %v18734_v36 = vrot.slane %v3227_v22, %v17494_v44  ;;  %v26141_v18 = vld [vmem:[#allocation18_spill] sm:$0xff]  ;;  %v18752_v40 = vld [vmem:[#allocation2 + $0x99] sm:$0xff] }
 0x316   : > { %26136 = vst [vmem:[#allocation174_spill] sm:$0xff] %v18720_v14  ;;  %v18723_v19 = vrot.slane %v3427_v5, %v17507_v58  ;;  %5552 = vrot.lane.b32.xlu0 %v18725_v53, %s17210_s14  ;;  %v3905_v5 = vrot.slane %v3897_v16, %v17494_v44  ;;  %v2143_v37 = vcombine.high %v26142_v7, %v26141_v18 }
 0x317   : > { %26138 = vst [vmem:[#allocation176_spill] sm:$0xff] %v18734_v36  ;;  %v18737_v12 = vrot.slane %v3243_v24, %v17494_v44  ;;  %v18739_v41 = vpop.permute.xlu1 %3001  ;;  %v2158_v45 = vcombine.low %v2093_v39, %v2109_v59  ;;  %v3946_v22 = vcombine.high %v18638_v62, %v18641_v6  ;;  %v2159_v49 = vcombine.high %v2093_v39, %v2109_v59  ;;  %v18766_v59 = vld [vmem:[#allocation2 + $0x139] sm:$0xff] }
 0x318   : > { %26137 = vst [vmem:[#allocation175_spill] sm:$0xff] %v18723_v19  ;;  %26140 = vst [vmem:[#allocation178_spill] sm:$0xff] %v18739_v41  ;;  %v18746_v10 = vpop.permute.xlu0 %4721  ;;  %v3961_v16 = vcombine.low %v3905_v5, %v3921_v20  ;;  %v3928_v7 = vrot.slane %v3914_v15, %v17494_v44  ;;  %v18758_v18 = vrot.slane %v2111_v34, %v17507_v58  ;;  %v17025_v19 = vld [vmem:[#allocation2 + $0x21] sm:$0xff] }
 0x319   : > { %26139 = vst [vmem:[#allocation177_spill] sm:$0xff] %v18737_v12  ;;  %26143 = vst [vmem:[#allocation18_spill] sm:$0xff] %v18746_v10  ;;  %v3291_v24 = vcombine.low %v18734_v36, %v18737_v12  ;;  %5530 = vrot.lane.b32.xlu1 %v18752_v40, %s17210_s14  ;;  %v18764_v14 = vrot.slane %v2127_v31, %v17507_v58  ;;  %v3962_v39 = vcombine.high %v3905_v5, %v3921_v20  ;;  %v17026_v36 = vld [vmem:[#allocation2 + $0x51] sm:$0xff]  ;;  %v17027_v20 = vld [vmem:[#allocation2 + $0x39] sm:$0xff] }
 0x31a   : > { %5556 = vrot.lane.b32.xlu0 %v18766_v59, %s17210_s14  ;;  %v2335_v12 = vcombine.high %v17025_v19, %v17026_v36  ;;  %v18771_v15 = vrot.slane %v3259_v43, %v17507_v58  ;;  %v3912_v31 = vrot.slane %v3898_v29, %v17494_v44  ;;  %v18780_v25 = vrot.slane %v2143_v37, %v17507_v58 }
 0x31b   : > { %v18774_v34 = vrot.slane %v3291_v24, %v17507_v58  ;;  %v18776_v51 = vpop.permute.xlu1 %3005  ;;  %v18783_v27 = vrot.slane %v2158_v45, %v17507_v58  ;;  %v2319_v5 = vcombine.high %v18562_v52, %v17027_v20  ;;  %v18789_v19 = vrot.slane %v3929_v17, %v17507_v58  ;;  %v17028_v24 = vld [vmem:[#allocation2 + $0xb1] sm:$0xff] }
 0x31c   : > { %26144 = vst [vmem:[#allocation17_spill] sm:$0xff] %v18771_v15  ;;  %26146 = vst [vmem:[#allocation180_spill] sm:$0xff] %v18776_v51  ;;  %v18786_v36 = vpop.permute.xlu0 %4725  ;;  %v18792_v43 = vrot.slane %v2159_v49, %v17507_v58  ;;  %v18798_v37 = vrot.slane %v3961_v16, %v17507_v58  ;;  %v3977_v45 = vcombine.low %v3912_v31, %v3928_v7  ;;  %v18801_v20 = vld [vmem:[#allocation2 + $0x151] sm:$0xff] }
 0x31d   : > { %26145 = vst [vmem:[#allocation179_spill] sm:$0xff] %v18774_v34  ;;  %26147 = vst [vmem:[#allocation181_spill] sm:$0xff] %v18786_v36  ;;  %5534 = vrot.lane.b32.xlu1 %v17028_v24, %s17210_s14  ;;  %v2199_v52 = vcombine.high %v17029_v61, %v18680_v13  ;;  %v18806_v49 = vrot.slane %v3930_v3, %v17507_v58  ;;  %v18809_v17 = vrot.slane %v3962_v39, %v17507_v58  ;;  %v26151_v34 = vld [vmem:[#allocation20_spill] sm:$0xff] }
 0x31e   : > { %26148 = vst [vmem:[#allocation182_spill] sm:$0xff] %v18789_v19  ;;  %26149 = vst [vmem:[#allocation183_spill] sm:$0xff] %v18798_v37  ;;  %5560 = vrot.lane.b32.xlu0 %v18801_v20, %s17210_s14  ;;  %v3978_v29 = vcombine.high %v3912_v31, %v3928_v7  ;;  %v2349_v15 = vrot.slane %v2335_v12, %v17494_v44  ;;  %v26153_v61 = vcombine.low %v18638_v62, %v18641_v6  ;;  %v17032_v7 = vld [vmem:[#allocation2 + $0xf1] sm:$0xff] }
 0x31f   : > { %v18812_v16 = vpop.permute.xlu1 %3009  ;;  %v18823_v3 = vrot.slane %v3946_v22, %v17507_v58  ;;  %v2333_v39 = vrot.slane %v2319_v5, %v17494_v44  ;;  %v2183_v31 = vcombine.high %v17031_v32, %v17032_v7  ;;  %v18841_v32 = vrot.slane %v3977_v45, %v17507_v58  ;;  %v26158_v22 = vld [vmem:[#allocation40_spill] sm:$0xff]  ;;  %v26159_v5 = vld [vmem:[#allocation42_spill] sm:$0xff]  ;;  %v26163_v45 = vld [vmem:[#allocation21_spill] sm:$0xff] }
 0x320   : > { %26150 = vst [vmem:[#allocation184_spill] sm:$0xff] %v18812_v16  ;;  %v18820_v13 = vrot.slane %v26153_v61, %v17507_v58  ;;  %v18826_v12 = vpop.permute.xlu0 %4729  ;;  %v4018_v61 = vcombine.high %v26159_v5, %v26158_v22  ;;  %v2213_v7 = vrot.slane %v2199_v52, %v17494_v44  ;;  %v26160_v6 = vld [vmem:[#allocation44_spill] sm:$0xff]  ;;  %v18855_v62 = vrot.slane %v3978_v29, %v17507_v58 }
 0x321   : > { %26155 = vst [vmem:[#allocation186_spill] sm:$0xff] %v18823_v3  ;;  %26156 = vst [vmem:[#allocation187_spill] sm:$0xff] %v18826_v12  ;;  %5538 = vrot.lane.b32.xlu1 %v18832_v50, %s17210_s14  ;;  %v4002_v2 = vcombine.high %v26161_v21, %v26160_v6  ;;  %v2383_v48 = vcombine.high %v26164_v47, %v26163_v45  ;;  %v2398_v22 = vcombine.low %v2333_v39, %v2349_v15  ;;  %v26167_v47 = vld [vmem:[#allocation25_spill] sm:$0xff]  ;;  %v26168_v6 = vld [vmem:[#allocation26_spill] sm:$0xff] }
 0x322   : > { %26154 = vst [vmem:[#allocation185_spill] sm:$0xff] %v18820_v13  ;;  %26157 = vst [vmem:[#allocation188_spill] sm:$0xff] %v18841_v32  ;;  %5564 = vrot.lane.b32.xlu0 %v18846_v9, %s17210_s14  ;;  %v2367_v52 = vcombine.high %v18711_v0, %v17028_v24  ;;  %v2197_v4 = vrot.slane %v2183_v31, %v17494_v44  ;;  %v2399_v35 = vcombine.high %v2333_v39, %v2349_v15  ;;  %v18875_v24 = vld [vmem:[#allocation2 + $0xe1] sm:$0xff]  ;;  %v18950_v13 = vld [vmem:[#allocation2 + $0x111] sm:$0xff] }
 0x323   : > { %26162 = vst [vmem:[#allocation40_spill] sm:$0xff] %v18855_v62  ;;  %v18860_v5 = vpop.permute.xlu1 %3013  ;;  %v2247_v45 = vcombine.high %v26168_v6, %v26167_v47  ;;  %v2351_v0 = vcombine.high %v18664_v38, %v18752_v40  ;;  %v4032_v39 = vrot.slane %v4018_v61, %v17494_v44  ;;  %v4016_v29 = vrot.slane %v4002_v2, %v17494_v44  ;;  %v26174_v47 = vld [vmem:[#allocation52_spill] sm:$0xff]  ;;  %v26176_v40 = vld [vmem:[#allocation47_spill] sm:$0xff] }
 0x324   : > { %26165 = vst [vmem:[#allocation42_spill] sm:$0xff] %v18860_v5  ;;  %v18865_v54 = vpop.permute.xlu0 %4733  ;;  %v2262_v31 = vcombine.low %v2197_v4, %v2213_v7  ;;  %v18890_v38 = vrot.slane %v2383_v48, %v17507_v58  ;;  %v18893_v6 = vrot.slane %v2398_v22, %v17507_v58  ;;  %v2263_v21 = vcombine.high %v2197_v4, %v2213_v7  ;;  %v18928_v48 = vld [vmem:[#allocation2 + $0x50] sm:$0xff] }
 0x325   : > { %26166 = vst [vmem:[#allocation44_spill] sm:$0xff] %v18865_v54  ;;  %5542 = vrot.lane.b32.xlu1 %v18875_v24, %s17210_s14  ;;  %v2381_v61 = vrot.slane %v2367_v52, %v17494_v44  ;;  %v4066_v30 = vcombine.high %v26175_v46, %v26174_v47  ;;  %v4138_v22 = vcombine.high %v26177_v42, %v26176_v40  ;;  %v18913_v52 = vld [vmem:[#allocation2 + $0xf9] sm:$0xff]  ;;  %v26178_v42 = vld [vmem:[#allocation55_spill] sm:$0xff]  ;;  %26180 = vst [vmem:[#allocation52_spill] sm:$0xff] %v18928_v48 }
 0x326   : > { %6517 = vrot.lane.b32.xlu0 %v18588_v11, %s17211_s15  ;;  %26169 = vst [vmem:[#allocation43_spill] sm:$0xff] %v18890_v38  ;;  %26170 = vst [vmem:[#allocation21_spill] sm:$0xff] %v18893_v6  ;;  %v18899_v11 = vrot.slane %v2399_v35, %v17507_v58  ;;  %v18910_v4 = vrot.slane %v2247_v45, %v17507_v58  ;;  %v2365_v7 = vrot.slane %v2351_v0, %v17494_v44  ;;  %v26179_v45 = vld [vmem:[#allocation59_spill] sm:$0xff]  ;;  %v18926_v0 = vld [vmem:[#allocation2 + $0x20] sm:$0xff] }
 0x327   : > { %v18896_v15 = vpop.permute.xlu1 %3017  ;;  %v4081_v35 = vcombine.low %v4016_v29, %v4032_v39  ;;  %v4082_v26 = vcombine.high %v4016_v29, %v4032_v39  ;;  %v18918_v46 = vrot.slane %v2262_v31, %v17507_v58  ;;  %v3483_v47 = vcombine.low %v18739_v41, %v18812_v16  ;;  %v26181_v31 = vld [vmem:[#allocation24_spill] sm:$0xff]  ;;  %v26182_v41 = vld [vmem:[#allocation23_spill] sm:$0xff] }
 0x328   : > { %26171 = vst [vmem:[#allocation22_spill] sm:$0xff] %v18896_v15  ;;  %26172 = vst [vmem:[#allocation25_spill] sm:$0xff] %v18899_v11  ;;  %v18901_v2 = vpop.permute.xlu0 %4737  ;;  %v4202_v40 = vcombine.high %v26179_v45, %v26178_v42  ;;  %v4154_v62 = vcombine.high %v18926_v0, %v18928_v48  ;;  %v18933_v29 = vrot.slane %v2263_v21, %v17507_v58 }
 0x329   : > { %26173 = vst [vmem:[#allocation26_spill] sm:$0xff] %v18901_v2  ;;  %5546 = vrot.lane.b32.xlu1 %v18913_v52, %s17210_s14  ;;  %v2215_v39 = vcombine.high %v18725_v53, %v18801_v20  ;;  %v2415_v16 = vcombine.high %v26182_v41, %v26181_v31  ;;  %v2431_v42 = vcombine.high %v2365_v7, %v2381_v61  ;;  %v17040_v53 = vld [vmem:[#allocation2 + $0x150] sm:$0xff]  ;;  %v18954_v41 = vld [vmem:[#allocation2 + $0x120] sm:$0xff]  ;;  %v16921_v31 = vld [vmem:[#allocation2 + $0x13c] ss:$48 sps:$4 sm:$0xff]  }
 0x32a   : > { %6521 = vrot.lane.b32.xlu0 %v18594_v56, %s17211_s15  ;;  %v2430_v56 = vcombine.low %v2365_v7, %v2381_v61  ;;  %v2231_v45 = vcombine.high %v18766_v59, %v18846_v9  ;;  %v3467_v32 = vcombine.low %v18691_v1, %v18776_v51  ;;  %v18948_v21 = vrot.slane %v4066_v30, %v17507_v58  ;;  %v19007_v1 = vld [vmem:[#allocation2 + $0x129] sm:$0xff]  ;;  %v26196_v51 = vld [vmem:[#allocation60_spill] sm:$0xff] }
 0x32b   : > { %v18939_v3 = vpop.permute.xlu1 %3021  ;;  %26185 = vst [vmem:[#allocation48_spill] sm:$0xff] %v18954_v41  ;;  %v4034_v20 = vcombine.high %v18954_v41, %v17040_v53  ;;  %v18958_v9 = vrot.slane %v4081_v35, %v17507_v58  ;;  %v18961_v59 = vrot.slane %v4082_v26, %v17507_v58  ;;  %v18964_v61 = vrot.slane %v4138_v22, %v17494_v44 }
 0x32c   : > { %26183 = vst [vmem:[#allocation54_spill] sm:$0xff] %v18939_v3  ;;  %v18945_v48 = vpop.permute.xlu0 %4741  ;;  %v18967_v30 = vrot.slane %v3483_v47, %v17494_v44  ;;  %v3499_v7 = vcombine.low %v18860_v5, %v18939_v3  ;;  %v18974_v53 = vrot.slane %v4202_v40, %v17507_v58  ;;  %v18977_v35 = vrot.slane %v4154_v62, %v17494_v44 }
 0x32d   : > { %26184 = vst [vmem:[#allocation47_spill] sm:$0xff] %v18945_v48  ;;  %5550 = vrot.lane.b32.xlu1 %v18950_v13, %s17210_s14  ;;  %v18980_v26 = vrot.slane %v2215_v39, %v17494_v44  ;;  %v18983_v22 = vrot.slane %v2415_v16, %v17507_v58  ;;  %v18986_v47 = vrot.slane %v2430_v56, %v17507_v58  ;;  %26194 = vst [vmem:[#allocation193_spill] sm:$0xff] %v19007_v1 }
 0x32e   : > { %26186 = vst [vmem:[#allocation55_spill] sm:$0xff] %v18967_v30  ;;  %6525 = vrot.lane.b32.xlu0 %v18580_v33, %s17211_s15  ;;  %26187 = vst [vmem:[#allocation59_spill] sm:$0xff] %v18974_v53  ;;  %v4833_v5 = vcombine.low %v18786_v36, %v18865_v54  ;;  %v18993_v40 = vrot.slane %v2431_v42, %v17507_v58  ;;  %v18996_v62 = vrot.slane %v2231_v45, %v17494_v44  ;;  %v26195_v45 = vld [vmem:[#allocation56_spill] sm:$0xff]  ;;  %v19018_v54 = vld [vmem:[#allocation2 + $0x68] sm:$0xff] }
 0x32f   : > { %26188 = vst [vmem:[#allocation24_spill] sm:$0xff] %v18983_v22  ;;  %26189 = vst [vmem:[#allocation23_spill] sm:$0xff] %v18986_v47  ;;  %v18990_v33 = vpop.permute.xlu1 %3025  ;;  %v18999_v39 = vrot.slane %v3467_v32, %v17494_v44  ;;  %v4817_v56 = vcombine.low %v18746_v10, %v18826_v12  ;;  %v19012_v42 = vrot.slane %v4034_v20, %v17494_v44  ;;  %v19016_v36 = vld [vmem:[#allocation2 + $0x98] sm:$0xff]  ;;  %v16993_v32 = vld [vmem:[#allocation2 + $0x81] ss:$48 sps:$4 sm:$0xff]  }
 0x330   : > { %26190 = vst [vmem:[#allocation189_spill] sm:$0xff] %v18990_v33  ;;  %26191 = vst [vmem:[#allocation190_spill] sm:$0xff] %v18993_v40  ;;  %v19001_v3 = vpop.permute.xlu0 %4745  ;;  %v3515_v16 = vcombine.low %v18896_v15, %v18990_v33  ;;  %v19025_v10 = vrot.slane %v3499_v7, %v17494_v44  ;;  %v19033_v20 = vrot.slane %v16921_v31, %v17494_v44  ;;  %v16989_v47 = vld [vmem:[#allocation2 + $0x21] ss:$48 sps:$4 sm:$0xff]  }
 0x331   : > { %26192 = vst [vmem:[#allocation191_spill] sm:$0xff] %v18999_v39  ;;  %26193 = vst [vmem:[#allocation192_spill] sm:$0xff] %v19001_v3  ;;  %5554 = vrot.lane.b32.xlu1 %v19007_v1, %s17210_s14  ;;  %v3531_v33 = vcombine.low %v18999_v39, %v18967_v30  ;;  %v19036_v41 = vrot.slane %v4833_v5, %v17494_v44  ;;  %v4849_v15 = vcombine.low %v18901_v2, %v19001_v3  ;;  %v26201_v30 = vld [vmem:[#allocation30_spill] sm:$0xff]  ;;  %v10061_v3 = vld [vmem:[#allocation2 + $0x171] sm:$0xff] }
 0x332   : > { %26197 = vst [vmem:[#allocation56_spill] sm:$0xff] %v19025_v10  ;;  %v19028_v12 = vrot.slane %v3515_v16, %v17494_v44  ;;  %6529 = vrot.lane.b32.xlu0 %v18584_v23, %s17211_s15  ;;  %v26202_v23 = vld [vmem:[#allocation29_spill] sm:$0xff]  ;;  %v2294_v31 = vcombine.low %v18980_v26, %v18996_v62  ;;  %v2295_v7 = vcombine.high %v18980_v26, %v18996_v62  ;;  %v16991_v2 = vld [vmem:[#allocation2 + $0x69] ss:$48 sps:$4 sm:$0xff]  }
 0x333   : > { %26199 = vst [vmem:[#allocation194_spill] sm:$0xff] %v19036_v41  ;;  %v19040_v39 = vpop.permute.xlu1 %4723  ;;  %v2279_v53 = vcombine.high %v26202_v23, %v26201_v30  ;;  %v19059_v16 = vrot.slane %v4817_v56, %v17494_v44  ;;  %v19063_v23 = vld [vmem:[#allocation2 + $0x141] sm:$0xff]  ;;  %v19070_v11 = vrot.slane %v3531_v33, %v17507_v58  ;;  %v4113_v62 = vcombine.low %v19012_v42, %v19033_v20 }
 0x334   : > { %26198 = vst [vmem:[#allocation60_spill] sm:$0xff] %v19028_v12  ;;  %26200 = vst [vmem:[#allocation195_spill] sm:$0xff] %v19040_v39  ;;  %v3563_v5 = vcombine.low %v19025_v10, %v19028_v12  ;;  %v19052_v1 = vpop.permute.xlu0 %4749  ;;  %v26205_v10 = vld [vmem:[#allocation49_spill] sm:$0xff]  ;;  %v19096_v38 = vrot.slane %v2294_v31, %v17507_v58  ;;  %v16999_v31 = vld [vmem:[#allocation2 + $0x129] ss:$48 sps:$4 sm:$0xff]  }
 0x335   : > { %26203 = vst [vmem:[#allocation30_spill] sm:$0xff] %v19052_v1  ;;  %26204 = vst [vmem:[#allocation29_spill] sm:$0xff] %v19059_v16  ;;  %v4865_v30 = vcombine.low %v18945_v48, %v19052_v1  ;;  %5558 = vrot.lane.b32.xlu1 %v19063_v23, %s17210_s14  ;;  %v26206_v12 = vld [vmem:[#allocation53_spill] sm:$0xff]  ;;  %v16987_v48 = vld [vmem:[#allocation2 + $0x9] ss:$48 sps:$4 sm:$0xff]   ;;  %v19080_v1 = vrot.slane %v16993_v32, %v17494_v44  ;;  %v19093_v40 = vrot.slane %v2279_v53, %v17507_v58 }
 0x336   : > { %v4098_v6 = vcombine.high %v26206_v12, %v26205_v10  ;;  %26207 = vst [vmem:[#allocation49_spill] sm:$0xff] %v19070_v11  ;;  %v19073_v26 = vrot.slane %v3563_v5, %v17507_v58  ;;  %6533 = vrot.lane.b32.xlu0 %v18684_v55, %s17211_s15  ;;  %v10991_v56 = vld [vmem:[#allocation2 + $0x141] sm:$0xff]  ;;  %v4881_v10 = vcombine.low %v19059_v16, %v19036_v41  ;;  %v19106_v41 = vld [vmem:[#allocation2 + $0x159] sm:$0xff]  ;;  %v26217_v11 = vld [vmem:[#allocation31_spill] sm:$0xff] }
 0x337   : > { %26209 = vst [vmem:[#allocation196_spill] sm:$0xff] %v19080_v1  ;;  %v19085_v12 = vrot.slane %v4849_v15, %v17494_v44  ;;  %v19088_v33 = vrot.slane %v4865_v30, %v17494_v44  ;;  %v19090_v5 = vpop.permute.xlu1 %4727  ;;  %v11452_v55 = vcombine.low %v10991_v56, %v10061_v3  ;;  %v2455_v32 = vcombine.high %v18832_v50, %v18913_v52  ;;  %v16997_v52 = vld [vmem:[#allocation2 + $0xe1] ss:$48 sps:$4 sm:$0xff]   ;;  %v26216_v16 = vld [vmem:[#allocation32_spill] sm:$0xff] }
 0x338   : > { %26208 = vst [vmem:[#allocation53_spill] sm:$0xff] %v19073_v26  ;;  %26212 = vst [vmem:[#allocation199_spill] sm:$0xff] %v19090_v5  ;;  %v19102_v15 = vpop.permute.xlu0 %4753  ;;  %v4114_v3 = vcombine.high %v19012_v42, %v19033_v20  ;;  %v19113_v53 = vrot.slane %v16989_v47, %v17494_v44  ;;  %v19116_v50 = vrot.slane %v16991_v2, %v17494_v44 }
 0x339   : > { %26210 = vst [vmem:[#allocation197_spill] sm:$0xff] %v19085_v12  ;;  %26211 = vst [vmem:[#allocation198_spill] sm:$0xff] %v19088_v33  ;;  %v4913_v30 = vcombine.low %v19085_v12, %v19088_v33  ;;  %5562 = vrot.lane.b32.xlu1 %v19106_v41, %s17210_s14  ;;  %v19119_v56 = vrot.slane %v2295_v7, %v17507_v58  ;;  %v2311_v26 = vcombine.high %v26217_v11, %v26216_v16  ;;  %v16995_v7 = vld [vmem:[#allocation2 + $0xc9] ss:$48 sps:$4 sm:$0xff]  }
 0x33a   : > { %26213 = vst [vmem:[#allocation200_spill] sm:$0xff] %v19102_v15  ;;  %26214 = vst [vmem:[#allocation201_spill] sm:$0xff] %v19113_v53  ;;  %6537 = vrot.lane.b32.xlu0 %v18654_v60, %s17211_s15  ;;  %v19126_v12 = vrot.slane %v4098_v6, %v17507_v58  ;;  %v19129_v47 = vrot.slane %v16987_v48, %v17494_v44  ;;  %v19132_v2 = vrot.slane %v4881_v10, %v17507_v58 }
 0x33b   : > { %26215 = vst [vmem:[#allocation202_spill] sm:$0xff] %v19116_v50  ;;  %v19135_v42 = vrot.slane %v4913_v30, %v17507_v58  ;;  %v19137_v20 = vpop.permute.xlu1 %4731  ;;  %v11364_v60 = vcombine.low %v19116_v50, %v19080_v1  ;;  %v19142_v16 = vrot.slane %v11452_v55, %v17494_v44  ;;  %v19145_v6 = vrot.slane %v2455_v32, %v17494_v44  ;;  %v19157_v1 = vld [vmem:[#allocation2 + $0x171] sm:$0xff] }
 0x33c   : > { %26218 = vst [vmem:[#allocation203_spill] sm:$0xff] %v19129_v47  ;;  %26219 = vst [vmem:[#allocation204_spill] sm:$0xff] %v19132_v2  ;;  %v2471_v48 = vcombine.high %v18875_v24, %v18950_v13  ;;  %v19149_v10 = vpop.permute.xlu0 %4757  ;;  %v2313_v30 = vcombine.high %v18910_v4, %v19093_v40  ;;  %v2315_v11 = vcombine.high %v18918_v46, %v19096_v38  ;;  %v26226_v50 = vld [vmem:[#allocation63_spill] sm:$0xff]  ;;  %v26227_v2 = vld [vmem:[#allocation64_spill] sm:$0xff] }
 0x33d   : > { %26220 = vst [vmem:[#allocation205_spill] sm:$0xff] %v19135_v42  ;;  %26221 = vst [vmem:[#allocation206_spill] sm:$0xff] %v19137_v20  ;;  %5566 = vrot.lane.b32.xlu1 %v19157_v1, %s17210_s14  ;;  %v11332_v55 = vcombine.low %v19129_v47, %v19113_v53  ;;  %v19164_v13 = vrot.slane %v16997_v52, %v17494_v44  ;;  %v19167_v24 = vrot.slane %v16999_v31, %v17494_v44 }
 0x33e   : > { %26222 = vst [vmem:[#allocation207_spill] sm:$0xff] %v19142_v16  ;;  %26223 = vst [vmem:[#allocation208_spill] sm:$0xff] %v19149_v10  ;;  %6541 = vrot.lane.b32.xlu0 %v18656_v63, %s17211_s15  ;;  %v2317_v32 = vcombine.high %v18933_v29, %v19119_v56  ;;  %v4130_v42 = vcombine.high %v26227_v2, %v26226_v50  ;;  %v19176_v33 = vrot.slane %v4113_v62, %v17507_v58 }
 0x33f   : > { %26224 = vst [vmem:[#allocation209_spill] sm:$0xff] %v19164_v13  ;;  %26225 = vst [vmem:[#allocation210_spill] sm:$0xff] %v19167_v24  ;;  %v19179_v47 = vrot.slane %v4114_v3, %v17507_v58  ;;  %v19181_v52 = vpop.permute.xlu1 %4735  ;;  %v26229_v31 = vcombine.high %v26152_v57, %v26151_v34  ;;  %v19189_v63 = vrot.slane %v11364_v60, %v17507_v58 }
 0x340   : > { %26228 = vst [vmem:[#allocation211_spill] sm:$0xff] %v19181_v52  ;;  %v19192_v22 = vrot.slane %v16995_v7, %v17494_v44  ;;  %v11500_v62 = vcombine.low %v19167_v24, %v19142_v16  ;;  %v2485_v50 = vrot.slane %v2471_v48, %v17494_v44  ;;  %v19197_v3 = vpop.permute.xlu0 %4761  ;;  %v26233_v2 = vcombine.high %v18758_v18, %v18780_v25  ;;  %v17048_v7 = vld [vmem:[#allocation2 + $0x8] sm:$0xff]  ;;  %v19214_v24 = vld [vmem:[#allocation2 + $0xb0] sm:$0xff]  ;;  %v19216_v16 = vld [vmem:[#allocation2 + $0x80] sm:$0xff] }
 0x341   : > { %v19186_v53 = vpack.i.bf16 %v2311_v26, %v26229_v31  ;;  %26230 = vst [vmem:[#allocation212_spill] sm:$0xff] %v19189_v63  ;;  %26232 = vst [vmem:[#allocation214_spill] sm:$0xff] %v19197_v3  ;;  %v4132_v26 = vcombine.high %v18948_v21, %v19126_v12  ;;  %v2312_v60 = vcombine.low %v18910_v4, %v19093_v40  ;;  %6519 = vrot.lane.b32.xlu1 %v17048_v7, %s17211_s15  ;;  %v19342_v63 = vld [vmem:[#allocation2 + $0xc8] sm:$0xff] }
 0x342   : > { %26231 = vst [vmem:[#allocation213_spill] sm:$0xff] %v19192_v22  ;;  %v19202_v15 = vpack.i.bf16 %v2313_v30, %v26233_v2  ;;  %v26234_v31 = vcombine.high %v18761_v8, %v18783_v27  ;;  %26236 = vst [vmem:[#allocation216_spill] sm:$0xff] %v19214_v24  ;;  %v4186_v2 = vcombine.high %v19216_v16, %v19214_v24  ;;  %6545 = vrot.lane.b32.xlu0 %v18625_v28, %s17211_s15 }
 0x343   : > { %v19221_v30 = vrot.slane %v11332_v55, %v17507_v58  ;;  %v11468_v4 = vcombine.low %v19192_v22, %v19164_v13  ;;  %v4136_v40 = vcombine.high %v18961_v59, %v19179_v47  ;;  %v2314_v7 = vcombine.low %v18918_v46, %v19096_v38  ;;  %v19235_v55 = vpop.permute.xlu1 %4739  ;;  %v26242_v46 = vld [vmem:[#allocation38_spill] sm:$0xff] }
 0x344   : > { %v19212_v48 = vpack.i.bf16 %v2315_v11, %v26234_v31  ;;  %v4134_v11 = vcombine.high %v18958_v9, %v19176_v33  ;;  %v2316_v31 = vcombine.low %v18933_v29, %v19119_v56  ;;  %26238 = vst [vmem:[#allocation218_spill] sm:$0xff] %v19235_v55  ;;  %v26239_v22 = vcombine.high %v18764_v14, %v18792_v43  ;;  %v26243_v29 = vld [vmem:[#allocation41_spill] sm:$0xff]  ;;  %v19255_v24 = vpop.permute.xlu0 %4765 }
 0x345   : > { %26237 = vst [vmem:[#allocation217_spill] sm:$0xff] %v19221_v30  ;;  %v26240_v28 = vcombine.high %v18789_v19, %v18798_v37  ;;  %v19248_v57 = vrot.slane %v11500_v62, %v17507_v58  ;;  %v2519_v56 = vcombine.high %v26243_v29, %v26242_v46  ;;  %26244 = vst [vmem:[#allocation38_spill] sm:$0xff] %v19255_v24  ;;  %6523 = vrot.lane.b32.xlu1 %v18926_v0, %s17211_s15  ;;  %v19340_v30 = vld [vmem:[#allocation2 + $0xf8] sm:$0xff] }
 0x346   : > { %26235 = vst [vmem:[#allocation215_spill] sm:$0xff] %v19212_v48  ;;  %v19240_v13 = vpack.i.bf16 %v2317_v32, %v26239_v22  ;;  %v2534_v48 = vcombine.low %v19145_v6, %v2485_v50  ;;  %v26245_v22 = vcombine.high %v18806_v49, %v18809_v17  ;;  %v4131_v46 = vcombine.low %v18948_v21, %v19126_v12 }
 0x347   : > { %v19245_v34 = vpack.i.bf16 %v4130_v42, %v26240_v28  ;;  %26241 = vst [vmem:[#allocation219_spill] sm:$0xff] %v19248_v57  ;;  %v26246_v42 = vcombine.low %v18758_v18, %v18780_v25  ;;  %v2535_v28 = vcombine.high %v19145_v6, %v2485_v50  ;;  %v19273_v29 = vrot.slane %v4186_v2, %v17494_v44  ;;  %v26248_v25 = vld [vmem:[#allocation185_spill] sm:$0xff]  ;;  %v26249_v18 = vld [vmem:[#allocation188_spill] sm:$0xff]  ;;  %v26251_v50 = vld [vmem:[#allocation186_spill] sm:$0xff] }
 0x348   : > { %v19260_v32 = vpack.i.bf16 %v4132_v26, %v26245_v22  ;;  %v19276_v38 = vrot.slane %v11468_v4, %v17507_v58  ;;  %v17051_v26 = vld [vmem:[#allocation2 + $0xc0] sm:$0xff]  ;;  %v26252_v6 = vld [vmem:[#allocation40_spill] sm:$0xff]  ;;  %v26255_v21 = vcombine.low %v18761_v8, %v18783_v27  ;;  %v26257_v2 = vcombine.low %v18764_v14, %v18792_v43  ;;  %v19313_v27 = vld [vmem:[#allocation2 + $0x110] sm:$0xff] }
 0x349   : > { %v19265_v62 = vpack.i.bf16 %v2312_v60, %v26246_v42  ;;  %6549 = vrot.lane.b32.xlu0 %v17051_v26, %s17211_s15  ;;  %v26250_v60 = vcombine.high %v26248_v25, %v26249_v18  ;;  %v26253_v0 = vcombine.high %v26251_v50, %v26252_v6  ;;  %v19299_v26 = vpop.permute.xlu1 %4743  ;;  %v26267_v57 = vcombine.low %v18806_v49, %v18809_v17 }
 0x34a   : > { %26247 = vst [vmem:[#allocation41_spill] sm:$0xff] %v19276_v38  ;;  %v19292_v12 = vpack.i.bf16 %v2314_v7, %v26255_v21  ;;  %v19297_v4 = vpack.i.bf16 %v2316_v31, %v26257_v2  ;;  %26259 = vst [vmem:[#allocation40_spill] sm:$0xff] %v19299_v26  ;;  %v19315_v7 = vld [vmem:[#allocation2 + $0xe0] sm:$0xff]  ;;  %v19327_v31 = vpop.permute.xlu0 %4769  ;;  %v4217_v21 = vcombine.low %v18964_v61, %v18977_v35 }
 0x34b   : > { %v19282_v22 = vpack.i.bf16 %v4134_v11, %v26250_v60  ;;  %v19287_v42 = vpack.i.bf16 %v4136_v40, %v26253_v0  ;;  %v26260_v11 = vcombine.high %v26196_v51, %v26195_v45  ;;  %v26261_v40 = vcombine.high %v19018_v54, %v19016_v36  ;;  %26262 = vst [vmem:[#allocation220_spill] sm:$0xff] %v19327_v31 }
 0x34c   : > { %26256 = vst [vmem:[#allocation188_spill] sm:$0xff] %v19292_v12  ;;  %26258 = vst [vmem:[#allocation186_spill] sm:$0xff] %v19297_v4  ;;  %v4290_v14 = vcombine.high %v19315_v7, %v19313_v27  ;;  %v19322_v51 = vrot.slane %v2519_v56, %v17507_v58  ;;  %v19325_v45 = vrot.slane %v2534_v48, %v17507_v58  ;;  %v26264_v56 = vld [vmem:[#allocation61_spill] sm:$0xff] }
 0x34d   : > { %26254 = vst [vmem:[#allocation185_spill] sm:$0xff] %v19287_v42  ;;  %v19305_v60 = vrot.slane %v26260_v11, %v17507_v58  ;;  %v19311_v8 = vrot.slane %v26261_v40, %v17494_v44  ;;  %v4133_v0 = vcombine.low %v18958_v9, %v19176_v33  ;;  %v2503_v2 = vcombine.high %v19063_v23, %v19157_v1  ;;  %v17054_v11 = vld [vmem:[#allocation2 + $0x38] sm:$0xff]  ;;  %v26263_v40 = vld [vmem:[#allocation57_spill] sm:$0xff]  ;;  %v19356_v38 = vpop.permute.xlu1 %4747  ;;  %v26316_v42 = vld [vmem:[#allocation215_spill] sm:$0xff] }
 0x34e   : > { %6527 = vrot.lane.b32.xlu1 %v17054_v11, %s17211_s15  ;;  %v4338_v43 = vcombine.high %v26264_v56, %v26263_v40  ;;  %v4274_v9 = vcombine.high %v19342_v63, %v19340_v30  ;;  %v19347_v33 = vrot.slane %v2535_v28, %v17507_v58  ;;  %v26265_v1 = vld [vmem:[#allocation193_spill] sm:$0xff]  ;;  %v5105_v11 = vcombine.low %v19090_v5, %v19181_v52  ;;  %v17057_v40 = vld [vmem:[#allocation2 + $0xd8] sm:$0xff]  ;;  %v26269_v28 = vld [vmem:[#allocation59_spill] sm:$0xff] }
 0x34f   : > { %v4249_v48 = vcombine.low %v19311_v8, %v19273_v29  ;;  %v2487_v23 = vcombine.high %v26265_v1, %v19106_v41  ;;  %6553 = vrot.lane.b32.xlu0 %v17057_v40, %s17211_s15  ;;  %v4135_v56 = vcombine.low %v18961_v59, %v19179_v47  ;;  %26266 = vst [vmem:[#allocation57_spill] sm:$0xff] %v19356_v38  ;;  %v17058_v1 = vld [vmem:[#allocation2 + $0x158] sm:$0xff]  ;;  %v19368_v5 = vld [vmem:[#allocation2 + $0x128] sm:$0xff]  ;;  %v19373_v47 = vpop.permute.xlu0 %4773  ;;  %v26315_v4 = vld [vmem:[#allocation21_spill] sm:$0xff] }
 0x350   : > { %v19361_v19 = vpack.i.bf16 %v4131_v46, %v26267_v57  ;;  %v19366_v41 = vrot.slane %v4290_v14, %v17494_v44  ;;  %26270 = vst [vmem:[#allocation193_spill] sm:$0xff] %v19368_v5  ;;  %v4306_v40 = vcombine.high %v19368_v5, %v17058_v1  ;;  %v5089_v59 = vcombine.low %v19040_v39, %v19137_v20  ;;  %v16938_v46 = vld [vmem:[#allocation2 + $0x144] ss:$48 sps:$4 sm:$0xff]   ;;  %v26274_v1 = vld [vmem:[#allocation52_spill] sm:$0xff] }
 0x351   : > { %26271 = vst [vmem:[#allocation59_spill] sm:$0xff] %v19373_v47  ;;  %v26272_v57 = vcombine.low %v26248_v25, %v26249_v18  ;;  %v19381_v17 = vrot.slane %v4217_v21, %v17507_v58  ;;  %v3999_v14 = vcombine.low %v26251_v50, %v26252_v6  ;;  %v2517_v37 = vrot.slane %v2503_v2, %v17494_v44  ;;  %v17060_v6 = vld [vmem:[#allocation2 + $0xf0] sm:$0xff]  ;;  %v19406_v2 = vpop.permute.xlu1 %4751  ;;  %v26282_v52 = vld [vmem:[#allocation200_spill] sm:$0xff] }
 0x352   : > { %26268 = vst [vmem:[#allocation61_spill] sm:$0xff] %v19361_v19  ;;  %6531 = vrot.lane.b32.xlu1 %v26274_v1, %s17211_s15  ;;  %v19389_v39 = vrot.slane %v4338_v43, %v17507_v58  ;;  %v19392_v20 = vrot.slane %v4249_v48, %v17507_v58  ;;  %v4288_v25 = vrot.slane %v4274_v9, %v17494_v44  ;;  %26277 = vst [vmem:[#allocation223_spill] sm:$0xff] %v19406_v2  ;;  %v26314_v19 = vld [vmem:[#allocation23_spill] sm:$0xff] }
 0x353   : > { %v19378_v49 = vpack.i.bf16 %v4133_v0, %v26272_v57  ;;  %v2501_v18 = vrot.slane %v2487_v23, %v17494_v44  ;;  %v19397_v0 = vrot.slane %v5105_v11, %v17494_v44  ;;  %v5121_v50 = vcombine.low %v19235_v55, %v19356_v38  ;;  %6557 = vrot.lane.b32.xlu0 %v17060_v6, %s17211_s15  ;;  %v19415_v57 = vpop.permute.xlu0 %4777  ;;  %v26280_v6 = vld [vmem:[#allocation46_spill] sm:$0xff] }
 0x354   : > { %v19402_v21 = vpack.i.bf16 %v4135_v56, %v3999_v14  ;;  %v4969_v43 = vcombine.low %v19149_v10, %v19255_v24  ;;  %v4320_v48 = vrot.slane %v4306_v40, %v17494_v44  ;;  %v4353_v9 = vcombine.low %v4288_v25, %v19366_v41  ;;  %26279 = vst [vmem:[#allocation225_spill] sm:$0xff] %v19415_v57  ;;  %v26281_v40 = vld [vmem:[#allocation45_spill] sm:$0xff]  ;;  %v26311_v24 = vld [vmem:[#allocation75_spill] sm:$0xff] }
 0x355   : > { %26273 = vst [vmem:[#allocation221_spill] sm:$0xff] %v19378_v49  ;;  %26275 = vst [vmem:[#allocation52_spill] sm:$0xff] %v19397_v0  ;;  %v4218_v23 = vcombine.high %v18964_v61, %v18977_v35  ;;  %v19413_v11 = vrot.slane %v5089_v59, %v17494_v44  ;;  %v5137_v56 = vcombine.low %v19299_v26, %v19406_v2  ;;  %v26313_v49 = vld [vmem:[#allocation216_spill] sm:$0xff] }
 0x356   : > { %26276 = vst [vmem:[#allocation222_spill] sm:$0xff] %v19402_v21  ;;  %v4336_v14 = vrot.slane %v16938_v46, %v17494_v44  ;;  %v4250_v1 = vcombine.high %v19311_v8, %v19273_v29  ;;  %v2551_v55 = vcombine.high %v26281_v40, %v26280_v6  ;;  %v2566_v38 = vcombine.low %v2501_v18, %v2517_v37  ;;  %v17061_v8 = vld [vmem:[#allocation2 + $0x108] sm:$0xff]  ;;  %v19444_v40 = vpop.permute.xlu1 %4755 }
 0x357   : > { %26278 = vst [vmem:[#allocation224_spill] sm:$0xff] %v19413_v11  ;;  %v4953_v61 = vcombine.low %v26282_v52, %v19197_v3  ;;  %6535 = vrot.lane.b32.xlu1 %v19018_v54, %s17211_s15  ;;  %v2567_v59 = vcombine.high %v2501_v18, %v2517_v37  ;;  %v5153_v46 = vcombine.low %v19413_v11, %v19397_v0  ;;  %26286 = vst [vmem:[#allocation227_spill] sm:$0xff] %v19444_v40  ;;  %v26287_v37 = vld [vmem:[#allocation58_spill] sm:$0xff]  ;;  %v19451_v11 = vpop.permute.xlu0 %4781 }
 0x358   : > { %v19433_v26 = vrot.slane %v5121_v50, %v17494_v44  ;;  %v19436_v29 = vrot.slane %v5137_v56, %v17494_v44  ;;  %6561 = vrot.lane.b32.xlu0 %v17061_v8, %s17211_s15  ;;  %v19440_v6 = vrot.slane %v4969_v43, %v17494_v44  ;;  %v4985_v54 = vcombine.low %v19327_v31, %v19415_v57  ;;  %v26288_v18 = vld [vmem:[#allocation62_spill] sm:$0xff] }
 0x359   : > { %v4370_v35 = vcombine.high %v26288_v18, %v26287_v37  ;;  %v4354_v50 = vcombine.high %v4288_v25, %v19366_v41  ;;  %26289 = vst [vmem:[#allocation58_spill] sm:$0xff] %v19451_v11  ;;  %v4385_v0 = vcombine.low %v4320_v48, %v4336_v14  ;;  %v19454_v8 = vrot.slane %v4218_v23, %v17507_v58  ;;  %v26310_v57 = vld [vmem:[#allocation70_spill] sm:$0xff] }
 0x35a   : > { %26283 = vst [vmem:[#allocation46_spill] sm:$0xff] %v19433_v26  ;;  %26284 = vst [vmem:[#allocation45_spill] sm:$0xff] %v19436_v29  ;;  %v5185_v56 = vcombine.low %v19433_v26, %v19436_v29  ;;  %v4386_v43 = vcombine.high %v4320_v48, %v4336_v14  ;;  %v2565_v2 = vrot.slane %v2551_v55, %v17507_v58  ;;  %v26300_v26 = vld [vmem:[#allocation43_spill] sm:$0xff] }
 0x35b   : > { %26285 = vst [vmem:[#allocation226_spill] sm:$0xff] %v19440_v6  ;;  %v19458_v5 = vrot.slane %v4953_v61, %v17494_v44  ;;  %v5001_v37 = vcombine.low %v19373_v47, %v19451_v11  ;;  %6539 = vrot.lane.b32.xlu1 %v19216_v16, %s17211_s15  ;;  %v19465_v41 = vrot.slane %v4250_v1, %v17507_v58  ;;  %v19489_v1 = vpop.permute.xlu1 %4759  ;;  %v26312_v47 = vld [vmem:[#allocation73_spill] sm:$0xff] }
 0x35c   : > { %v19468_v25 = vrot.slane %v2566_v38, %v17507_v58  ;;  %v19471_v23 = vrot.slane %v2567_v59, %v17507_v58  ;;  %v19474_v55 = vrot.slane %v5153_v46, %v17507_v58  ;;  %v19477_v48 = vrot.slane %v5185_v56, %v17507_v58  ;;  %15788 = vrot.lane.b32.xlu0 %v19186_v53, %s17206_s12  ;;  %v19496_v46 = vpop.permute.xlu0 %5504  ;;  %v26298_v59 = vld [vmem:[#allocation27_spill] sm:$0xff] }
 0x35d   : > { %26290 = vst [vmem:[#allocation62_spill] sm:$0xff] %v19458_v5  ;;  %v5017_v16 = vcombine.low %v19458_v5, %v19440_v6  ;;  %v19484_v14 = vrot.slane %v4985_v54, %v17494_v44  ;;  %v19487_v38 = vrot.slane %v5001_v37, %v17494_v44  ;;  %26295 = vst [vmem:[#allocation232_spill] sm:$0xff] %v19489_v1  ;;  %v26301_v5 = vld [vmem:[#allocation78_spill] sm:$0xff] }
 0x35e   : > { %26291 = vst [vmem:[#allocation228_spill] sm:$0xff] %v19474_v55  ;;  %26292 = vst [vmem:[#allocation229_spill] sm:$0xff] %v19477_v48  ;;  %v19492_v61 = vrot.slane %v4370_v35, %v17507_v58  ;;  %v19499_v53 = vrot.slane %v4353_v9, %v17507_v58  ;;  %v19502_v18 = vrot.slane %v4385_v0, %v17507_v58  ;;  %v26297_v9 = vld [vmem:[#allocation28_spill] sm:$0xff] }
 0x35f   : > { %26293 = vst [vmem:[#allocation230_spill] sm:$0xff] %v19484_v14  ;;  %26294 = vst [vmem:[#allocation231_spill] sm:$0xff] %v19487_v38  ;;  %v19505_v54 = vrot.slane %v4386_v43, %v17507_v58  ;;  %v5049_v56 = vcombine.low %v19484_v14, %v19487_v38  ;;  %6543 = vrot.lane.b32.xlu1 %v19016_v36, %s17211_s15  ;;  %v4271_v35 = vcombine.low %v19454_v8, %v19465_v41  ;;  %v26299_v48 = vld [vmem:[#allocation24_spill] sm:$0xff] }
 0x360   : > { %26296 = vst [vmem:[#allocation233_spill] sm:$0xff] %v19496_v46  ;;  %v19514_v37 = vrot.slane %v4354_v50, %v17507_v58  ;;  %v2447_v55 = vcombine.high %v26298_v59, %v26297_v9  ;;  %15798 = vrot.lane.b32.xlu0 %v19202_v15, %s17204_s10  ;;  %v2584_v0 = vcombine.low %v19322_v51, %v2565_v2  ;;  %v26302_v50 = vld [vmem:[#allocation74_spill] sm:$0xff]  ;;  %v19535_v15 = vpop.permute.xlu1 %4763  ;;  %v19539_v38 = vpop.permute.xlu0 %5508 }
 0x361   : > { %v2586_v43 = vcombine.low %v19325_v45, %v19468_v25  ;;  %v2588_v36 = vcombine.low %v19347_v33, %v19471_v23  ;;  %v2449_v29 = vcombine.high %v26300_v26, %v26299_v48  ;;  %v1402_v6 = vcombine.high %v26302_v50, %v26301_v5  ;;  %26305 = vst [vmem:[#allocation78_spill] sm:$0xff] %v19535_v15  ;;  %v26307_v5 = vld [vmem:[#allocation51_spill] sm:$0xff]  ;;  %v26308_v50 = vld [vmem:[#allocation50_spill] sm:$0xff] }
 0x362   : > { %v19530_v14 = vrot.slane %v5017_v16, %v17507_v58  ;;  %v19533_v9 = vrot.slane %v5049_v56, %v17507_v58  ;;  %v4403_v59 = vcombine.low %v19389_v39, %v19492_v61  ;;  %26306 = vst [vmem:[#allocation74_spill] sm:$0xff] %v19539_v38  ;;  %v4405_v52 = vcombine.low %v19499_v53, %v19502_v18  ;;  %v26309_v56 = vld [vmem:[#allocation72_spill] sm:$0xff] }
 0x363   : > { %v4407_v3 = vcombine.low %v19514_v37, %v19505_v54  ;;  %v2583_v16 = vcombine.high %v26308_v50, %v26307_v5  ;;  %v2585_v31 = vcombine.high %v19322_v51, %v2565_v2  ;;  %v1370_v10 = vcombine.high %v26310_v57, %v26309_v56  ;;  %6547 = vrot.lane.b32.xlu1 %v26313_v49, %s17211_s15  ;;  %v26319_v49 = vld [vmem:[#allocation190_spill] sm:$0xff]  ;;  %v26320_v56 = vld [vmem:[#allocation25_spill] sm:$0xff]  ;;  %v26321_v5 = vld [vmem:[#allocation71_spill] sm:$0xff] }
 0x364   : > { %26303 = vst [vmem:[#allocation24_spill] sm:$0xff] %v19530_v14  ;;  %26304 = vst [vmem:[#allocation43_spill] sm:$0xff] %v19533_v9  ;;  %v1386_v11 = vcombine.high %v26312_v47, %v26311_v24  ;;  %v2451_v12 = vcombine.high %v26315_v4, %v26314_v19  ;;  %15808 = vrot.lane.b32.xlu0 %v26316_v42, %s17202_s8  ;;  %v26317_v51 = vcombine.low %v26300_v26, %v26299_v48  ;;  %v26322_v50 = vld [vmem:[#allocation69_spill] sm:$0xff]  ;;  %v19577_v9 = vpop.permute.xlu1 %4767 }
 0x365   : > { %v26318_v24 = vcombine.low %v26315_v4, %v26314_v19  ;;  %v2587_v57 = vcombine.high %v19325_v45, %v19468_v25  ;;  %v2453_v21 = vcombine.high %v26320_v56, %v26319_v49  ;;  %v1354_v14 = vcombine.high %v26322_v50, %v26321_v5  ;;  %26323 = vst [vmem:[#allocation72_spill] sm:$0xff] %v19577_v9  ;;  %v19589_v45 = vpop.permute.xlu0 %5512 }
 0x366   : > { %v19563_v2 = vpack.i.bf16 %v2584_v0, %v26317_v51  ;;  %v1416_v42 = vrot.slane %v1402_v6, %v17494_v44  ;;  %v26324_v26 = vcombine.low %v26320_v56, %v26319_v49  ;;  %v26325_v19 = vcombine.low %v26269_v28, %v19305_v60  ;;  %26326 = vst [vmem:[#allocation70_spill] sm:$0xff] %v19589_v45  ;;  %v26328_v51 = vld [vmem:[#allocation88_spill] sm:$0xff] }
 0x367   : > { %v19568_v47 = vpack.i.bf16 %v2586_v43, %v26318_v24  ;;  %v26327_v25 = vcombine.low %v19381_v17, %v19392_v20  ;;  %v19596_v6 = vpack.i.bf16 %v4407_v3, %v4271_v35  ;;  %v19598_v43 = vpack.i.bf16 %v2583_v16, %v2447_v55  ;;  %6551 = vrot.lane.b32.xlu1 %v19342_v63, %s17211_s15  ;;  %v26329_v3 = vld [vmem:[#allocation82_spill] sm:$0xff] }
 0x368   : > { %v19582_v48 = vpack.i.bf16 %v2588_v36, %v26324_v26  ;;  %v19587_v4 = vpack.i.bf16 %v4403_v59, %v26325_v19  ;;  %v19600_v5 = vpack.i.bf16 %v2585_v31, %v2449_v29  ;;  %v1384_v36 = vrot.slane %v1370_v10, %v17494_v44  ;;  %15818 = vrot.lane.b32.xlu0 %v19240_v13, %s17201_s7  ;;  %v26331_v29 = vld [vmem:[#allocation80_spill] sm:$0xff] }
 0x369   : > { %v19594_v0 = vpack.i.bf16 %v4405_v52, %v26327_v25  ;;  %v1400_v50 = vrot.slane %v1386_v11, %v17494_v44  ;;  %v2589_v59 = vcombine.high %v19347_v33, %v19471_v23  ;;  %v4268_v52 = vcombine.high %v26269_v28, %v19305_v60  ;;  %v26330_v33 = vld [vmem:[#allocation81_spill] sm:$0xff]  ;;  %v19623_v28 = vpop.permute.xlu1 %4771  ;;  %v26333_v13 = vld [vmem:[#allocation76_spill] sm:$0xff]  ;;  %v19631_v49 = vpop.permute.xlu0 %5516 }
 0x36a   : > { %v1642_v35 = vcombine.high %v26329_v3, %v26328_v51  ;;  %v19614_v31 = vpack.i.bf16 %v2587_v57, %v2451_v12  ;;  %v4404_v10 = vcombine.high %v19389_v39, %v19492_v61  ;;  %v4406_v63 = vcombine.high %v19499_v53, %v19502_v18  ;;  %26332 = vst [vmem:[#allocation75_spill] sm:$0xff] %v19623_v28  ;;  %v26334_v12 = vld [vmem:[#allocation79_spill] sm:$0xff]  ;;  %v26335_v57 = vld [vmem:[#allocation86_spill] sm:$0xff]  ;;  %v26336_v39 = vld [vmem:[#allocation77_spill] sm:$0xff] }
 0x36b   : > { %v1368_v11 = vrot.slane %v1354_v14, %v17494_v44  ;;  %v1450_v23 = vcombine.high %v26331_v29, %v26330_v33  ;;  %v1465_v60 = vcombine.low %v1400_v50, %v1416_v42  ;;  %v4408_v55 = vcombine.high %v19514_v37, %v19505_v54  ;;  %26337 = vst [vmem:[#allocation73_spill] sm:$0xff] %v19631_v49  ;;  %v26338_v53 = vld [vmem:[#allocation66_spill] sm:$0xff]  ;;  %v26339_v14 = vld [vmem:[#allocation68_spill] sm:$0xff]  ;;  %v26340_v25 = vld [vmem:[#allocation65_spill] sm:$0xff] }
 0x36c   : > { %v1418_v16 = vcombine.high %v26334_v12, %v26333_v13  ;;  %v1466_v24 = vcombine.high %v1400_v50, %v1416_v42  ;;  %v1626_v61 = vcombine.high %v26336_v39, %v26335_v57  ;;  %v4402_v18 = vcombine.high %v26339_v14, %v26338_v53  ;;  %6555 = vrot.lane.b32.xlu1 %v19315_v7, %s17211_s15  ;;  %v26341_v50 = vld [vmem:[#allocation67_spill] sm:$0xff]  ;;  %v26349_v29 = vld [vmem:[#allocation121_spill] sm:$0xff]  ;;  %v26352_v13 = vld [vmem:[#allocation122_spill] sm:$0xff] }
 0x36d   : > { %v1433_v56 = vcombine.low %v1368_v11, %v1384_v36  ;;  %v1434_v26 = vcombine.high %v1368_v11, %v1384_v36  ;;  %v4270_v54 = vcombine.high %v19381_v17, %v19392_v20  ;;  %v4272_v37 = vcombine.high %v19454_v8, %v19465_v41  ;;  %15823 = vrot.lane.b32.xlu0 %v19245_v34, %s17206_s12  ;;  %v19656_v17 = vpop.permute.xlu1 %4775  ;;  %v26348_v11 = vld [vmem:[#allocation83_spill] sm:$0xff]  ;;  %v26353_v57 = vld [vmem:[#allocation85_spill] sm:$0xff]  ;;  %v26354_v39 = vld [vmem:[#allocation84_spill] sm:$0xff] }
 0x36e   : > { %v1656_v42 = vrot.slane %v1642_v35, %v17494_v44  ;;  %v19644_v19 = vpack.i.bf16 %v2589_v59, %v2453_v21  ;;  %v4266_v51 = vcombine.high %v26341_v50, %v26340_v25  ;;  %v19648_v36 = vpack.i.bf16 %v4404_v10, %v4268_v52  ;;  %26343 = vst [vmem:[#allocation23_spill] sm:$0xff] %v19656_v17  ;;  %v19669_v52 = vpop.permute.xlu0 %5520  ;;  %v26368_v25 = vld [vmem:[#allocation119_spill] sm:$0xff]  ;;  %v26372_v53 = vld [vmem:[#allocation124_spill] sm:$0xff] }
 0x36f   : > { %v19651_v7 = vrot.slane %v1450_v23, %v17507_v58  ;;  %v19654_v20 = vrot.slane %v1465_v60, %v17507_v58  ;;  %v19658_v8 = vpack.i.bf16 %v4406_v63, %v4270_v54  ;;  %v19660_v41 = vpack.i.bf16 %v4408_v55, %v4272_v37  ;;  %26346 = vst [vmem:[#allocation190_spill] sm:$0xff] %v19669_v52  ;;  %v26347_v63 = vld [vmem:[#allocation89_spill] sm:$0xff]  ;;  %v26350_v23 = vld [vmem:[#allocation108_spill] sm:$0xff]  ;;  %v26357_v54 = vld [vmem:[#allocation114_spill] sm:$0xff] }
 0x370   : > { %26342 = vst [vmem:[#allocation216_spill] sm:$0xff] %v19648_v36  ;;  %v19663_v34 = vrot.slane %v1418_v16, %v17507_v58  ;;  %v19666_v21 = vrot.slane %v1466_v24, %v17507_v58  ;;  %v1640_v59 = vrot.slane %v1626_v61, %v17494_v44  ;;  %v19671_v3 = vpack.i.bf16 %v4402_v18, %v4266_v51  ;;  %v26351_v55 = vld [vmem:[#allocation120_spill] sm:$0xff]  ;;  %v26355_v18 = vld [vmem:[#allocation103_spill] sm:$0xff]  ;;  %v26358_v37 = vld [vmem:[#allocation98_spill] sm:$0xff] }
 0x371   : > { %26344 = vst [vmem:[#allocation21_spill] sm:$0xff] %v19658_v8  ;;  %26345 = vst [vmem:[#allocation215_spill] sm:$0xff] %v19660_v41  ;;  %v19674_v35 = vrot.slane %v1433_v56, %v17507_v58  ;;  %v19677_v10 = vrot.slane %v1434_v26, %v17507_v58  ;;  %v1490_v33 = vcombine.high %v26348_v11, %v26347_v63  ;;  %6559 = vrot.lane.b32.xlu1 %v19340_v30, %s17211_s15  ;;  %v26356_v56 = vld [vmem:[#allocation87_spill] sm:$0xff]  ;;  %v19697_v30 = vpop.permute.xlu1 %4779  ;;  %v26367_v61 = vld [vmem:[#allocation128_spill] sm:$0xff] }
 0x372   : > { %v1674_v60 = vcombine.high %v26350_v23, %v26349_v29  ;;  %v1690_v12 = vcombine.high %v26352_v13, %v26351_v55  ;;  %v1705_v16 = vcombine.low %v1640_v59, %v1656_v42  ;;  %v5241_v24 = vcombine.low %v19489_v1, %v19577_v9  ;;  %15833 = vrot.lane.b32.xlu0 %v19260_v32, %s17204_s10  ;;  %v19705_v29 = vpop.permute.xlu0 %5524  ;;  %v26366_v13 = vld [vmem:[#allocation109_spill] sm:$0xff]  ;;  %v26391_v9 = vld [vmem:[#allocation134_spill] sm:$0xff] }
 0x373   : > { %v1506_v26 = vcombine.high %v26356_v56, %v26355_v18  ;;  %v1658_v51 = vcombine.high %v26358_v37, %v26357_v54  ;;  %26359 = vst [vmem:[#allocation25_spill] sm:$0xff] %v19697_v30  ;;  %v5225_v32 = vcombine.low %v19444_v40, %v19535_v15  ;;  %26360 = vst [vmem:[#allocation71_spill] sm:$0xff] %v19705_v29 }
 0x374   : > { %v1504_v18 = vrot.slane %v1490_v33, %v17494_v44  ;;  %v1706_v56 = vcombine.high %v1640_v59, %v1656_v42  ;;  %v1688_v54 = vrot.slane %v1674_v60, %v17494_v44  ;;  %v19720_v11 = vrot.slane %v1690_v12, %v17507_v58  ;;  %v26362_v59 = vld [vmem:[#allocation126_spill] sm:$0xff]  ;;  %v26363_v33 = vld [vmem:[#allocation129_spill] sm:$0xff] }
 0x375   : > { %6563 = vrot.lane.b32.xlu1 %v19313_v27, %s17211_s15  ;;  %v19723_v23 = vrot.slane %v1705_v16, %v17507_v58  ;;  %v19726_v55 = vrot.slane %v5241_v24, %v17494_v44  ;;  %v5257_v42 = vcombine.low %v19623_v28, %v19697_v30  ;;  %v1520_v27 = vrot.slane %v1506_v26, %v17494_v44  ;;  %v19738_v37 = vpop.permute.xlu1 %4783  ;;  %v26365_v24 = vld [vmem:[#allocation123_spill] sm:$0xff] }
 0x376   : > { %15843 = vrot.lane.b32.xlu0 %v19282_v22, %s17202_s8  ;;  %v1554_v60 = vcombine.high %v26363_v33, %v26362_v59  ;;  %v1672_v12 = vrot.slane %v1658_v51, %v17494_v44  ;;  %v5616_v16 = vcombine.low %v19539_v38, %v19631_v49  ;;  %26364 = vst [vmem:[#allocation88_spill] sm:$0xff] %v19738_v37  ;;  %v19747_v26 = vpop.permute.xlu0 %5528  ;;  %v26371_v33 = vld [vmem:[#allocation125_spill] sm:$0xff]  ;;  %v26386_v28 = vld [vmem:[#allocation11_spill] sm:$0xff] }
 0x377   : > { %26361 = vst [vmem:[#allocation69_spill] sm:$0xff] %v19726_v55  ;;  %v1522_v63 = vcombine.high %v26366_v13, %v26365_v24  ;;  %v1538_v50 = vcombine.high %v26368_v25, %v26367_v61  ;;  %v19745_v22 = vrot.slane %v5225_v32, %v17494_v44  ;;  %26370 = vst [vmem:[#allocation81_spill] sm:$0xff] %v19747_v26  ;;  %v26375_v24 = vld [vmem:[#allocation185_spill] sm:$0xff] }
 0x378   : > { %v5273_v59 = vcombine.low %v19656_v17, %v19738_v37  ;;  %v19752_v51 = vrot.slane %v1706_v56, %v17507_v58  ;;  %v1722_v14 = vcombine.high %v26372_v53, %v26371_v33  ;;  %v1737_v40 = vcombine.low %v1672_v12, %v1688_v54  ;;  %v26393_v37 = vld [vmem:[#allocation142_spill] sm:$0xff] }
 0x379   : > { %26369 = vst [vmem:[#allocation82_spill] sm:$0xff] %v19745_v22  ;;  %v5600_v13 = vcombine.low %v19496_v46, %v19589_v45  ;;  %15793 = vrot.lane.b32.xlu1 %v19265_v62, %s17205_s11  ;;  %v1738_v25 = vcombine.high %v1672_v12, %v1688_v54  ;;  %v5289_v61 = vcombine.low %v19745_v22, %v19726_v55  ;;  %v19775_v54 = vpop.permute.xlu1 %5506  ;;  %v26381_v55 = vld [vmem:[#allocation133_spill] sm:$0xff] }
 0x37a   : > { %v19763_v32 = vrot.slane %v5257_v42, %v17494_v44  ;;  %v19766_v56 = vrot.slane %v5273_v59, %v17494_v44  ;;  %15853 = vrot.lane.b32.xlu0 %v26375_v24, %s17201_s7  ;;  %v1569_v53 = vcombine.low %v1504_v18, %v1520_v27  ;;  %v1570_v33 = vcombine.high %v1504_v18, %v1520_v27  ;;  %v19784_v22 = vpop.permute.xlu0 %5532 }
 0x37b   : > { %v19771_v15 = vrot.slane %v5616_v16, %v17494_v44  ;;  %v5632_v62 = vcombine.low %v19669_v52, %v19747_v26  ;;  %26377 = vst [vmem:[#allocation86_spill] sm:$0xff] %v19775_v54  ;;  %v19778_v12 = vrot.slane %v1554_v60, %v17507_v58  ;;  %v1536_v42 = vrot.slane %v1522_v63, %v17494_v44  ;;  %v26380_v63 = vld [vmem:[#allocation188_spill] sm:$0xff]  ;;  %v26411_v52 = vld [vmem:[#allocation147_spill] sm:$0xff] }
 0x37c   : > { %26373 = vst [vmem:[#allocation80_spill] sm:$0xff] %v19763_v32  ;;  %26374 = vst [vmem:[#allocation76_spill] sm:$0xff] %v19766_v56  ;;  %v1552_v59 = vrot.slane %v1538_v50, %v17494_v44  ;;  %v5321_v24 = vcombine.low %v19763_v32, %v19766_v56  ;;  %v19787_v18 = vrot.slane %v1722_v14, %v17507_v58  ;;  %v26382_v32 = vld [vmem:[#allocation132_spill] sm:$0xff] }
 0x37d   : > { %26376 = vst [vmem:[#allocation79_spill] sm:$0xff] %v19771_v15  ;;  %26378 = vst [vmem:[#allocation77_spill] sm:$0xff] %v19784_v22  ;;  %v19790_v27 = vrot.slane %v1737_v40, %v17507_v58  ;;  %v19793_v16 = vrot.slane %v5600_v13, %v17494_v44  ;;  %v5648_v60 = vcombine.low %v19705_v29, %v19784_v22  ;;  %15803 = vrot.lane.b32.xlu1 %v26380_v63, %s17203_s9  ;;  %v26385_v13 = vld [vmem:[#allocation13_spill] sm:$0xff] }
 0x37e   : > { %v19800_v50 = vrot.slane %v1738_v25, %v17507_v58  ;;  %v1586_v56 = vcombine.high %v26382_v32, %v26381_v55  ;;  %v19805_v14 = vrot.slane %v5289_v61, %v17507_v58  ;;  %v19808_v40 = vrot.slane %v5321_v24, %v17507_v58  ;;  %15863 = vrot.lane.b32.xlu0 %v19563_v2, %s17205_s11  ;;  %v19822_v61 = vpop.permute.xlu1 %5510  ;;  %v26396_v2 = vld [vmem:[#allocation127_spill] sm:$0xff]  ;;  %v26414_v22 = vld [vmem:[#allocation141_spill] sm:$0xff] }
 0x37f   : > { %26379 = vst [vmem:[#allocation89_spill] sm:$0xff] %v19793_v16  ;;  %v1810_v30 = vcombine.high %v26386_v28, %v26385_v13  ;;  %v5664_v63 = vcombine.low %v19793_v16, %v19771_v15  ;;  %v19817_v25 = vrot.slane %v5632_v62, %v17494_v44  ;;  %v19820_v55 = vrot.slane %v5648_v60, %v17494_v44  ;;  %v19829_v28 = vpop.permute.xlu0 %5536  ;;  %v26390_v62 = vld [vmem:[#allocation140_spill] sm:$0xff]  ;;  %v26392_v60 = vld [vmem:[#allocation33_spill] sm:$0xff]  ;;  %v26394_v15 = vld [vmem:[#allocation186_spill] sm:$0xff] }
 0x380   : > { %26383 = vst [vmem:[#allocation83_spill] sm:$0xff] %v19805_v14  ;;  %26384 = vst [vmem:[#allocation121_spill] sm:$0xff] %v19808_v40  ;;  %v19825_v32 = vrot.slane %v1569_v53, %v17507_v58  ;;  %v1601_v24 = vcombine.low %v1536_v42, %v1552_v59  ;;  %v1602_v1 = vcombine.high %v1536_v42, %v1552_v59  ;;  %v26395_v59 = vld [vmem:[#allocation138_spill] sm:$0xff] }
 0x381   : > { %26387 = vst [vmem:[#allocation108_spill] sm:$0xff] %v19817_v25  ;;  %26388 = vst [vmem:[#allocation120_spill] sm:$0xff] %v19820_v55  ;;  %v19832_v13 = vrot.slane %v1570_v33, %v17507_v58  ;;  %v1778_v17 = vcombine.high %v26391_v9, %v26390_v62  ;;  %v1794_v16 = vcombine.high %v26393_v37, %v26392_v60  ;;  %15813 = vrot.lane.b32.xlu1 %v26394_v15, %s17200_s30  ;;  %v26401_v37 = vld [vmem:[#allocation130_spill] sm:$0xff] }
 0x382   : > { %26389 = vst [vmem:[#allocation122_spill] sm:$0xff] %v19822_v61  ;;  %v5696_v53 = vcombine.low %v19817_v25, %v19820_v55  ;;  %v19843_v42 = vrot.slane %v1586_v56, %v17507_v58  ;;  %v1762_v14 = vcombine.high %v26396_v2, %v26395_v59  ;;  %15873 = vrot.lane.b32.xlu0 %v19568_v47, %s17203_s9  ;;  %v19860_v56 = vpop.permute.xlu1 %5514  ;;  %v26402_v25 = vld [vmem:[#allocation149_spill] sm:$0xff]  ;;  %v26403_v2 = vld [vmem:[#allocation12_spill] sm:$0xff] }
 0x383   : > { %v1824_v33 = vrot.slane %v1810_v30, %v17494_v44  ;;  %v19855_v62 = vrot.slane %v5664_v63, %v17507_v58  ;;  %26399 = vst [vmem:[#allocation114_spill] sm:$0xff] %v19860_v56  ;;  %v19865_v47 = vrot.slane %v1601_v24, %v17507_v58  ;;  %v19868_v60 = vrot.slane %v1602_v1, %v17507_v58  ;;  %v19870_v59 = vpop.permute.xlu0 %5540  ;;  %v26400_v30 = vld [vmem:[#allocation131_spill] sm:$0xff]  ;;  %v26404_v1 = vld [vmem:[#allocation61_spill] sm:$0xff] }
 0x384   : > { %v19858_v15 = vrot.slane %v5696_v53, %v17507_v58  ;;  %v1792_v9 = vrot.slane %v1778_v17, %v17494_v44  ;;  %v1808_v40 = vrot.slane %v1794_v16, %v17494_v44  ;;  %v3108_v55 = vcombine.high %v26403_v2, %v26402_v25  ;;  %v26405_v63 = vld [vmem:[#allocation137_spill] sm:$0xff]  ;;  %v26406_v53 = vld [vmem:[#allocation136_spill] sm:$0xff]  ;;  %v26407_v25 = vld [vmem:[#allocation143_spill] sm:$0xff] }
 0x385   : > { %26397 = vst [vmem:[#allocation103_spill] sm:$0xff] %v19855_v62  ;;  %15828 = vrot.lane.b32.xlu1 %v26404_v1, %s17205_s11  ;;  %v1776_v46 = vrot.slane %v1762_v14, %v17494_v44  ;;  %v1618_v45 = vcombine.high %v26406_v53, %v26405_v63  ;;  %v1620_v17 = vcombine.high %v19778_v12, %v19843_v42  ;;  %v26408_v2 = vld [vmem:[#allocation139_spill] sm:$0xff]  ;;  %v26409_v62 = vld [vmem:[#allocation146_spill] sm:$0xff] }
 0x386   : > { %26398 = vst [vmem:[#allocation87_spill] sm:$0xff] %v19858_v15  ;;  %15883 = vrot.lane.b32.xlu0 %v19582_v48, %s17200_s30  ;;  %v3076_v24 = vcombine.high %v26408_v2, %v26407_v25  ;;  %v26410_v15 = vld [vmem:[#allocation144_spill] sm:$0xff]  ;;  %v26412_v14 = vld [vmem:[#allocation35_spill] sm:$0xff]  ;;  %v1873_v29 = vcombine.low %v1808_v40, %v1824_v33  ;;  %v19899_v48 = vpop.permute.xlu1 %5518  ;;  %v1874_v38 = vcombine.high %v1808_v40, %v1824_v33  ;;  %v26416_v2 = vld [vmem:[#allocation34_spill] sm:$0xff] }
 0x387   : > { %v3092_v1 = vcombine.high %v26410_v15, %v26409_v62  ;;  %v1858_v26 = vcombine.high %v26412_v14, %v26411_v52  ;;  %26413 = vst [vmem:[#allocation98_spill] sm:$0xff] %v19899_v48  ;;  %v26415_v63 = vld [vmem:[#allocation135_spill] sm:$0xff]  ;;  %v19903_v49 = vpop.permute.xlu0 %5544  ;;  %v1622_v16 = vcombine.high %v19825_v32, %v19865_v47  ;;  %v26417_v62 = vld [vmem:[#allocation145_spill] sm:$0xff]  ;;  %v1841_v41 = vcombine.low %v1776_v46, %v1792_v9 }
 0x388   : > { %v3060_v53 = vcombine.high %v26415_v63, %v26414_v22  ;;  %v1826_v15 = vcombine.high %v26417_v62, %v26416_v2  ;;  %v3122_v52 = vrot.slane %v3108_v55, %v17494_v44  ;;  %v26418_v14 = vld [vmem:[#allocation221_spill] sm:$0xff]  ;;  %v1624_v22 = vcombine.high %v19832_v13, %v19868_v60 }
 0x389   : > { %15838 = vrot.lane.b32.xlu1 %v26418_v14, %s17203_s9  ;;  %v1842_v40 = vcombine.high %v1776_v46, %v1792_v9  ;;  %v26419_v33 = vcombine.high %v26354_v39, %v26353_v57  ;;  %v26420_v2 = vcombine.high %v19663_v34, %v19651_v7  ;;  %v1619_v55 = vcombine.low %v19778_v12, %v19843_v42  ;;  %v26426_v57 = vld [vmem:[#allocation222_spill] sm:$0xff] }
 0x38a   : > { %15898 = vrot.lane.b32.xlu0 %v19587_v4, %s17205_s11  ;;  %v3090_v14 = vrot.slane %v3076_v24, %v17494_v44  ;;  %v3106_v46 = vrot.slane %v3092_v1, %v17494_v44  ;;  %v19933_v9 = vrot.slane %v1858_v26, %v17507_v58  ;;  %v19936_v4 = vrot.slane %v1873_v29, %v17507_v58  ;;  %v26425_v1 = vld [vmem:[#allocation152_spill] sm:$0xff] }
 0x38b   : > { %v19921_v63 = vpack.i.bf16 %v1618_v45, %v26419_v33  ;;  %v19926_v62 = vpack.i.bf16 %v1620_v17, %v26420_v2  ;;  %v19938_v45 = vpop.permute.xlu1 %5522  ;;  %v3074_v33 = vrot.slane %v3060_v53, %v17494_v44  ;;  %v19942_v17 = vrot.slane %v1874_v38, %v17507_v58  ;;  %v19944_v2 = vpop.permute.xlu0 %5548  ;;  %v26424_v53 = vld [vmem:[#allocation153_spill] sm:$0xff] }
 0x38c   : > { %26421 = vst [vmem:[#allocation126_spill] sm:$0xff] %v19938_v45  ;;  %v26422_v12 = vcombine.high %v19674_v35, %v19654_v20  ;;  %v1621_v26 = vcombine.low %v19825_v32, %v19865_v47  ;;  %v19954_v29 = vrot.slane %v1826_v15, %v17507_v58  ;;  %v19957_v24 = vrot.slane %v1841_v41, %v17507_v58 }
 0x38d   : > { %v3156_v38 = vcombine.high %v26425_v1, %v26424_v53  ;;  %v3171_v25 = vcombine.low %v3106_v46, %v3122_v52  ;;  %15848 = vrot.lane.b32.xlu1 %v26426_v57, %s17200_s30  ;;  %v19964_v39 = vrot.slane %v1842_v40, %v17507_v58  ;;  %v3172_v32 = vcombine.high %v3106_v46, %v3122_v52 }
 0x38e   : > { %v19949_v42 = vpack.i.bf16 %v1622_v16, %v26422_v12  ;;  %v26427_v16 = vld [vmem:[#allocation14_spill] sm:$0xff]  ;;  %15908 = vrot.lane.b32.xlu0 %v19594_v0, %s17203_s9  ;;  %v1623_v41 = vcombine.low %v19832_v13, %v19868_v60  ;;  %v3139_v47 = vcombine.low %v3074_v33, %v3090_v14  ;;  %v3140_v15 = vcombine.high %v3074_v33, %v3090_v14  ;;  %v26432_v14 = vld [vmem:[#allocation151_spill] sm:$0xff]  ;;  %v26433_v33 = vld [vmem:[#allocation36_spill] sm:$0xff] }
 0x38f   : > { %v26428_v12 = vld [vmem:[#allocation150_spill] sm:$0xff]  ;;  %v19972_v53 = vpop.permute.xlu1 %5526  ;;  %v1891_v57 = vcombine.low %v19954_v29, %v19933_v9  ;;  %v1893_v40 = vcombine.low %v19957_v24, %v19936_v4  ;;  %v19978_v1 = vpop.permute.xlu0 %5552  ;;  %v26430_v52 = vcombine.high %v19677_v10, %v19666_v21  ;;  %v26431_v0 = vcombine.low %v19663_v34, %v19651_v7 }
 0x390   : > { %26423 = vst [vmem:[#allocation129_spill] sm:$0xff] %v19949_v42  ;;  %v3124_v8 = vcombine.high %v26428_v12, %v26427_v16  ;;  %26429 = vst [vmem:[#allocation123_spill] sm:$0xff] %v19972_v53  ;;  %v1895_v60 = vcombine.low %v19964_v39, %v19942_v17  ;;  %v1890_v16 = vcombine.high %v26433_v33, %v26432_v14  ;;  %v26434_v42 = vld [vmem:[#allocation157_spill] sm:$0xff]  ;;  %v26457_v33 = vld [vmem:[#allocation159_spill] sm:$0xff] }
 0x391   : > { %v19983_v46 = vpack.i.bf16 %v1624_v22, %v26430_v52  ;;  %v19988_v13 = vpack.i.bf16 %v1619_v55, %v26431_v0  ;;  %v19995_v12 = vrot.slane %v3156_v38, %v17507_v58  ;;  %v19998_v36 = vrot.slane %v3171_v25, %v17507_v58  ;;  %v26435_v22 = vld [vmem:[#allocation148_spill] sm:$0xff]  ;;  %15858 = vrot.lane.b32.xlu1 %v19598_v43, %s17206_s12 }
 0x392   : > { %v3332_v52 = vcombine.high %v26435_v22, %v26434_v42  ;;  %v26436_v7 = vcombine.low %v19674_v35, %v19654_v20  ;;  %v20010_v55 = vrot.slane %v3124_v8, %v17507_v58  ;;  %v20013_v38 = vrot.slane %v3172_v32, %v17507_v58  ;;  %15918 = vrot.lane.b32.xlu0 %v19596_v6, %s17200_s30 }
 0x393   : > { %v5888_v25 = vcombine.low %v19822_v61, %v19899_v48  ;;  %v26437_v43 = vcombine.low %v19677_v10, %v19666_v21  ;;  %v20025_v20 = vrot.slane %v3139_v47, %v17507_v58  ;;  %v20028_v8 = vrot.slane %v3140_v15, %v17507_v58  ;;  %v20030_v35 = vpop.permute.xlu1 %5530  ;;  %v20044_v10 = vpop.permute.xlu0 %5556  ;;  %v26460_v61 = vld [vmem:[#allocation158_spill] sm:$0xff] }
 0x394   : > { %v20007_v34 = vpack.i.bf16 %v1621_v26, %v26436_v7  ;;  %26438 = vst [vmem:[#allocation109_spill] sm:$0xff] %v20030_v35  ;;  %v26439_v26 = vcombine.low %v19720_v11, %v19787_v18  ;;  %v26441_v6 = vcombine.low %v19723_v23, %v19790_v27  ;;  %v5872_v21 = vcombine.low %v19775_v54, %v19860_v56  ;;  %v26447_v7 = vld [vmem:[#allocation156_spill] sm:$0xff]  ;;  %v26505_v48 = vld [vmem:[#allocation18_spill] sm:$0xff] }
 0x395   : > { %v20022_v42 = vpack.i.bf16 %v1623_v41, %v26437_v43  ;;  %v26443_v41 = vcombine.low %v19752_v51, %v19800_v50  ;;  %v26445_v15 = vcombine.high %v26401_v37, %v26400_v30  ;;  %v1892_v22 = vcombine.high %v19954_v29, %v19933_v9  ;;  %15868 = vrot.lane.b32.xlu1 %v19600_v5, %s17204_s10  ;;  %v26448_v43 = vld [vmem:[#allocation37_spill] sm:$0xff]  ;;  %v26450_v29 = vld [vmem:[#allocation48_spill] sm:$0xff] }
 0x396   : > { %v20035_v32 = vpack.i.bf16 %v1891_v57, %v26439_v26  ;;  %v20040_v0 = vpack.i.bf16 %v1893_v40, %v26441_v6  ;;  %v20059_v40 = vrot.slane %v3332_v52, %v17494_v44  ;;  %v5904_v9 = vcombine.low %v19938_v45, %v20030_v35  ;;  %6565 = vrot.lane.b32.xlu0 %v26450_v29, %s17211_s15  ;;  %v26454_v30 = vld [vmem:[#allocation172_spill] sm:$0xff]  ;;  %v26455_v37 = vld [vmem:[#allocation165_spill] sm:$0xff]  ;;  %v26458_v45 = vld [vmem:[#allocation155_spill] sm:$0xff] }
 0x397   : > { %v20049_v47 = vpack.i.bf16 %v1895_v60, %v26443_v41  ;;  %v20054_v57 = vpack.i.bf16 %v1890_v16, %v26445_v15  ;;  %v20070_v16 = vrot.slane %v5888_v25, %v17494_v44  ;;  %v26451_v41 = vld [vmem:[#allocation39_spill] sm:$0xff]  ;;  %v26452_v15 = vld [vmem:[#allocation154_spill] sm:$0xff]  ;;  %v5752_v6 = vcombine.low %v19870_v59, %v19944_v2  ;;  %v20084_v25 = vpop.permute.xlu1 %5534  ;;  %v20095_v52 = vpop.permute.xlu0 %5560  ;;  %v26459_v35 = vld [vmem:[#allocation161_spill] sm:$0xff] }
 0x398   : > { %26440 = vst [vmem:[#allocation128_spill] sm:$0xff] %v20035_v32  ;;  %26442 = vst [vmem:[#allocation119_spill] sm:$0xff] %v20040_v0  ;;  %v3348_v60 = vcombine.high %v26452_v15, %v26451_v41  ;;  %v1894_v29 = vcombine.high %v19957_v24, %v19936_v4  ;;  %v3244_v5 = vcombine.high %v26455_v37, %v26454_v30  ;;  %v26461_v24 = vld [vmem:[#allocation16_spill] sm:$0xff]  ;;  %v26513_v32 = vld [vmem:[#allocation225_spill] sm:$0xff] }
 0x399   : > { %26444 = vst [vmem:[#allocation125_spill] sm:$0xff] %v20049_v47  ;;  %26446 = vst [vmem:[#allocation124_spill] sm:$0xff] %v20054_v57  ;;  %v20093_v14 = vrot.slane %v5872_v21, %v17494_v44  ;;  %v5920_v41 = vcombine.low %v19972_v53, %v20084_v25  ;;  %v1896_v15 = vcombine.high %v19964_v39, %v19942_v17  ;;  %15878 = vrot.lane.b32.xlu1 %v19614_v31, %s17202_s8  ;;  %v26462_v21 = vld [vmem:[#allocation163_spill] sm:$0xff] }
 0x39a   : > { %26449 = vst [vmem:[#allocation185_spill] sm:$0xff] %v20070_v16  ;;  %26453 = vst [vmem:[#allocation188_spill] sm:$0xff] %v20084_v25  ;;  %v3196_v26 = vcombine.high %v26458_v45, %v26457_v33  ;;  %v3212_v4 = vcombine.high %v26460_v61, %v26459_v35  ;;  %v5736_v37 = vcombine.low %v19829_v28, %v19903_v49  ;;  %15928 = vrot.lane.b32.xlu0 %v19921_v63, %s17206_s12  ;;  %v26498_v25 = vld [vmem:[#allocation44_spill] sm:$0xff]  ;;  %v26510_v57 = vld [vmem:[#allocation47_spill] sm:$0xff] }
 0x39b   : > { %26456 = vst [vmem:[#allocation133_spill] sm:$0xff] %v20093_v14  ;;  %v3228_v53 = vcombine.high %v26462_v21, %v26461_v24  ;;  %v5936_v39 = vcombine.low %v20093_v14, %v20070_v16  ;;  %v20116_v45 = vrot.slane %v5904_v9, %v17494_v44  ;;  %v20119_v61 = vrot.slane %v5920_v41, %v17494_v44  ;;  %v20128_v33 = vpop.permute.xlu1 %5538  ;;  %v20144_v30 = vpop.permute.xlu0 %5564 }
 0x39c   : > { %v20124_v31 = vrot.slane %v5752_v6, %v17494_v44  ;;  %v5768_v17 = vcombine.low %v19978_v1, %v20095_v52  ;;  %26465 = vst [vmem:[#allocation11_spill] sm:$0xff] %v20128_v33  ;;  %v26466_v35 = vcombine.high %v19720_v11, %v19787_v18  ;;  %v26468_v9 = vcombine.high %v19723_v23, %v19790_v27  ;;  %v26473_v23 = vld [vmem:[#allocation162_spill] sm:$0xff] }
 0x39d   : > { %26463 = vst [vmem:[#allocation132_spill] sm:$0xff] %v20116_v45  ;;  %26464 = vst [vmem:[#allocation13_spill] sm:$0xff] %v20119_v61  ;;  %v3362_v63 = vrot.slane %v3348_v60, %v17494_v44  ;;  %v3258_v6 = vrot.slane %v3244_v5, %v17494_v44  ;;  %v5968_v21 = vcombine.low %v20116_v45, %v20119_v61  ;;  %15888 = vrot.lane.b32.xlu1 %v19644_v19, %s17201_s7  ;;  %v26485_v45 = vld [vmem:[#allocation173_spill] sm:$0xff] }
 0x39e   : > { %v20133_v24 = vpack.i.bf16 %v1892_v22, %v26466_v35  ;;  %v20138_v41 = vpack.i.bf16 %v1894_v29, %v26468_v9  ;;  %v26470_v14 = vcombine.high %v19752_v51, %v19800_v50  ;;  %v3210_v18 = vrot.slane %v3196_v26, %v17494_v44  ;;  %v26472_v22 = vld [vmem:[#allocation167_spill] sm:$0xff]  ;;  %15938 = vrot.lane.b32.xlu0 %v19926_v62, %s17204_s10  ;;  %v26477_v26 = vld [vmem:[#allocation164_spill] sm:$0xff] }
 0x39f   : > { %v3380_v27 = vcombine.high %v26473_v23, %v26472_v22  ;;  %v20155_v29 = vrot.slane %v5736_v37, %v17494_v44  ;;  %v5784_v60 = vcombine.low %v20044_v10, %v20144_v30  ;;  %v3226_v5 = vrot.slane %v3212_v4, %v17494_v44  ;;  %v20181_v4 = vpop.permute.xlu1 %5542  ;;  %v26480_v9 = vld [vmem:[#allocation15_spill] sm:$0xff]  ;;  %v26481_v22 = vld [vmem:[#allocation177_spill] sm:$0xff]  ;;  %v26482_v23 = vld [vmem:[#allocation176_spill] sm:$0xff] }
 0x3a0   : > { %26467 = vst [vmem:[#allocation140_spill] sm:$0xff] %v20133_v24  ;;  %26469 = vst [vmem:[#allocation134_spill] sm:$0xff] %v20138_v41  ;;  %v20149_v11 = vpack.i.bf16 %v1896_v15, %v26470_v14  ;;  %v3242_v51 = vrot.slane %v3228_v53, %v17494_v44  ;;  %v20164_v50 = vrot.slane %v5936_v39, %v17507_v58  ;;  %v26478_v15 = vld [vmem:[#allocation160_spill] sm:$0xff]  ;;  %v26479_v39 = vld [vmem:[#allocation166_spill] sm:$0xff] }
 0x3a1   : > { %26474 = vst [vmem:[#allocation142_spill] sm:$0xff] %v20155_v29  ;;  %v20167_v14 = vrot.slane %v5968_v21, %v17507_v58  ;;  %v3364_v37 = vcombine.high %v26478_v15, %v26477_v26  ;;  %v5800_v35 = vcombine.low %v20155_v29, %v20124_v31  ;;  %v20176_v19 = vrot.slane %v5768_v17, %v17494_v44  ;;  %v20189_v15 = vpop.permute.xlu0 %6517  ;;  %v26484_v41 = vld [vmem:[#allocation170_spill] sm:$0xff]  ;;  %v26486_v26 = vld [vmem:[#allocation129_spill] sm:$0xff] }
 0x3a2   : > { %26471 = vst [vmem:[#allocation33_spill] sm:$0xff] %v20149_v11  ;;  %26475 = vst [vmem:[#allocation186_spill] sm:$0xff] %v20164_v50  ;;  %v20179_v53 = vrot.slane %v5784_v60, %v17494_v44  ;;  %v3396_v21 = vcombine.high %v26480_v9, %v26479_v39  ;;  %v3292_v62 = vcombine.high %v26482_v23, %v26481_v22  ;;  %15893 = vrot.lane.b32.xlu1 %v19671_v3, %s17206_s12  ;;  %v26542_v29 = vld [vmem:[#allocation193_spill] sm:$0xff] }
 0x3a3   : > { %26476 = vst [vmem:[#allocation138_spill] sm:$0xff] %v20167_v14  ;;  %v3307_v11 = vcombine.low %v3242_v51, %v3258_v6  ;;  %26483 = vst [vmem:[#allocation127_spill] sm:$0xff] %v20189_v15  ;;  %v3411_v17 = vcombine.low %v20059_v40, %v3362_v63  ;;  %v3260_v60 = vcombine.high %v26485_v45, %v26484_v41  ;;  %15948 = vrot.lane.b32.xlu0 %v26486_v26, %s17202_s8  ;;  %v26487_v14 = vld [vmem:[#allocation169_spill] sm:$0xff]  ;;  %v26488_v45 = vld [vmem:[#allocation168_spill] sm:$0xff]  ;;  %v20211_v3 = vpop.permute.xlu1 %5546 }
 0x3a4   : > { %v3394_v61 = vrot.slane %v3380_v27, %v17494_v44  ;;  %v5832_v16 = vcombine.low %v20176_v19, %v20179_v53  ;;  %v3412_v39 = vcombine.high %v20059_v40, %v3362_v63  ;;  %v3275_v9 = vcombine.low %v3210_v18, %v3226_v5  ;;  %26491 = vst [vmem:[#allocation61_spill] sm:$0xff] %v20211_v3  ;;  %v26504_v26 = vld [vmem:[#allocation187_spill] sm:$0xff] }
 0x3a5   : > { %v3276_v22 = vcombine.high %v3210_v18, %v3226_v5  ;;  %v3308_v23 = vcombine.high %v3242_v51, %v3258_v6  ;;  %v3378_v50 = vrot.slane %v3364_v37, %v17494_v44  ;;  %v3428_v41 = vcombine.high %v26488_v45, %v26487_v14  ;;  %v20218_v18 = vpop.permute.xlu0 %6521  ;;  %v26494_v5 = vld [vmem:[#allocation179_spill] sm:$0xff]  ;;  %v26495_v51 = vld [vmem:[#allocation17_spill] sm:$0xff] }
 0x3a6   : > { %v20206_v27 = vrot.slane %v5800_v35, %v17507_v58  ;;  %v20209_v24 = vrot.slane %v5832_v16, %v17507_v58  ;;  %v20214_v40 = vrot.slane %v3396_v21, %v17507_v58  ;;  %v3306_v63 = vrot.slane %v3292_v62, %v17507_v58  ;;  %26493 = vst [vmem:[#allocation139_spill] sm:$0xff] %v20218_v18  ;;  %v26497_v21 = vld [vmem:[#allocation216_spill] sm:$0xff] }
 0x3a7   : > { %v3315_v6 = vrot.slane %v3307_v11, %v17507_v58  ;;  %v3324_v14 = vcombine.high %v26495_v51, %v26494_v5  ;;  %v20223_v37 = vrot.slane %v3411_v17, %v17507_v58  ;;  %v3274_v16 = vrot.slane %v3260_v60, %v17507_v58  ;;  %15903 = vrot.lane.b32.xlu1 %v26497_v21, %s17204_s10  ;;  %v26499_v5 = vld [vmem:[#allocation181_spill] sm:$0xff] }
 0x3a8   : > { %26489 = vst [vmem:[#allocation149_spill] sm:$0xff] %v20206_v27  ;;  %26490 = vst [vmem:[#allocation12_spill] sm:$0xff] %v20209_v24  ;;  %v3443_v35 = vcombine.low %v3378_v50, %v3394_v61  ;;  %v3283_v62 = vrot.slane %v3275_v9, %v17507_v58  ;;  %v3444_v11 = vcombine.high %v3378_v50, %v3394_v61  ;;  %15958 = vrot.lane.b32.xlu0 %v19983_v46, %s17201_s7  ;;  %v26502_v9 = vld [vmem:[#allocation58_spill] sm:$0xff]  ;;  %v26503_v61 = vld [vmem:[#allocation59_spill] sm:$0xff] }
 0x3a9   : > { %26492 = vst [vmem:[#allocation143_spill] sm:$0xff] %v20214_v40  ;;  %26496 = vst [vmem:[#allocation146_spill] sm:$0xff] %v20223_v37  ;;  %v20232_v45 = vrot.slane %v3308_v23, %v17507_v58  ;;  %v4834_v51 = vcombine.high %v26499_v5, %v26498_v25  ;;  %v20239_v17 = vrot.slane %v3412_v39, %v17507_v58  ;;  %v20249_v23 = vpop.permute.xlu1 %5550  ;;  %v20253_v5 = vpop.permute.xlu0 %6525  ;;  %v26528_v40 = vld [vmem:[#allocation178_spill] sm:$0xff] }
 0x3aa   : > { %v20242_v60 = vrot.slane %v3276_v22, %v17507_v58  ;;  %v20245_v21 = vrot.slane %v3428_v41, %v17507_v58  ;;  %v5002_v50 = vcombine.high %v26503_v61, %v26502_v9  ;;  %v4818_v25 = vcombine.high %v26505_v48, %v26504_v26  ;;  %26506 = vst [vmem:[#allocation35_spill] sm:$0xff] %v20253_v5  ;;  %v26509_v41 = vld [vmem:[#allocation30_spill] sm:$0xff]  ;;  %v26512_v61 = vld [vmem:[#allocation208_spill] sm:$0xff]  ;;  %v26515_v26 = vld [vmem:[#allocation21_spill] sm:$0xff] }
 0x3ab   : > { %26500 = vst [vmem:[#allocation144_spill] sm:$0xff] %v20239_v17  ;;  %v26507_v46 = vcombine.high %v26448_v43, %v26447_v7  ;;  %v3326_v54 = vcombine.high %v3274_v16, %v3306_v63  ;;  %v3328_v22 = vcombine.high %v3283_v62, %v3315_v6  ;;  %v20259_v56 = vrot.slane %v3443_v35, %v17507_v58  ;;  %v26511_v9 = vld [vmem:[#allocation38_spill] sm:$0xff]  ;;  %v26514_v17 = vld [vmem:[#allocation220_spill] sm:$0xff] }
 0x3ac   : > { %26501 = vst [vmem:[#allocation147_spill] sm:$0xff] %v20245_v21  ;;  %v4866_v47 = vcombine.high %v26510_v57, %v26509_v41  ;;  %v4970_v0 = vcombine.high %v26512_v61, %v26511_v9  ;;  %v4986_v48 = vcombine.high %v26514_v17, %v26513_v32  ;;  %15913 = vrot.lane.b32.xlu1 %v26515_v26, %s17202_s8  ;;  %v26519_v61 = vld [vmem:[#allocation192_spill] sm:$0xff]  ;;  %v26520_v32 = vld [vmem:[#allocation26_spill] sm:$0xff]  ;;  %v26529_v21 = vld [vmem:[#allocation215_spill] sm:$0xff] }
 0x3ad   : > { %v15962_v39 = vpack.i.bf16 %v3324_v14, %v26507_v46  ;;  %26508 = vst [vmem:[#allocation141_spill] sm:$0xff] %v20259_v56  ;;  %v20270_v7 = vrot.slane %v3444_v11, %v17507_v58  ;;  %v20273_v14 = vrot.slane %v4834_v51, %v17494_v44  ;;  %v3330_v57 = vcombine.high %v20242_v60, %v20232_v45  ;;  %v26521_v43 = vld [vmem:[#allocation214_spill] sm:$0xff]  ;;  %v26522_v26 = vld [vmem:[#allocation200_spill] sm:$0xff]  ;;  %v26531_v41 = vld [vmem:[#allocation29_spill] sm:$0xff] }
 0x3ae   : > { %v3325_v35 = vcombine.low %v3274_v16, %v3306_v63  ;;  %v4850_v17 = vcombine.high %v26520_v32, %v26519_v61  ;;  %v4954_v37 = vcombine.high %v26522_v26, %v26521_v43  ;;  %v5016_v11 = vrot.slane %v5002_v50, %v17494_v44  ;;  %v26527_v32 = vld [vmem:[#allocation184_spill] sm:$0xff]  ;;  %v26530_v46 = vld [vmem:[#allocation194_spill] sm:$0xff] }
 0x3af   : > { %26516 = vst [vmem:[#allocation135_spill] sm:$0xff] %v20270_v7  ;;  %15963 = vrot.lane.b32.xlu0 %v15962_v39, %s17206_s12  ;;  %v20285_v7 = vpop.permute.xlu1 %5554  ;;  %v4832_v51 = vrot.slane %v4818_v25, %v17494_v44  ;;  %v20288_v39 = vpop.permute.xlu0 %6529  ;;  %v26525_v63 = vcombine.high %v20010_v55, %v19995_v12  ;;  %v26526_v9 = vcombine.high %v20025_v20, %v19998_v36 }
 0x3b0   : > { %26523 = vst [vmem:[#allocation34_spill] sm:$0xff] %v20285_v7  ;;  %26524 = vst [vmem:[#allocation145_spill] sm:$0xff] %v20288_v39  ;;  %v3327_v61 = vcombine.low %v3283_v62, %v3315_v6  ;;  %v3484_v43 = vcombine.high %v26528_v40, %v26527_v32  ;;  %v4880_v50 = vrot.slane %v4866_v47, %v17494_v44  ;;  %15923 = vrot.lane.b32.xlu1 %v26529_v21, %s17201_s7  ;;  %v26537_v32 = vld [vmem:[#allocation197_spill] sm:$0xff] }
 0x3b1   : > { %v15972_v16 = vpack.i.bf16 %v3326_v54, %v26525_v63  ;;  %v15982_v56 = vpack.i.bf16 %v3328_v22, %v26526_v9  ;;  %v4984_v26 = vrot.slane %v4970_v0, %v17494_v44  ;;  %v5000_v25 = vrot.slane %v4986_v48, %v17494_v44  ;;  %v26534_v22 = vld [vmem:[#allocation231_spill] sm:$0xff]  ;;  %v26535_v48 = vld [vmem:[#allocation230_spill] sm:$0xff] }
 0x3b2   : > { %v4882_v54 = vcombine.high %v26531_v41, %v26530_v46  ;;  %v4897_v63 = vcombine.low %v4832_v51, %v20273_v14  ;;  %v26532_v6 = vcombine.high %v20028_v8, %v20013_v38  ;;  %v26533_v47 = vcombine.low %v20010_v55, %v19995_v12 }
 0x3b3   : > { %15973 = vrot.lane.b32.xlu0 %v15972_v16, %s17204_s10  ;;  %v4864_v62 = vrot.slane %v4850_v17, %v17494_v44  ;;  %v4968_v21 = vrot.slane %v4954_v37, %v17494_v44  ;;  %v5050_v46 = vcombine.high %v26535_v48, %v26534_v22  ;;  %v5065_v41 = vcombine.low %v5000_v25, %v5016_v11  ;;  %v20319_v9 = vpop.permute.xlu1 %5558  ;;  %v26536_v16 = vld [vmem:[#allocation198_spill] sm:$0xff] }
 0x3b4   : > { %v15992_v40 = vpack.i.bf16 %v3330_v57, %v26532_v6  ;;  %v20313_v0 = vpack.i.bf16 %v3325_v35, %v26533_v47  ;;  %v4914_v27 = vcombine.high %v26537_v32, %v26536_v16  ;;  %v5066_v24 = vcombine.high %v5000_v25, %v5016_v11  ;;  %v20323_v57 = vpop.permute.xlu0 %6533  ;;  %v26540_v6 = vld [vmem:[#allocation226_spill] sm:$0xff]  ;;  %6567 = vrot.lane.b32.xlu1 %v26542_v29, %s17211_s15  ;;  %v26548_v32 = vld [vmem:[#allocation205_spill] sm:$0xff] }
 0x3b5   : > { %26538 = vst [vmem:[#allocation221_spill] sm:$0xff] %v20323_v57  ;;  %v26539_v12 = vcombine.low %v20025_v20, %v19998_v36  ;;  %v3329_v37 = vcombine.low %v20242_v60, %v20232_v45  ;;  %v4929_v35 = vcombine.low %v4864_v62, %v4880_v50  ;;  %v4930_v17 = vcombine.high %v4864_v62, %v4880_v50  ;;  %v26541_v47 = vld [vmem:[#allocation62_spill] sm:$0xff] }
 0x3b6   : > { %v5018_v22 = vcombine.high %v26541_v47, %v26540_v6  ;;  %v5033_v48 = vcombine.low %v4968_v21, %v4984_v26  ;;  %v20337_v11 = vrot.slane %v3484_v43, %v17494_v44  ;;  %v4898_v25 = vcombine.high %v4832_v51, %v20273_v14 }
 0x3b7   : > { %v20328_v55 = vpack.i.bf16 %v3327_v61, %v26539_v12  ;;  %v5034_v36 = vcombine.high %v4968_v21, %v4984_v26  ;;  %v6024_v20 = vcombine.low %v20181_v4, %v20249_v23  ;;  %15983 = vrot.lane.b32.xlu0 %v15982_v56, %s17202_s8  ;;  %v20344_v45 = vrot.slane %v4882_v54, %v17507_v58  ;;  %v20355_v43 = vpop.permute.xlu1 %5562  ;;  %v26545_v26 = vld [vmem:[#allocation43_spill] sm:$0xff]  ;;  %v26546_v54 = vld [vmem:[#allocation24_spill] sm:$0xff] }
 0x3b8   : > { %v20347_v60 = vrot.slane %v4897_v63, %v17507_v58  ;;  %v20350_v61 = vrot.slane %v5050_v46, %v17507_v58  ;;  %v20353_v29 = vrot.slane %v5065_v41, %v17507_v58  ;;  %26543 = vst [vmem:[#allocation153_spill] sm:$0xff] %v20355_v43  ;;  %v20358_v14 = vrot.slane %v4914_v27, %v17507_v58  ;;  %v20365_v50 = vpop.permute.xlu0 %6537  ;;  %v26549_v12 = vld [vmem:[#allocation204_spill] sm:$0xff] }
 0x3b9   : > { %v20361_v51 = vrot.slane %v5066_v24, %v17507_v58  ;;  %v6008_v56 = vcombine.low %v20128_v33, %v20211_v3  ;;  %26544 = vst [vmem:[#allocation152_spill] sm:$0xff] %v20365_v50  ;;  %v5082_v63 = vcombine.high %v26546_v54, %v26545_v26  ;;  %v20370_v62 = vrot.slane %v4929_v35, %v17507_v58  ;;  %v26554_v26 = vld [vmem:[#allocation191_spill] sm:$0xff]  ;;  %v26558_v54 = vld [vmem:[#allocation73_spill] sm:$0xff] }
 0x3ba   : > { %v20373_v21 = vrot.slane %v4930_v17, %v17507_v58  ;;  %v20376_v27 = vrot.slane %v5018_v22, %v17507_v58  ;;  %v20379_v24 = vrot.slane %v5033_v48, %v17507_v58  ;;  %15933 = vrot.lane.b32.xlu1 %v19988_v13, %s17205_s11  ;;  %v20384_v46 = vrot.slane %v5034_v36, %v17507_v58  ;;  %v26561_v33 = vld [vmem:[#allocation71_spill] sm:$0xff] }
 0x3bb   : > { %v20387_v41 = vrot.slane %v6024_v20, %v17494_v44  ;;  %v6040_v16 = vcombine.low %v20285_v7, %v20355_v43  ;;  %15993 = vrot.lane.b32.xlu0 %v15992_v40, %s17201_s7  ;;  %v4946_v35 = vcombine.high %v26549_v12, %v26548_v32  ;;  %v20395_v17 = vrot.slane %v4898_v25, %v17507_v58  ;;  %v20399_v6 = vpop.permute.xlu1 %5566  ;;  %v26559_v7 = vld [vmem:[#allocation74_spill] sm:$0xff]  ;;  %v26560_v43 = vld [vmem:[#allocation77_spill] sm:$0xff] }
 0x3bc   : > { %v6629_v13 = vcombine.low %v20218_v18, %v20288_v39  ;;  %v5084_v47 = vcombine.high %v20376_v27, %v20350_v61  ;;  %v5086_v22 = vcombine.high %v20379_v24, %v20353_v29  ;;  %v20406_v48 = vrot.slane %v6008_v56, %v17494_v44  ;;  %v20408_v40 = vpop.permute.xlu0 %6541 }
 0x3bd   : > { %26547 = vst [vmem:[#allocation222_spill] sm:$0xff] %v20387_v41  ;;  %26551 = vst [vmem:[#allocation150_spill] sm:$0xff] %v20408_v40  ;;  %v6056_v25 = vcombine.low %v20319_v9, %v20399_v6  ;;  %v15997_v36 = vpack.i.bf16 %v5082_v63, %v4946_v35  ;;  %v5088_v20 = vcombine.high %v20384_v46, %v20361_v51 }
 0x3be   : > { %26550 = vst [vmem:[#allocation14_spill] sm:$0xff] %v20406_v48  ;;  %v6613_v18 = vcombine.low %v20189_v15, %v20253_v5  ;;  %15943 = vrot.lane.b32.xlu1 %v20007_v34, %s17203_s9  ;;  %v4948_v39 = vcombine.high %v20344_v45, %v20358_v14  ;;  %v4950_v56 = vcombine.high %v20347_v60, %v20370_v62  ;;  %v26553_v5 = vld [vmem:[#allocation55_spill] sm:$0xff] }
 0x3bf   : > { %v26552_v32 = vcombine.low %v20028_v8, %v20013_v38  ;;  %v6072_v63 = vcombine.low %v20406_v48, %v20387_v41  ;;  %v20430_v35 = vrot.slane %v6040_v16, %v17494_v44  ;;  %v20433_v15 = vrot.slane %v6056_v25, %v17494_v44  ;;  %15998 = vrot.lane.b32.xlu0 %v15997_v36, %s17206_s12 }
 0x3c0   : > { %v4952_v34 = vcombine.high %v20395_v17, %v20373_v21  ;;  %v20441_v38 = vrot.slane %v6629_v13, %v17494_v44  ;;  %v6645_v8 = vcombine.low %v20323_v57, %v20408_v40  ;;  %v16007_v16 = vpack.i.bf16 %v5084_v47, %v4948_v39  ;;  %v20451_v36 = vpop.permute.xlu0 %6545 }
 0x3c1   : > { %v20425_v12 = vpack.i.bf16 %v3329_v37, %v26552_v32  ;;  %v20445_v37 = vpop.permute.xlu1 %6519  ;;  %v5785_v32 = vcombine.high %v20044_v10, %v20144_v30  ;;  %v6104_v25 = vcombine.low %v20430_v35, %v20433_v15  ;;  %26557 = vst [vmem:[#allocation48_spill] sm:$0xff] %v20451_v36  ;;  %v16017_v48 = vpack.i.bf16 %v5086_v22, %v4950_v56 }
 0x3c2   : > { %26555 = vst [vmem:[#allocation157_spill] sm:$0xff] %v20441_v38  ;;  %26556 = vst [vmem:[#allocation148_spill] sm:$0xff] %v20445_v37  ;;  %v16027_v41 = vpack.i.bf16 %v5088_v20, %v4952_v34  ;;  %v5617_v13 = vcombine.high %v26559_v7, %v26558_v54  ;;  %v5649_v3 = vcombine.high %v26561_v33, %v26560_v43  ;;  %15953 = vrot.lane.b32.xlu1 %v20022_v42, %s17200_s30  ;;  %v26564_v43 = vld [vmem:[#allocation190_spill] sm:$0xff]  ;;  %v26570_v34 = vld [vmem:[#allocation233_spill] sm:$0xff] }
 0x3c3   : > { %v20458_v57 = vrot.slane %v6613_v18, %v17494_v44  ;;  %v6661_v39 = vcombine.low %v20365_v50, %v20451_v36  ;;  %v5753_v10 = vcombine.high %v19870_v59, %v19944_v2  ;;  %v5769_v30 = vcombine.high %v19978_v1, %v20095_v52  ;;  %16008 = vrot.lane.b32.xlu0 %v16007_v16, %s17204_s10  ;;  %v26563_v18 = vld [vmem:[#allocation81_spill] sm:$0xff]  ;;  %v26587_v50 = vld [vmem:[#allocation42_spill] sm:$0xff] }
 0x3c4   : > { %v20469_v7 = vrot.slane %v6072_v63, %v17507_v58  ;;  %v20472_v33 = vrot.slane %v6104_v25, %v17507_v58  ;;  %v5633_v54 = vcombine.high %v26564_v43, %v26563_v18  ;;  %v20480_v47 = vrot.slane %v6645_v8, %v17494_v44  ;;  %v20494_v56 = vpop.permute.xlu0 %6549  ;;  %v26569_v63 = vld [vmem:[#allocation70_spill] sm:$0xff]  ;;  %v26575_v43 = vld [vmem:[#allocation89_spill] sm:$0xff] }
 0x3c5   : > { %26562 = vst [vmem:[#allocation39_spill] sm:$0xff] %v20458_v57  ;;  %v6677_v42 = vcombine.low %v20458_v57, %v20441_v38  ;;  %v20483_v59 = vrot.slane %v6661_v39, %v17494_v44  ;;  %v20485_v2 = vpop.permute.xlu1 %6523  ;;  %v5737_v1 = vcombine.high %v19829_v28, %v19903_v49  ;;  %v5799_v52 = vrot.slane %v5785_v32, %v17494_v44  ;;  %v26571_v28 = vld [vmem:[#allocation120_spill] sm:$0xff]  ;;  %v26573_v39 = vld [vmem:[#allocation142_spill] sm:$0xff] }
 0x3c6   : > { %26565 = vst [vmem:[#allocation154_spill] sm:$0xff] %v20480_v47  ;;  %26567 = vst [vmem:[#allocation165_spill] sm:$0xff] %v20485_v2  ;;  %v5833_v22 = vcombine.high %v20176_v19, %v20179_v53  ;;  %v5601_v8 = vcombine.high %v26570_v34, %v26569_v63  ;;  %v20499_v16 = vrot.slane %v5617_v13, %v17494_v44  ;;  %15968 = vrot.lane.b32.xlu1 %v20313_v0, %s17205_s11  ;;  %v26572_v19 = vld [vmem:[#allocation108_spill] sm:$0xff] }
 0x3c7   : > { %26566 = vst [vmem:[#allocation172_spill] sm:$0xff] %v20483_v59  ;;  %26568 = vst [vmem:[#allocation159_spill] sm:$0xff] %v20494_v56  ;;  %v20502_v25 = vrot.slane %v5649_v3, %v17494_v44  ;;  %v6709_v49 = vcombine.low %v20480_v47, %v20483_v59  ;;  %v5697_v53 = vcombine.high %v26572_v19, %v26571_v28  ;;  %16018 = vrot.lane.b32.xlu0 %v16017_v48, %s17202_s8  ;;  %v26574_v3 = vld [vmem:[#allocation79_spill] sm:$0xff]  ;;  %v26580_v19 = vld [vmem:[#allocation12_spill] sm:$0xff] }
 0x3c8   : > { %v5767_v32 = vrot.slane %v5753_v10, %v17494_v44  ;;  %v5801_v18 = vcombine.high %v26573_v39, %v20124_v31  ;;  %v5783_v13 = vrot.slane %v5769_v30, %v17494_v44  ;;  %v5665_v63 = vcombine.high %v26575_v43, %v26574_v3  ;;  %v20530_v48 = vpop.permute.xlu0 %6553  ;;  %v26581_v39 = vld [vmem:[#allocation149_spill] sm:$0xff]  ;;  %v26583_v43 = vld [vmem:[#allocation22_spill] sm:$0xff]  ;;  %v26591_v57 = vld [vmem:[#allocation56_spill] sm:$0xff] }
 0x3c9   : > { %v5647_v34 = vrot.slane %v5633_v54, %v17494_v44  ;;  %v20519_v20 = vrot.slane %v6677_v42, %v17507_v58  ;;  %v20522_v0 = vrot.slane %v6709_v49, %v17507_v58  ;;  %v20524_v28 = vpop.permute.xlu1 %6527  ;;  %v5751_v10 = vrot.slane %v5737_v1, %v17494_v44  ;;  %26579 = vst [vmem:[#allocation16_spill] sm:$0xff] %v20530_v48  ;;  %v26582_v54 = vld [vmem:[#allocation189_spill] sm:$0xff]  ;;  %v26586_v59 = vld [vmem:[#allocation54_spill] sm:$0xff] }
 0x3ca   : > { %26578 = vst [vmem:[#allocation158_spill] sm:$0xff] %v20524_v28  ;;  %v20528_v31 = vrot.slane %v5833_v22, %v17507_v58  ;;  %v5848_v30 = vcombine.low %v5783_v13, %v5799_v52  ;;  %v5865_v3 = vcombine.high %v26581_v39, %v26580_v19  ;;  %v3516_v42 = vcombine.high %v26583_v43, %v26582_v54  ;;  %v26584_v54 = vld [vmem:[#allocation87_spill] sm:$0xff] }
 0x3cb   : > { %26576 = vst [vmem:[#allocation155_spill] sm:$0xff] %v20519_v20  ;;  %26577 = vst [vmem:[#allocation161_spill] sm:$0xff] %v20522_v0  ;;  %v5615_v56 = vrot.slane %v5601_v8, %v17494_v44  ;;  %v5712_v49 = vcombine.low %v5647_v34, %v20502_v25  ;;  %15978 = vrot.lane.b32.xlu1 %v20328_v55, %s17203_s9  ;;  %v20543_v1 = vrot.slane %v5697_v53, %v17507_v58  ;;  %v26585_v43 = vld [vmem:[#allocation103_spill] sm:$0xff] }
 0x3cc   : > { %v20546_v22 = vrot.slane %v5801_v18, %v17507_v58  ;;  %v5816_v48 = vcombine.low %v5751_v10, %v5767_v32  ;;  %16028 = vrot.lane.b32.xlu0 %v16027_v41, %s17201_s7  ;;  %v5729_v8 = vcombine.high %v26585_v43, %v26584_v54  ;;  %v3500_v36 = vcombine.high %v26587_v50, %v26586_v59  ;;  %v20564_v41 = vpop.permute.xlu0 %6557 }
 0x3cd   : > { %v20554_v47 = vrot.slane %v5665_v63, %v17507_v58  ;;  %v5680_v55 = vcombine.low %v5615_v56, %v20499_v16  ;;  %v20557_v20 = vpop.permute.xlu1 %6531  ;;  %v5083_v53 = vcombine.low %v20376_v27, %v20350_v61  ;;  %v5849_v18 = vcombine.high %v5783_v13, %v5799_v52  ;;  %26589 = vst [vmem:[#allocation167_spill] sm:$0xff] %v20564_v41  ;;  %v26590_v63 = vld [vmem:[#allocation60_spill] sm:$0xff] }
 0x3ce   : > { %26588 = vst [vmem:[#allocation163_spill] sm:$0xff] %v20557_v20  ;;  %v20562_v0 = vrot.slane %v5848_v30, %v17507_v58  ;;  %v16032_v40 = vpack.i.bf16 %v5865_v3, %v5729_v8  ;;  %v5867_v50 = vcombine.high %v20546_v22, %v20528_v31  ;;  %v3530_v59 = vrot.slane %v3516_v42, %v17494_v44 }
 0x3cf   : > { %v3564_v38 = vcombine.high %v26591_v57, %v26590_v63  ;;  %v5713_v54 = vcombine.high %v5647_v34, %v20502_v25  ;;  %15988 = vrot.lane.b32.xlu1 %v20425_v12, %s17200_s30  ;;  %v4947_v61 = vcombine.low %v20344_v45, %v20358_v14  ;;  %v20577_v27 = vrot.slane %v5712_v49, %v17507_v58 }
 0x3d0   : > { %v5817_v52 = vcombine.high %v5751_v10, %v5767_v32  ;;  %v20580_v13 = vrot.slane %v5816_v48, %v17507_v58  ;;  %16033 = vrot.lane.b32.xlu0 %v16032_v40, %s17206_s12  ;;  %v5731_v57 = vcombine.high %v20554_v47, %v20543_v1  ;;  %v3514_v25 = vrot.slane %v3500_v36, %v17494_v44  ;;  %v20597_v40 = vpop.permute.xlu0 %6561 }
 0x3d1   : > { %v5681_v34 = vcombine.high %v5615_v56, %v20499_v16  ;;  %v20587_v12 = vpop.permute.xlu1 %6535  ;;  %v16002_v30 = vpack.i.bf16 %v5083_v53, %v4947_v61  ;;  %v5085_v45 = vcombine.low %v20379_v24, %v20353_v29  ;;  %v20592_v14 = vrot.slane %v5680_v55, %v17507_v58  ;;  %26593 = vst [vmem:[#allocation164_spill] sm:$0xff] %v20597_v40  ;;  %v26594_v56 = vld [vmem:[#allocation171_spill] sm:$0xff]  ;;  %v26595_v16 = vld [vmem:[#allocation180_spill] sm:$0xff] }
 0x3d2   : > { %26592 = vst [vmem:[#allocation162_spill] sm:$0xff] %v20587_v12  ;;  %v20595_v32 = vrot.slane %v5849_v18, %v17507_v58  ;;  %v16042_v10 = vpack.i.bf16 %v5867_v50, %v5731_v57  ;;  %v5869_v36 = vcombine.high %v20580_v13, %v20562_v0  ;;  %v26596_v48 = vcombine.high %v26594_v56, %v26595_v16  ;;  %v26612_v56 = vld [vmem:[#allocation40_spill] sm:$0xff] }
 0x3d3   : > { %v3579_v42 = vcombine.low %v3514_v25, %v3530_v59  ;;  %v3580_v49 = vcombine.high %v3514_v25, %v3530_v59  ;;  %16003 = vrot.lane.b32.xlu1 %v16002_v30, %s17205_s11  ;;  %v4949_v29 = vcombine.low %v20347_v60, %v20370_v62  ;;  %v20609_v24 = vrot.slane %v3564_v38, %v17507_v58 }
 0x3d4   : > { %v3482_v3 = vrot.slane %v26596_v48, %v17494_v44  ;;  %v20612_v8 = vrot.slane %v5713_v54, %v17507_v58  ;;  %v20615_v55 = vrot.slane %v5817_v52, %v17507_v58  ;;  %16043 = vrot.lane.b32.xlu0 %v16042_v10, %s17204_s10  ;;  %v5733_v53 = vcombine.high %v20592_v14, %v20577_v27  ;;  %v20635_v61 = vpop.permute.xlu0 %15788  ;;  %v26601_v10 = vld [vmem:[#allocation141_spill] sm:$0xff] }
 0x3d5   : > { %v20622_v59 = vpop.permute.xlu1 %6539  ;;  %v16012_v60 = vpack.i.bf16 %v5085_v45, %v4949_v29  ;;  %v5087_v62 = vcombine.low %v20384_v46, %v20361_v51  ;;  %v26598_v38 = vcombine.high %v26554_v26, %v26553_v5  ;;  %v20633_v63 = vrot.slane %v5681_v34, %v17507_v58  ;;  %v26599_v26 = vld [vmem:[#allocation147_spill] sm:$0xff] }
 0x3d6   : > { %v3547_v18 = vcombine.low %v3482_v3, %v20337_v11  ;;  %v3548_v50 = vcombine.high %v3482_v3, %v20337_v11  ;;  %26597 = vst [vmem:[#allocation160_spill] sm:$0xff] %v20622_v59  ;;  %v16052_v52 = vpack.i.bf16 %v5869_v36, %v5733_v53  ;;  %v5871_v11 = vcombine.high %v20615_v55, %v20595_v32  ;;  %v26600_v46 = vld [vmem:[#allocation143_spill] sm:$0xff]  ;;  %v26602_v36 = vld [vmem:[#allocation146_spill] sm:$0xff] }
 0x3d7   : > { %v20630_v54 = vrot.slane %v26598_v38, %v17507_v58  ;;  %v20640_v57 = vrot.slane %v3579_v42, %v17507_v58  ;;  %v20643_v51 = vrot.slane %v3580_v49, %v17507_v58  ;;  %16013 = vrot.lane.b32.xlu1 %v16012_v60, %s17203_s9  ;;  %v4951_v5 = vcombine.low %v20395_v17, %v20373_v21  ;;  %v26604_v53 = vld [vmem:[#allocation135_spill] sm:$0xff]  ;;  %v26605_v60 = vld [vmem:[#allocation144_spill] sm:$0xff] }
 0x3d8   : > { %v3461_v25 = vcombine.low %v26600_v46, %v26599_v26  ;;  %v6901_v34 = vcombine.low %v20485_v2, %v20557_v20  ;;  %16053 = vrot.lane.b32.xlu0 %v16052_v52, %s17202_s8  ;;  %v5735_v30 = vcombine.high %v20633_v63, %v20612_v8  ;;  %v20660_v16 = vrot.slane %v3547_v18, %v17507_v58  ;;  %v20671_v49 = vpop.permute.xlu0 %15798  ;;  %v26606_v18 = vld [vmem:[#allocation175_spill] sm:$0xff]  ;;  %v26607_v52 = vld [vmem:[#allocation174_spill] sm:$0xff] }
 0x3d9   : > { %v3597_v45 = vcombine.low %v20630_v54, %v20609_v24  ;;  %v20663_v21 = vrot.slane %v3548_v50, %v17507_v58  ;;  %v20665_v17 = vpop.permute.xlu1 %6543  ;;  %v16022_v48 = vpack.i.bf16 %v5087_v62, %v4951_v5  ;;  %v5866_v3 = vcombine.low %v20546_v22, %v20528_v31  ;;  %v26609_v5 = vld [vmem:[#allocation23_spill] sm:$0xff] }
 0x3da   : > { %26603 = vst [vmem:[#allocation166_spill] sm:$0xff] %v20665_v17  ;;  %v6885_v42 = vcombine.low %v20445_v37, %v20524_v28  ;;  %v16062_v29 = vpack.i.bf16 %v5871_v11, %v5735_v30  ;;  %v5730_v50 = vcombine.low %v20554_v47, %v20543_v1  ;;  %v3599_v31 = vcombine.low %v20660_v16, %v20640_v57  ;;  %v26608_v11 = vld [vmem:[#allocation88_spill] sm:$0xff]  ;;  %v26611_v1 = vld [vmem:[#allocation223_spill] sm:$0xff] }
 0x3db   : > { %16023 = vrot.lane.b32.xlu1 %v16022_v48, %s17200_s30  ;;  %v5274_v30 = vcombine.high %v26609_v5, %v26608_v11  ;;  %v20689_v38 = vrot.slane %v6901_v34, %v17494_v44  ;;  %v6917_v48 = vcombine.low %v20587_v12, %v20665_v17  ;;  %v20694_v47 = vpack.i.bf16 %v3597_v45, %v3461_v25  ;;  %v26614_v11 = vld [vmem:[#allocation53_spill] sm:$0xff]  ;;  %v26616_v37 = vld [vmem:[#allocation72_spill] sm:$0xff]  ;;  %v26619_v17 = vld [vmem:[#allocation75_spill] sm:$0xff] }
 0x3dc   : > { %16063 = vrot.lane.b32.xlu0 %v16062_v29, %s17201_s7  ;;  %v5138_v2 = vcombine.high %v26612_v56, %v26611_v1  ;;  %v16037_v20 = vpack.i.bf16 %v5866_v3, %v5730_v50  ;;  %v5868_v62 = vcombine.low %v20580_v13, %v20562_v0  ;;  %v26615_v5 = vld [vmem:[#allocation49_spill] sm:$0xff]  ;;  %v26617_v28 = vld [vmem:[#allocation232_spill] sm:$0xff]  ;;  %v20709_v25 = vrot.slane %v6885_v42, %v17494_v44  ;;  %v20711_v45 = vpop.permute.xlu0 %15808  ;;  %v26621_v3 = vld [vmem:[#allocation211_spill] sm:$0xff] }
 0x3dd   : > { %26610 = vst [vmem:[#allocation15_spill] sm:$0xff] %v20689_v38  ;;  %v20698_v22 = vpop.permute.xlu1 %6547  ;;  %v3596_v34 = vcombine.high %v26615_v5, %v26614_v11  ;;  %v5242_v41 = vcombine.high %v26617_v28, %v26616_v37  ;;  %v26618_v12 = vld [vmem:[#allocation25_spill] sm:$0xff]  ;;  %v26622_v50 = vld [vmem:[#allocation199_spill] sm:$0xff]  ;;  %v26624_v1 = vld [vmem:[#allocation218_spill] sm:$0xff]  ;;  %v5732_v28 = vcombine.low %v20592_v14, %v20577_v27  ;;  %v20728_v42 = vrot.slane %v6917_v48, %v17494_v44 }
 0x3de   : > { %26613 = vst [vmem:[#allocation177_spill] sm:$0xff] %v20698_v22  ;;  %v5258_v29 = vcombine.high %v26619_v17, %v26618_v12  ;;  %26620 = vst [vmem:[#allocation176_spill] sm:$0xff] %v20709_v25  ;;  %v6933_v56 = vcombine.low %v20622_v59, %v20698_v22  ;;  %v5106_v0 = vcombine.high %v26622_v50, %v26621_v3  ;;  %v26623_v13 = vld [vmem:[#allocation57_spill] sm:$0xff]  ;;  %v26625_v11 = vld [vmem:[#allocation78_spill] sm:$0xff] }
 0x3df   : > { %v5122_v40 = vcombine.high %v26624_v1, %v26623_v13  ;;  %v26626_v5 = vld [vmem:[#allocation227_spill] sm:$0xff]  ;;  %16038 = vrot.lane.b32.xlu1 %v16037_v20, %s17205_s11  ;;  %v5288_v12 = vrot.slane %v5274_v30, %v17494_v44  ;;  %v6949_v17 = vcombine.low %v20709_v25, %v20689_v38  ;;  %26627 = vst [vmem:[#allocation170_spill] sm:$0xff] %v20728_v42  ;;  %v26629_v50 = vld [vmem:[#allocation128_spill] sm:$0xff] }
 0x3e0   : > { %v5226_v37 = vcombine.high %v26626_v5, %v26625_v11  ;;  %v20731_v3 = vrot.slane %v6933_v56, %v17494_v44  ;;  %16073 = vrot.lane.b32.xlu0 %v26629_v50, %s17205_s11  ;;  %v26630_v11 = vld [vmem:[#allocation206_spill] sm:$0xff]  ;;  %v26631_v5 = vld [vmem:[#allocation195_spill] sm:$0xff]  ;;  %v16047_v27 = vpack.i.bf16 %v5868_v62, %v5732_v28  ;;  %v5870_v14 = vcombine.low %v20615_v55, %v20595_v32  ;;  %v20748_v25 = vpop.permute.xlu0 %15818  ;;  %v26645_v59 = vld [vmem:[#allocation224_spill] sm:$0xff] }
 0x3e1   : > { %v5090_v20 = vcombine.high %v26631_v5, %v26630_v11  ;;  %v20737_v13 = vpop.permute.xlu1 %6551  ;;  %v3598_v30 = vcombine.high %v20630_v54, %v20609_v24  ;;  %v5152_v48 = vrot.slane %v5138_v2, %v17494_v44  ;;  %v5256_v56 = vrot.slane %v5242_v41, %v17494_v44  ;;  %v26633_v24 = vld [vmem:[#allocation76_spill] sm:$0xff]  ;;  %v26639_v5 = vld [vmem:[#allocation46_spill] sm:$0xff] }
 0x3e2   : > { %26628 = vst [vmem:[#allocation173_spill] sm:$0xff] %v20731_v3  ;;  %26632 = vst [vmem:[#allocation129_spill] sm:$0xff] %v20737_v13  ;;  %v5272_v1 = vrot.slane %v5258_v29, %v17494_v44  ;;  %v6981_v50 = vcombine.low %v20728_v42, %v20731_v3  ;;  %v5120_v11 = vrot.slane %v5106_v0, %v17494_v44  ;;  %v26634_v41 = vld [vmem:[#allocation80_spill] sm:$0xff]  ;;  %v26637_v0 = vld [vmem:[#allocation119_spill] sm:$0xff] }
 0x3e3   : > { %v5136_v62 = vrot.slane %v5122_v40, %v17494_v44  ;;  %v5240_v32 = vrot.slane %v5226_v37, %v17494_v44  ;;  %16048 = vrot.lane.b32.xlu1 %v16047_v27, %s17203_s9  ;;  %v5734_v2 = vcombine.low %v20633_v63, %v20612_v8  ;;  %v5322_v55 = vcombine.high %v26634_v41, %v26633_v24  ;;  %v26638_v37 = vld [vmem:[#allocation45_spill] sm:$0xff]  ;;  %v26642_v42 = vld [vmem:[#allocation82_spill] sm:$0xff] }
 0x3e4   : > { %v5337_v54 = vcombine.low %v5272_v1, %v5288_v12  ;;  %v20759_v29 = vrot.slane %v6949_v17, %v17507_v58  ;;  %v20762_v28 = vrot.slane %v6981_v50, %v17507_v58  ;;  %16083 = vrot.lane.b32.xlu0 %v26637_v0, %s17203_s9  ;;  %v5104_v40 = vrot.slane %v5090_v20, %v17494_v44  ;;  %v26641_v41 = vld [vmem:[#allocation69_spill] sm:$0xff]  ;;  %v20775_v13 = vpop.permute.xlu0 %15823  ;;  %v26644_v0 = vld [vmem:[#allocation52_spill] sm:$0xff]  ;;  %v26663_v50 = vld [vmem:[#allocation123_spill] sm:$0xff] }
 0x3e5   : > { %v5186_v27 = vcombine.high %v26639_v5, %v26638_v37  ;;  %v5338_v38 = vcombine.high %v5272_v1, %v5288_v12  ;;  %v20769_v8 = vpop.permute.xlu1 %6555  ;;  %v16057_v63 = vpack.i.bf16 %v5870_v14, %v5734_v2  ;;  %v5201_v24 = vcombine.low %v5136_v62, %v5152_v48  ;;  %26643 = vst [vmem:[#allocation44_spill] sm:$0xff] %v20775_v13  ;;  %v26647_v5 = vld [vmem:[#allocation125_spill] sm:$0xff] }
 0x3e6   : > { %26635 = vst [vmem:[#allocation169_spill] sm:$0xff] %v20759_v29  ;;  %26636 = vst [vmem:[#allocation168_spill] sm:$0xff] %v20762_v28  ;;  %v5290_v17 = vcombine.high %v26642_v42, %v26641_v41  ;;  %v5305_v3 = vcombine.low %v5240_v32, %v5256_v56  ;;  %v5154_v20 = vcombine.high %v26645_v59, %v26644_v0 }
 0x3e7   : > { %26640 = vst [vmem:[#allocation216_spill] sm:$0xff] %v20769_v8  ;;  %v5202_v22 = vcombine.high %v5136_v62, %v5152_v48  ;;  %v5306_v43 = vcombine.high %v5240_v32, %v5256_v56  ;;  %16058 = vrot.lane.b32.xlu1 %v16057_v63, %s17200_s30  ;;  %v26646_v12 = vcombine.low %v26602_v36, %v26601_v10  ;;  %v26667_v8 = vld [vmem:[#allocation133_spill] sm:$0xff] }
 0x3e8   : > { %v5169_v1 = vcombine.low %v5104_v40, %v5120_v11  ;;  %v5170_v2 = vcombine.high %v5104_v40, %v5120_v11  ;;  %v20784_v42 = vrot.slane %v5322_v55, %v17507_v58  ;;  %v20787_v37 = vrot.slane %v5337_v54, %v17507_v58  ;;  %16093 = vrot.lane.b32.xlu0 %v26647_v5, %s17200_s30  ;;  %v20824_v0 = vpop.permute.xlu0 %15833  ;;  %v26657_v5 = vld [vmem:[#allocation98_spill] sm:$0xff] }
 0x3e9   : > { %v16117_v14 = vpack.i.bf16 %v3599_v31, %v26646_v12  ;;  %v20792_v59 = vrot.slane %v5338_v38, %v17507_v58  ;;  %v20794_v48 = vpop.permute.xlu1 %6559  ;;  %v26649_v56 = vcombine.low %v26605_v60, %v26604_v53  ;;  %v26650_v31 = vcombine.low %v20663_v21, %v20643_v51  ;;  %26653 = vst [vmem:[#allocation58_spill] sm:$0xff] %v20824_v0 }
 0x3ea   : > { %26648 = vst [vmem:[#allocation181_spill] sm:$0xff] %v20794_v48  ;;  %v26651_v62 = vcombine.high %v26607_v52, %v26606_v18  ;;  %v26652_v55 = vcombine.high %v26600_v46, %v26599_v26  ;;  %v20813_v38 = vrot.slane %v5186_v27, %v17507_v58  ;;  %v20816_v40 = vrot.slane %v5201_v24, %v17507_v58  ;;  %v26666_v48 = vld [vmem:[#allocation185_spill] sm:$0xff]  ;;  %v26675_v52 = vld [vmem:[#allocation34_spill] sm:$0xff] }
 0x3eb   : > { %v16127_v11 = vpack.i.bf16 %v26650_v31, %v26649_v56  ;;  %v20819_v63 = vrot.slane %v5290_v17, %v17507_v58  ;;  %v20822_v41 = vrot.slane %v5305_v3, %v17507_v58  ;;  %v20830_v26 = vrot.slane %v5202_v22, %v17507_v58  ;;  %v26655_v17 = vld [vmem:[#allocation114_spill] sm:$0xff]  ;;  %v26674_v18 = vld [vmem:[#allocation153_spill] sm:$0xff] }
 0x3ec   : > { %v20805_v32 = vpack.i.bf16 %v3596_v34, %v26651_v62  ;;  %v20810_v54 = vpack.i.bf16 %v3598_v30, %v26652_v55  ;;  %v20827_v34 = vrot.slane %v5154_v20, %v17507_v58  ;;  %v20833_v46 = vrot.slane %v5306_v43, %v17507_v58  ;;  %v26654_v30 = vld [vmem:[#allocation124_spill] sm:$0xff]  ;;  %16108 = vrot.lane.b32.xlu0 %v20694_v47, %s17205_s11  ;;  %v26656_v20 = vld [vmem:[#allocation86_spill] sm:$0xff]  ;;  %v26660_v62 = vld [vmem:[#allocation109_spill] sm:$0xff]  ;;  %v20863_v29 = vpop.permute.xlu0 %15843 }
 0x3ed   : > { %16068 = vrot.lane.b32.xlu1 %v26654_v30, %s17206_s12  ;;  %v20840_v3 = vrot.slane %v5169_v1, %v17507_v58  ;;  %v20843_v24 = vrot.slane %v5170_v2, %v17507_v58  ;;  %v5355_v22 = vcombine.low %v20819_v63, %v20784_v42  ;;  %v5357_v43 = vcombine.low %v20822_v41, %v20787_v37  ;;  %v26658_v56 = vld [vmem:[#allocation122_spill] sm:$0xff]  ;;  %v20855_v1 = vpop.permute.xlu1 %6563  ;;  %v26662_v30 = vld [vmem:[#allocation188_spill] sm:$0xff] }
 0x3ee   : > { %v5873_v12 = vcombine.high %v26656_v20, %v26655_v17  ;;  %v5889_v31 = vcombine.high %v26658_v56, %v26657_v5  ;;  %26659 = vst [vmem:[#allocation59_spill] sm:$0xff] %v20855_v1  ;;  %v5359_v2 = vcombine.low %v20833_v46, %v20792_v59  ;;  %v26661_v47 = vld [vmem:[#allocation126_spill] sm:$0xff]  ;;  %v5921_v27 = vcombine.high %v26663_v50, %v26662_v30  ;;  %v26665_v5 = vld [vmem:[#allocation140_spill] sm:$0xff] }
 0x3ef   : > { %v5905_v55 = vcombine.high %v26661_v47, %v26660_v62  ;;  %26664 = vst [vmem:[#allocation187_spill] sm:$0xff] %v20863_v29  ;;  %v5219_v17 = vcombine.low %v20827_v34, %v20813_v38  ;;  %v5221_v20 = vcombine.low %v20840_v3, %v20816_v40  ;;  %v5223_v56 = vcombine.low %v20843_v24, %v20830_v26 }
 0x3f0   : > { %v15791_v62 = vunpack.i.h.bf16 %v20635_v61  ;;  %v15790_v50 = vunpack.i.l.bf16 %v20635_v61  ;;  %16118 = vrot.lane.b32.xlu0 %v16117_v14, %s17203_s9  ;;  %v20877_v28 = vrot.slane %v5873_v12, %v17494_v44  ;;  %v5937_v1 = vcombine.high %v26667_v8, %v26666_v48  ;;  %v26669_v12 = vld [vmem:[#allocation13_spill] sm:$0xff] }
 0x3f1   : > { %16078 = vrot.lane.b32.xlu1 %v26665_v5, %s17204_s10  ;;  %v16142_v47 = vpack.i.bf16 %v5355_v22, %v5219_v17  ;;  %v16152_v30 = vpack.i.bf16 %v5357_v43, %v5221_v20  ;;  %v20880_v5 = vrot.slane %v5889_v31, %v17494_v44  ;;  %v15794_v29 = vpop.permute.xlu1 %15793  ;;  %v20884_v0 = vpack.i.bf16 %v5359_v2, %v5223_v56  ;;  %v20894_v43 = vpop.permute.xlu0 %15853  ;;  %v26670_v31 = vld [vmem:[#allocation132_spill] sm:$0xff]  ;;  %v26672_v20 = vld [vmem:[#allocation61_spill] sm:$0xff] }
 0x3f2   : > { %v20887_v61 = vrot.slane %v5905_v55, %v17494_v44  ;;  %v20890_v14 = vrot.slane %v5921_v27, %v17494_v44  ;;  %v6057_v22 = vcombine.high %v20319_v9, %v20399_v6  ;;  %26668 = vst [vmem:[#allocation18_spill] sm:$0xff] %v20894_v43  ;;  %v5969_v17 = vcombine.high %v26670_v31, %v26669_v12  ;;  %v26671_v55 = vld [vmem:[#allocation134_spill] sm:$0xff]  ;;  %v26673_v27 = vld [vmem:[#allocation11_spill] sm:$0xff]  ;;  %v26677_v43 = vld [vmem:[#allocation32_spill] sm:$0xff] }
 0x3f3   : > { %v6025_v8 = vcombine.high %v20181_v4, %v20249_v23  ;;  %v15796_v48 = vunpack.i.h.bf16 %v15794_v29  ;;  %v15795_v2 = vunpack.i.l.bf16 %v15794_v29  ;;  %v6009_v56 = vcombine.high %v26673_v27, %v26672_v20  ;;  %v26676_v6 = vld [vmem:[#allocation31_spill] sm:$0xff]  ;;  %v26680_v31 = vld [vmem:[#allocation20_spill] sm:$0xff] }
 0x3f4   : > { %v6041_v9 = vcombine.high %v26675_v52, %v26674_v18  ;;  %v26678_v13 = vcombine.low %v26676_v6, %v26677_v43  ;;  %v26679_v12 = vld [vmem:[#allocation19_spill] sm:$0xff]  ;;  %16128 = vrot.lane.b32.xlu0 %v16127_v11, %s17200_s30  ;;  %v15801_v23 = vunpack.i.h.bf16 %v20671_v49  ;;  %v15800_v29 = vunpack.i.l.bf16 %v20671_v49 }
 0x3f5   : > { %16088 = vrot.lane.b32.xlu1 %v26671_v55, %s17202_s8  ;;  %v26681_v39 = vcombine.low %v26679_v12, %v26680_v31  ;;  %v15804_v52 = vpop.permute.xlu1 %15803  ;;  %v6071_v43 = vrot.slane %v6057_v22, %v17494_v44  ;;  %v5984_v11 = vcombine.low %v20887_v61, %v20890_v14  ;;  %v26683_v22 = vld [vmem:[#allocation222_spill] sm:$0xff]  ;;  %v6023_v12 = vrot.slane %v6009_v56, %v17494_v44 }
 0x3f6   : > { %v2703_v19 = vsel %vm2009_vm5, %v26678_v13, %v15791_v62  ;;  %v6105_v13 = vcombine.high %v20430_v35, %v20433_v15  ;;  %v20922_v62 = vpop.permute.xlu0 %15863  ;;  %v15806_v20 = vunpack.i.h.bf16 %v15804_v52  ;;  %v6055_v15 = vrot.slane %v6041_v9, %v17494_v44 }
 0x3f7   : > { %v2702_v4 = vsel %vm2009_vm5, %v26681_v39, %v15790_v50  ;;  %v2705_v55 = vsel %vm2012_vm6, %v2703_v19, %v15796_v48  ;;  %v15805_v39 = vunpack.i.l.bf16 %v15804_v52  ;;  %v6039_v50 = vrot.slane %v6025_v8, %v17494_v44  ;;  %v26682_v48 = vld [vmem:[#allocation33_spill] sm:$0xff] }
 0x3f8   : > { %v2704_v18 = vsel %vm2012_vm6, %v2702_v4, %v15795_v2  ;;  %v2707_v19 = vsel %vm2015_vm7, %v2705_v55, %v15801_v23  ;;  %v26684_v2 = vld [vmem:[#allocation14_spill] sm:$0xff]  ;;  %16143 = vrot.lane.b32.xlu0 %v16142_v47, %s17205_s11  ;;  %v20938_v8 = vrot.slane %v5969_v17, %v17507_v58  ;;  %v15811_v31 = vunpack.i.h.bf16 %v20711_v45 }
 0x3f9   : > { %v2706_v49 = vsel %vm2015_vm7, %v2704_v18, %v15800_v29  ;;  %16098 = vrot.lane.b32.xlu1 %v26682_v48, %s17201_s7  ;;  %v6073_v27 = vcombine.high %v26684_v2, %v26683_v22  ;;  %v2709_v6 = vsel %vm2018_vm8, %v2707_v19, %v15806_v20  ;;  %v15810_v4 = vunpack.i.l.bf16 %v20711_v45  ;;  %v15814_v23 = vpop.permute.xlu1 %15813 }
 0x3fa   : > { %v2708_v35 = vsel %vm2018_vm8, %v2706_v49, %v15805_v39  ;;  %v20944_v29 = vrot.slane %v6105_v13, %v17507_v58  ;;  %v6120_v9 = vcombine.low %v6055_v15, %v6071_v43  ;;  %v20946_v55 = vpop.permute.xlu0 %15873  ;;  %v15816_v18 = vunpack.i.h.bf16 %v15814_v23 }
 0x3fb   : > { %v15815_v52 = vunpack.i.l.bf16 %v15814_v23  ;;  %v15821_v47 = vunpack.i.h.bf16 %v20748_v25  ;;  %v15820_v17 = vunpack.i.l.bf16 %v20748_v25  ;;  %v2710_v20 = vsel %vm2021_vm9, %v2708_v35, %v15810_v4 }
 0x3fc   : > { %v2711_v56 = vsel %vm2021_vm9, %v2709_v6, %v15811_v31  ;;  %v20955_v45 = vrot.slane %v6073_v27, %v17507_v58  ;;  %v6088_v13 = vcombine.low %v6023_v12, %v6039_v50  ;;  %16153 = vrot.lane.b32.xlu0 %v16152_v30, %s17203_s9  ;;  %v20961_v19 = vrot.slane %v5937_v1, %v17507_v58 }
 0x3fd   : > { %16103 = vrot.lane.b32.xlu1 %v20805_v32, %s17206_s12  ;;  %v2712_v39 = vsel %vm2024_vm10, %v2710_v20, %v15815_v52  ;;  %v2713_v49 = vsel %vm2024_vm10, %v2711_v56, %v15816_v18  ;;  %v5952_v25 = vcombine.low %v20877_v28, %v20880_v5  ;;  %v20965_v48 = vpop.permute.xlu1 %15828  ;;  %v6121_v2 = vcombine.high %v6055_v15, %v6071_v43  ;;  %v26686_v18 = vld [vmem:[#allocation121_spill] sm:$0xff]  ;;  %v26687_v52 = vld [vmem:[#allocation83_spill] sm:$0xff] }
 0x3fe   : > { %v20968_v32 = vsel %vm2027_vm11, %v2712_v39, %v15820_v17  ;;  %v20971_v22 = vsel %vm2027_vm11, %v2713_v49, %v15821_v47  ;;  %v20974_v27 = vrot.slane %v6120_v9, %v17507_v58  ;;  %v20976_v35 = vpop.permute.xlu0 %15883  ;;  %v6138_v1 = vcombine.low %v20955_v45, %v20944_v29  ;;  %v26688_v56 = vld [vmem:[#allocation229_spill] sm:$0xff] }
 0x3ff   : > { %v15606_v30 = vpack.c.bf16 %v20971_v22, %v20968_v32  ;;  %v5985_v6 = vcombine.high %v20887_v61, %v20890_v14  ;;  %v3464_v43 = vcombine.high %v26602_v36, %v26601_v10  ;;  %v20989_v15 = vrot.slane %v5984_v11, %v17507_v58 }
 0x400   : > { %v6089_v31 = vcombine.high %v6023_v12, %v6039_v50  ;;  %v20992_v4 = vrot.slane %v6088_v13, %v17507_v58  ;;  %16163 = vrot.lane.b32.xlu0 %v20884_v0, %s17200_s30  ;;  %v6002_v23 = vcombine.low %v20961_v19, %v20938_v8  ;;  %v5953_v61 = vcombine.high %v20877_v28, %v20880_v5  ;;  %v26689_v13 = vld [vmem:[#allocation228_spill] sm:$0xff] }
 0x401   : > { %16113 = vrot.lane.b32.xlu1 %v20810_v54, %s17204_s10  ;;  %v21000_v54 = vpop.permute.xlu1 %15838  ;;  %v26685_v10 = vcombine.high %v20660_v16, %v20640_v57  ;;  %v3602_v14 = vcombine.high %v20663_v21, %v20643_v51  ;;  %v21008_v11 = vrot.slane %v5952_v25, %v17507_v58  ;;  %v21011_v0 = vrot.slane %v6121_v2, %v17507_v58 }
 0x402   : > { %v21013_v50 = vpop.permute.xlu0 %15898  ;;  %v16177_v12 = vpack.i.bf16 %v6138_v1, %v6002_v23  ;;  %v6140_v28 = vcombine.low %v20992_v4, %v20974_v27  ;;  %v3466_v57 = vcombine.high %v26605_v60, %v26604_v53  ;;  %v21021_v16 = vrot.slane %v5985_v6, %v17507_v58 }
 0x403   : > { %v16122_v36 = vpack.i.bf16 %v26685_v10, %v3464_v43  ;;  %v21024_v51 = vrot.slane %v6089_v31, %v17507_v58  ;;  %v6004_v21 = vcombine.low %v21008_v11, %v20989_v15  ;;  %v5354_v47 = vcombine.high %v26687_v52, %v26686_v18  ;;  %v26690_v10 = vld [vmem:[#allocation50_spill] sm:$0xff] }
 0x404   : > { %16178 = vrot.lane.b32.xlu0 %v16177_v12, %s17205_s11  ;;  %v16132_v9 = vpack.i.bf16 %v3602_v14, %v3466_v57  ;;  %v21034_v17 = vrot.slane %v5953_v61, %v17507_v58  ;;  %v5218_v39 = vcombine.high %v26689_v13, %v26688_v56  ;;  %v5356_v1 = vcombine.high %v20819_v63, %v20784_v42  ;;  %v26694_v57 = vld [vmem:[#allocation28_spill] sm:$0xff] }
 0x405   : > { %16123 = vrot.lane.b32.xlu1 %v16122_v36, %s17202_s8  ;;  %v21029_v5 = vpop.permute.xlu1 %15848  ;;  %v16187_v60 = vpack.i.bf16 %v6140_v28, %v6004_v21  ;;  %v6142_v20 = vcombine.low %v21024_v51, %v21011_v0  ;;  %v5220_v61 = vcombine.high %v20827_v34, %v20813_v38  ;;  %v26691_v36 = vld [vmem:[#allocation51_spill] sm:$0xff]  ;;  %v15866_v63 = vunpack.i.h.bf16 %v20922_v62 }
 0x406   : > { %v21036_v53 = vpop.permute.xlu0 %15908  ;;  %v6006_v49 = vcombine.low %v21034_v17, %v21021_v16  ;;  %v16137_v2 = vpack.i.bf16 %v5354_v47, %v5218_v39  ;;  %v26692_v14 = vcombine.low %v26690_v10, %v26691_v36  ;;  %v26693_v28 = vld [vmem:[#allocation27_spill] sm:$0xff]  ;;  %v5358_v38 = vcombine.high %v20822_v41, %v20787_v37 }
 0x407   : > { %v26695_v21 = vcombine.low %v26693_v28, %v26694_v57  ;;  %v15876_v37 = vunpack.i.h.bf16 %v20946_v55  ;;  %v15875_v41 = vunpack.i.l.bf16 %v20946_v55  ;;  %v5224_v28 = vcombine.high %v20843_v24, %v20830_v26  ;;  %v6483_v26 = vld [vmem:[#allocation2 + $0x168] sm:$0xff] }
 0x408   : > { %16188 = vrot.lane.b32.xlu0 %v16187_v60, %s17203_s9  ;;  %v16197_v23 = vpack.i.bf16 %v6142_v20, %v6006_v49  ;;  %v16147_v60 = vpack.i.bf16 %v5356_v1, %v5220_v61  ;;  %v5360_v61 = vcombine.high %v20833_v46, %v20792_v59  ;;  %v15886_v59 = vunpack.i.h.bf16 %v20976_v35  ;;  %v26696_v24 = vld [vmem:[#allocation138_spill] sm:$0xff] }
 0x409   : > { %16133 = vrot.lane.b32.xlu1 %v16132_v9, %s17201_s7  ;;  %v15859_v25 = vpop.permute.xlu1 %15858  ;;  %v15865_v9 = vunpack.i.l.bf16 %v20922_v62  ;;  %v15885_v46 = vunpack.i.l.bf16 %v20976_v35  ;;  %v6005_v32 = vcombine.high %v21008_v11, %v20989_v15 }
 0x40a   : > { %v21048_v6 = vpop.permute.xlu0 %15918  ;;  %v15861_v43 = vunpack.i.h.bf16 %v15859_v25  ;;  %v15860_v31 = vunpack.i.l.bf16 %v15859_v25 }
 0x40c   : > { %v2717_v12 = vsel %vm2009_vm5, %v26692_v14, %v15861_v43  ;;  %v2716_v42 = vsel %vm2009_vm5, %v26695_v21, %v15860_v31  ;;  %16198 = vrot.lane.b32.xlu0 %v16197_v23, %s17200_s30  ;;  %v5222_v43 = vcombine.high %v20840_v3, %v20816_v40 }
 0x40d   : > { %16138 = vrot.lane.b32.xlu1 %v16137_v2, %s17206_s12  ;;  %v15869_v47 = vpop.permute.xlu1 %15868  ;;  %v2718_v49 = vsel %vm2012_vm6, %v2716_v42, %v15865_v9  ;;  %v2719_v25 = vsel %vm2012_vm6, %v2717_v12, %v15866_v63  ;;  %v6479_v2 = vld [vmem:[#allocation2 + $0x138] sm:$0xff]  ;;  %v6481_v12 = vld [vmem:[#allocation2 + $0x150] sm:$0xff]  ;;  %v16167_v42 = vpack.i.bf16 %v5360_v61, %v5224_v28  ;;  %v6137_v63 = vcombine.high %v20469_v7, %v20472_v33 }
 0x40e   : > { %v21066_v34 = vpop.permute.xlu0 %6565  ;;  %v15871_v20 = vunpack.i.h.bf16 %v15869_v47  ;;  %v15870_v39 = vunpack.i.l.bf16 %v15869_v47  ;;  %v16157_v23 = vpack.i.bf16 %v5358_v38, %v5222_v43  ;;  %v26697_v38 = vld [vmem:[#allocation186_spill] sm:$0xff]  ;;  %v26698_v61 = vld [vmem:[#allocation68_spill] sm:$0xff] }
 0x410   : > { %v2720_v62 = vsel %vm2015_vm7, %v2718_v49, %v15870_v39  ;;  %v2721_v1 = vsel %vm2015_vm7, %v2719_v25, %v15871_v20  ;;  %6569 = vrot.lane.b32.xlu0 %v6479_v2, %s17211_s15  ;;  %v6001_v20 = vcombine.high %v26697_v38, %v26696_v24 }
 0x411   : > { %16148 = vrot.lane.b32.xlu1 %v16147_v60, %s17204_s10  ;;  %v15879_v31 = vpop.permute.xlu1 %15878  ;;  %v2722_v40 = vsel %vm2018_vm8, %v2720_v62, %v15875_v41  ;;  %v2723_v3 = vsel %vm2018_vm8, %v2721_v1, %v15876_v37  ;;  %v6139_v1 = vcombine.high %v20955_v45, %v20944_v29  ;;  %v2731_v45 = vld [vmem:[#allocation3 + $0x10] sm:$0xff] }
 0x412   : > { %v21080_v10 = vpop.permute.xlu0 %15928  ;;  %v15881_v36 = vunpack.i.h.bf16 %v15879_v31  ;;  %v15880_v14 = vunpack.i.l.bf16 %v15879_v31  ;;  %v16172_v43 = vpack.i.bf16 %v6137_v63, %v6001_v20 }
 0x414   : > { %v2724_v55 = vsel %vm2021_vm9, %v2722_v40, %v15880_v14  ;;  %v2725_v57 = vsel %vm2021_vm9, %v2723_v3, %v15881_v36  ;;  %6573 = vrot.lane.b32.xlu0 %v6481_v12, %s17211_s15  ;;  %v26699_v36 = vld [vmem:[#allocation66_spill] sm:$0xff]  ;;  %v26701_v3 = vld [vmem:[#allocation67_spill] sm:$0xff]  ;;  %v26702_v12 = vld [vmem:[#allocation65_spill] sm:$0xff] }
 0x415   : > { %16158 = vrot.lane.b32.xlu1 %v16157_v23, %s17202_s8  ;;  %v15889_v21 = vpop.permute.xlu1 %15888  ;;  %v2726_v39 = vsel %vm2024_vm10, %v2724_v55, %v15885_v46  ;;  %v2727_v49 = vsel %vm2024_vm10, %v2725_v57, %v15886_v59  ;;  %v6003_v23 = vcombine.high %v20961_v19, %v20938_v8  ;;  %v26700_v14 = vcombine.low %v26698_v61, %v26699_v36 }
 0x416   : > { %v21094_v9 = vpop.permute.xlu0 %15938  ;;  %v15891_v47 = vunpack.i.h.bf16 %v15889_v21  ;;  %v15890_v60 = vunpack.i.l.bf16 %v15889_v21  ;;  %v26703_v28 = vcombine.low %v26701_v3, %v26702_v12  ;;  %v15901_v55 = vunpack.i.h.bf16 %v21013_v50  ;;  %v6480_v3 = vld [vmem:[#allocation2 + $0x140] sm:$0xff] }
 0x417   : > { %v15900_v57 = vunpack.i.l.bf16 %v21013_v50  ;;  %v16182_v19 = vpack.i.bf16 %v6139_v1, %v6003_v23  ;;  %v6141_v59 = vcombine.high %v20992_v4, %v20974_v27  ;;  %v26704_v27 = vmov 0.0   ;;  %v2732_v4 = vld [vmem:[#allocation3 + $0x18] sm:$0xff] }
 0x418   : > { %6577 = vrot.lane.b32.xlu0 %v6483_v26, %s17211_s15  ;;  %v2728_v35 = vsel %vm2027_vm11, %v2726_v39, %v15890_v60  ;;  %v2729_v25 = vsel %vm2027_vm11, %v2727_v49, %v15891_v47  ;;  %v15911_v50 = vunpack.i.h.bf16 %v21036_v53  ;;  %v15910_v60 = vunpack.i.l.bf16 %v21036_v53 }
 0x419   : > { %16168 = vrot.lane.b32.xlu1 %v16167_v42, %s17201_s7  ;;  %v15894_v2 = vpop.permute.xlu1 %15893  ;;  %v15604_v62 = vpack.c.bf16 %v2729_v25, %v2728_v35  ;;  %v16192_v20 = vpack.i.bf16 %v6141_v59, %v6005_v32  ;;  %v6143_v39 = vcombine.high %v21024_v51, %v21011_v0  ;;  %v15921_v0 = vunpack.i.h.bf16 %v21048_v6  ;;  %v26706_v59 = vld [vmem:[#allocation137_spill] sm:$0xff] }
 0x41a   : > { %v21106_v37 = vpop.permute.xlu0 %15948  ;;  %v15896_v41 = vunpack.i.h.bf16 %v15894_v2  ;;  %v15895_v31 = vunpack.i.l.bf16 %v15894_v2  ;;  %v6007_v2 = vcombine.high %v21034_v17, %v21021_v16  ;;  %v15920_v51 = vunpack.i.l.bf16 %v21048_v6 }
 0x41b   : > { %15605 = vmatprep.subr.bf16.mxu1 %v15604_v62  ;;  %v15931_v12 = vunpack.i.h.bf16 %v21080_v10 }
 0x41c   : > { %v4536_v40 = vsel %vm2009_vm5, %v26700_v14, %v15896_v41  ;;  %v4535_v29 = vsel %vm2009_vm5, %v26703_v28, %v15895_v31  ;;  %15607 = vmatpush1.bf16.msra.mxu1 %v15606_v30  ;;  %v16202_v1 = vpack.i.bf16 %v6143_v39, %v6007_v2  ;;  %v15930_v28 = vunpack.i.l.bf16 %v21080_v10 }
 0x41d   : > { %16173 = vrot.lane.b32.xlu1 %v16172_v43, %s17206_s12  ;;  %v15904_v8 = vpop.permute.xlu1 %15903  ;;  %v4537_v63 = vsel %vm2012_vm6, %v4535_v29, %v15900_v57  ;;  %v4538_v47 = vsel %vm2012_vm6, %v4536_v40, %v15901_v55 }
 0x41e   : > { %v21126_v46 = vpop.permute.xlu0 %15958  ;;  %v15906_v21 = vunpack.i.h.bf16 %v15904_v8  ;;  %v15905_v42 = vunpack.i.l.bf16 %v15904_v8  ;;  %v6482_v8 = vld [vmem:[#allocation2 + $0x158] sm:$0xff] }
 0x41f   : > { %15553 = vmatmul.mubr.msk.f32.vlgmr.msra.gmra.mrb[2].mxu1 %vm2009_vm5, %v2731_v45 }
 0x420   : > { %v4539_v22 = vsel %vm2015_vm7, %v4537_v63, %v15905_v42  ;;  %v4540_v30 = vsel %vm2015_vm7, %v4538_v47, %v15906_v21  ;;  %2809 = vmatprep.mubr.f32.mxu1 %v26704_v27  ;;  %v26708_v63 = vld [vmem:[#allocation84_spill] sm:$0xff]  ;;  %v26709_v47 = vld [vmem:[#allocation85_spill] sm:$0xff] }
 0x421   : > { %16183 = vrot.lane.b32.xlu1 %v16182_v19, %s17204_s10  ;;  %v15914_v26 = vpop.permute.xlu1 %15913  ;;  %v4541_v35 = vsel %vm2018_vm8, %v4539_v22, %v15910_v60  ;;  %v4542_v25 = vsel %vm2018_vm8, %v4540_v30, %v15911_v50  ;;  %v26705_v19 = vld [vmem:[#allocation136_spill] sm:$0xff]  ;;  %v26710_v32 = vcombine.low %v26708_v63, %v26709_v47  ;;  %v15940_v50 = vunpack.i.l.bf16 %v21094_v9  ;;  %v26714_v63 = vld [vmem:[#allocation37_spill] sm:$0xff] }
 0x422   : > { %v21141_v49 = vpop.permute.xlu0 %15963  ;;  %v15916_v15 = vunpack.i.h.bf16 %v15914_v26  ;;  %v15915_v11 = vunpack.i.l.bf16 %v15914_v26  ;;  %v26707_v21 = vcombine.low %v26705_v19, %v26706_v59  ;;  %v26711_v19 = vld [vmem:[#allocation17_spill] sm:$0xff]  ;;  %v26712_v59 = vld [vmem:[#allocation179_spill] sm:$0xff]  ;;  %v26715_v47 = vld [vmem:[#allocation156_spill] sm:$0xff] }
 0x423   : > { %15554 = vmatmul.mubr.msk.f32.gmra.mrb[4].mxu1 %vm2009_vm5, %v2732_v4  ;;  %v2010_v22 = vsel %vm2009_vm5, %v26710_v32, %v15930_v28  ;;  %v15941_v4 = vunpack.i.h.bf16 %v21094_v9  ;;  %v15950_v9 = vunpack.i.l.bf16 %v21106_v37  ;;  %v26716_v32 = vcombine.low %v26714_v63, %v26715_v47  ;;  %v26720_v47 = vld [vmem:[#allocation204_spill] sm:$0xff] }
 0x424   : > { %v4543_v53 = vsel %vm2021_vm9, %v4541_v35, %v15915_v11  ;;  %v4544_v43 = vsel %vm2021_vm9, %v4542_v25, %v15916_v15  ;;  %2886 = vmatprep.mubr.f32.mxu1 %v26704_v27  ;;  %v2011_v42 = vsel %vm2009_vm5, %v26707_v21, %v15931_v12  ;;  %v6484_v15 = vld [vmem:[#allocation2 + $0x170] sm:$0xff]  ;;  %v26713_v21 = vcombine.low %v26711_v19, %v26712_v59  ;;  %v26717_v59 = vld [vmem:[#allocation24_spill] sm:$0xff] }
 0x425   : > { %16193 = vrot.lane.b32.xlu1 %v16192_v20, %s17202_s8  ;;  %v15924_v62 = vpop.permute.xlu1 %15923  ;;  %v4545_v16 = vsel %vm2024_vm10, %v4543_v53, %v15920_v51  ;;  %v4546_v17 = vsel %vm2024_vm10, %v4544_v43, %v15921_v0  ;;  %v15951_v53 = vunpack.i.h.bf16 %v21106_v37  ;;  %v15961_v0 = vunpack.i.h.bf16 %v21126_v46 }
 0x426   : > { %v21154_v41 = vpop.permute.xlu0 %15973  ;;  %v15926_v31 = vunpack.i.h.bf16 %v15924_v62  ;;  %v15925_v23 = vunpack.i.l.bf16 %v15924_v62  ;;  %v15960_v51 = vunpack.i.l.bf16 %v21126_v46 }
 0x428   : > { %v21160_v61 = vsel %vm2027_vm11, %v4545_v16, %v15925_v23  ;;  %v21163_v36 = vsel %vm2027_vm11, %v4546_v17, %v15926_v31  ;;  %v15966_v23 = vunpack.i.h.bf16 %v21141_v49  ;;  %v15965_v16 = vunpack.i.l.bf16 %v21141_v49 }
 0x429   : > { %16203 = vrot.lane.b32.xlu1 %v16202_v1, %s17201_s7  ;;  %v21165_v14 = vpop.permute.xlu1 %6567  ;;  %v15616_v6 = vpack.c.bf16 %v21163_v36, %v21160_v61 }
 0x42a   : > { %v21169_v40 = vpop.permute.xlu0 %15983 }
 0x42d   : > { %6571 = vrot.lane.b32.xlu1 %v6480_v3, %s17211_s15  ;;  %v15934_v29 = vpop.permute.xlu1 %15933 }
 0x42e   : > { %v21174_v45 = vpop.permute.xlu0 %15993  ;;  %v15936_v55 = vunpack.i.h.bf16 %v15934_v29  ;;  %v15935_v57 = vunpack.i.l.bf16 %v15934_v29 }
 0x430   : > { %v2014_v10 = vsel %vm2012_vm6, %v2011_v42, %v15936_v55  ;;  %v2013_v30 = vsel %vm2012_vm6, %v2010_v22, %v15935_v57  ;;  %v3716_v42 = vsel %vm2009_vm5, %v26713_v21, %v15966_v23  ;;  %v3715_v22 = vsel %vm2009_vm5, %v26716_v32, %v15965_v16  ;;  %v26718_v21 = vld [vmem:[#allocation43_spill] sm:$0xff]  ;;  %v26721_v32 = vld [vmem:[#allocation205_spill] sm:$0xff] }
 0x431   : > { %6575 = vrot.lane.b32.xlu1 %v6482_v8, %s17211_s15  ;;  %v15944_v60 = vpop.permute.xlu1 %15943  ;;  %v2016_v11 = vsel %vm2015_vm7, %v2013_v30, %v15940_v50  ;;  %v2017_v35 = vsel %vm2015_vm7, %v2014_v10, %v15941_v4  ;;  %v15976_v4 = vunpack.i.h.bf16 %v21154_v41  ;;  %v15975_v50 = vunpack.i.l.bf16 %v21154_v41 }
 0x432   : > { %v21189_v26 = vpop.permute.xlu0 %15998  ;;  %v15946_v20 = vunpack.i.h.bf16 %v15944_v60  ;;  %v15945_v39 = vunpack.i.l.bf16 %v15944_v60  ;;  %v15995_v41 = vunpack.i.l.bf16 %v21174_v45 }
 0x433   : > { %v16001_v23 = vunpack.i.h.bf16 %v21189_v26  ;;  %v16000_v16 = vunpack.i.l.bf16 %v21189_v26 }
 0x434   : > { %v2019_v25 = vsel %vm2018_vm8, %v2016_v11, %v15945_v39  ;;  %v2020_v2 = vsel %vm2018_vm8, %v2017_v35, %v15946_v20 }
 0x435   : > { %6579 = vrot.lane.b32.xlu1 %v6484_v15, %s17211_s15  ;;  %v15954_v43 = vpop.permute.xlu1 %15953  ;;  %v2022_v17 = vsel %vm2021_vm9, %v2019_v25, %v15950_v9  ;;  %v2023_v3 = vsel %vm2021_vm9, %v2020_v2, %v15951_v53  ;;  %v15986_v53 = vunpack.i.h.bf16 %v21169_v40  ;;  %v15985_v9 = vunpack.i.l.bf16 %v21169_v40 }
 0x436   : > { %v21200_v62 = vpop.permute.xlu0 %16008  ;;  %v15956_v1 = vunpack.i.h.bf16 %v15954_v43  ;;  %v15955_v31 = vunpack.i.l.bf16 %v15954_v43 }
 0x438   : > { %v2025_v12 = vsel %vm2024_vm10, %v2022_v17, %v15955_v31  ;;  %v2026_v37 = vsel %vm2024_vm10, %v2023_v3, %v15956_v1 }
 0x439   : > { %v15969_v28 = vpop.permute.xlu1 %15968  ;;  %v21209_v29 = vsel %vm2027_vm11, %v2025_v12, %v15960_v51  ;;  %v21212_v46 = vsel %vm2027_vm11, %v2026_v37, %v15961_v0  ;;  %v15996_v0 = vunpack.i.h.bf16 %v21174_v45 }
 0x43a   : > { %v21214_v55 = vpop.permute.xlu0 %16018  ;;  %v15971_v57 = vunpack.i.h.bf16 %v15969_v28  ;;  %v15970_v8 = vunpack.i.l.bf16 %v15969_v28  ;;  %v15610_v49 = vpack.c.bf16 %v21212_v46, %v21209_v29 }
 0x43c   : > { %v3718_v10 = vsel %vm2012_vm6, %v3716_v42, %v15971_v57  ;;  %v3717_v30 = vsel %vm2012_vm6, %v3715_v22, %v15970_v8  ;;  %v26719_v42 = vcombine.low %v26717_v59, %v26718_v21  ;;  %v26722_v22 = vcombine.low %v26720_v47, %v26721_v32  ;;  %v26724_v47 = vld [vmem:[#allocation12_spill] sm:$0xff] }
 0x43d   : > { %v15979_v60 = vpop.permute.xlu1 %15978  ;;  %v3719_v11 = vsel %vm2015_vm7, %v3717_v30, %v15975_v50  ;;  %v3720_v35 = vsel %vm2015_vm7, %v3718_v10, %v15976_v4  ;;  %v16011_v50 = vunpack.i.h.bf16 %v21200_v62 }
 0x43e   : > { %v16029_v20 = vpop.permute.xlu0 %16028  ;;  %v15981_v39 = vunpack.i.h.bf16 %v15979_v60  ;;  %v15980_v15 = vunpack.i.l.bf16 %v15979_v60  ;;  %v5474_v63 = vsel %vm2009_vm5, %v26719_v42, %v16001_v23  ;;  %v5473_v10 = vsel %vm2009_vm5, %v26722_v22, %v16000_v16 }
 0x43f   : > { %v16010_v60 = vunpack.i.l.bf16 %v21200_v62 }
 0x440   : > { %v3721_v25 = vsel %vm2018_vm8, %v3719_v11, %v15980_v15  ;;  %v3722_v2 = vsel %vm2018_vm8, %v3720_v35, %v15981_v39 }
 0x441   : > { %v15989_v43 = vpop.permute.xlu1 %15988  ;;  %v3723_v17 = vsel %vm2021_vm9, %v3721_v25, %v15985_v9  ;;  %v3724_v3 = vsel %vm2021_vm9, %v3722_v2, %v15986_v53 }
 0x442   : > { %v16034_v51 = vpop.permute.xlu0 %16033  ;;  %v15991_v1 = vunpack.i.h.bf16 %v15989_v43  ;;  %v15990_v31 = vunpack.i.l.bf16 %v15989_v43  ;;  %v16021_v43 = vunpack.i.h.bf16 %v21214_v55 }
 0x444   : > { %v3725_v12 = vsel %vm2024_vm10, %v3723_v17, %v15990_v31  ;;  %v3726_v40 = vsel %vm2024_vm10, %v3724_v3, %v15991_v1  ;;  %v16031_v1 = vunpack.i.h.bf16 %v16029_v20  ;;  %v16030_v31 = vunpack.i.l.bf16 %v16029_v20 }
 0x445   : > { %v16004_v37 = vpop.permute.xlu1 %16003  ;;  %v21245_v28 = vsel %vm2027_vm11, %v3725_v12, %v15995_v41  ;;  %v21248_v45 = vsel %vm2027_vm11, %v3726_v40, %v15996_v0  ;;  %v16020_v0 = vunpack.i.l.bf16 %v21214_v55  ;;  %v16036_v17 = vunpack.i.h.bf16 %v16034_v51 }
 0x446   : > { %v16044_v57 = vpop.permute.xlu0 %16043  ;;  %v16006_v8 = vunpack.i.h.bf16 %v16004_v37  ;;  %v16005_v19 = vunpack.i.l.bf16 %v16004_v37  ;;  %v15614_v26 = vpack.c.bf16 %v21248_v45, %v21245_v28  ;;  %v16035_v3 = vunpack.i.l.bf16 %v16034_v51 }
 0x448   : > { %v5476_v30 = vsel %vm2012_vm6, %v5474_v63, %v16006_v8  ;;  %v5475_v4 = vsel %vm2012_vm6, %v5473_v10, %v16005_v19  ;;  %v26723_v63 = vld [vmem:[#allocation149_spill] sm:$0xff]  ;;  %v26726_v10 = vld [vmem:[#allocation103_spill] sm:$0xff] }
 0x449   : > { %v16014_v39 = vpop.permute.xlu1 %16013  ;;  %v5477_v25 = vsel %vm2015_vm7, %v5475_v4, %v16010_v60  ;;  %v5478_v2 = vsel %vm2015_vm7, %v5476_v30, %v16011_v50  ;;  %v26725_v32 = vcombine.low %v26723_v63, %v26724_v47  ;;  %v26727_v30 = vld [vmem:[#allocation87_spill] sm:$0xff] }
 0x44a   : > { %v16054_v15 = vpop.permute.xlu0 %16053  ;;  %v16016_v11 = vunpack.i.h.bf16 %v16014_v39  ;;  %v16015_v35 = vunpack.i.l.bf16 %v16014_v39  ;;  %v26728_v4 = vcombine.low %v26726_v10, %v26727_v30  ;;  %v26729_v10 = vld [vmem:[#allocation36_spill] sm:$0xff]  ;;  %v26730_v30 = vld [vmem:[#allocation151_spill] sm:$0xff] }
 0x44b   : > { %v6257_v22 = vsel %vm2009_vm5, %v26725_v32, %v16036_v17 }
 0x44c   : > { %v5479_v53 = vsel %vm2018_vm8, %v5477_v25, %v16015_v35  ;;  %v5480_v9 = vsel %vm2018_vm8, %v5478_v2, %v16016_v11  ;;  %v6256_v50 = vsel %vm2009_vm5, %v26728_v4, %v16035_v3  ;;  %v16046_v11 = vunpack.i.h.bf16 %v16044_v57 }
 0x44d   : > { %v16024_v41 = vpop.permute.xlu1 %16023  ;;  %v5481_v12 = vsel %vm2021_vm9, %v5479_v53, %v16020_v0  ;;  %v5482_v40 = vsel %vm2021_vm9, %v5480_v9, %v16021_v43  ;;  %v16045_v35 = vunpack.i.l.bf16 %v16044_v57  ;;  %v26731_v4 = vcombine.low %v26729_v10, %v26730_v30  ;;  %v26737_v30 = vld [vmem:[#allocation35_spill] sm:$0xff] }
 0x44e   : > { %v16064_v62 = vpop.permute.xlu0 %16063  ;;  %v16026_v23 = vunpack.i.h.bf16 %v16024_v41  ;;  %v16025_v16 = vunpack.i.l.bf16 %v16024_v41 }
 0x44f   : > { %v16065_v57 = vunpack.i.l.bf16 %v16064_v62 }
 0x450   : > { %v5483_v37 = vsel %vm2024_vm10, %v5481_v12, %v16025_v16  ;;  %v5484_v8 = vsel %vm2024_vm10, %v5482_v40, %v16026_v23  ;;  %v16055_v23 = vunpack.i.l.bf16 %v16054_v15  ;;  %v16066_v40 = vunpack.i.h.bf16 %v16064_v62 }
 0x451   : > { %v16039_v19 = vpop.permute.xlu1 %16038  ;;  %v21275_v59 = vsel %vm2027_vm11, %v5483_v37, %v16030_v31  ;;  %v21278_v55 = vsel %vm2027_vm11, %v5484_v8, %v16031_v1  ;;  %v16056_v31 = vunpack.i.h.bf16 %v16054_v15 }
 0x452   : > { %v16074_v20 = vpop.permute.xlu0 %16073  ;;  %v16041_v21 = vunpack.i.h.bf16 %v16039_v19  ;;  %v16040_v42 = vunpack.i.l.bf16 %v16039_v19  ;;  %v15626_v51 = vpack.c.bf16 %v21278_v55, %v21275_v59 }
 0x454   : > { %v6259_v60 = vsel %vm2012_vm6, %v6257_v22, %v16041_v21  ;;  %v6258_v39 = vsel %vm2012_vm6, %v6256_v50, %v16040_v42 }
 0x455   : > { %v16049_v25 = vpop.permute.xlu1 %16048  ;;  %v6260_v43 = vsel %vm2015_vm7, %v6258_v39, %v16045_v35  ;;  %v6261_v0 = vsel %vm2015_vm7, %v6259_v60, %v16046_v11  ;;  %v26732_v60 = vld [vmem:[#allocation130_spill] sm:$0xff]  ;;  %v26733_v39 = vld [vmem:[#allocation131_spill] sm:$0xff] }
 0x456   : > { %v16084_v2 = vpop.permute.xlu0 %16083  ;;  %v16051_v53 = vunpack.i.h.bf16 %v16049_v25  ;;  %v16050_v9 = vunpack.i.l.bf16 %v16049_v25  ;;  %v26734_v11 = vcombine.low %v26732_v60, %v26733_v39  ;;  %v16076_v25 = vunpack.i.h.bf16 %v16074_v20 }
 0x458   : > { %v6262_v41 = vsel %vm2018_vm8, %v6260_v43, %v16050_v9  ;;  %v6263_v1 = vsel %vm2018_vm8, %v6261_v0, %v16051_v53  ;;  %v16075_v53 = vunpack.i.l.bf16 %v16074_v20 }
 0x459   : > { %v16059_v16 = vpop.permute.xlu1 %16058  ;;  %v6264_v37 = vsel %vm2021_vm9, %v6262_v41, %v16055_v23  ;;  %v6265_v8 = vsel %vm2021_vm9, %v6263_v1, %v16056_v31 }
 0x45a   : > { %v16094_v17 = vpop.permute.xlu0 %16093  ;;  %v16061_v3 = vunpack.i.h.bf16 %v16059_v16  ;;  %v16060_v12 = vunpack.i.l.bf16 %v16059_v16 }
 0x45b   : > { %v16095_v60 = vunpack.i.l.bf16 %v16094_v17 }
 0x45c   : > { %v6266_v19 = vsel %vm2024_vm10, %v6264_v37, %v16060_v12  ;;  %v6267_v21 = vsel %vm2024_vm10, %v6265_v8, %v16061_v3  ;;  %v16086_v3 = vunpack.i.h.bf16 %v16084_v2  ;;  %v16085_v12 = vunpack.i.l.bf16 %v16084_v2 }
 0x45d   : > { %v21301_v63 = vsel %vm2027_vm11, %v6266_v19, %v16065_v57  ;;  %v21304_v15 = vsel %vm2027_vm11, %v6267_v21, %v16066_v40  ;;  %v26735_v21 = vld [vmem:[#allocation145_spill] sm:$0xff]  ;;  %v16096_v2 = vunpack.i.h.bf16 %v16094_v17  ;;  %v26739_v17 = vld [vmem:[#allocation44_spill] sm:$0xff] }
 0x45e   : > { %v21306_v47 = vpop.permute.xlu0 %16108  ;;  %v15622_v62 = vpack.c.bf16 %v21304_v15, %v21301_v63 }
 0x45f   : > { %v16069_v42 = vpop.permute.xlu1 %16068 }
 0x460   : > { %v16071_v32 = vunpack.i.h.bf16 %v16069_v42  ;;  %v16070_v22 = vunpack.i.l.bf16 %v16069_v42  ;;  %v26736_v42 = vld [vmem:[#allocation139_spill] sm:$0xff] }
 0x462   : > { %v2031_v50 = vsel %vm2009_vm5, %v26731_v4, %v16071_v32  ;;  %v2030_v35 = vsel %vm2009_vm5, %v26734_v11, %v16070_v22  ;;  %v21318_v43 = vpop.permute.xlu0 %16118  ;;  %v6630_v32 = vcombine.high %v26736_v42, %v26735_v21  ;;  %v26738_v4 = vld [vmem:[#allocation127_spill] sm:$0xff]  ;;  %v26740_v21 = vld [vmem:[#allocation157_spill] sm:$0xff] }
 0x463   : > { %v16079_v9 = vpop.permute.xlu1 %16078  ;;  %v2032_v1 = vsel %vm2012_vm6, %v2030_v35, %v16075_v53  ;;  %v2033_v31 = vsel %vm2012_vm6, %v2031_v50, %v16076_v25  ;;  %v6614_v50 = vcombine.high %v26738_v4, %v26737_v30  ;;  %v26741_v42 = vld [vmem:[#allocation39_spill] sm:$0xff] }
 0x464   : > { %v16081_v0 = vunpack.i.h.bf16 %v16079_v9  ;;  %v16080_v41 = vunpack.i.l.bf16 %v16079_v9 }
 0x466   : > { %v2034_v23 = vsel %vm2015_vm7, %v2032_v1, %v16080_v41  ;;  %v2035_v16 = vsel %vm2015_vm7, %v2033_v31, %v16081_v0  ;;  %v21324_v57 = vpop.permute.xlu0 %16128  ;;  %v21339_v0 = vrot.slane %v6630_v32, %v17494_v44  ;;  %v21344_v31 = vrot.slane %v6614_v50, %v17494_v44 }
 0x467   : > { %v16089_v40 = vpop.permute.xlu1 %16088  ;;  %v2036_v8 = vsel %vm2018_vm8, %v2034_v23, %v16085_v12  ;;  %v2037_v19 = vsel %vm2018_vm8, %v2035_v16, %v16086_v3  ;;  %v15826_v23 = vunpack.i.h.bf16 %v26739_v17  ;;  %v15825_v16 = vunpack.i.l.bf16 %v26739_v17  ;;  %v26751_v17 = vld [vmem:[#allocation63_spill] sm:$0xff] }
 0x468   : > { %v16091_v37 = vunpack.i.h.bf16 %v16089_v40  ;;  %v16090_v20 = vunpack.i.l.bf16 %v16089_v40  ;;  %v15831_v40 = vunpack.i.h.bf16 %v20965_v48  ;;  %v6678_v32 = vcombine.high %v26741_v42, %v26740_v21 }
 0x469   : > { %v6693_v4 = vcombine.low %v21344_v31, %v21339_v0  ;;  %v6694_v50 = vcombine.high %v21344_v31, %v21339_v0  ;;  %v26764_v31 = vld [vmem:[#allocation164_spill] sm:$0xff] }
 0x46a   : > { %v2038_v22 = vsel %vm2021_vm9, %v2036_v8, %v16090_v20  ;;  %v2039_v10 = vsel %vm2021_vm9, %v2037_v19, %v16091_v37  ;;  %v21334_v11 = vpop.permute.xlu0 %16143  ;;  %v15830_v37 = vunpack.i.l.bf16 %v20965_v48 }
 0x46b   : > { %v16099_v39 = vpop.permute.xlu1 %16098  ;;  %v2040_v53 = vsel %vm2024_vm10, %v2038_v22, %v16095_v60  ;;  %v2041_v9 = vsel %vm2024_vm10, %v2039_v10, %v16096_v2  ;;  %v26742_v22 = vld [vmem:[#allocation183_spill] sm:$0xff]  ;;  %v26743_v10 = vld [vmem:[#allocation182_spill] sm:$0xff]  ;;  %v26744_v2 = vld [vmem:[#allocation49_spill] sm:$0xff]  ;;  %v21452_v21 = vrot.slane %v6694_v50, %v17507_v58 }
 0x46c   : > { %v16101_v35 = vunpack.i.h.bf16 %v16099_v39  ;;  %v16100_v25 = vunpack.i.l.bf16 %v16099_v39  ;;  %v3993_v30 = vcombine.low %v26743_v10, %v26742_v22  ;;  %v26745_v60 = vld [vmem:[#allocation53_spill] sm:$0xff]  ;;  %v16111_v10 = vunpack.i.h.bf16 %v21306_v47  ;;  %v26765_v50 = vld [vmem:[#allocation16_spill] sm:$0xff] }
 0x46d   : > { %v26746_v48 = vcombine.low %v26744_v2, %v26745_v60 }
 0x46e   : > { %v2042_v41 = vsel %vm2027_vm11, %v2040_v53, %v16100_v25  ;;  %v2043_v1 = vsel %vm2027_vm11, %v2041_v9, %v16101_v35  ;;  %v21350_v20 = vpop.permute.xlu0 %16153  ;;  %v26747_v35 = vld [vmem:[#allocation174_spill] sm:$0xff]  ;;  %v26748_v25 = vld [vmem:[#allocation175_spill] sm:$0xff]  ;;  %v4521_v22 = vsel %vm2009_vm5, %v3993_v30, %v15825_v16 }
 0x46f   : > { %v16104_v3 = vpop.permute.xlu1 %16103  ;;  %v15608_v12 = vpack.c.bf16 %v2043_v1, %v2042_v41  ;;  %v26749_v53 = vcombine.low %v26747_v35, %v26748_v25  ;;  %v2044_v41 = vld [vmem:[#allocation3] sm:$0xff]  ;;  %v26750_v1 = vld [vmem:[#allocation64_spill] sm:$0xff]  ;;  %v15840_v35 = vunpack.i.l.bf16 %v21000_v54 }
 0x470   : > { %v16106_v8 = vunpack.i.h.bf16 %v16104_v3  ;;  %v16105_v19 = vunpack.i.l.bf16 %v16104_v3  ;;  %v26752_v3 = vcombine.low %v26750_v1, %v26751_v17  ;;  %v26754_v1 = vld [vmem:[#allocation150_spill] sm:$0xff]  ;;  %v26755_v17 = vld [vmem:[#allocation221_spill] sm:$0xff] }
 0x471   : > { %15609 = vmatprep.subr.bf16.mxu1 %v15608_v12 }
 0x472   : > { %v3730_v39 = vsel %vm2009_vm5, %v26746_v48, %v16106_v8  ;;  %v3729_v9 = vsel %vm2009_vm5, %v26749_v53, %v16105_v19  ;;  %15611 = vmatpush1.bf16.msra.mxu1 %v15610_v49  ;;  %v4522_v12 = vsel %vm2009_vm5, %v26752_v3, %v15826_v23  ;;  %v16110_v8 = vunpack.i.l.bf16 %v21306_v47  ;;  %v21380_v48 = vpop.permute.xlu0 %16163  ;;  %v26753_v47 = vld [vmem:[#allocation58_spill] sm:$0xff]  ;;  %v26756_v3 = vld [vmem:[#allocation48_spill] sm:$0xff] }
 0x473   : > { %v16114_v2 = vpop.permute.xlu1 %16113  ;;  %v4524_v60 = vsel %vm2012_vm6, %v4522_v12, %v15831_v40  ;;  %v4523_v19 = vsel %vm2012_vm6, %v4521_v22, %v15830_v37  ;;  %v15841_v49 = vunpack.i.h.bf16 %v21000_v54  ;;  %v3732_v16 = vsel %vm2012_vm6, %v3730_v39, %v16111_v10  ;;  %v2045_v53 = vld [vmem:[#allocation3 + $0x8] sm:$0xff] }
 0x474   : > { %v16116_v29 = vunpack.i.h.bf16 %v16114_v2  ;;  %v16115_v46 = vunpack.i.l.bf16 %v16114_v2  ;;  %v3731_v23 = vsel %vm2012_vm6, %v3729_v9, %v16110_v8  ;;  %v15836_v30 = vunpack.i.h.bf16 %v26753_v47  ;;  %v26757_v9 = vld [vmem:[#allocation152_spill] sm:$0xff] }
 0x475   : > { %15555 = vmatmul.mubr.msk.f32.vlgmr.msra.gmra.mrb[2].mxu1 %vm2009_vm5, %v2044_v41  ;;  %v15835_v40 = vunpack.i.l.bf16 %v26753_v47  ;;  %v6646_v54 = vcombine.high %v26755_v17, %v26754_v1  ;;  %v6662_v12 = vcombine.high %v26757_v9, %v26756_v3  ;;  %v16121_v39 = vunpack.i.h.bf16 %v21318_v43 }
 0x476   : > { %v3733_v37 = vsel %vm2015_vm7, %v3731_v23, %v16115_v46  ;;  %v3734_v25 = vsel %vm2015_vm7, %v3732_v16, %v16116_v29  ;;  %2892 = vmatprep.mubr.f32.mxu1 %v26704_v27  ;;  %v16120_v41 = vunpack.i.l.bf16 %v21318_v43  ;;  %v4526_v8 = vsel %vm2015_vm7, %v4524_v60, %v15836_v30  ;;  %v21400_v2 = vpop.permute.xlu0 %16178 }
 0x477   : > { %v16124_v22 = vpop.permute.xlu1 %16123  ;;  %v4525_v10 = vsel %vm2015_vm7, %v4523_v19, %v15835_v40  ;;  %v4528_v16 = vsel %vm2018_vm8, %v4526_v8, %v15841_v49  ;;  %v3736_v1 = vsel %vm2018_vm8, %v3734_v25, %v16121_v39  ;;  %v15851_v43 = vunpack.i.h.bf16 %v21029_v5  ;;  %v26758_v40 = vld [vmem:[#allocation187_spill] sm:$0xff] }
 0x478   : > { %v16126_v29 = vunpack.i.h.bf16 %v16124_v22  ;;  %v16125_v46 = vunpack.i.l.bf16 %v16124_v22  ;;  %v4527_v23 = vsel %vm2018_vm8, %v4525_v10, %v15840_v35  ;;  %v3735_v47 = vsel %vm2018_vm8, %v3733_v37, %v16120_v41 }
 0x479   : > { %15556 = vmatmul.mubr.msk.f32.gmra.mrb[4].mxu1 %vm2009_vm5, %v2045_v53  ;;  %v15850_v19 = vunpack.i.l.bf16 %v21029_v5  ;;  %v15846_v35 = vunpack.i.h.bf16 %v26758_v40  ;;  %v15845_v49 = vunpack.i.l.bf16 %v26758_v40  ;;  %v16131_v37 = vunpack.i.h.bf16 %v21324_v57  ;;  %v26761_v40 = vld [vmem:[#allocation18_spill] sm:$0xff] }
 0x47a   : > { %v3737_v60 = vsel %vm2021_vm9, %v3735_v47, %v16125_v46  ;;  %v3738_v30 = vsel %vm2021_vm9, %v3736_v1, %v16126_v29  ;;  %3816 = vmatprep.mubr.f32.mxu1 %v26704_v27  ;;  %v16130_v25 = vunpack.i.l.bf16 %v21324_v57  ;;  %v6660_v53 = vrot.slane %v6646_v54, %v17494_v44  ;;  %v21418_v5 = vpop.permute.xlu0 %16188  ;;  %v26759_v46 = vld [vmem:[#allocation172_spill] sm:$0xff]  ;;  %v26760_v47 = vld [vmem:[#allocation154_spill] sm:$0xff] }
 0x47b   : > { %v16134_v17 = vpop.permute.xlu1 %16133  ;;  %v6676_v3 = vrot.slane %v6662_v12, %v17494_v44  ;;  %v4529_v41 = vsel %vm2021_vm9, %v4527_v23, %v15845_v49  ;;  %v4530_v22 = vsel %vm2021_vm9, %v4528_v16, %v15846_v35  ;;  %v3740_v8 = vsel %vm2024_vm10, %v3738_v30, %v16131_v37 }
 0x47c   : > { %v16136_v9 = vunpack.i.h.bf16 %v16134_v17  ;;  %v16135_v39 = vunpack.i.l.bf16 %v16134_v17  ;;  %v3739_v10 = vsel %vm2024_vm10, %v3737_v60, %v16130_v25  ;;  %v4531_v29 = vsel %vm2024_vm10, %v4529_v41, %v15850_v19 }
 0x47d   : > { %v4532_v57 = vsel %vm2024_vm10, %v4530_v22, %v15851_v43  ;;  %v6710_v1 = vcombine.high %v26760_v47, %v26759_v46  ;;  %v15856_v17 = vunpack.i.h.bf16 %v26761_v40  ;;  %v15855_v23 = vunpack.i.l.bf16 %v26761_v40  ;;  %v3744_v22 = vld [vmem:[#allocation3 + $0x20] sm:$0xff] }
 0x47e   : > { %v3741_v54 = vsel %vm2027_vm11, %v3739_v10, %v16135_v39  ;;  %v3742_v12 = vsel %vm2027_vm11, %v3740_v8, %v16136_v9  ;;  %v21436_v19 = vrot.slane %v6678_v32, %v17507_v58  ;;  %v21438_v43 = vpop.permute.xlu0 %16198  ;;  %v21444_v49 = vrot.slane %v6693_v4, %v17507_v58  ;;  %v26766_v8 = vld [vmem:[#allocation167_spill] sm:$0xff] }
 0x47f   : > { %v16139_v16 = vpop.permute.xlu1 %16138  ;;  %v15612_v35 = vpack.c.bf16 %v3742_v12, %v3741_v54  ;;  %v6725_v37 = vcombine.low %v6660_v53, %v6676_v3  ;;  %v4533_v25 = vsel %vm2027_vm11, %v4531_v29, %v15855_v23  ;;  %v4534_v9 = vsel %vm2027_vm11, %v4532_v57, %v15856_v17  ;;  %v26767_v29 = vld [vmem:[#allocation159_spill] sm:$0xff]  ;;  %v3745_v12 = vld [vmem:[#allocation3 + $0x28] sm:$0xff] }
 0x480   : > { %v16141_v60 = vunpack.i.h.bf16 %v16139_v16  ;;  %v16140_v30 = vunpack.i.l.bf16 %v16139_v16  ;;  %v6726_v42 = vcombine.high %v6660_v53, %v6676_v3  ;;  %v26762_v32 = vcombine.low %v26687_v52, %v26686_v18 }
 0x481   : > { %15613 = vmatprep.subr.bf16.mxu1 %v15612_v35  ;;  %v26763_v4 = vcombine.low %v26689_v13, %v26688_v56  ;;  %v21466_v0 = vrot.slane %v6710_v1, %v17507_v58  ;;  %v6765_v53 = vcombine.low %v26765_v50, %v26764_v31  ;;  %v16146_v18 = vunpack.i.h.bf16 %v21334_v11 }
 0x482   : > { %v5488_v39 = vsel %vm2009_vm5, %v26762_v32, %v16141_v60  ;;  %15615 = vmatpush1.bf16.msra.mxu1 %v15614_v26  ;;  %v16145_v52 = vunpack.i.l.bf16 %v21334_v11  ;;  %v6766_v56 = vcombine.high %v26765_v50, %v26764_v31  ;;  %v6570_v13 = vpop.permute.xlu0 %6569  ;;  %v15618_v26 = vpack.c.bf16 %v4534_v9, %v4533_v25  ;;  %v4550_v31 = vld [vmem:[#allocation3 + $0x30] sm:$0xff] }
 0x483   : > { %v5487_v41 = vsel %vm2009_vm5, %v26763_v4, %v16140_v30  ;;  %v16149_v3 = vpop.permute.xlu1 %16148  ;;  %15617 = vmatprep.subr.bf16.mxu1 %v15616_v6  ;;  %v21478_v10 = vrot.slane %v6725_v37, %v17507_v58  ;;  %v6749_v57 = vcombine.low %v26767_v29, %v26766_v8  ;;  %v5490_v54 = vsel %vm2012_vm6, %v5488_v39, %v16146_v18  ;;  %v26768_v30 = vld [vmem:[#allocation161_spill] sm:$0xff]  ;;  %v26769_v37 = vld [vmem:[#allocation155_spill] sm:$0xff] }
 0x484   : > { %v16151_v28 = vunpack.i.h.bf16 %v16149_v3  ;;  %v16150_v45 = vunpack.i.l.bf16 %v16149_v3  ;;  %v5489_v11 = vsel %vm2012_vm6, %v5487_v41, %v16145_v52  ;;  %v6750_v61 = vcombine.high %v26767_v29, %v26766_v8 }
 0x485   : > { %15557 = vmatmul.mubr.msk.f32.vlgmr.msra.gmra.mrb[2].mxu1 %vm2009_vm5, %v3744_v22  ;;  %v21491_v46 = vrot.slane %v6726_v42, %v17507_v58  ;;  %v6773_v47 = vrot.slane %v6765_v53, %v17494_v44  ;;  %v16156_v1 = vunpack.i.h.bf16 %v21350_v20  ;;  %v16155_v40 = vunpack.i.l.bf16 %v21350_v20 }
 0x486   : > { %v5491_v36 = vsel %vm2015_vm7, %v5489_v11, %v16150_v45  ;;  %v5492_v6 = vsel %vm2015_vm7, %v5490_v54, %v16151_v28  ;;  %15619 = vmatpush1.bf16.msra.mxu1 %v15618_v26  ;;  %3822 = vmatprep.mubr.f32.mxu1 %v26704_v27  ;;  %v21497_v23 = vrot.slane %v6766_v56, %v17494_v44  ;;  %v6574_v16 = vpop.permute.xlu0 %6573  ;;  %v16166_v53 = vunpack.i.h.bf16 %v21380_v48 }
 0x487   : > { %v16159_v17 = vpop.permute.xlu1 %16158  ;;  %v6742_v25 = vcombine.high %v26769_v37, %v26768_v30  ;;  %v6757_v9 = vrot.slane %v6749_v57, %v17494_v44  ;;  %v5493_v42 = vsel %vm2018_vm8, %v5491_v36, %v16155_v40  ;;  %v5494_v32 = vsel %vm2018_vm8, %v5492_v6, %v16156_v1 }
 0x488   : > { %v16161_v35 = vunpack.i.h.bf16 %v16159_v17  ;;  %v16160_v60 = vunpack.i.l.bf16 %v16159_v17  ;;  %v6743_v20 = vcombine.low %v21436_v19, %v21466_v0  ;;  %v21508_v39 = vrot.slane %v6750_v61, %v17494_v44  ;;  %v4551_v61 = vld [vmem:[#allocation3 + $0x38] sm:$0xff] }
 0x489   : > { %15558 = vmatmul.mubr.msk.f32.gmra.mrb[4].mxu1 %vm2009_vm5, %v3745_v12  ;;  %v6781_v4 = vcombine.low %v21066_v34, %v6574_v16  ;;  %v6813_v50 = vcombine.low %v6757_v9, %v6773_v47  ;;  %v16165_v18 = vunpack.i.l.bf16 %v21380_v48  ;;  %v6782_v52 = vcombine.high %v21066_v34, %v6574_v16 }
 0x48a   : > { %v5495_v41 = vsel %vm2021_vm9, %v5493_v42, %v16160_v60  ;;  %v5496_v22 = vsel %vm2021_vm9, %v5494_v32, %v16161_v35  ;;  %4622 = vmatprep.mubr.f32.mxu1 %v26704_v27  ;;  %v6814_v56 = vcombine.high %v6757_v9, %v6773_v47  ;;  %v6829_v28 = vcombine.low %v21508_v39, %v21497_v23  ;;  %v6578_v45 = vpop.permute.xlu0 %6577 }
 0x48b   : > { %v16169_v3 = vpop.permute.xlu1 %16168  ;;  %v6797_v29 = vcombine.low %v6570_v13, %v6578_v45  ;;  %v6798_v57 = vcombine.high %v6570_v13, %v6578_v45  ;;  %v5497_v11 = vsel %vm2024_vm10, %v5495_v41, %v16165_v18  ;;  %v5498_v54 = vsel %vm2024_vm10, %v5496_v22, %v16166_v53 }
 0x48c   : > { %v16171_v26 = vunpack.i.h.bf16 %v16169_v3  ;;  %v16170_v8 = vunpack.i.l.bf16 %v16169_v3  ;;  %v6830_v48 = vcombine.high %v21508_v39, %v21497_v23  ;;  %v6789_v34 = vrot.slane %v6781_v4, %v17494_v44 }
 0x48d   : > { %15559 = vmatmul.mubr.msk.f32.vlgmr.msra.gmra.mrb[2].mxu1 %vm2009_vm5, %v4550_v31  ;;  %v6796_v13 = vrot.slane %v6782_v52, %v17494_v44  ;;  %v6805_v12 = vrot.slane %v6797_v29, %v17494_v44  ;;  %v6812_v47 = vrot.slane %v6798_v57, %v17494_v44  ;;  %v21538_v17 = vrot.slane %v6813_v50, %v17507_v58 }
 0x48e   : > { %4628 = vmatprep.mubr.f32.mxu1 %v26704_v27  ;;  %v21527_v36 = vsel %vm2027_vm11, %v5497_v11, %v16170_v8  ;;  %v21530_v6 = vsel %vm2027_vm11, %v5498_v54, %v16171_v26  ;;  %v6828_v23 = vrot.slane %v6814_v56, %v17507_v58  ;;  %v6837_v60 = vrot.slane %v6829_v28, %v17507_v58 }
 0x48f   : > { %v16174_v1 = vpop.permute.xlu1 %16173  ;;  %v15624_v40 = vpack.c.bf16 %v21530_v6, %v21527_v36  ;;  %v6845_v9 = vcombine.low %v6789_v34, %v6805_v12  ;;  %v6846_v42 = vcombine.high %v6789_v34, %v6805_v12  ;;  %v6861_v32 = vcombine.low %v6796_v13, %v6812_v47  ;;  %v26784_v6 = vld [vmem:[#allocation173_spill] sm:$0xff] }
 0x490   : > { %v16176_v16 = vunpack.i.h.bf16 %v16174_v1  ;;  %v16175_v35 = vunpack.i.l.bf16 %v16174_v1  ;;  %v16180_v39 = vunpack.i.l.bf16 %v21400_v2  ;;  %v6862_v4 = vcombine.high %v6796_v13, %v6812_v47 }
 0x491   : > { %15560 = vmatmul.mubr.msk.f32.gmra.mrb[4].mxu1 %vm2009_vm5, %v4551_v61  ;;  %v26770_v41 = vcombine.low %v20469_v7, %v20472_v33  ;;  %v26771_v31 = vcombine.low %v26697_v38, %v26696_v24  ;;  %v16181_v53 = vunpack.i.h.bf16 %v21400_v2  ;;  %v21555_v18 = vrot.slane %v6845_v9, %v17507_v58 }
 0x492   : > { %9934 = vmatprep.mubr.f32.mxu1 %v26704_v27  ;;  %v6860_v52 = vrot.slane %v6846_v42, %v17507_v58  ;;  %v6869_v3 = vrot.slane %v6861_v32, %v17507_v58  ;;  %v16191_v7 = vunpack.i.h.bf16 %v21418_v5  ;;  %v16190_v8 = vunpack.i.l.bf16 %v21418_v5 }
 0x493   : > { %v6271_v22 = vsel %vm2009_vm5, %v26770_v41, %v16176_v16  ;;  %v6270_v50 = vsel %vm2009_vm5, %v26771_v31, %v16175_v35  ;;  %v16184_v56 = vpop.permute.xlu1 %16183  ;;  %v6877_v38 = vcombine.low %v21538_v17, %v21555_v18  ;;  %v6878_v2 = vcombine.high %v21538_v17, %v21555_v18 }
 0x494   : > { %v16186_v33 = vunpack.i.h.bf16 %v16184_v56  ;;  %v16185_v28 = vunpack.i.l.bf16 %v16184_v56  ;;  %v6272_v24 = vsel %vm2012_vm6, %v6270_v50, %v16180_v39  ;;  %v6273_v45 = vsel %vm2012_vm6, %v6271_v22, %v16181_v53 }
 0x495   : > { %v6879_v26 = vcombine.low %v6828_v23, %v6860_v52  ;;  %v6876_v29 = vrot.slane %v6862_v4, %v17507_v58  ;;  %v16207_v34 = vpack.i.bf16 %v6878_v2, %v6742_v25  ;;  %v6880_v13 = vcombine.high %v6828_v23, %v6860_v52  ;;  %v26774_v2 = vld [vmem:[#allocation158_spill] sm:$0xff] }
 0x496   : > { %v6274_v57 = vsel %vm2015_vm7, %v6272_v24, %v16185_v28  ;;  %v6275_v11 = vsel %vm2015_vm7, %v6273_v45, %v16186_v33  ;;  %v6881_v12 = vcombine.low %v6837_v60, %v6869_v3  ;;  %v6744_v5 = vcombine.high %v21436_v19, %v21466_v0  ;;  %v26773_v28 = vld [vmem:[#allocation216_spill] sm:$0xff] }
 0x497   : > { %v16194_v54 = vpop.permute.xlu1 %16193  ;;  %v16212_v61 = vpack.i.bf16 %v6879_v26, %v6743_v20  ;;  %v6745_v16 = vcombine.low %v21444_v49, %v21478_v10  ;;  %v6844_v35 = vrot.slane %v6830_v48, %v17507_v58  ;;  %v6276_v9 = vsel %vm2018_vm8, %v6274_v57, %v16190_v8  ;;  %16208 = vrot.lane.b32.xlu0 %v16207_v34, %s17206_s12  ;;  %v26775_v26 = vld [vmem:[#allocation148_spill] sm:$0xff]  ;;  %v26776_v57 = vld [vmem:[#allocation163_spill] sm:$0xff]  ;;  %v26778_v34 = vld [vmem:[#allocation177_spill] sm:$0xff] }
 0x498   : > { %v16196_v47 = vunpack.i.h.bf16 %v16194_v54  ;;  %v16195_v1 = vunpack.i.l.bf16 %v16194_v54  ;;  %v6277_v25 = vsel %vm2018_vm8, %v6275_v11, %v16191_v7  ;;  %v16201_v20 = vunpack.i.h.bf16 %v21438_v43  ;;  %v26777_v11 = vld [vmem:[#allocation165_spill] sm:$0xff] }
 0x499   : > { %16213 = vrot.lane.b32.xlu1 %v16212_v61, %s17205_s11  ;;  %v16200_v23 = vunpack.i.l.bf16 %v21438_v43  ;;  %v16217_v32 = vpack.i.bf16 %v6880_v13, %v6744_v5  ;;  %v16222_v39 = vpack.i.bf16 %v6881_v12, %v6745_v16  ;;  %v6882_v48 = vcombine.high %v6837_v60, %v6869_v3  ;;  %v26779_v61 = vld [vmem:[#allocation160_spill] sm:$0xff]  ;;  %v26780_v13 = vld [vmem:[#allocation181_spill] sm:$0xff]  ;;  %v26782_v16 = vld [vmem:[#allocation166_spill] sm:$0xff] }
 0x49a   : > { %v6278_v42 = vsel %vm2021_vm9, %v6276_v9, %v16195_v1  ;;  %v6279_v19 = vsel %vm2021_vm9, %v6277_v25, %v16196_v47  ;;  %v6883_v4 = vcombine.low %v6844_v35, %v6876_v29  ;;  %v6746_v31 = vcombine.high %v21444_v49, %v21478_v10  ;;  %v26772_v10 = vld [vmem:[#allocation59_spill] sm:$0xff]  ;;  %v26781_v12 = vld [vmem:[#allocation129_spill] sm:$0xff] }
 0x49b   : > { %v16204_v0 = vpop.permute.xlu1 %16203  ;;  %16218 = vrot.lane.b32.xlu0 %v16217_v32, %s17204_s10  ;;  %v6747_v43 = vcombine.low %v21452_v21, %v21491_v46  ;;  %v6280_v50 = vsel %vm2024_vm10, %v6278_v42, %v16200_v23  ;;  %v6281_v53 = vsel %vm2024_vm10, %v6279_v19, %v16201_v20  ;;  %v6884_v49 = vcombine.high %v6844_v35, %v6876_v29  ;;  %v26783_v35 = vld [vmem:[#allocation162_spill] sm:$0xff]  ;;  %v26786_v32 = vld [vmem:[#allocation15_spill] sm:$0xff] }
 0x49c   : > { %v16206_v41 = vunpack.i.h.bf16 %v16204_v0  ;;  %v16205_v22 = vunpack.i.l.bf16 %v16204_v0  ;;  %v16227_v56 = vpack.i.bf16 %v6882_v48, %v6746_v31  ;;  %v7037_v24 = vcombine.low %v26773_v28, %v26772_v10 }
 0x49d   : > { %16223 = vrot.lane.b32.xlu1 %v16222_v39, %s17203_s9  ;;  %v16232_v7 = vpack.i.bf16 %v6883_v4, %v6747_v43  ;;  %v6748_v45 = vcombine.high %v21452_v21, %v21491_v46  ;;  %v6886_v8 = vcombine.high %v26775_v26, %v26774_v2  ;;  %v6902_v54 = vcombine.high %v26777_v11, %v26776_v57  ;;  %v6285_v21 = vld [vmem:[#allocation3 + $0x50] sm:$0xff]  ;;  %v26787_v39 = vld [vmem:[#allocation176_spill] sm:$0xff] }
 0x49e   : > { %v6282_v52 = vsel %vm2027_vm11, %v6280_v50, %v16205_v22  ;;  %v6283_v60 = vsel %vm2027_vm11, %v6281_v53, %v16206_v41  ;;  %v6934_v29 = vcombine.high %v26779_v61, %v26778_v34  ;;  %v7021_v47 = vcombine.low %v26781_v12, %v26780_v13  ;;  %v26788_v61 = vld [vmem:[#allocation168_spill] sm:$0xff] }
 0x49f   : > { %v6572_v3 = vpop.permute.xlu1 %6571  ;;  %v15620_v33 = vpack.c.bf16 %v6283_v60, %v6282_v52  ;;  %16228 = vrot.lane.b32.xlu0 %v16227_v56, %s17202_s8  ;;  %v16237_v5 = vpack.i.bf16 %v6884_v49, %v6748_v45  ;;  %v7038_v46 = vcombine.high %v26773_v28, %v26772_v10  ;;  %v6918_v9 = vcombine.high %v26783_v35, %v26782_v16 }
 0x4a0   : > { %v7022_v25 = vcombine.high %v26781_v12, %v26780_v13  ;;  %v7045_v20 = vrot.slane %v7037_v24, %v17494_v44  ;;  %v6900_v63 = vrot.slane %v6886_v8, %v17494_v44  ;;  %v6916_v15 = vrot.slane %v6902_v54, %v17494_v44 }
 0x4a1   : > { %16233 = vrot.lane.b32.xlu1 %v16232_v7, %s17200_s30  ;;  %15621 = vmatprep.subr.bf16.mxu0 %v15620_v33  ;;  %v6948_v36 = vrot.slane %v6934_v29, %v17494_v44  ;;  %v7029_v19 = vrot.slane %v7021_v47, %v17494_v44  ;;  %v6950_v48 = vcombine.high %v26787_v39, %v26786_v32  ;;  %v26789_v29 = vld [vmem:[#allocation169_spill] sm:$0xff] }
 0x4a2   : > { %15623 = vmatpush1.bf16.msra.mxu0 %v15622_v62  ;;  %v6932_v22 = vrot.slane %v6918_v9, %v17494_v44  ;;  %v7036_v31 = vrot.slane %v7022_v25, %v17494_v44  ;;  %v6965_v52 = vcombine.low %v6900_v63, %v6916_v15  ;;  %v7014_v13 = vcombine.high %v26789_v29, %v26788_v61 }
 0x4a3   : > { %v6576_v1 = vpop.permute.xlu1 %6575  ;;  %15625 = vmatprep.subr.bf16.mxu0 %v15624_v40  ;;  %16238 = vrot.lane.b32.xlu0 %v16237_v5, %s17201_s7  ;;  %v26785_v40 = vld [vmem:[#allocation170_spill] sm:$0xff]  ;;  %v7085_v43 = vcombine.low %v7029_v19, %v7045_v20  ;;  %v7086_v50 = vcombine.high %v7029_v19, %v7045_v20  ;;  %v6964_v10 = vrot.slane %v6950_v48, %v17507_v58  ;;  %v5502_v48 = vld [vmem:[#allocation3 + $0x40] sm:$0xff] }
 0x4a4   : > { %v7053_v62 = vcombine.low %v21165_v14, %v6576_v1  ;;  %v7054_v23 = vcombine.high %v21165_v14, %v6576_v1  ;;  %v6982_v42 = vcombine.high %v26785_v40, %v26784_v6  ;;  %v7052_v14 = vrot.slane %v7038_v46, %v17494_v44 }
 0x4a5   : > { %15561 = vmatmul.mubr.msk.f32.vlgmr.msra.gmra.mrb[2].mxu0 %vm2009_vm5, %v6285_v21  ;;  %v6997_v56 = vcombine.low %v6932_v22, %v6948_v36  ;;  %v6998_v28 = vcombine.high %v6932_v22, %v6948_v36  ;;  %v21652_v24 = vrot.slane %v7085_v43, %v17507_v58  ;;  %v7100_v2 = vrot.slane %v7086_v50, %v17507_v58  ;;  %v7387_v43 = vld [vmem:[#allocation2] sm:$0xff]  ;;  %v7389_v50 = vld [vmem:[#allocation2 + $0x18] sm:$0xff] }
 0x4a6   : > { %15627 = vmatpush1.bf16.msra.mxu0 %v15626_v51  ;;  %6363 = vmatprep.mubr.f32.mxu0 %v26704_v27  ;;  %v7061_v53 = vrot.slane %v7053_v62, %v17494_v44  ;;  %v7068_v59 = vrot.slane %v7054_v23, %v17494_v44  ;;  %v6996_v60 = vrot.slane %v6982_v42, %v17507_v58  ;;  %v6286_v23 = vld [vmem:[#allocation3 + $0x58] sm:$0xff] }
 0x4a7   : > { %v6580_v0 = vpop.permute.xlu1 %6579  ;;  %v7101_v7 = vcombine.low %v7036_v31, %v7052_v14  ;;  %v7005_v11 = vrot.slane %v6997_v56, %v17507_v58  ;;  %v7102_v54 = vcombine.high %v7036_v31, %v7052_v14  ;;  %v6966_v21 = vcombine.high %v6900_v63, %v6916_v15  ;;  %v7394_v56 = vld [vmem:[#allocation2 + $0x50] sm:$0xff] }
 0x4a8   : > { %v7069_v4 = vcombine.low %v6572_v3, %v6580_v0  ;;  %v7070_v41 = vcombine.high %v6572_v3, %v6580_v0  ;;  %v7015_v34 = vcombine.low %v6964_v10, %v6996_v60  ;;  %v6973_v46 = vrot.slane %v6965_v52, %v17507_v58  ;;  %v7392_v52 = vld [vmem:[#allocation2 + $0x38] sm:$0xff] }
 0x4a9   : > { %v7109_v12 = vrot.slane %v7101_v7, %v17507_v58  ;;  %v7012_v62 = vrot.slane %v6998_v28, %v17507_v58  ;;  %v7116_v36 = vrot.slane %v7102_v54, %v17507_v58  ;;  %v7016_v40 = vcombine.high %v6964_v10, %v6996_v60  ;;  %15562 = vmatmul.mubr.msk.f32.gmra.mrb[4].mxu0 %vm2009_vm5, %v6286_v23  ;;  %v7395_v60 = vld [vmem:[#allocation2 + $0x60] sm:$0xff]  ;;  %v7397_v7 = vld [vmem:[#allocation2 + $0x78] sm:$0xff]  ;;  %v7401_v10 = vld [vmem:[#allocation2 + $0xa8] sm:$0xff] }
 0x4aa   : > { %v7077_v55 = vrot.slane %v7069_v4, %v17494_v44  ;;  %v7084_v51 = vrot.slane %v7070_v41, %v17494_v44  ;;  %v7017_v6 = vcombine.low %v6973_v46, %v7005_v11  ;;  %v6980_v63 = vrot.slane %v6966_v21, %v17507_v58  ;;  %6440 = vmatprep.mubr.f32.mxu0 %v26704_v27  ;;  %v7400_v28 = vld [vmem:[#allocation2 + $0x98] sm:$0xff]  ;;  %v7406_v54 = vld [vmem:[#allocation2 + $0xe0] sm:$0xff]  ;;  %v7412_v21 = vld [vmem:[#allocation2 + $0x128] sm:$0xff] }
 0x4ab   : > { %v7018_v39 = vcombine.high %v6973_v46, %v7005_v11  ;;  %v7407_v11 = vld [vmem:[#allocation2 + $0xf0] sm:$0xff] }
 0x4ac   : > { %v7117_v3 = vcombine.low %v7061_v53, %v7077_v55  ;;  %v7118_v33 = vcombine.high %v7061_v53, %v7077_v55  ;;  %v7133_v49 = vcombine.low %v7068_v59, %v7084_v51  ;;  %v7134_v45 = vcombine.high %v7068_v59, %v7084_v51  ;;  %v7388_v53 = vld [vmem:[#allocation2 + $0x8] sm:$0xff]  ;;  %v7391_v59 = vld [vmem:[#allocation2 + $0x30] sm:$0xff]  ;;  %v7390_v55 = vld [vmem:[#allocation2 + $0x20] sm:$0xff] }
 0x4ad   : > { %v7019_v32 = vcombine.low %v6980_v63, %v7012_v62  ;;  %15563 = vmatmul.mubr.msk.f32.vlgmr.msra.gmra.mrb[2].mxu0 %vm2009_vm5, %v5502_v48  ;;  %v7020_v22 = vcombine.high %v6980_v63, %v7012_v62  ;;  %v7393_v51 = vld [vmem:[#allocation2 + $0x48] sm:$0xff]  ;;  %v7415_v46 = vld [vmem:[#allocation2 + $0x150] sm:$0xff]  ;;  %v26790_v63 = vcombine.low %v26769_v37, %v26768_v30 }
 0x4ae   : > { %v21656_v26 = vrot.slane %v7117_v3, %v17507_v58  ;;  %v7132_v8 = vrot.slane %v7118_v33, %v17507_v58  ;;  %v7141_v57 = vrot.slane %v7133_v49, %v17507_v58  ;;  %v7148_v16 = vrot.slane %v7134_v45, %v17507_v58  ;;  %6446 = vmatprep.mubr.f32.mxu0 %v26704_v27  ;;  %v7396_v3 = vld [vmem:[#allocation2 + $0x68] sm:$0xff]  ;;  %v7399_v33 = vld [vmem:[#allocation2 + $0x90] sm:$0xff]  ;;  %v7398_v49 = vld [vmem:[#allocation2 + $0x80] sm:$0xff] }
 0x4af   : > { %v7403_v45 = vld [vmem:[#allocation2 + $0xc0] sm:$0xff] }
 0x4b0   : > { %v7149_v47 = vcombine.low %v21652_v24, %v21656_v26  ;;  %v7151_v1 = vcombine.low %v7100_v2, %v7132_v8  ;;  %v7150_v5 = vcombine.high %v21652_v24, %v21656_v26  ;;  %v7153_v25 = vcombine.low %v7109_v12, %v7141_v57 }
 0x4b1   : > { %v7152_v20 = vcombine.high %v7100_v2, %v7132_v8  ;;  %v7155_v19 = vcombine.low %v7116_v36, %v7148_v16  ;;  %v7154_v0 = vcombine.high %v7109_v12, %v7141_v57  ;;  %v7156_v41 = vcombine.high %v7116_v36, %v7148_v16  ;;  %v7402_v2 = vld [vmem:[#allocation2 + $0xb0] sm:$0xff]  ;;  %v7405_v8 = vld [vmem:[#allocation2 + $0xd8] sm:$0xff]  ;;  %v7404_v57 = vld [vmem:[#allocation2 + $0xc8] sm:$0xff] }
 0x4b2   : > { %v16247_v35 = vpack.i.bf16 %v7151_v1, %v7015_v34  ;;  %v16242_v9 = vpack.i.bf16 %v7150_v5, %v7014_v13  ;;  %v16257_v15 = vpack.i.bf16 %v7153_v25, %v7017_v6  ;;  %v7409_v34 = vld [vmem:[#allocation2 + $0x108] sm:$0xff]  ;;  %v7408_v13 = vld [vmem:[#allocation2 + $0xf8] sm:$0xff]  ;;  %v7411_v12 = vld [vmem:[#allocation2 + $0x120] sm:$0xff] }
 0x4b3   : > { %v16252_v42 = vpack.i.bf16 %v7152_v20, %v7016_v40  ;;  %v16267_v14 = vpack.i.bf16 %v7155_v19, %v7019_v32  ;;  %v16262_v4 = vpack.i.bf16 %v7154_v0, %v7018_v39  ;;  %v16272_v31 = vpack.i.bf16 %v7156_v41, %v7020_v22  ;;  %v7410_v1 = vld [vmem:[#allocation2 + $0x110] sm:$0xff]  ;;  %v7413_v5 = vld [vmem:[#allocation2 + $0x138] sm:$0xff]  ;;  %v17062_v16 = vld [vmem:[#allocation2 + $0x140] sm:$0xff] }
 0x4b4   : > { %16248 = vrot.lane.b32.xlu0 %v16247_v35, %s17205_s11  ;;  %16243 = vrot.lane.b32.xlu1 %v16242_v9, %s17206_s12  ;;  %v7417_v35 = vld [vmem:[#allocation2 + $0x168] sm:$0xff]  ;;  %v17063_v9 = vld [vmem:[#allocation2 + $0x158] sm:$0xff]  ;;  %v17064_v25 = vld [vmem:[#allocation2 + $0x170] sm:$0xff] }
 0x4b8   : > { %16258 = vrot.lane.b32.xlu0 %v16257_v15, %s17203_s9  ;;  %16253 = vrot.lane.b32.xlu1 %v16252_v42, %s17204_s10 }
 0x4bc   : > { %16268 = vrot.lane.b32.xlu0 %v16267_v14, %s17200_s30  ;;  %16263 = vrot.lane.b32.xlu1 %v16262_v4, %s17202_s8 }
 0x4c0   : > { %7451 = vrot.lane.b32.xlu0 %v7387_v43, %s17210_s14  ;;  %16273 = vrot.lane.b32.xlu1 %v16272_v31, %s17201_s7 }
 0x4c4   : > { %7455 = vrot.lane.b32.xlu0 %v7389_v50, %s17210_s14  ;;  %7453 = vrot.lane.b32.xlu1 %v7388_v53, %s17210_s14 }
 0x4c8   : > { %7459 = vrot.lane.b32.xlu0 %v7391_v59, %s17210_s14  ;;  %7457 = vrot.lane.b32.xlu1 %v7390_v55, %s17210_s14 }
 0x4cc   : > { %7463 = vrot.lane.b32.xlu0 %v7393_v51, %s17210_s14  ;;  %7461 = vrot.lane.b32.xlu1 %v7392_v52, %s17210_s14 }
 0x4d0   : > { %7467 = vrot.lane.b32.xlu0 %v7395_v60, %s17210_s14  ;;  %7465 = vrot.lane.b32.xlu1 %v7394_v56, %s17210_s14 }
 0x4d4   : > { %7471 = vrot.lane.b32.xlu0 %v7397_v7, %s17210_s14  ;;  %7469 = vrot.lane.b32.xlu1 %v7396_v3, %s17210_s14 }
 0x4d8   : > { %7475 = vrot.lane.b32.xlu0 %v7399_v33, %s17210_s14  ;;  %7473 = vrot.lane.b32.xlu1 %v7398_v49, %s17210_s14 }
 0x4dc   : > { %7479 = vrot.lane.b32.xlu0 %v7401_v10, %s17210_s14  ;;  %7477 = vrot.lane.b32.xlu1 %v7400_v28, %s17210_s14 }
 0x4e0   : > { %7483 = vrot.lane.b32.xlu0 %v7403_v45, %s17210_s14  ;;  %7481 = vrot.lane.b32.xlu1 %v7402_v2, %s17210_s14 }
 0x4e4   : > { %7487 = vrot.lane.b32.xlu0 %v7405_v8, %s17210_s14  ;;  %7485 = vrot.lane.b32.xlu1 %v7404_v57, %s17210_s14 }
 0x4e8   : > { %7491 = vrot.lane.b32.xlu0 %v7407_v11, %s17210_s14  ;;  %7489 = vrot.lane.b32.xlu1 %v7406_v54, %s17210_s14  ;;  %v26791_v54 = vcombine.low %v26789_v29, %v26788_v61 }
 0x4ec   : > { %7495 = vrot.lane.b32.xlu0 %v7409_v34, %s17210_s14  ;;  %7493 = vrot.lane.b32.xlu1 %v7408_v13, %s17210_s14 }
 0x4f0   : > { %7499 = vrot.lane.b32.xlu0 %v7411_v12, %s17210_s14  ;;  %7497 = vrot.lane.b32.xlu1 %v7410_v1, %s17210_s14 }
 0x4f4   : > { %7503 = vrot.lane.b32.xlu0 %v7413_v5, %s17210_s14  ;;  %7501 = vrot.lane.b32.xlu1 %v7412_v21, %s17210_s14 }
 0x4f8   : > { %7507 = vrot.lane.b32.xlu0 %v7415_v46, %s17210_s14  ;;  %7505 = vrot.lane.b32.xlu1 %v17062_v16, %s17210_s14 }
 0x4fc   : > { %7511 = vrot.lane.b32.xlu0 %v7417_v35, %s17210_s14  ;;  %7509 = vrot.lane.b32.xlu1 %v17063_v9, %s17210_s14 }
 0x500   : > { %7513 = vrot.lane.b32.xlu1 %v17064_v25, %s17210_s14 }
 0x509   : > { %v16209_v20 = vpop.permute.xlu0 %16208 }
 0x50a   : > { %v16211_v23 = vunpack.i.h.bf16 %v16209_v20  ;;  %v16210_v36 = vunpack.i.l.bf16 %v16209_v20 }
 0x50b   : > { %v16214_v62 = vpop.permute.xlu1 %16213 }
 0x50c   : > { %v16216_v6 = vunpack.i.h.bf16 %v16214_v62  ;;  %v16215_v40 = vunpack.i.l.bf16 %v16214_v62  ;;  %v7269_v15 = vsel %vm2009_vm5, %v26790_v63, %v16210_v36  ;;  %v7270_v42 = vsel %vm2009_vm5, %v6877_v38, %v16211_v23 }
 0x50d   : > { %v16219_v19 = vpop.permute.xlu0 %16218 }
 0x50e   : > { %v16221_v32 = vunpack.i.h.bf16 %v16219_v19  ;;  %v16220_v39 = vunpack.i.l.bf16 %v16219_v19  ;;  %v7272_v48 = vsel %vm2012_vm6, %v7270_v42, %v16216_v6  ;;  %v7271_v14 = vsel %vm2012_vm6, %v7269_v15, %v16215_v40 }
 0x50f   : > { %v16224_v0 = vpop.permute.xlu1 %16223 }
 0x510   : > { %v16226_v4 = vunpack.i.h.bf16 %v16224_v0  ;;  %v16225_v41 = vunpack.i.l.bf16 %v16224_v0  ;;  %v7273_v22 = vsel %vm2015_vm7, %v7271_v14, %v16220_v39  ;;  %v7274_v30 = vsel %vm2015_vm7, %v7272_v48, %v16221_v32 }
 0x511   : > { %v16229_v37 = vpop.permute.xlu0 %16228 }
 0x512   : > { %v16231_v43 = vunpack.i.h.bf16 %v16229_v37  ;;  %v16230_v17 = vunpack.i.l.bf16 %v16229_v37  ;;  %v7275_v18 = vsel %vm2018_vm8, %v7273_v22, %v16225_v41  ;;  %v7276_v38 = vsel %vm2018_vm8, %v7274_v30, %v16226_v4 }
 0x513   : > { %v16234_v31 = vpop.permute.xlu1 %16233 }
 0x514   : > { %v16236_v50 = vunpack.i.h.bf16 %v16234_v31  ;;  %v16235_v53 = vunpack.i.l.bf16 %v16234_v31  ;;  %v7277_v59 = vsel %vm2021_vm9, %v7275_v18, %v16230_v17  ;;  %v7278_v55 = vsel %vm2021_vm9, %v7276_v38, %v16231_v43 }
 0x515   : > { %v16239_v51 = vpop.permute.xlu0 %16238 }
 0x516   : > { %v16241_v52 = vunpack.i.h.bf16 %v16239_v51  ;;  %v16240_v60 = vunpack.i.l.bf16 %v16239_v51  ;;  %v7279_v56 = vsel %vm2024_vm10, %v7277_v59, %v16235_v53  ;;  %v7280_v7 = vsel %vm2024_vm10, %v7278_v55, %v16236_v50 }
 0x518   : > { %v7281_v3 = vsel %vm2027_vm11, %v7279_v56, %v16240_v60  ;;  %v7282_v33 = vsel %vm2027_vm11, %v7280_v7, %v16241_v52 }
 0x519   : > { %v15630_v49 = vpack.c.bf16 %v7282_v33, %v7281_v3 }
 0x526   : > { %v16249_v10 = vpop.permute.xlu0 %16248  ;;  %v16244_v28 = vpop.permute.xlu1 %16243 }
 0x527   : > { %v16246_v45 = vunpack.i.h.bf16 %v16244_v28  ;;  %v16245_v2 = vunpack.i.l.bf16 %v16244_v28  ;;  %v16251_v8 = vunpack.i.h.bf16 %v16249_v10  ;;  %v16250_v57 = vunpack.i.l.bf16 %v16249_v10 }
 0x529   : > { %v7284_v11 = vsel %vm2009_vm5, %v7149_v47, %v16246_v45  ;;  %v7283_v34 = vsel %vm2009_vm5, %v26791_v54, %v16245_v2 }
 0x52a   : > { %v16259_v13 = vpop.permute.xlu0 %16258  ;;  %v16254_v12 = vpop.permute.xlu1 %16253  ;;  %v7285_v16 = vsel %vm2012_vm6, %v7283_v34, %v16250_v57  ;;  %v7286_v35 = vsel %vm2012_vm6, %v7284_v11, %v16251_v8 }
 0x52b   : > { %v16256_v1 = vunpack.i.h.bf16 %v16254_v12  ;;  %v16255_v5 = vunpack.i.l.bf16 %v16254_v12  ;;  %v16261_v21 = vunpack.i.h.bf16 %v16259_v13  ;;  %v16260_v46 = vunpack.i.l.bf16 %v16259_v13 }
 0x52d   : > { %v7287_v9 = vsel %vm2015_vm7, %v7285_v16, %v16255_v5  ;;  %v7288_v24 = vsel %vm2015_vm7, %v7286_v35, %v16256_v1 }
 0x52e   : > { %v16269_v26 = vpop.permute.xlu0 %16268  ;;  %v16264_v47 = vpop.permute.xlu1 %16263  ;;  %v7289_v62 = vsel %vm2018_vm8, %v7287_v9, %v16260_v46  ;;  %v7290_v23 = vsel %vm2018_vm8, %v7288_v24, %v16261_v21 }
 0x52f   : > { %v16266_v25 = vunpack.i.h.bf16 %v16264_v47  ;;  %v16265_v61 = vunpack.i.l.bf16 %v16264_v47  ;;  %v16271_v29 = vunpack.i.h.bf16 %v16269_v26  ;;  %v16270_v20 = vunpack.i.l.bf16 %v16269_v26 }
 0x531   : > { %v7291_v36 = vsel %vm2021_vm9, %v7289_v62, %v16265_v61  ;;  %v7292_v6 = vsel %vm2021_vm9, %v7290_v23, %v16266_v25 }
 0x532   : > { %v21752_v40 = vpop.permute.xlu0 %7451  ;;  %v16274_v63 = vpop.permute.xlu1 %16273  ;;  %v7293_v19 = vsel %vm2024_vm10, %v7291_v36, %v16270_v20  ;;  %v7294_v0 = vsel %vm2024_vm10, %v7292_v6, %v16271_v29 }
 0x533   : > { %v16276_v15 = vunpack.i.h.bf16 %v16274_v63  ;;  %v16275_v42 = vunpack.i.l.bf16 %v16274_v63  ;;  %v26792_v63 = vld [vmem:[#allocation10_spill] sm:$0xff] }
 0x535   : > { %v7295_v32 = vsel %vm2027_vm11, %v7293_v19, %v16275_v42  ;;  %v7296_v39 = vsel %vm2027_vm11, %v7294_v0, %v16276_v15 }
 0x536   : > { %v7456_v48 = vpop.permute.xlu0 %7455  ;;  %v21758_v14 = vpop.permute.xlu1 %7453  ;;  %v15628_v4 = vpack.c.bf16 %v7296_v39, %v7295_v32 }
 0x538   : > { %15629 = vmatprep.subr.bf16.mxu0 %v15628_v4 }
 0x539   : > { %15631 = vmatpush1.bf16.msra.mxu0 %v15630_v49 }
 0x53a   : > { %v21760_v41 = vpop.permute.xlu0 %7459  ;;  %v21762_v22 = vpop.permute.xlu1 %7457 }
 0x53b   : > { %v7547_v59 = vcombine.low %v21752_v40, %v21760_v41  ;;  %v7548_v36 = vcombine.high %v21752_v40, %v21760_v41 }
 0x53d   : > { %v7555_v7 = vrot.slane %v7547_v59, %v17494_v44 }
 0x53e   : > { %v7464_v30 = vpop.permute.xlu0 %7463  ;;  %v21764_v37 = vpop.permute.xlu1 %7461 }
 0x53f   : > { %v7563_v38 = vcombine.low %v7456_v48, %v7464_v30  ;;  %v7819_v33 = vcombine.low %v21758_v14, %v21764_v37  ;;  %v7564_v62 = vcombine.high %v7456_v48, %v7464_v30  ;;  %v7562_v48 = vrot.slane %v7548_v36, %v17494_v44 }
 0x541   : > { %v21781_v55 = vrot.slane %v7563_v38, %v17494_v44  ;;  %v21812_v54 = vrot.slane %v7819_v33, %v17494_v44  ;;  %v7578_v32 = vrot.slane %v7564_v62, %v17494_v44  ;;  %v26793_v38 = vld [vmem:[#allocation9_spill] sm:$0xff] }
 0x542   : > { %v21766_v31 = vpop.permute.xlu0 %7467  ;;  %v21768_v43 = vpop.permute.xlu1 %7465 }
 0x543   : > { %v7835_v52 = vcombine.low %v21762_v22, %v21768_v43  ;;  %v7611_v49 = vcombine.low %v7555_v7, %v21781_v55  ;;  %v7612_v30 = vcombine.high %v7555_v7, %v21781_v55 }
 0x545   : > { %v21801_v45 = vrot.slane %v7835_v52, %v17494_v44  ;;  %v21817_v13 = vrot.slane %v7611_v49, %v17507_v58  ;;  %v7836_v49 = vcombine.high %v21762_v22, %v21768_v43  ;;  %v21887_v55 = vrot.slane %v7612_v30, %v17507_v58 }
 0x546   : > { %v21770_v17 = vpop.permute.xlu0 %7471  ;;  %v21772_v18 = vpop.permute.xlu1 %7469 }
 0x547   : > { %v7883_v1 = vcombine.low %v21812_v54, %v21801_v45 }
 0x549   : > { %v21839_v24 = vrot.slane %v7883_v1, %v17507_v58 }
 0x54a   : > { %v21774_v50 = vpop.permute.xlu0 %7475  ;;  %v21776_v53 = vpop.permute.xlu1 %7473 }
 0x54b   : > { %v7579_v51 = vcombine.low %v21766_v31, %v21774_v50  ;;  %v7580_v4 = vcombine.high %v21766_v31, %v21774_v50 }
 0x54d   : > { %v21795_v10 = vrot.slane %v7579_v51, %v17494_v44  ;;  %v21884_v50 = vrot.slane %v7580_v4, %v17494_v44 }
 0x54e   : > { %v7480_v60 = vpop.permute.xlu0 %7479  ;;  %v21787_v56 = vpop.permute.xlu1 %7477 }
 0x54f   : > { %v7595_v3 = vcombine.low %v21770_v17, %v7480_v60  ;;  %v7851_v2 = vcombine.low %v21772_v18, %v21787_v56  ;;  %v7596_v39 = vcombine.high %v21770_v17, %v7480_v60  ;;  %v7627_v60 = vcombine.low %v7562_v48, %v7578_v32 }
 0x551   : > { %v21798_v28 = vrot.slane %v7595_v3, %v17494_v44  ;;  %v21825_v5 = vrot.slane %v7851_v2, %v17494_v44  ;;  %v7628_v3 = vcombine.high %v7562_v48, %v7578_v32  ;;  %v21876_v33 = vrot.slane %v7596_v39, %v17494_v44 }
 0x552   : > { %v21805_v8 = vpop.permute.xlu0 %7483  ;;  %v21807_v57 = vpop.permute.xlu1 %7481 }
 0x553   : > { %v7643_v11 = vcombine.low %v21795_v10, %v21798_v28  ;;  %v7867_v34 = vcombine.low %v21776_v53, %v21807_v57  ;;  %v7644_v2 = vcombine.high %v21795_v10, %v21798_v28  ;;  %v21901_v1 = vrot.slane %v7628_v3, %v17507_v58 }
 0x555   : > { %v21820_v12 = vrot.slane %v7643_v11, %v17507_v58  ;;  %v21828_v21 = vrot.slane %v7867_v34, %v17494_v44  ;;  %v21898_v34 = vrot.slane %v7627_v60, %v17507_v58 }
 0x556   : > { %v21830_v46 = vpop.permute.xlu0 %7487  ;;  %v21832_v16 = vpop.permute.xlu1 %7485 }
 0x557   : > { %v7915_v9 = vcombine.low %v21825_v5, %v21828_v21 }
 0x559   : > { %v21842_v26 = vrot.slane %v7915_v9, %v17507_v58  ;;  %v7659_v9 = vcombine.low %v21884_v50, %v21876_v33 }
 0x55a   : > { %v21844_v47 = vpop.permute.xlu0 %7491  ;;  %v21846_v25 = vpop.permute.xlu1 %7489 }
 0x55b   : > { %v7683_v11 = vcombine.low %v21805_v8, %v21844_v47  ;;  %v7684_v28 = vcombine.high %v21805_v8, %v21844_v47  ;;  %v21929_v48 = vrot.slane %v7659_v9, %v17507_v58 }
 0x55d   : > { %v7691_v39 = vrot.slane %v7683_v11, %v17494_v44  ;;  %v7698_v30 = vrot.slane %v7684_v28, %v17494_v44  ;;  %v7676_v11 = vcombine.high %v21817_v13, %v21820_v12 }
 0x55e   : > { %v7496_v29 = vpop.permute.xlu0 %7495  ;;  %v21851_v20 = vpop.permute.xlu1 %7493 }
 0x55f   : > { %v7699_v31 = vcombine.low %v21830_v46, %v7496_v29  ;;  %v7700_v62 = vcombine.high %v21830_v46, %v7496_v29  ;;  %v21919_v46 = vrot.slane %v7644_v2, %v17507_v58  ;;  %v7868_v29 = vcombine.high %v21776_v53, %v21807_v57 }
 0x560   : > { %v4624_v23 = vpop.f32.mrb[2].mxu1  ;;  %v7955_v60 = vcombine.low %v21832_v16, %v21851_v20 }
 0x561   : > { %v4626_v6 = vpop.f32.mrb[3].mxu1  ;;  %v4649_v15 = vadd.f32 %v26792_v63, %v4624_v23  ;;  %v21907_v23 = vrot.slane %v7836_v49, %v17494_v44  ;;  %v7707_v36 = vrot.slane %v7699_v31, %v17494_v44  ;;  %v7714_v4 = vrot.slane %v7700_v62, %v17494_v44 }
 0x562   : > { %v4650_v42 = vadd.f32 %v26792_v63, %v4626_v6  ;;  %v7500_v19 = vpop.permute.xlu0 %7499  ;;  %v21859_v0 = vpop.permute.xlu1 %7497  ;;  %v7660_v6 = vcombine.high %v21884_v50, %v21876_v33 }
 0x563   : > { %4653 = vst [vmem:[%s21863_s23] sm:$0xff] %v4649_v15  ;;  %v7852_v15 = vcombine.high %v21772_v18, %v21787_v56  ;;  %v7971_v8 = vcombine.low %v21846_v25, %v21859_v0  ;;  %v7763_v9 = vcombine.low %v7698_v30, %v7714_v4  ;;  %v7764_v35 = vcombine.high %v7698_v30, %v7714_v4 }
 0x564   : > { %4654 = vst [vmem:[%s21863_s23 + $0x8] sm:$0xff] %v4650_v42  ;;  %v4630_v40 = vpop.f32.mrb[4].mxu1 }
 0x565   : > { %v4632_v41 = vpop.f32.mrb[5].mxu1  ;;  %v4651_v59 = vadd.f32 %v26793_v38, %v4630_v40  ;;  %v21940_v50 = vrot.slane %v7971_v8, %v17494_v44  ;;  %v7866_v53 = vrot.slane %v7852_v15, %v17494_v44 }
 0x566   : > { %v4652_v17 = vadd.f32 %v26793_v38, %v4632_v41  ;;  %v7504_v51 = vpop.permute.xlu0 %7503  ;;  %v21873_v52 = vpop.permute.xlu1 %7501 }
 0x567   : > { %4655 = vst [vmem:[%s21863_s23 + $0x10] sm:$0xff] %v4651_v59  ;;  %v7747_v59 = vcombine.low %v7691_v39, %v7707_v36 }
 0x568   : > { %4656 = vst [vmem:[%s21863_s23 + $0x18] sm:$0xff] %v4652_v17  ;;  %v7748_v17 = vcombine.high %v7691_v39, %v7707_v36 }
 0x56a   : > { %v7508_v22 = vpop.permute.xlu0 %7507  ;;  %v21895_v43 = vpop.permute.xlu1 %7505 }
 0x56b   : > { %v7715_v42 = vcombine.low %v7500_v19, %v7508_v22  ;;  %v7716_v32 = vcombine.high %v7500_v19, %v7508_v22  ;;  %v7677_v22 = vcombine.low %v21887_v55, %v21919_v46 }
 0x56d   : > { %v7723_v3 = vrot.slane %v7715_v42, %v17494_v44  ;;  %v7730_v33 = vrot.slane %v7716_v32, %v17494_v44  ;;  %v21949_v42 = vrot.slane %v7747_v59, %v17507_v58  ;;  %v7963_v32 = vrot.slane %v7955_v60, %v17494_v44 }
 0x56e   : > { %v7512_v47 = vpop.permute.xlu0 %7511  ;;  %v21926_v40 = vpop.permute.xlu1 %7509  ;;  %v7771_v60 = vrot.slane %v7763_v9, %v17507_v58 }
 0x56f   : > { %v7731_v19 = vcombine.low %v7504_v51, %v7512_v47  ;;  %v7732_v41 = vcombine.high %v7504_v51, %v7512_v47  ;;  %v7987_v51 = vcombine.low %v21873_v52, %v21926_v40  ;;  %v7762_v47 = vrot.slane %v7748_v17, %v17507_v58 }
 0x571   : > { %v7739_v49 = vrot.slane %v7731_v19, %v17494_v44  ;;  %v7746_v31 = vrot.slane %v7732_v41, %v17494_v44  ;;  %v7995_v59 = vrot.slane %v7987_v51, %v17494_v44 }
 0x572   : > { %v7514_v2 = vpop.permute.xlu1 %7513 }
 0x573   : > { %v7779_v62 = vcombine.low %v7723_v3, %v7739_v49  ;;  %v7780_v28 = vcombine.high %v7723_v3, %v7739_v49  ;;  %v7795_v36 = vcombine.low %v7730_v33, %v7746_v31  ;;  %v7796_v39 = vcombine.high %v7730_v33, %v7746_v31 }
 0x574   : > { %v8003_v8 = vcombine.low %v21895_v43, %v7514_v2  ;;  %v8019_v3 = vcombine.low %v7963_v32, %v21940_v50  ;;  %v8004_v4 = vcombine.high %v21895_v43, %v7514_v2  ;;  %v7988_v33 = vcombine.high %v21873_v52, %v21926_v40 }
 0x575   : > { %v21955_v19 = vrot.slane %v7779_v62, %v17507_v58  ;;  %v7794_v41 = vrot.slane %v7780_v28, %v17507_v58  ;;  %v7803_v61 = vrot.slane %v7795_v36, %v17507_v58  ;;  %v7674_v62 = vrot.slane %v7660_v6, %v17507_v58 }
 0x576   : > { %v8011_v49 = vrot.slane %v8003_v8, %v17494_v44  ;;  %v7810_v28 = vrot.slane %v7796_v39, %v17507_v58  ;;  %v21971_v9 = vrot.slane %v8019_v3, %v17507_v58  ;;  %v7678_v6 = vcombine.high %v21887_v55, %v21919_v46 }
 0x577   : > { %v7812_v17 = vcombine.high %v21949_v42, %v21955_v19  ;;  %v7813_v31 = vcombine.low %v7762_v47, %v7794_v41  ;;  %v7814_v10 = vcombine.high %v7762_v47, %v7794_v41  ;;  %v7815_v8 = vcombine.low %v7771_v60, %v7803_v61 }
 0x578   : > { %v8051_v30 = vcombine.low %v7995_v59, %v8011_v49  ;;  %v7778_v39 = vrot.slane %v7764_v35, %v17507_v58  ;;  %v7972_v43 = vcombine.high %v21846_v25, %v21859_v0  ;;  %v7679_v2 = vcombine.low %v21898_v34, %v21929_v48 }
 0x579   : > { %v16277_v36 = vpack.i.bf16 %v7812_v17, %v7676_v11  ;;  %v16282_v51 = vpack.i.bf16 %v7813_v31, %v7677_v22  ;;  %v7956_v52 = vcombine.high %v21832_v16, %v21851_v20  ;;  %v8018_v40 = vrot.slane %v8004_v4, %v17494_v44 }
 0x57a   : > { %v21976_v7 = vrot.slane %v8051_v30, %v17507_v58  ;;  %v8052_v11 = vcombine.high %v7995_v59, %v8011_v49  ;;  %v16287_v35 = vpack.i.bf16 %v7814_v10, %v7678_v6  ;;  %v16292_v46 = vpack.i.bf16 %v7815_v8, %v7679_v2  ;;  %v5503_v30 = vld [vmem:[#allocation3 + $0x48] sm:$0xff] }
 0x57b   : > { %16278 = vrot.lane.b32.xlu0 %v16277_v36, %s17206_s12  ;;  %16283 = vrot.lane.b32.xlu1 %v16282_v51, %s17205_s11  ;;  %v7816_v22 = vcombine.high %v7771_v60, %v7803_v61  ;;  %v7817_v25 = vcombine.low %v7778_v39, %v7810_v28  ;;  %v7882_v0 = vrot.slane %v7868_v29, %v17494_v44 }
 0x57c   : > { %v8083_v55 = vcombine.low %v21971_v9, %v21976_v7  ;;  %v7916_v47 = vcombine.high %v21825_v5, %v21828_v21  ;;  %v8002_v16 = vrot.slane %v7988_v33, %v17494_v44  ;;  %v7680_v20 = vcombine.high %v21898_v34, %v21929_v48  ;;  %15564 = vmatmul.mubr.msk.f32.gmra.mrb[4].mxu0 %vm2009_vm5, %v5503_v30  ;;  %v22137_v30 = vld [vmem:[#allocation2 + $0xfa] sm:$0xff] }
 0x57d   : > { %v7986_v41 = vrot.slane %v7972_v43, %v17494_v44  ;;  %v8020_v10 = vcombine.high %v7963_v32, %v21940_v50  ;;  %v7681_v61 = vcombine.low %v21901_v1, %v7674_v62  ;;  %v7970_v57 = vrot.slane %v7956_v52, %v17494_v44  ;;  %7370 = vmatprep.mubr.f32.mxu0 %v26704_v27 }
 0x57e   : > { %v8066_v5 = vrot.slane %v8052_v11, %v17507_v58  ;;  %v8067_v21 = vcombine.low %v8002_v16, %v8018_v40  ;;  %v16297_v34 = vpack.i.bf16 %v7816_v22, %v7680_v20  ;;  %v7818_v48 = vcombine.high %v7778_v39, %v7810_v28  ;;  %v7298_v39 = vld [vmem:[#allocation3 + $0x60] sm:$0xff]  ;;  %26804 = vst [vmem:[#allocation26_spill] sm:$0xff] %v22137_v30 }
 0x57f   : > { %16288 = vrot.lane.b32.xlu0 %v16287_v35, %s17204_s10  ;;  %16293 = vrot.lane.b32.xlu1 %v16292_v46, %s17203_s9  ;;  %v16302_v29 = vpack.i.bf16 %v7817_v25, %v7681_v61  ;;  %v8084_v50 = vcombine.high %v21971_v9, %v21976_v7  ;;  %v26794_v32 = vcombine.high %v21758_v14, %v21764_v37 }
 0x580   : > { %v7930_v59 = vrot.slane %v7916_v47, %v17507_v58  ;;  %v7931_v18 = vcombine.low %v7866_v53, %v7882_v0  ;;  %v7682_v56 = vcombine.high %v21901_v1, %v7674_v62  ;;  %v8034_v15 = vrot.slane %v8020_v10, %v17507_v58  ;;  %15565 = vmatmul.mubr.msk.f32.vlgmr.msra.gmra.mrb[2].mxu0 %vm2009_vm5, %v7298_v39  ;;  %v7299_v47 = vld [vmem:[#allocation3 + $0x68] sm:$0xff]  ;;  %v22165_v39 = vld [vmem:[#allocation2 + $0x152] sm:$0xff] }
 0x581   : > { %v7834_v3 = vrot.slane %v26794_v32, %v17494_v44  ;;  %v8035_v49 = vcombine.low %v7970_v57, %v7986_v41  ;;  %v7948_v60 = vcombine.high %v21839_v24, %v21842_v26  ;;  %v26795_v14 = vcombine.high %v21812_v54, %v21801_v45  ;;  %7376 = vmatprep.mubr.f32.mxu0 %v26704_v27  ;;  %v22069_v32 = vld [vmem:[#allocation2 + $0x32] sm:$0xff] }
 0x582   : > { %v8068_v17 = vcombine.high %v8002_v16, %v8018_v40  ;;  %v8075_v1 = vrot.slane %v8067_v21, %v17507_v58  ;;  %v16307_v31 = vpack.i.bf16 %v7818_v48, %v7682_v56  ;;  %v8085_v28 = vcombine.low %v8034_v15, %v8066_v5  ;;  %v22061_v48 = vld [vmem:[#allocation2 + $0x1a] sm:$0xff]  ;;  %v22085_v56 = vld [vmem:[#allocation2 + $0x62] sm:$0xff] }
 0x583   : > { %16298 = vrot.lane.b32.xlu0 %v16297_v34, %s17202_s8  ;;  %16303 = vrot.lane.b32.xlu1 %v16302_v29, %s17200_s30  ;;  %v7898_v37 = vrot.slane %v26795_v14, %v17507_v58  ;;  %v7899_v33 = vcombine.low %v7834_v3, %v21907_v23  ;;  %v16312_v62 = vpack.i.bf16 %v8084_v50, %v7948_v60  ;;  %v22053_v34 = vld [vmem:[#allocation2 + $0x2] sm:$0xff]  ;;  %v22057_v29 = vld [vmem:[#allocation2 + $0xa] sm:$0xff]  ;;  %v22101_v14 = vld [vmem:[#allocation2 + $0x92] sm:$0xff] }
 0x584   : > { %v8086_v4 = vcombine.high %v8034_v15, %v8066_v5  ;;  %v7932_v36 = vcombine.high %v7866_v53, %v7882_v0  ;;  %v7939_v51 = vrot.slane %v7931_v18, %v17507_v58  ;;  %v8036_v6 = vcombine.high %v7970_v57, %v7986_v41  ;;  %15566 = vmatmul.mubr.msk.f32.gmra.mrb[4].mxu0 %vm2009_vm5, %v7299_v47  ;;  %v22065_v50 = vld [vmem:[#allocation2 + $0x22] sm:$0xff]  ;;  %v22081_v18 = vld [vmem:[#allocation2 + $0x52] sm:$0xff]  ;;  %v22089_v15 = vld [vmem:[#allocation2 + $0x6a] sm:$0xff] }
 0x585   : > { %v7949_v8 = vcombine.low %v7898_v37, %v7930_v59  ;;  %v8043_v45 = vrot.slane %v8035_v49, %v17507_v58  ;;  %v7950_v54 = vcombine.high %v7898_v37, %v7930_v59  ;;  %v7900_v43 = vcombine.high %v7834_v3, %v21907_v23  ;;  %8304 = vmatprep.mubr.f32.mxu0 %v26704_v27  ;;  %v22073_v3 = vld [vmem:[#allocation2 + $0x3a] sm:$0xff]  ;;  %v22077_v59 = vld [vmem:[#allocation2 + $0x4a] sm:$0xff]  ;;  %v22097_v60 = vld [vmem:[#allocation2 + $0x82] sm:$0xff] }
 0x586   : > { %v7907_v2 = vrot.slane %v7899_v33, %v17507_v58  ;;  %v8082_v52 = vrot.slane %v8068_v17, %v17507_v58  ;;  %v7946_v22 = vrot.slane %v7932_v36, %v17507_v58  ;;  %v8050_v25 = vrot.slane %v8036_v6, %v17507_v58  ;;  %26796 = vst [vmem:[#allocation30_spill] sm:$0xff] %v22057_v29  ;;  %v22093_v49 = vld [vmem:[#allocation2 + $0x7a] sm:$0xff]  ;;  %v22109_v33 = vld [vmem:[#allocation2 + $0xaa] sm:$0xff]  ;;  %v22113_v17 = vld [vmem:[#allocation2 + $0xb2] sm:$0xff] }
 0x587   : > { %16308 = vrot.lane.b32.xlu0 %v16307_v31, %s17201_s7  ;;  %16313 = vrot.lane.b32.xlu1 %v16312_v62, %s17206_s12  ;;  %v16317_v40 = vpack.i.bf16 %v8085_v28, %v7949_v8  ;;  %v16322_v11 = vpack.i.bf16 %v8086_v4, %v7950_v54  ;;  %v8087_v35 = vcombine.low %v8043_v45, %v8075_v1  ;;  %v22105_v37 = vld [vmem:[#allocation2 + $0x9a] sm:$0xff]  ;;  %v22121_v31 = vld [vmem:[#allocation2 + $0xca] sm:$0xff]  ;;  %v22129_v28 = vld [vmem:[#allocation2 + $0xe2] sm:$0xff] }
 0x588   : > { %v8088_v46 = vcombine.high %v8043_v45, %v8075_v1  ;;  %v7951_v23 = vcombine.low %v7907_v2, %v7939_v51  ;;  %v7952_v0 = vcombine.high %v7907_v2, %v7939_v51  ;;  %v7914_v16 = vrot.slane %v7900_v43, %v17507_v58  ;;  %26797 = vst [vmem:[#allocation47_spill] sm:$0xff] %v22073_v3  ;;  %v22117_v1 = vld [vmem:[#allocation2 + $0xc2] sm:$0xff]  ;;  %v22125_v62 = vld [vmem:[#allocation2 + $0xda] sm:$0xff]  ;;  %v22133_v4 = vld [vmem:[#allocation2 + $0xf2] sm:$0xff] }
 0x589   : > { %v8089_v10 = vcombine.low %v8050_v25, %v8082_v52  ;;  %v8090_v61 = vcombine.high %v8050_v25, %v8082_v52  ;;  %26798 = vst [vmem:[#allocation38_spill] sm:$0xff] %v22089_v15  ;;  %26799 = vst [vmem:[#allocation208_spill] sm:$0xff] %v22097_v60  ;;  %v22141_v36 = vld [vmem:[#allocation2 + $0x10a] sm:$0xff]  ;;  %v22145_v51 = vld [vmem:[#allocation2 + $0x112] sm:$0xff]  ;;  %v26811_v47 = vcombine.low %v21949_v42, %v21955_v19 }
 0x58a   : > { %v16327_v20 = vpack.i.bf16 %v8087_v35, %v7951_v23  ;;  %v16332_v41 = vpack.i.bf16 %v8088_v46, %v7952_v0  ;;  %v7953_v53 = vcombine.low %v7914_v16, %v7946_v22  ;;  %v7954_v57 = vcombine.high %v7914_v16, %v7946_v22  ;;  %26800 = vst [vmem:[#allocation225_spill] sm:$0xff] %v22105_v37  ;;  %v22149_v8 = vld [vmem:[#allocation2 + $0x122] sm:$0xff]  ;;  %v22153_v6 = vld [vmem:[#allocation2 + $0x12a] sm:$0xff]  ;;  %v22157_v45 = vld [vmem:[#allocation2 + $0x13a] sm:$0xff] }
 0x58b   : > { %16318 = vrot.lane.b32.xlu0 %v16317_v40, %s17205_s11  ;;  %16323 = vrot.lane.b32.xlu1 %v16322_v11, %s17204_s10  ;;  %26801 = vst [vmem:[#allocation220_spill] sm:$0xff] %v22113_v17  ;;  %26802 = vst [vmem:[#allocation21_spill] sm:$0xff] %v22121_v31  ;;  %v22161_v54 = vld [vmem:[#allocation2 + $0x142] sm:$0xff]  ;;  %v22169_v43 = vld [vmem:[#allocation2 + $0x15a] sm:$0xff]  ;;  %v26810_v23 = vcombine.low %v21817_v13, %v21820_v12 }
 0x58c   : > { %v16337_v5 = vpack.i.bf16 %v8089_v10, %v7953_v53  ;;  %v16342_v21 = vpack.i.bf16 %v8090_v61, %v7954_v57  ;;  %26803 = vst [vmem:[#allocation192_spill] sm:$0xff] %v22129_v28  ;;  %26805 = vst [vmem:[#allocation214_spill] sm:$0xff] %v22145_v51  ;;  %v22173_v2 = vld [vmem:[#allocation2 + $0x16a] sm:$0xff]  ;;  %v22177_v52 = vld [vmem:[#allocation2 + $0x172] sm:$0xff] }
 0x58d   : > { %26806 = vst [vmem:[#allocation200_spill] sm:$0xff] %v22153_v6  ;;  %26807 = vst [vmem:[#allocation184_spill] sm:$0xff] %v22161_v54 }
 0x58e   : > { %26808 = vst [vmem:[#allocation178_spill] sm:$0xff] %v22169_v43  ;;  %26809 = vst [vmem:[#allocation215_spill] sm:$0xff] %v22177_v52 }
 0x58f   : > { %16328 = vrot.lane.b32.xlu0 %v16327_v20, %s17203_s9  ;;  %16333 = vrot.lane.b32.xlu1 %v16332_v41, %s17202_s8 }
 0x593   : > { %16338 = vrot.lane.b32.xlu0 %v16337_v5, %s17200_s30  ;;  %16343 = vrot.lane.b32.xlu1 %v16342_v21, %s17201_s7 }
 0x597   : > { %8394 = vrot.lane.b32.xlu0 %v22053_v34, %s17210_s14  ;;  %8396 = vrot.lane.b32.xlu1 %v22057_v29, %s17210_s14 }
 0x59b   : > { %8398 = vrot.lane.b32.xlu0 %v22061_v48, %s17210_s14  ;;  %8400 = vrot.lane.b32.xlu1 %v22065_v50, %s17210_s14 }
 0x59f   : > { %8402 = vrot.lane.b32.xlu0 %v22069_v32, %s17210_s14  ;;  %8404 = vrot.lane.b32.xlu1 %v22073_v3, %s17210_s14 }
 0x5a3   : > { %8406 = vrot.lane.b32.xlu0 %v22077_v59, %s17210_s14  ;;  %8408 = vrot.lane.b32.xlu1 %v22081_v18, %s17210_s14 }
 0x5a7   : > { %8410 = vrot.lane.b32.xlu0 %v22085_v56, %s17210_s14  ;;  %8412 = vrot.lane.b32.xlu1 %v22089_v15, %s17210_s14  ;;  %v9194_v15 = vcombine.high %v22061_v48, %v22077_v59 }
 0x5a9   : > { %v22351_v59 = vrot.slane %v9194_v15, %v17494_v44 }
 0x5ab   : > { %8414 = vrot.lane.b32.xlu0 %v22093_v49, %s17210_s14  ;;  %8416 = vrot.lane.b32.xlu1 %v22097_v60, %s17210_s14  ;;  %v9466_v60 = vcombine.high %v22065_v50, %v22081_v18  ;;  %26818 = vst [vmem:[#allocation197_spill] sm:$0xff] %v22351_v59 }
 0x5ad   : > { %v22354_v18 = vrot.slane %v9466_v60, %v17494_v44 }
 0x5af   : > { %8418 = vrot.lane.b32.xlu0 %v22101_v14, %s17210_s14  ;;  %8420 = vrot.lane.b32.xlu1 %v22105_v37, %s17210_s14  ;;  %26819 = vst [vmem:[#allocation226_spill] sm:$0xff] %v22354_v18 }
 0x5b3   : > { %8422 = vrot.lane.b32.xlu0 %v22109_v33, %s17210_s14  ;;  %8424 = vrot.lane.b32.xlu1 %v22113_v17, %s17210_s14 }
 0x5b7   : > { %8426 = vrot.lane.b32.xlu0 %v22117_v1, %s17210_s14  ;;  %8428 = vrot.lane.b32.xlu1 %v22121_v31, %s17210_s14 }
 0x5bb   : > { %8430 = vrot.lane.b32.xlu0 %v22125_v62, %s17210_s14  ;;  %8432 = vrot.lane.b32.xlu1 %v22129_v28, %s17210_s14 }
 0x5bf   : > { %8434 = vrot.lane.b32.xlu0 %v22133_v4, %s17210_s14  ;;  %8436 = vrot.lane.b32.xlu1 %v22137_v30, %s17210_s14 }
 0x5c3   : > { %8438 = vrot.lane.b32.xlu0 %v22141_v36, %s17210_s14  ;;  %8440 = vrot.lane.b32.xlu1 %v22145_v51, %s17210_s14 }
 0x5c7   : > { %8442 = vrot.lane.b32.xlu0 %v22149_v8, %s17210_s14  ;;  %8444 = vrot.lane.b32.xlu1 %v22153_v6, %s17210_s14 }
 0x5cb   : > { %8446 = vrot.lane.b32.xlu0 %v22157_v45, %s17210_s14  ;;  %8448 = vrot.lane.b32.xlu1 %v22161_v54, %s17210_s14 }
 0x5cf   : > { %8450 = vrot.lane.b32.xlu0 %v22165_v39, %s17210_s14  ;;  %8452 = vrot.lane.b32.xlu1 %v22169_v43, %s17210_s14 }
 0x5d3   : > { %8454 = vrot.lane.b32.xlu0 %v22173_v2, %s17210_s14  ;;  %8456 = vrot.lane.b32.xlu1 %v22177_v52, %s17210_s14 }
 0x5ed   : > { %v16279_v40 = vpop.permute.xlu0 %16278  ;;  %v16284_v11 = vpop.permute.xlu1 %16283 }
 0x5ee   : > { %v16281_v35 = vunpack.i.h.bf16 %v16279_v40  ;;  %v16280_v46 = vunpack.i.l.bf16 %v16279_v40  ;;  %v16286_v22 = vunpack.i.h.bf16 %v16284_v11  ;;  %v16285_v25 = vunpack.i.l.bf16 %v16284_v11 }
 0x5f0   : > { %v8203_v0 = vsel %vm2009_vm5, %v26810_v23, %v16280_v46  ;;  %v8204_v16 = vsel %vm2009_vm5, %v26811_v47, %v16281_v35 }
 0x5f1   : > { %v16289_v20 = vpop.permute.xlu0 %16288  ;;  %v16294_v41 = vpop.permute.xlu1 %16293  ;;  %v8206_v53 = vsel %vm2012_vm6, %v8204_v16, %v16286_v22  ;;  %v8205_v57 = vsel %vm2012_vm6, %v8203_v0, %v16285_v25 }
 0x5f2   : > { %v16291_v10 = vunpack.i.h.bf16 %v16289_v20  ;;  %v16290_v61 = vunpack.i.l.bf16 %v16289_v20  ;;  %v16296_v5 = vunpack.i.h.bf16 %v16294_v41  ;;  %v16295_v21 = vunpack.i.l.bf16 %v16294_v41 }
 0x5f4   : > { %v8207_v40 = vsel %vm2015_vm7, %v8205_v57, %v16290_v61  ;;  %v8208_v13 = vsel %vm2015_vm7, %v8206_v53, %v16291_v10 }
 0x5f5   : > { %v16299_v12 = vpop.permute.xlu0 %16298  ;;  %v16304_v11 = vpop.permute.xlu1 %16303  ;;  %v8209_v19 = vsel %vm2018_vm8, %v8207_v40, %v16295_v21  ;;  %v8210_v35 = vsel %vm2018_vm8, %v8208_v13, %v16296_v5 }
 0x5f6   : > { %v16301_v46 = vunpack.i.h.bf16 %v16299_v12  ;;  %v16300_v42 = vunpack.i.l.bf16 %v16299_v12  ;;  %v16306_v23 = vunpack.i.h.bf16 %v16304_v11  ;;  %v16305_v47 = vunpack.i.l.bf16 %v16304_v11 }
 0x5f8   : > { %v8211_v22 = vsel %vm2021_vm9, %v8209_v19, %v16300_v42  ;;  %v8212_v25 = vsel %vm2021_vm9, %v8210_v35, %v16301_v46  ;;  %v26812_v19 = vcombine.low %v21839_v24, %v21842_v26 }
 0x5f9   : > { %v16309_v0 = vpop.permute.xlu0 %16308  ;;  %v16314_v16 = vpop.permute.xlu1 %16313  ;;  %v8213_v10 = vsel %vm2024_vm10, %v8211_v22, %v16305_v47  ;;  %v8214_v61 = vsel %vm2024_vm10, %v8212_v25, %v16306_v23 }
 0x5fa   : > { %v16311_v20 = vunpack.i.h.bf16 %v16309_v0  ;;  %v16310_v41 = vunpack.i.l.bf16 %v16309_v0  ;;  %v16316_v53 = vunpack.i.h.bf16 %v16314_v16  ;;  %v16315_v57 = vunpack.i.l.bf16 %v16314_v16 }
 0x5fc   : > { %v8215_v21 = vsel %vm2027_vm11, %v8213_v10, %v16310_v41  ;;  %v8216_v5 = vsel %vm2027_vm11, %v8214_v61, %v16311_v20  ;;  %v8218_v46 = vsel %vm2009_vm5, %v8083_v55, %v16316_v53  ;;  %v8217_v35 = vsel %vm2009_vm5, %v26812_v19, %v16315_v57 }
 0x5fd   : > { %v16319_v40 = vpop.permute.xlu0 %16318  ;;  %v16324_v13 = vpop.permute.xlu1 %16323  ;;  %v15634_v12 = vpack.c.bf16 %v8216_v5, %v8215_v21 }
 0x5fe   : > { %v16321_v11 = vunpack.i.h.bf16 %v16319_v40  ;;  %v16320_v42 = vunpack.i.l.bf16 %v16319_v40  ;;  %v16326_v23 = vunpack.i.h.bf16 %v16324_v13  ;;  %v16325_v47 = vunpack.i.l.bf16 %v16324_v13 }
 0x600   : > { %v8219_v22 = vsel %vm2012_vm6, %v8217_v35, %v16320_v42  ;;  %v8220_v25 = vsel %vm2012_vm6, %v8218_v46, %v16321_v11 }
 0x601   : > { %v16329_v0 = vpop.permute.xlu0 %16328  ;;  %v16334_v16 = vpop.permute.xlu1 %16333  ;;  %v8221_v10 = vsel %vm2015_vm7, %v8219_v22, %v16325_v47  ;;  %v8222_v7 = vsel %vm2015_vm7, %v8220_v25, %v16326_v23 }
 0x602   : > { %v16331_v20 = vunpack.i.h.bf16 %v16329_v0  ;;  %v16330_v41 = vunpack.i.l.bf16 %v16329_v0  ;;  %v16336_v9 = vunpack.i.h.bf16 %v16334_v16  ;;  %v16335_v55 = vunpack.i.l.bf16 %v16334_v16  ;;  %v8232_v16 = vld [vmem:[#allocation3 + $0x70] sm:$0xff] }
 0x604   : > { %v8223_v24 = vsel %vm2018_vm8, %v8221_v10, %v16330_v41  ;;  %v8224_v26 = vsel %vm2018_vm8, %v8222_v7, %v16331_v20  ;;  %v8233_v10 = vld [vmem:[#allocation3 + $0x78] sm:$0xff] }
 0x605   : > { %v16339_v61 = vpop.permute.xlu0 %16338  ;;  %v16344_v53 = vpop.permute.xlu1 %16343  ;;  %v8225_v13 = vsel %vm2021_vm9, %v8223_v24, %v16335_v55  ;;  %v8226_v11 = vsel %vm2021_vm9, %v8224_v26, %v16336_v9 }
 0x606   : > { %v16341_v57 = vunpack.i.h.bf16 %v16339_v61  ;;  %v16340_v21 = vunpack.i.l.bf16 %v16339_v61  ;;  %v16346_v5 = vunpack.i.h.bf16 %v16344_v53  ;;  %v16345_v40 = vunpack.i.l.bf16 %v16344_v53 }
 0x608   : > { %v8227_v42 = vsel %vm2024_vm10, %v8225_v13, %v16340_v21  ;;  %v8228_v46 = vsel %vm2024_vm10, %v8226_v11, %v16341_v57 }
 0x609   : > { %v22219_v19 = vpop.permute.xlu0 %8394  ;;  %v22221_v35 = vpop.permute.xlu1 %8396  ;;  %v8229_v23 = vsel %vm2027_vm11, %v8227_v42, %v16345_v40  ;;  %v8230_v47 = vsel %vm2027_vm11, %v8228_v46, %v16346_v5 }
 0x60a   : > { %v15632_v22 = vpack.c.bf16 %v8230_v47, %v8229_v23 }
 0x60c   : > { %15633 = vmatprep.subr.bf16.mxu0 %v15632_v22 }
 0x60d   : > { %v22225_v25 = vpop.permute.xlu0 %8398  ;;  %v22227_v0 = vpop.permute.xlu1 %8400  ;;  %15635 = vmatpush1.bf16.msra.mxu0 %v15634_v12 }
 0x610   : > { %15567 = vmatmul.mubr.msk.f32.vlgmr.msra.gmra.mrb[2].mxu0 %vm2009_vm5, %v8232_v16 }
 0x611   : > { %v22230_v20 = vpop.permute.xlu0 %8402  ;;  %v22232_v41 = vpop.permute.xlu1 %8404  ;;  %8310 = vmatprep.mubr.f32.mxu0 %v26704_v27 }
 0x612   : > { %v8490_v5 = vcombine.low %v22219_v19, %v22230_v20  ;;  %v8762_v40 = vcombine.low %v22221_v35, %v22232_v41  ;;  %v8491_v37 = vcombine.high %v22219_v19, %v22230_v20 }
 0x614   : > { %15568 = vmatmul.mubr.msk.f32.gmra.mrb[4].mxu0 %vm2009_vm5, %v8233_v10  ;;  %v22271_v22 = vrot.slane %v8490_v5, %v17494_v44  ;;  %v22367_v15 = vrot.slane %v8491_v37, %v17494_v44 }
 0x615   : > { %v8407_v7 = vpop.permute.xlu0 %8406  ;;  %v22236_v9 = vpop.permute.xlu1 %8408  ;;  %13479 = vmatprep.mubr.f32.mxu0 %v26704_v27 }
 0x616   : > { %v8506_v61 = vcombine.low %v22225_v25, %v8407_v7  ;;  %v8778_v53 = vcombine.low %v22227_v0, %v22236_v9 }
 0x618   : > { %v22259_v13 = vrot.slane %v8506_v61, %v17494_v44  ;;  %v22264_v42 = vrot.slane %v8778_v53, %v17494_v44  ;;  %v22277_v61 = vrot.slane %v8762_v40, %v17494_v44 }
 0x619   : > { %v22239_v55 = vpop.permute.xlu0 %8410  ;;  %v22241_v12 = vpop.permute.xlu1 %8412 }
 0x61a   : > { %v8554_v53 = vcombine.low %v22271_v22, %v22259_v13  ;;  %v8826_v63 = vcombine.low %v22277_v61, %v22264_v42 }
 0x61c   : > { %v22304_v6 = vrot.slane %v8554_v53, %v17507_v58  ;;  %v22310_v43 = vrot.slane %v8826_v63, %v17507_v58  ;;  %v9178_v63 = vcombine.high %v22053_v34, %v22069_v32  ;;  %v9210_v53 = vcombine.high %v22085_v56, %v22101_v14 }
 0x61d   : > { %v22243_v24 = vpop.permute.xlu0 %8414  ;;  %v22245_v26 = vpop.permute.xlu1 %8416  ;;  %v9226_v34 = vcombine.high %v22093_v49, %v22109_v33  ;;  %v8779_v56 = vcombine.high %v22227_v0, %v22236_v9 }
 0x61e   : > { %26813 = vst [vmem:[#allocation194_spill] sm:$0xff] %v22304_v6  ;;  %26815 = vst [vmem:[#allocation231_spill] sm:$0xff] %v22310_v43  ;;  %v22343_v32 = vrot.slane %v9178_v63, %v17494_v44 }
 0x61f   : > { %v22372_v63 = vrot.slane %v9226_v34, %v17494_v44 }
 0x620   : > { %26817 = vst [vmem:[#allocation198_spill] sm:$0xff] %v22343_v32 }
 0x621   : > { %v22250_v57 = vpop.permute.xlu0 %8418  ;;  %v22252_v21 = vpop.permute.xlu1 %8420 }
 0x622   : > { %v8522_v11 = vcombine.low %v22239_v55, %v22250_v57  ;;  %v8794_v46 = vcombine.low %v22241_v12, %v22252_v21 }
 0x624   : > { %v22282_v27 = vrot.slane %v8522_v11, %v17494_v44  ;;  %v22293_v31 = vrot.slane %v8794_v46, %v17494_v44 }
 0x625   : > { %v8423_v23 = vpop.permute.xlu0 %8422  ;;  %v22268_v47 = vpop.permute.xlu1 %8424 }
 0x626   : > { %v8538_v16 = vcombine.low %v22243_v24, %v8423_v23  ;;  %v8810_v10 = vcombine.low %v22245_v26, %v22268_v47  ;;  %v8539_v49 = vcombine.high %v22243_v24, %v8423_v23  ;;  %v8555_v23 = vcombine.high %v22271_v22, %v22259_v13 }
 0x627   : > { %v22392_v22 = vrot.slane %v8779_v56, %v17494_v44 }
 0x628   : > { %v22285_v38 = vrot.slane %v8538_v16, %v17494_v44  ;;  %v22288_v5 = vrot.slane %v8810_v10, %v17494_v44  ;;  %v22406_v13 = vrot.slane %v8555_v23, %v17507_v58 }
 0x629   : > { %v22295_v40 = vpop.permute.xlu0 %8426  ;;  %v22297_v30 = vpop.permute.xlu1 %8428 }
 0x62a   : > { %v8586_v11 = vcombine.low %v22282_v27, %v22285_v38  ;;  %v8858_v16 = vcombine.low %v22293_v31, %v22288_v5  ;;  %v8587_v23 = vcombine.high %v22282_v27, %v22285_v38 }
 0x62c   : > { %v22307_v10 = vrot.slane %v8586_v11, %v17507_v58  ;;  %v22313_v46 = vrot.slane %v8858_v16, %v17507_v58  ;;  %v8507_v16 = vcombine.high %v22225_v25, %v8407_v7  ;;  %v22362_v25 = vrot.slane %v9210_v53, %v17494_v44 }
 0x62d   : > { %v22315_v28 = vpop.permute.xlu0 %8430  ;;  %v22317_v51 = vpop.permute.xlu1 %8432  ;;  %v8523_v53 = vcombine.high %v22239_v55, %v22250_v57  ;;  %v22395_v55 = vrot.slane %v8539_v49, %v17494_v44 }
 0x62e   : > { %26814 = vst [vmem:[#allocation29_spill] sm:$0xff] %v22307_v10  ;;  %26816 = vst [vmem:[#allocation230_spill] sm:$0xff] %v22313_v46  ;;  %v22348_v50 = vrot.slane %v8507_v16, %v17494_v44 }
 0x62f   : > { %26822 = vst [vmem:[#allocation62_spill] sm:$0xff] %v22362_v25  ;;  %v8537_v49 = vrot.slane %v8523_v53, %v17494_v44 }
 0x630   : > { %v8570_v48 = vcombine.low %v22367_v15, %v22348_v50  ;;  %v8571_v57 = vcombine.high %v22367_v15, %v22348_v50 }
 0x631   : > { %v8435_v17 = vpop.permute.xlu0 %8434  ;;  %v22323_v54 = vpop.permute.xlu1 %8436  ;;  %v8602_v3 = vcombine.low %v8537_v49, %v22395_v55  ;;  %v8603_v56 = vcombine.high %v8537_v49, %v22395_v55 }
 0x632   : > { %v8626_v24 = vcombine.low %v22295_v40, %v8435_v17  ;;  %v8627_v20 = vcombine.high %v22295_v40, %v8435_v17  ;;  %v22413_v15 = vrot.slane %v8570_v48, %v17507_v58  ;;  %v8898_v17 = vcombine.low %v22297_v30, %v22323_v54 }
 0x634   : > { %v8634_v53 = vrot.slane %v8626_v24, %v17494_v44 }
 0x635   : > { %v8439_v11 = vpop.permute.xlu0 %8438  ;;  %v22325_v52 = vpop.permute.xlu1 %8440 }
 0x636   : > { %v8642_v34 = vcombine.low %v22315_v28, %v8439_v11  ;;  %v8914_v37 = vcombine.low %v22317_v51, %v22325_v52  ;;  %v8643_v50 = vcombine.high %v22315_v28, %v8439_v11  ;;  %v8641_v28 = vrot.slane %v8627_v20, %v17494_v44 }
 0x638   : > { %v8650_v40 = vrot.slane %v8642_v34, %v17494_v44  ;;  %v22425_v11 = vrot.slane %v8914_v37, %v17494_v44  ;;  %v8657_v33 = vrot.slane %v8643_v50, %v17494_v44  ;;  %v8601_v50 = vrot.slane %v8587_v23, %v17507_v58 }
 0x639   : > { %v8443_v43 = vpop.permute.xlu0 %8442  ;;  %v22338_v46 = vpop.permute.xlu1 %8444 }
 0x63a   : > { %v8690_v24 = vcombine.low %v8634_v53, %v8650_v40  ;;  %v8707_v25 = vcombine.high %v8641_v28, %v8657_v33 }
 0x63d   : > { %v8447_v7 = vpop.permute.xlu0 %8446  ;;  %v22369_v60 = vpop.permute.xlu1 %8448 }
 0x641   : > { %v8451_v16 = vpop.permute.xlu0 %8450  ;;  %v22403_v19 = vpop.permute.xlu1 %8452 }
 0x642   : > { %v8658_v18 = vcombine.low %v8443_v43, %v8451_v16  ;;  %v8659_v29 = vcombine.high %v8443_v43, %v8451_v16  ;;  %v8930_v48 = vcombine.low %v22338_v46, %v22403_v19  ;;  %v22432_v43 = vrot.slane %v8898_v17, %v17494_v44 }
 0x643   : > { %v8691_v16 = vcombine.high %v8634_v53, %v8650_v40  ;;  %v8706_v40 = vcombine.low %v8641_v28, %v8657_v33 }
 0x644   : > { %v8666_v20 = vrot.slane %v8658_v18, %v17494_v44  ;;  %v8673_v37 = vrot.slane %v8659_v29, %v17494_v44  ;;  %v8962_v17 = vcombine.low %v22432_v43, %v22425_v11  ;;  %v22445_v29 = vrot.slane %v8690_v24, %v17507_v58 }
 0x645   : > { %v8455_v34 = vpop.permute.xlu0 %8454  ;;  %v8457_v14 = vpop.permute.xlu1 %8456  ;;  %v8705_v23 = vrot.slane %v8691_v16, %v17507_v58  ;;  %v8811_v16 = vcombine.high %v22245_v26, %v22268_v47  ;;  %v8899_v26 = vcombine.high %v22297_v30, %v22323_v54  ;;  %v8963_v30 = vcombine.high %v22432_v43, %v22425_v11 }
 0x646   : > { %v8674_v27 = vcombine.low %v8447_v7, %v8455_v34  ;;  %v8675_v38 = vcombine.high %v8447_v7, %v8455_v34  ;;  %v8946_v32 = vcombine.low %v22369_v60, %v8457_v14  ;;  %v8610_v7 = vrot.slane %v8602_v3, %v17507_v58 }
 0x647   : > { %v8938_v34 = vrot.slane %v8930_v48, %v17494_v44  ;;  %v8947_v28 = vcombine.high %v22369_v60, %v8457_v14  ;;  %v8915_v14 = vcombine.high %v22317_v51, %v22325_v52  ;;  %v8825_v51 = vrot.slane %v8811_v16, %v17494_v44  ;;  %v26827_v16 = vld [vmem:[#allocation230_spill] sm:$0xff] }
 0x648   : > { %v8682_v55 = vrot.slane %v8674_v27, %v17494_v44  ;;  %v8689_v49 = vrot.slane %v8675_v38, %v17494_v44  ;;  %v8954_v59 = vrot.slane %v8946_v32, %v17494_v44  ;;  %v8619_v32 = vcombine.high %v22304_v6, %v22307_v10 }
 0x649   : > { %v8617_v6 = vrot.slane %v8603_v56, %v17507_v58  ;;  %v8622_v60 = vcombine.low %v22413_v15, %v8610_v7  ;;  %v8961_v47 = vrot.slane %v8947_v28, %v17494_v44  ;;  %v8859_v52 = vcombine.high %v22293_v31, %v22288_v5 }
 0x64a   : > { %v8722_v53 = vcombine.low %v8666_v20, %v8682_v55  ;;  %v8723_v18 = vcombine.high %v8666_v20, %v8682_v55  ;;  %v8738_v0 = vcombine.low %v8673_v37, %v8689_v49  ;;  %v8739_v27 = vcombine.high %v8673_v37, %v8689_v49 }
 0x64b   : > { %v8994_v38 = vcombine.low %v8938_v34, %v8954_v59  ;;  %v22456_v20 = vrot.slane %v8962_v17, %v17507_v58  ;;  %v8620_v37 = vcombine.low %v22406_v13, %v8601_v50  ;;  %v8714_v55 = vrot.slane %v8706_v40, %v17507_v58 }
 0x64c   : > { %v22451_v3 = vrot.slane %v8722_v53, %v17507_v58  ;;  %v8737_v9 = vrot.slane %v8723_v18, %v17507_v58  ;;  %v8746_v48 = vrot.slane %v8738_v0, %v17507_v58  ;;  %v8585_v0 = vrot.slane %v8571_v57, %v17507_v58 }
 0x64d   : > { %v22459_v24 = vrot.slane %v8994_v38, %v17507_v58  ;;  %v8753_v33 = vrot.slane %v8739_v27, %v17507_v58  ;;  %v8621_v57 = vcombine.high %v22406_v13, %v8601_v50  ;;  %v8721_v27 = vrot.slane %v8707_v25, %v17507_v58 }
 0x64e   : > { %26825 = vst [vmem:[#allocation193_spill] sm:$0xff] %v22451_v3  ;;  %v8755_v49 = vcombine.high %v22445_v29, %v22451_v3  ;;  %v8756_v53 = vcombine.low %v8705_v23, %v8737_v9  ;;  %v8757_v10 = vcombine.high %v8705_v23, %v8737_v9  ;;  %v8758_v40 = vcombine.low %v8714_v55, %v8746_v48 }
 0x64f   : > { %v9026_v17 = vcombine.low %v22456_v20, %v22459_v24  ;;  %v8931_v3 = vcombine.high %v22338_v46, %v22403_v19  ;;  %v8795_v9 = vcombine.high %v22241_v12, %v22252_v21  ;;  %v8995_v46 = vcombine.high %v8938_v34, %v8954_v59 }
 0x650   : > { %v16347_v18 = vpack.i.bf16 %v8755_v49, %v8619_v32  ;;  %v16352_v38 = vpack.i.bf16 %v8756_v53, %v8620_v37  ;;  %v16357_v19 = vpack.i.bf16 %v8757_v10, %v8621_v57  ;;  %v16362_v25 = vpack.i.bf16 %v8758_v40, %v8622_v60  ;;  %v26828_v49 = vld [vmem:[#allocation231_spill] sm:$0xff] }
 0x651   : > { %v8759_v13 = vcombine.high %v8714_v55, %v8746_v48  ;;  %v8760_v56 = vcombine.low %v8721_v27, %v8753_v33  ;;  %v8945_v50 = vrot.slane %v8931_v3, %v17494_v44  ;;  %v8623_v32 = vcombine.high %v22413_v15, %v8610_v7 }
 0x652   : > { %16348 = vrot.lane.b32.xlu0 %v16347_v18, %s17206_s12  ;;  %16353 = vrot.lane.b32.xlu1 %v16352_v38, %s17205_s11  ;;  %v8929_v12 = vrot.slane %v8915_v14, %v17494_v44  ;;  %v8624_v54 = vcombine.low %v8585_v0, %v8617_v6  ;;  %v8809_v21 = vrot.slane %v8795_v9, %v17494_v44 }
 0x653   : > { %v8913_v10 = vrot.slane %v8899_v26, %v17494_v44  ;;  %v9009_v31 = vrot.slane %v8995_v46, %v17507_v58  ;;  %v9010_v5 = vcombine.low %v8945_v50, %v8961_v47  ;;  %v16367_v59 = vpack.i.bf16 %v8759_v13, %v8623_v32  ;;  %v26832_v46 = vld [vmem:[#allocation101_spill] sm:$0xff] }
 0x654   : > { %v16372_v34 = vpack.i.bf16 %v8760_v56, %v8624_v54  ;;  %v8761_v15 = vcombine.high %v8721_v27, %v8753_v33  ;;  %v9027_v7 = vcombine.high %v22456_v20, %v22459_v24  ;;  %v26826_v11 = vcombine.high %v22221_v35, %v22232_v41 }
 0x655   : > { %v8873_v23 = vrot.slane %v8859_v52, %v17507_v58  ;;  %v8874_v3 = vcombine.low %v8809_v21, %v8825_v51  ;;  %v8625_v48 = vcombine.high %v8585_v0, %v8617_v6  ;;  %v8977_v37 = vrot.slane %v8963_v30, %v17507_v58  ;;  %v26835_v30 = vld [vmem:[#allocation106_spill] sm:$0xff] }
 0x656   : > { %16358 = vrot.lane.b32.xlu0 %v16357_v19, %s17204_s10  ;;  %16363 = vrot.lane.b32.xlu1 %v16362_v25, %s17203_s9  ;;  %v8777_v43 = vrot.slane %v26826_v11, %v17494_v44  ;;  %v8978_v55 = vcombine.low %v8913_v10, %v8929_v12  ;;  %v8891_v53 = vcombine.high %v26828_v49, %v26827_v16 }
 0x657   : > { %v26829_v33 = vcombine.high %v22277_v61, %v22264_v42  ;;  %v9011_v28 = vcombine.high %v8945_v50, %v8961_v47  ;;  %v9018_v6 = vrot.slane %v9010_v5, %v17507_v58  ;;  %v16377_v0 = vpack.i.bf16 %v8761_v15, %v8625_v48  ;;  %v26831_v47 = vld [vmem:[#allocation92_spill] sm:$0xff] }
 0x658   : > { %v8842_v41 = vcombine.low %v8777_v43, %v22392_v22  ;;  %v16382_v18 = vpack.i.bf16 %v9027_v7, %v8891_v53  ;;  %v9028_v38 = vcombine.low %v8977_v37, %v9009_v31  ;;  %v9029_v40 = vcombine.high %v8977_v37, %v9009_v31  ;;  %v26840_v37 = vld [vmem:[#allocation62_spill] sm:$0xff] }
 0x659   : > { %v8841_v35 = vrot.slane %v26829_v33, %v17507_v58  ;;  %v26830_v57 = vcombine.high %v22157_v45, %v22173_v2  ;;  %v8875_v14 = vcombine.high %v8809_v21, %v8825_v51  ;;  %v8882_v60 = vrot.slane %v8874_v3, %v17507_v58  ;;  %v26839_v3 = vld [vmem:[#allocation38_spill] sm:$0xff] }
 0x65a   : > { %16368 = vrot.lane.b32.xlu0 %v16367_v59, %s17202_s8  ;;  %16373 = vrot.lane.b32.xlu1 %v16372_v34, %s17200_s30  ;;  %v8979_v61 = vcombine.high %v8913_v10, %v8929_v12  ;;  %v8986_v9 = vrot.slane %v8978_v55, %v17507_v58  ;;  %v9410_v19 = vcombine.high %v26832_v46, %v26831_v47  ;;  %v26834_v12 = vld [vmem:[#allocation99_spill] sm:$0xff] }
 0x65b   : > { %v22524_v27 = vrot.slane %v26830_v57, %v17494_v44  ;;  %v8892_v42 = vcombine.low %v8841_v35, %v8873_v23  ;;  %v8893_v26 = vcombine.high %v8841_v35, %v8873_v23  ;;  %v8843_v25 = vcombine.high %v8777_v43, %v22392_v22  ;;  %v26838_v23 = vld [vmem:[#allocation225_spill] sm:$0xff]  ;;  %v26846_v57 = vld [vmem:[#allocation111_spill] sm:$0xff] }
 0x65c   : > { %v8850_v45 = vrot.slane %v8842_v41, %v17507_v58  ;;  %v9025_v2 = vrot.slane %v9011_v28, %v17507_v58  ;;  %v9030_v51 = vcombine.low %v8986_v9, %v9018_v6  ;;  %v9031_v52 = vcombine.high %v8986_v9, %v9018_v6 }
 0x65d   : > { %v16387_v13 = vpack.i.bf16 %v9028_v38, %v8892_v42  ;;  %v16392_v56 = vpack.i.bf16 %v9029_v40, %v8893_v26  ;;  %v26833_v50 = vcombine.high %v22125_v62, %v22141_v36  ;;  %v9378_v54 = vcombine.high %v26835_v30, %v26834_v12  ;;  %v26848_v42 = vld [vmem:[#allocation104_spill] sm:$0xff]  ;;  %v26853_v30 = vld [vmem:[#allocation95_spill] sm:$0xff] }
 0x65e   : > { %16378 = vrot.lane.b32.xlu0 %v16377_v0, %s17201_s7  ;;  %16383 = vrot.lane.b32.xlu1 %v16382_v18, %s17206_s12  ;;  %v26836_v22 = vcombine.high %v22149_v8, %v22165_v39  ;;  %v8889_v10 = vrot.slane %v8875_v14, %v17507_v58  ;;  %v8993_v31 = vrot.slane %v8979_v61, %v17507_v58  ;;  %v26844_v0 = vld [vmem:[#allocation197_spill] sm:$0xff]  ;;  %v26845_v18 = vld [vmem:[#allocation198_spill] sm:$0xff]  ;;  %v26847_v14 = vld [vmem:[#allocation116_spill] sm:$0xff] }
 0x65f   : > { %v9344_v32 = vrot.slane %v26833_v50, %v17494_v44  ;;  %v8894_v5 = vcombine.low %v8850_v45, %v8882_v60  ;;  %v8895_v59 = vcombine.high %v8850_v45, %v8882_v60  ;;  %v26837_v62 = vcombine.high %v22117_v1, %v22133_v4  ;;  %v26841_v1 = vld [vmem:[#allocation96_spill] sm:$0xff]  ;;  %v26842_v4 = vld [vmem:[#allocation90_spill] sm:$0xff] }
 0x660   : > { %v9360_v21 = vrot.slane %v26836_v22, %v17494_v44  ;;  %v8857_v8 = vrot.slane %v8843_v25, %v17507_v58  ;;  %v9424_v39 = vrot.slane %v9410_v19, %v17507_v58  ;;  %v9032_v11 = vcombine.low %v8993_v31, %v9025_v2  ;;  %v26849_v61 = vld [vmem:[#allocation94_spill] sm:$0xff] }
 0x661   : > { %v9328_v36 = vrot.slane %v26837_v62, %v17494_v44  ;;  %v16397_v15 = vpack.i.bf16 %v9030_v51, %v8894_v5  ;;  %v16402_v7 = vpack.i.bf16 %v9031_v52, %v8895_v59  ;;  %v9033_v43 = vcombine.high %v8993_v31, %v9025_v2 }
 0x662   : > { %16388 = vrot.lane.b32.xlu0 %v16387_v13, %s17205_s11  ;;  %16393 = vrot.lane.b32.xlu1 %v16392_v56, %s17204_s10  ;;  %v9425_v34 = vcombine.low %v9360_v21, %v22524_v27  ;;  %v9482_v48 = vcombine.high %v26839_v3, %v26838_v23  ;;  %v9289_v55 = vcombine.low %v26840_v37, %v22372_v63  ;;  %v26851_v13 = vld [vmem:[#allocation110_spill] sm:$0xff]  ;;  %v26852_v56 = vld [vmem:[#allocation115_spill] sm:$0xff]  ;;  %v26862_v3 = vld [vmem:[#allocation200_spill] sm:$0xff] }
 0x663   : > { %v9393_v53 = vcombine.low %v9328_v36, %v9344_v32  ;;  %v26843_v33 = vcombine.high %v26841_v1, %v26842_v4  ;;  %v8896_v41 = vcombine.low %v8857_v8, %v8889_v10  ;;  %v8897_v28 = vcombine.high %v8857_v8, %v8889_v10  ;;  %v26856_v10 = vld [vmem:[#allocation184_spill] sm:$0xff]  ;;  %v26861_v23 = vld [vmem:[#allocation178_spill] sm:$0xff] }
 0x664   : > { %v9392_v6 = vrot.slane %v9378_v54, %v17507_v58  ;;  %v9257_v38 = vcombine.low %v26845_v18, %v26844_v0  ;;  %v9426_v40 = vcombine.high %v9360_v21, %v22524_v27  ;;  %v9442_v60 = vcombine.high %v26847_v14, %v26846_v57  ;;  %v26854_v54 = vld [vmem:[#allocation105_spill] sm:$0xff]  ;;  %v26855_v21 = vld [vmem:[#allocation215_spill] sm:$0xff]  ;;  %v26858_v8 = vld [vmem:[#allocation208_spill] sm:$0xff] }
 0x665   : > { %v9288_v35 = vrot.slane %v26843_v33, %v17507_v58  ;;  %v26850_v9 = vcombine.high %v26848_v42, %v26849_v61  ;;  %v16407_v47 = vpack.i.bf16 %v9032_v11, %v8896_v41  ;;  %v16412_v46 = vpack.i.bf16 %v9033_v43, %v8897_v28  ;;  %v26860_v11 = vld [vmem:[#allocation192_spill] sm:$0xff]  ;;  %v26863_v4 = vld [vmem:[#allocation26_spill] sm:$0xff]  ;;  %v26864_v33 = vld [vmem:[#allocation21_spill] sm:$0xff] }
 0x666   : > { %16398 = vrot.lane.b32.xlu0 %v16397_v15, %s17203_s9  ;;  %16403 = vrot.lane.b32.xlu1 %v16402_v7, %s17202_s8  ;;  %v9443_v19 = vcombine.low %v9392_v6, %v9424_v39  ;;  %v9433_v25 = vrot.slane %v9425_v34, %v17507_v58  ;;  %v9258_v45 = vcombine.high %v26845_v18, %v26844_v0  ;;  %v26857_v34 = vld [vmem:[#allocation220_spill] sm:$0xff]  ;;  %v26859_v7 = vld [vmem:[#allocation214_spill] sm:$0xff] }
 0x667   : > { %v9256_v26 = vrot.slane %v26850_v9, %v17507_v58  ;;  %v9290_v2 = vcombine.high %v26840_v37, %v22372_v63  ;;  %v9394_v27 = vcombine.high %v9328_v36, %v9344_v32  ;;  %v9306_v51 = vcombine.high %v26852_v56, %v26851_v13  ;;  %v26866_v0 = vld [vmem:[#allocation102_spill] sm:$0xff] }
 0x668   : > { %v9297_v50 = vrot.slane %v9289_v55, %v17507_v58  ;;  %v9401_v12 = vrot.slane %v9393_v53, %v17507_v58  ;;  %v9514_v22 = vcombine.high %v26854_v54, %v26853_v30  ;;  %v9634_v31 = vcombine.high %v26856_v10, %v26855_v21 }
 0x669   : > { %v9307_v52 = vcombine.low %v9256_v26, %v9288_v35  ;;  %v9444_v63 = vcombine.high %v9392_v6, %v9424_v39  ;;  %v9265_v32 = vrot.slane %v9257_v38, %v17507_v58  ;;  %v16417_v5 = vpack.i.bf16 %v9442_v60, %v9306_v51  ;;  %v26865_v6 = vld [vmem:[#allocation93_spill] sm:$0xff]  ;;  %v26870_v51 = vld [vmem:[#allocation107_spill] sm:$0xff] }
 0x66a   : > { %16408 = vrot.lane.b32.xlu0 %v16407_v47, %s17200_s30  ;;  %16413 = vrot.lane.b32.xlu1 %v16412_v46, %s17201_s7  ;;  %v9445_v62 = vcombine.low %v9401_v12, %v9433_v25  ;;  %v9440_v36 = vrot.slane %v9426_v40, %v17507_v58  ;;  %v9498_v15 = vcombine.high %v26858_v8, %v26857_v34  ;;  %v26867_v46 = vld [vmem:[#allocation91_spill] sm:$0xff] }
 0x66b   : > { %v16422_v59 = vpack.i.bf16 %v9443_v19, %v9307_v52  ;;  %v9602_v43 = vcombine.high %v26860_v11, %v26859_v7  ;;  %v9618_v37 = vcombine.high %v26862_v3, %v26861_v23  ;;  %v9308_v55 = vcombine.high %v9256_v26, %v9288_v35  ;;  %v26868_v19 = vld [vmem:[#allocation97_spill] sm:$0xff]  ;;  %v26878_v3 = vld [vmem:[#allocation226_spill] sm:$0xff] }
 0x66c   : > { %v9309_v39 = vcombine.low %v9265_v32, %v9297_v50  ;;  %v9304_v53 = vrot.slane %v9290_v2, %v17507_v58  ;;  %v9408_v1 = vrot.slane %v9394_v27, %v17507_v58  ;;  %v9586_v41 = vcombine.high %v26864_v33, %v26863_v4  ;;  %v26869_v27 = vld [vmem:[#allocation100_spill] sm:$0xff]  ;;  %v26877_v11 = vld [vmem:[#allocation117_spill] sm:$0xff] }
 0x66d   : > { %v9648_v28 = vrot.slane %v9634_v31, %v17494_v44  ;;  %v9682_v18 = vcombine.high %v26866_v0, %v26865_v6  ;;  %v9446_v38 = vcombine.high %v9401_v12, %v9433_v25  ;;  %v16427_v40 = vpack.i.bf16 %v9444_v63, %v9308_v55  ;;  %v26872_v31 = vld [vmem:[#allocation118_spill] sm:$0xff] }
 0x66e   : > { %16418 = vrot.lane.b32.xlu0 %v16417_v5, %s17206_s12  ;;  %16423 = vrot.lane.b32.xlu1 %v16422_v59, %s17205_s11  ;;  %v16432_v35 = vpack.i.bf16 %v9445_v62, %v9309_v39  ;;  %v9272_v60 = vrot.slane %v9258_v45, %v17507_v58  ;;  %v9447_v42 = vcombine.low %v9408_v1, %v9440_v36  ;;  %v26873_v5 = vld [vmem:[#allocation30_spill] sm:$0xff]  ;;  %v26874_v59 = vld [vmem:[#allocation47_spill] sm:$0xff] }
 0x66f   : > { %v9512_v61 = vrot.slane %v9498_v15, %v17494_v44  ;;  %v9616_v9 = vrot.slane %v9602_v43, %v17494_v44  ;;  %v9632_v26 = vrot.slane %v9618_v37, %v17494_v44  ;;  %v9310_v47 = vcombine.high %v9265_v32, %v9297_v50  ;;  %v26871_v50 = vld [vmem:[#allocation113_spill] sm:$0xff] }
 0x670   : > { %v9546_v2 = vcombine.high %v26868_v19, %v26867_v46  ;;  %v9650_v52 = vcombine.high %v26870_v51, %v26869_v27  ;;  %v9311_v25 = vcombine.low %v9272_v60, %v9304_v53  ;;  %v9496_v45 = vrot.slane %v9482_v48, %v17494_v44  ;;  %v26876_v48 = vld [vmem:[#allocation112_spill] sm:$0xff] }
 0x671   : > { %v9600_v12 = vrot.slane %v9586_v41, %v17494_v44  ;;  %v9697_v30 = vcombine.low %v9632_v26, %v9648_v28  ;;  %v16437_v54 = vpack.i.bf16 %v9446_v38, %v9310_v47  ;;  %v9448_v10 = vcombine.high %v9408_v1, %v9440_v36 }
 0x672   : > { %16428 = vrot.lane.b32.xlu0 %v16427_v40, %s17204_s10  ;;  %16433 = vrot.lane.b32.xlu1 %v16432_v35, %s17203_s9  ;;  %v16442_v21 = vpack.i.bf16 %v9447_v42, %v9311_v25  ;;  %v9714_v63 = vcombine.high %v26872_v31, %v26871_v50  ;;  %v9696_v32 = vrot.slane %v9682_v18, %v17507_v58 }
 0x673   : > { %v26875_v62 = vcombine.high %v26873_v5, %v26874_v59  ;;  %v9561_v8 = vcombine.low %v9496_v45, %v9512_v61  ;;  %v9665_v15 = vcombine.low %v9600_v12, %v9616_v9  ;;  %v9312_v7 = vcombine.high %v9272_v60, %v9304_v53  ;;  %v10033_v5 = vld [vmem:[#allocation2 + $0x21] sm:$0xff]  ;;  %v22662_v59 = vld [vmem:[#allocation2 + $0x31] sm:$0xff] }
 0x674   : > { %v9578_v36 = vcombine.high %v26877_v11, %v26876_v48  ;;  %v9560_v43 = vrot.slane %v9546_v2, %v17507_v58  ;;  %v9664_v23 = vrot.slane %v9650_v52, %v17507_v58  ;;  %v9698_v55 = vcombine.high %v9632_v26, %v9648_v28  ;;  %26879 = vst [vmem:[#allocation55_spill] sm:$0xff] %v22662_v59 }
 0x675   : > { %v9464_v34 = vrot.slane %v26875_v62, %v17494_v44  ;;  %v9528_v39 = vrot.slane %v9514_v22, %v17507_v58  ;;  %v9705_v1 = vrot.slane %v9697_v30, %v17507_v58  ;;  %v16447_v4 = vpack.i.bf16 %v9448_v10, %v9312_v7  ;;  %v22652_v10 = vld [vmem:[#allocation2 + $0x1] sm:$0xff]  ;;  %v10035_v62 = vld [vmem:[#allocation2 + $0x39] sm:$0xff]  ;;  %v10039_v7 = vld [vmem:[#allocation2 + $0x69] sm:$0xff] }
 0x676   : > { %16438 = vrot.lane.b32.xlu0 %v16437_v54, %s17202_s8  ;;  %16443 = vrot.lane.b32.xlu1 %v16442_v21, %s17200_s30  ;;  %v16452_v53 = vpack.i.bf16 %v9714_v63, %v9578_v36  ;;  %v9715_v33 = vcombine.low %v9664_v23, %v9696_v32  ;;  %v9716_v41 = vcombine.high %v9664_v23, %v9696_v32  ;;  %v10031_v63 = vld [vmem:[#allocation2 + $0x9] sm:$0xff]  ;;  %v22657_v32 = vld [vmem:[#allocation2 + $0x19] sm:$0xff]  ;;  %v22682_v23 = vld [vmem:[#allocation2 + $0x91] sm:$0xff] }
 0x677   : > { %v9529_v37 = vcombine.low %v9464_v34, %v26878_v3  ;;  %v9562_v6 = vcombine.high %v9496_v45, %v9512_v61  ;;  %v9569_v0 = vrot.slane %v9561_v8, %v17507_v58  ;;  %v9673_v18 = vrot.slane %v9665_v15, %v17507_v58  ;;  %v10037_v8 = vld [vmem:[#allocation2 + $0x51] sm:$0xff]  ;;  %v22672_v15 = vld [vmem:[#allocation2 + $0x61] sm:$0xff]  ;;  %v22677_v36 = vld [vmem:[#allocation2 + $0x79] sm:$0xff] }
 0x678   : > { %v9666_v38 = vcombine.high %v9600_v12, %v9616_v9  ;;  %v9579_v40 = vcombine.low %v9528_v39, %v9560_v43  ;;  %v9580_v28 = vcombine.high %v9528_v39, %v9560_v43  ;;  %v9530_v22 = vcombine.high %v9464_v34, %v26878_v3  ;;  %v22667_v34 = vld [vmem:[#allocation2 + $0x49] sm:$0xff]  ;;  %v10041_v43 = vld [vmem:[#allocation2 + $0x81] sm:$0xff]  ;;  %v10043_v3 = vld [vmem:[#allocation2 + $0x99] sm:$0xff] }
 0x679   : > { %v9537_v35 = vrot.slane %v9529_v37, %v17507_v58  ;;  %v9717_v60 = vcombine.low %v9673_v18, %v9705_v1  ;;  %v9718_v47 = vcombine.high %v9673_v18, %v9705_v1  ;;  %v9712_v61 = vrot.slane %v9698_v55, %v17507_v58  ;;  %v22687_v37 = vld [vmem:[#allocation2 + $0xa9] sm:$0xff]  ;;  %v10045_v55 = vld [vmem:[#allocation2 + $0xb1] sm:$0xff]  ;;  %v22692_v39 = vld [vmem:[#allocation2 + $0xc1] sm:$0xff] }
 0x67a   : > { %16448 = vrot.lane.b32.xlu0 %v16447_v4, %s17201_s7  ;;  %16453 = vrot.lane.b32.xlu1 %v16452_v53, %s17206_s12  ;;  %v16457_v42 = vpack.i.bf16 %v9715_v33, %v9579_v40  ;;  %v16462_v26 = vpack.i.bf16 %v9716_v41, %v9580_v28  ;;  %v9576_v19 = vrot.slane %v9562_v6, %v17507_v58  ;;  %v10047_v1 = vld [vmem:[#allocation2 + $0xc9] sm:$0xff]  ;;  %v22697_v4 = vld [vmem:[#allocation2 + $0xd9] sm:$0xff]  ;;  %v10049_v53 = vld [vmem:[#allocation2 + $0xe1] sm:$0xff] }
 0x67b   : > { %v9581_v46 = vcombine.low %v9537_v35, %v9569_v0  ;;  %v9582_v9 = vcombine.high %v9537_v35, %v9569_v0  ;;  %v9680_v2 = vrot.slane %v9666_v38, %v17507_v58  ;;  %v9544_v52 = vrot.slane %v9530_v22, %v17507_v58  ;;  %v22702_v33 = vld [vmem:[#allocation2 + $0xf1] sm:$0xff]  ;;  %v10051_v41 = vld [vmem:[#allocation2 + $0xf9] sm:$0xff]  ;;  %v22707_v6 = vld [vmem:[#allocation2 + $0x109] sm:$0xff] }
 0x67c   : > { %v10053_v0 = vld [vmem:[#allocation2 + $0x111] sm:$0xff]  ;;  %v22712_v18 = vld [vmem:[#allocation2 + $0x121] sm:$0xff]  ;;  %v10055_v38 = vld [vmem:[#allocation2 + $0x129] sm:$0xff] }
 0x67d   : > { %v16467_v27 = vpack.i.bf16 %v9717_v60, %v9581_v46  ;;  %v16472_v51 = vpack.i.bf16 %v9718_v47, %v9582_v9  ;;  %v9719_v25 = vcombine.low %v9680_v2, %v9712_v61  ;;  %v9720_v45 = vcombine.high %v9680_v2, %v9712_v61  ;;  %26880 = vst [vmem:[#allocation191_spill] sm:$0xff] %v22712_v18  ;;  %v22717_v40 = vld [vmem:[#allocation2 + $0x139] sm:$0xff]  ;;  %v10057_v28 = vld [vmem:[#allocation2 + $0x141] sm:$0xff]  ;;  %v22722_v22 = vld [vmem:[#allocation2 + $0x151] sm:$0xff] }
 0x67e   : > { %16458 = vrot.lane.b32.xlu0 %v16457_v42, %s17205_s11  ;;  %16463 = vrot.lane.b32.xlu1 %v16462_v26, %s17204_s10  ;;  %v9583_v12 = vcombine.low %v9544_v52, %v9576_v19  ;;  %v9584_v30 = vcombine.high %v9544_v52, %v9576_v19  ;;  %26881 = vst [vmem:[#allocation73_spill] sm:$0xff] %v22722_v22  ;;  %v10059_v35 = vld [vmem:[#allocation2 + $0x159] sm:$0xff]  ;;  %v22727_v61 = vld [vmem:[#allocation2 + $0x169] sm:$0xff]  ;;  %v22731_v19 = vld [vmem:[#allocation2 + $0x171] sm:$0xff] }
 0x67f   : > { %26882 = vst [vmem:[#allocation74_spill] sm:$0xff] %v22731_v19  ;;  %v26883_v2 = vld [vmem:[#allocation194_spill] sm:$0xff] }
 0x680   : > { %v16477_v54 = vpack.i.bf16 %v9719_v25, %v9583_v12  ;;  %v16482_v21 = vpack.i.bf16 %v9720_v45, %v9584_v30  ;;  %v26886_v25 = vld [vmem:[#allocation193_spill] sm:$0xff] }
 0x681   : > { %v26887_v45 = vcombine.low %v22445_v29, %v26886_v25 }
 0x682   : > { %16468 = vrot.lane.b32.xlu0 %v16467_v27, %s17203_s9  ;;  %16473 = vrot.lane.b32.xlu1 %v16472_v51, %s17202_s8  ;;  %v26884_v27 = vld [vmem:[#allocation29_spill] sm:$0xff] }
 0x683   : > { %v26885_v51 = vcombine.low %v26883_v2, %v26884_v27 }
 0x686   : > { %16478 = vrot.lane.b32.xlu0 %v16477_v54, %s17200_s30  ;;  %16483 = vrot.lane.b32.xlu1 %v16482_v21, %s17201_s7 }
 0x68a   : > { %10094 = vrot.lane.b32.xlu0 %v22652_v10, %s17210_s14  ;;  %10096 = vrot.lane.b32.xlu1 %v10031_v63, %s17210_s14 }
 0x68e   : > { %10098 = vrot.lane.b32.xlu0 %v22657_v32, %s17210_s14  ;;  %10100 = vrot.lane.b32.xlu1 %v10033_v5, %s17210_s14 }
 0x692   : > { %10102 = vrot.lane.b32.xlu0 %v22662_v59, %s17210_s14  ;;  %10104 = vrot.lane.b32.xlu1 %v10035_v62, %s17210_s14 }
 0x696   : > { %10106 = vrot.lane.b32.xlu0 %v22667_v34, %s17210_s14  ;;  %10108 = vrot.lane.b32.xlu1 %v10037_v8, %s17210_s14 }
 0x69a   : > { %10110 = vrot.lane.b32.xlu0 %v22672_v15, %s17210_s14  ;;  %10112 = vrot.lane.b32.xlu1 %v10039_v7, %s17210_s14 }
 0x69e   : > { %10114 = vrot.lane.b32.xlu0 %v22677_v36, %s17210_s14  ;;  %10116 = vrot.lane.b32.xlu1 %v10041_v43, %s17210_s14 }
 0x6a2   : > { %10118 = vrot.lane.b32.xlu0 %v22682_v23, %s17210_s14  ;;  %10120 = vrot.lane.b32.xlu1 %v10043_v3, %s17210_s14 }
 0x6a6   : > { %10122 = vrot.lane.b32.xlu0 %v22687_v37, %s17210_s14  ;;  %10124 = vrot.lane.b32.xlu1 %v10045_v55, %s17210_s14 }
 0x6aa   : > { %10126 = vrot.lane.b32.xlu0 %v22692_v39, %s17210_s14  ;;  %10128 = vrot.lane.b32.xlu1 %v10047_v1, %s17210_s14 }
 0x6ae   : > { %10130 = vrot.lane.b32.xlu0 %v22697_v4, %s17210_s14  ;;  %10132 = vrot.lane.b32.xlu1 %v10049_v53, %s17210_s14 }
 0x6b2   : > { %10134 = vrot.lane.b32.xlu0 %v22702_v33, %s17210_s14  ;;  %10136 = vrot.lane.b32.xlu1 %v10051_v41, %s17210_s14 }
 0x6b6   : > { %10138 = vrot.lane.b32.xlu0 %v22707_v6, %s17210_s14  ;;  %10140 = vrot.lane.b32.xlu1 %v10053_v0, %s17210_s14 }
 0x6ba   : > { %10142 = vrot.lane.b32.xlu0 %v22712_v18, %s17210_s14  ;;  %10144 = vrot.lane.b32.xlu1 %v10055_v38, %s17210_s14 }
 0x6be   : > { %10146 = vrot.lane.b32.xlu0 %v22717_v40, %s17210_s14  ;;  %10148 = vrot.lane.b32.xlu1 %v10057_v28, %s17210_s14 }
 0x6c2   : > { %10150 = vrot.lane.b32.xlu0 %v22722_v22, %s17210_s14  ;;  %10152 = vrot.lane.b32.xlu1 %v10059_v35, %s17210_s14 }
 0x6c4   : > { %v16349_v60 = vpop.permute.xlu0 %16348  ;;  %v16354_v42 = vpop.permute.xlu1 %16353 }
 0x6c5   : > { %v16351_v26 = vunpack.i.h.bf16 %v16349_v60  ;;  %v16350_v47 = vunpack.i.l.bf16 %v16349_v60  ;;  %v16356_v46 = vunpack.i.h.bf16 %v16354_v42  ;;  %v16355_v9 = vunpack.i.l.bf16 %v16354_v42 }
 0x6c6   : > { %10154 = vrot.lane.b32.xlu0 %v22727_v61, %s17210_s14  ;;  %10156 = vrot.lane.b32.xlu1 %v22731_v19, %s17210_s14 }
 0x6c7   : > { %v9146_v52 = vsel %vm2009_vm5, %v26885_v51, %v16350_v47  ;;  %v9147_v12 = vsel %vm2009_vm5, %v26887_v45, %v16351_v26 }
 0x6c8   : > { %v16359_v30 = vpop.permute.xlu0 %16358  ;;  %v16364_v54 = vpop.permute.xlu1 %16363  ;;  %v9149_v5 = vsel %vm2012_vm6, %v9147_v12, %v16356_v46  ;;  %v9148_v62 = vsel %vm2012_vm6, %v9146_v52, %v16355_v9 }
 0x6c9   : > { %v16361_v21 = vunpack.i.h.bf16 %v16359_v30  ;;  %v16360_v63 = vunpack.i.l.bf16 %v16359_v30  ;;  %v16366_v8 = vunpack.i.h.bf16 %v16364_v54  ;;  %v16365_v7 = vunpack.i.l.bf16 %v16364_v54 }
 0x6cb   : > { %v9150_v43 = vsel %vm2015_vm7, %v9148_v62, %v16360_v63  ;;  %v9151_v3 = vsel %vm2015_vm7, %v9149_v5, %v16361_v21  ;;  %v26888_v5 = vcombine.low %v26828_v49, %v26827_v16 }
 0x6cc   : > { %v16369_v55 = vpop.permute.xlu0 %16368  ;;  %v16374_v1 = vpop.permute.xlu1 %16373  ;;  %v9152_v41 = vsel %vm2018_vm8, %v9150_v43, %v16365_v7  ;;  %v9153_v0 = vsel %vm2018_vm8, %v9151_v3, %v16366_v8 }
 0x6cd   : > { %v16371_v53 = vunpack.i.h.bf16 %v16369_v55  ;;  %v16370_v29 = vunpack.i.l.bf16 %v16369_v55  ;;  %v16376_v38 = vunpack.i.h.bf16 %v16374_v1  ;;  %v16375_v28 = vunpack.i.l.bf16 %v16374_v1 }
 0x6cf   : > { %v9154_v35 = vsel %vm2021_vm9, %v9152_v41, %v16370_v29  ;;  %v9155_v60 = vsel %vm2021_vm9, %v9153_v0, %v16371_v53 }
 0x6d0   : > { %v16379_v42 = vpop.permute.xlu0 %16378  ;;  %v16384_v26 = vpop.permute.xlu1 %16383  ;;  %v9156_v9 = vsel %vm2024_vm10, %v9154_v35, %v16375_v28  ;;  %v9157_v2 = vsel %vm2024_vm10, %v9155_v60, %v16376_v38 }
 0x6d1   : > { %v16381_v47 = vunpack.i.h.bf16 %v16379_v42  ;;  %v16380_v46 = vunpack.i.l.bf16 %v16379_v42  ;;  %v16386_v27 = vunpack.i.h.bf16 %v16384_v26  ;;  %v16385_v51 = vunpack.i.l.bf16 %v16384_v26 }
 0x6d3   : > { %v22754_v52 = vsel %vm2027_vm11, %v9156_v9, %v16380_v46  ;;  %v22757_v25 = vsel %vm2027_vm11, %v9157_v2, %v16381_v47  ;;  %v9161_v63 = vsel %vm2009_vm5, %v9026_v17, %v16386_v27  ;;  %v9160_v62 = vsel %vm2009_vm5, %v26888_v5, %v16385_v51 }
 0x6d4   : > { %v16389_v45 = vpop.permute.xlu0 %16388  ;;  %v16394_v12 = vpop.permute.xlu1 %16393  ;;  %v15642_v30 = vpack.c.bf16 %v22757_v25, %v22754_v52 }
 0x6d5   : > { %v16391_v54 = vunpack.i.h.bf16 %v16389_v45  ;;  %v16390_v21 = vunpack.i.l.bf16 %v16389_v45  ;;  %v16396_v8 = vunpack.i.h.bf16 %v16394_v12  ;;  %v16395_v7 = vunpack.i.l.bf16 %v16394_v12 }
 0x6d7   : > { %v9162_v43 = vsel %vm2012_vm6, %v9160_v62, %v16390_v21  ;;  %v9163_v3 = vsel %vm2012_vm6, %v9161_v63, %v16391_v54  ;;  %v26889_v62 = vcombine.low %v26847_v14, %v26846_v57 }
 0x6d8   : > { %v16399_v55 = vpop.permute.xlu0 %16398  ;;  %v16404_v1 = vpop.permute.xlu1 %16403  ;;  %v9164_v41 = vsel %vm2015_vm7, %v9162_v43, %v16395_v7  ;;  %v9165_v20 = vsel %vm2015_vm7, %v9163_v3, %v16396_v8  ;;  %v26890_v7 = vcombine.low %v26852_v56, %v26851_v13 }
 0x6d9   : > { %v16401_v53 = vunpack.i.h.bf16 %v16399_v55  ;;  %v16400_v29 = vunpack.i.l.bf16 %v16399_v55  ;;  %v16406_v24 = vunpack.i.h.bf16 %v16404_v1  ;;  %v16405_v17 = vunpack.i.l.bf16 %v16404_v1  ;;  %v26891_v55 = vld [vmem:[#allocation10_spill] sm:$0xff] }
 0x6db   : > { %v9166_v16 = vsel %vm2018_vm8, %v9164_v41, %v16400_v29  ;;  %v9167_v49 = vsel %vm2018_vm8, %v9165_v20, %v16401_v53 }
 0x6dc   : > { %v16409_v0 = vpop.permute.xlu0 %16408  ;;  %v16414_v38 = vpop.permute.xlu1 %16413  ;;  %v9168_v26 = vsel %vm2021_vm9, %v9166_v16, %v16405_v17  ;;  %v9169_v47 = vsel %vm2021_vm9, %v9167_v49, %v16406_v24 }
 0x6dd   : > { %v16411_v28 = vunpack.i.h.bf16 %v16409_v0  ;;  %v16410_v35 = vunpack.i.l.bf16 %v16409_v0  ;;  %v16416_v60 = vunpack.i.h.bf16 %v16414_v38  ;;  %v16415_v42 = vunpack.i.l.bf16 %v16414_v38  ;;  %v26892_v38 = vld [vmem:[#allocation9_spill] sm:$0xff] }
 0x6df   : > { %v9170_v46 = vsel %vm2024_vm10, %v9168_v26, %v16410_v35  ;;  %v9171_v9 = vsel %vm2024_vm10, %v9169_v47, %v16411_v28 }
 0x6e0   : > { %v16419_v2 = vpop.permute.xlu0 %16418  ;;  %v16424_v27 = vpop.permute.xlu1 %16423  ;;  %v22780_v51 = vsel %vm2027_vm11, %v9170_v46, %v16415_v42  ;;  %v22783_v45 = vsel %vm2027_vm11, %v9171_v9, %v16416_v60 }
 0x6e1   : > { %v16421_v12 = vunpack.i.h.bf16 %v16419_v2  ;;  %v16420_v54 = vunpack.i.l.bf16 %v16419_v2  ;;  %v16426_v21 = vunpack.i.h.bf16 %v16424_v27  ;;  %v16425_v63 = vunpack.i.l.bf16 %v16424_v27 }
 0x6e2   : > { %v15640_v5 = vpack.c.bf16 %v22783_v45, %v22780_v51 }
 0x6e3   : > { %v9834_v8 = vsel %vm2009_vm5, %v26889_v62, %v16421_v12  ;;  %v9833_v43 = vsel %vm2009_vm5, %v26890_v7, %v16420_v54  ;;  %v8306_v3 = vpop.f32.mrb[2].mxu0 }
 0x6e4   : > { %v8321_v1 = vadd.f32 %v8306_v3, %v26891_v55  ;;  %v16429_v53 = vpop.permute.xlu0 %16428  ;;  %v16434_v29 = vpop.permute.xlu1 %16433  ;;  %v9836_v16 = vsel %vm2012_vm6, %v9834_v8, %v16426_v21  ;;  %v9835_v57 = vsel %vm2012_vm6, %v9833_v43, %v16425_v63 }
 0x6e5   : > { %v16431_v41 = vunpack.i.h.bf16 %v16429_v53  ;;  %v16430_v20 = vunpack.i.l.bf16 %v16429_v53  ;;  %v16435_v24 = vunpack.i.l.bf16 %v16434_v29  ;;  %v8308_v17 = vpop.f32.mrb[3].mxu0  ;;  %v16436_v14 = vunpack.i.h.bf16 %v16434_v29 }
 0x6e6   : > { %15569 = vst [vmem:[%s21863_s23 + $0x20] sm:$0xff] %v8321_v1  ;;  %v8322_v13 = vadd.f32 %v8308_v17, %v26891_v55 }
 0x6e7   : > { %v9837_v56 = vsel %vm2015_vm7, %v9835_v57, %v16430_v20  ;;  %v9838_v49 = vsel %vm2015_vm7, %v9836_v16, %v16431_v41  ;;  %v8312_v0 = vpop.f32.mrb[4].mxu0 }
 0x6e8   : > { %15570 = vst [vmem:[%s21863_s23 + $0x28] sm:$0xff] %v8322_v13  ;;  %v8323_v28 = vadd.f32 %v8312_v0, %v26892_v38  ;;  %v16439_v35 = vpop.permute.xlu0 %16438  ;;  %v16444_v60 = vpop.permute.xlu1 %16443  ;;  %v9839_v42 = vsel %vm2018_vm8, %v9837_v56, %v16435_v24  ;;  %v9840_v9 = vsel %vm2018_vm8, %v9838_v49, %v16436_v14  ;;  %v26893_v14 = vcombine.low %v26872_v31, %v26871_v50 }
 0x6e9   : > { %v16441_v26 = vunpack.i.h.bf16 %v16439_v35  ;;  %v16440_v47 = vunpack.i.l.bf16 %v16439_v35  ;;  %v8314_v46 = vpop.f32.mrb[5].mxu0  ;;  %v16446_v2 = vunpack.i.h.bf16 %v16444_v60  ;;  %v16445_v27 = vunpack.i.l.bf16 %v16444_v60 }
 0x6ea   : > { %15571 = vst [vmem:[%s21863_s23 + $0x30] sm:$0xff] %v8323_v28  ;;  %v8324_v12 = vadd.f32 %v8314_v46, %v26892_v38  ;;  %v26894_v56 = vcombine.low %v26877_v11, %v26876_v48  ;;  %v11164_v38 = vcombine.low %v22712_v18, %v22722_v22 }
 0x6eb   : > { %v9841_v54 = vsel %vm2021_vm9, %v9839_v42, %v16440_v47  ;;  %v9842_v21 = vsel %vm2021_vm9, %v9840_v9, %v16441_v26 }
 0x6ec   : > { %15572 = vst [vmem:[%s21863_s23 + $0x38] sm:$0xff] %v8324_v12  ;;  %v16449_v63 = vpop.permute.xlu0 %16448  ;;  %v16454_v62 = vpop.permute.xlu1 %16453  ;;  %v9843_v43 = vsel %vm2024_vm10, %v9841_v54, %v16445_v27  ;;  %v9844_v3 = vsel %vm2024_vm10, %v9842_v21, %v16446_v2  ;;  %v11172_v18 = vrot.slane %v11164_v38, %v17494_v44 }
 0x6ed   : > { %v16451_v8 = vunpack.i.h.bf16 %v16449_v63  ;;  %v16450_v7 = vunpack.i.l.bf16 %v16449_v63  ;;  %v16456_v1 = vunpack.i.h.bf16 %v16454_v62  ;;  %v16455_v53 = vunpack.i.l.bf16 %v16454_v62 }
 0x6ef   : > { %v9845_v29 = vsel %vm2027_vm11, %v9843_v43, %v16450_v7  ;;  %v9846_v41 = vsel %vm2027_vm11, %v9844_v3, %v16451_v8  ;;  %v9848_v13 = vsel %vm2009_vm5, %v26893_v14, %v16456_v1  ;;  %v9847_v49 = vsel %vm2009_vm5, %v26894_v56, %v16455_v53 }
 0x6f0   : > { %v16459_v20 = vpop.permute.xlu0 %16458  ;;  %v16464_v24 = vpop.permute.xlu1 %16463  ;;  %v15638_v17 = vpack.c.bf16 %v9846_v41, %v9845_v29  ;;  %v26895_v56 = vmov 0.0  }
 0x6f1   : > { %v16461_v16 = vunpack.i.h.bf16 %v16459_v20  ;;  %v16460_v57 = vunpack.i.l.bf16 %v16459_v20  ;;  %v16466_v0 = vunpack.i.h.bf16 %v16464_v24  ;;  %v16465_v28 = vunpack.i.l.bf16 %v16464_v24 }
 0x6f3   : > { %v9849_v35 = vsel %vm2012_vm6, %v9847_v49, %v16460_v57  ;;  %v9850_v60 = vsel %vm2012_vm6, %v9848_v13, %v16461_v16  ;;  %v9862_v57 = vld [vmem:[#allocation3 + $0x90] sm:$0xff] }
 0x6f4   : > { %v16469_v42 = vpop.permute.xlu0 %16468  ;;  %v16474_v26 = vpop.permute.xlu1 %16473  ;;  %v9851_v9 = vsel %vm2015_vm7, %v9849_v35, %v16465_v28  ;;  %v9852_v50 = vsel %vm2015_vm7, %v9850_v60, %v16466_v0 }
 0x6f5   : > { %v16471_v47 = vunpack.i.h.bf16 %v16469_v42  ;;  %v16470_v46 = vunpack.i.l.bf16 %v16469_v42  ;;  %v16476_v31 = vunpack.i.h.bf16 %v16474_v26  ;;  %v16475_v2 = vunpack.i.l.bf16 %v16474_v26 }
 0x6f7   : > { %v9853_v48 = vsel %vm2018_vm8, %v9851_v9, %v16470_v46  ;;  %v9854_v11 = vsel %vm2018_vm8, %v9852_v50, %v16471_v47 }
 0x6f8   : > { %v16479_v27 = vpop.permute.xlu0 %16478  ;;  %v16484_v12 = vpop.permute.xlu1 %16483  ;;  %v9855_v8 = vsel %vm2021_vm9, %v9853_v48, %v16475_v2  ;;  %v9856_v7 = vsel %vm2021_vm9, %v9854_v11, %v16476_v31 }
 0x6f9   : > { %v16481_v54 = vunpack.i.h.bf16 %v16479_v27  ;;  %v16480_v21 = vunpack.i.l.bf16 %v16479_v27  ;;  %v16486_v63 = vunpack.i.h.bf16 %v16484_v12  ;;  %v16485_v62 = vunpack.i.l.bf16 %v16484_v12 }
 0x6fb   : > { %v9857_v43 = vsel %vm2024_vm10, %v9855_v8, %v16480_v21  ;;  %v9858_v3 = vsel %vm2024_vm10, %v9856_v7, %v16481_v54 }
 0x6fc   : > { %v22833_v1 = vpop.permute.xlu0 %10094  ;;  %v22835_v53 = vpop.permute.xlu1 %10096  ;;  %v9859_v29 = vsel %vm2027_vm11, %v9857_v43, %v16485_v62  ;;  %v9860_v41 = vsel %vm2027_vm11, %v9858_v3, %v16486_v63 }
 0x6fd   : > { %v15636_v20 = vpack.c.bf16 %v9860_v41, %v9859_v29 }
 0x6ff   : > { %15637 = vmatprep.subr.bf16.mxu1 %v15636_v20 }
 0x700   : > { %v22839_v24 = vpop.permute.xlu0 %10098  ;;  %v22841_v16 = vpop.permute.xlu1 %10100  ;;  %15639 = vmatpush1.bf16.msra.mxu1 %v15638_v17 }
 0x701   : > { %15641 = vmatprep.subr.bf16.mxu1 %v15640_v5 }
 0x703   : > { %15573 = vmatmul.mubr.msk.f32.vlgmr.msra.gmra.mrb[6].mxu1 %vm2009_vm5, %v9862_v57 }
 0x704   : > { %v22847_v14 = vpop.permute.xlu0 %10102  ;;  %v22849_v13 = vpop.permute.xlu1 %10104  ;;  %15643 = vmatpush1.bf16.msra.mxu1 %v15642_v30  ;;  %9940 = vmatprep.mubr.f32.mxu1 %v26895_v56 }
 0x705   : > { %v10190_v35 = vcombine.low %v22833_v1, %v22847_v14  ;;  %v10462_v60 = vcombine.low %v22835_v53, %v22849_v13 }
 0x707   : > { %v22894_v31 = vrot.slane %v10190_v35, %v17494_v44  ;;  %v22901_v11 = vrot.slane %v10462_v60, %v17494_v44  ;;  %v11012_v60 = vcombine.low %v22657_v32, %v22667_v34 }
 0x708   : > { %v22855_v49 = vpop.permute.xlu0 %10106  ;;  %v22857_v17 = vpop.permute.xlu1 %10108 }
 0x709   : > { %v10206_v28 = vcombine.low %v22839_v24, %v22855_v49  ;;  %v10478_v52 = vcombine.low %v22841_v16, %v22857_v17  ;;  %v11020_v35 = vrot.slane %v11012_v60, %v17494_v44 }
 0x70b   : > { %v22880_v42 = vrot.slane %v10206_v28, %v17494_v44  ;;  %v22885_v47 = vrot.slane %v10478_v52, %v17494_v44 }
 0x70c   : > { %v22859_v0 = vpop.permute.xlu0 %10110  ;;  %v22861_v51 = vpop.permute.xlu1 %10112 }
 0x70d   : > { %26896 = vst [vmem:[#allocation77_spill] sm:$0xff] %v22861_v51  ;;  %v10254_v27 = vcombine.low %v22894_v31, %v22880_v42  ;;  %v10526_v63 = vcombine.low %v22901_v11, %v22885_v47 }
 0x70f   : > { %v22928_v29 = vrot.slane %v10254_v27, %v17507_v58  ;;  %v22934_v20 = vrot.slane %v10526_v63, %v17507_v58  ;;  %v11180_v27 = vcombine.low %v22717_v40, %v22727_v61 }
 0x710   : > { %v22863_v45 = vpop.permute.xlu0 %10114  ;;  %v22865_v5 = vpop.permute.xlu1 %10116 }
 0x711   : > { %26897 = vst [vmem:[#allocation71_spill] sm:$0xff] %v22865_v5  ;;  %26902 = vst [vmem:[#allocation120_spill] sm:$0xff] %v22928_v29 }
 0x712   : > { %26904 = vst [vmem:[#allocation142_spill] sm:$0xff] %v22934_v20  ;;  %v11188_v20 = vrot.slane %v11180_v27, %v17494_v44 }
 0x714   : > { %v22871_v25 = vpop.permute.xlu0 %10118  ;;  %v22873_v30 = vpop.permute.xlu1 %10120  ;;  %v11228_v27 = vcombine.low %v11172_v18, %v11188_v20 }
 0x715   : > { %26898 = vst [vmem:[#allocation81_spill] sm:$0xff] %v22873_v30  ;;  %v10222_v26 = vcombine.low %v22859_v0, %v22871_v25  ;;  %v10494_v46 = vcombine.low %v22861_v51, %v22873_v30 }
 0x717   : > { %v22906_v12 = vrot.slane %v10222_v26, %v17494_v44  ;;  %v22917_v62 = vrot.slane %v10494_v46, %v17494_v44  ;;  %v11044_v46 = vcombine.low %v22677_v36, %v22687_v37  ;;  %v11132_v26 = vcombine.low %v22692_v39, %v22702_v33 }
 0x718   : > { %v22889_v9 = vpop.permute.xlu0 %10122  ;;  %v22891_v50 = vpop.permute.xlu1 %10124 }
 0x719   : > { %26899 = vst [vmem:[#allocation190_spill] sm:$0xff] %v22891_v50  ;;  %v10238_v2 = vcombine.low %v22863_v45, %v22889_v9  ;;  %v10510_v48 = vcombine.low %v22865_v5, %v22891_v50  ;;  %26901 = vst [vmem:[#allocation233_spill] sm:$0xff] %v22917_v62  ;;  %v11052_v55 = vrot.slane %v11044_v46, %v17494_v44 }
 0x71a   : > { %v22980_v60 = vrot.slane %v11132_v26, %v17494_v44  ;;  %v10191_v5 = vcombine.high %v22833_v1, %v22847_v14  ;;  %v11229_v50 = vcombine.high %v11172_v18, %v11188_v20  ;;  %v10479_v14 = vcombine.high %v22841_v16, %v22857_v17 }
 0x71b   : > { %v22909_v54 = vrot.slane %v10238_v2, %v17494_v44  ;;  %v22912_v21 = vrot.slane %v10510_v48, %v17494_v44  ;;  %v11148_v2 = vcombine.low %v22697_v4, %v22707_v6  ;;  %v10996_v48 = vcombine.low %v22652_v10, %v22662_v59 }
 0x71c   : > { %v22919_v8 = vpop.permute.xlu0 %10126  ;;  %v22921_v7 = vpop.permute.xlu1 %10128  ;;  %v23030_v16 = vrot.slane %v11229_v50, %v17507_v58 }
 0x71d   : > { %26900 = vst [vmem:[#allocation70_spill] sm:$0xff] %v22912_v21  ;;  %v10286_v43 = vcombine.low %v22906_v12, %v22909_v54  ;;  %v10558_v3 = vcombine.low %v22917_v62, %v22912_v21  ;;  %v22970_v19 = vrot.slane %v11148_v2, %v17494_v44  ;;  %v11004_v56 = vrot.slane %v10996_v48, %v17494_v44 }
 0x71e   : > { %v10207_v2 = vcombine.high %v22839_v24, %v22855_v49  ;;  %v11013_v24 = vcombine.high %v22657_v32, %v22667_v34  ;;  %v23017_v32 = vrot.slane %v11228_v27, %v17507_v58  ;;  %26912 = vst [vmem:[#allocation56_spill] sm:$0xff] %v23030_v16 }
 0x71f   : > { %v22931_v41 = vrot.slane %v10286_v43, %v17507_v58  ;;  %v22937_v57 = vrot.slane %v10558_v3, %v17507_v58  ;;  %v11028_v3 = vcombine.low %v22672_v15, %v22682_v23  ;;  %v11060_v51 = vcombine.low %v11004_v56, %v11020_v35 }
 0x720   : > { %v22939_v28 = vpop.permute.xlu0 %10130  ;;  %v22941_v52 = vpop.permute.xlu1 %10132  ;;  %v11061_v46 = vcombine.high %v11004_v56, %v11020_v35  ;;  %v11196_v48 = vcombine.low %v22980_v60, %v22970_v19  ;;  %v23002_v49 = vrot.slane %v10207_v2, %v17494_v44  ;;  %26910 = vst [vmem:[#allocation42_spill] sm:$0xff] %v23017_v32  ;;  %v26916_v32 = vld [vmem:[#allocation71_spill] sm:$0xff] }
 0x721   : > { %26903 = vst [vmem:[#allocation108_spill] sm:$0xff] %v22931_v41  ;;  %26905 = vst [vmem:[#allocation79_spill] sm:$0xff] %v22937_v57  ;;  %v11036_v21 = vrot.slane %v11028_v3, %v17494_v44  ;;  %v22994_v38 = vrot.slane %v11060_v51, %v17507_v58  ;;  %v10239_v51 = vcombine.high %v22863_v45, %v22889_v9 }
 0x722   : > { %v22997_v56 = vrot.slane %v11061_v46, %v17507_v58  ;;  %v23008_v1 = vrot.slane %v11196_v48, %v17507_v58  ;;  %v10255_v45 = vcombine.high %v22894_v31, %v22880_v42 }
 0x723   : > { %v11092_v22 = vcombine.low %v11036_v21, %v11052_v55  ;;  %v11093_v30 = vcombine.high %v11036_v21, %v11052_v55  ;;  %26906 = vst [vmem:[#allocation89_spill] sm:$0xff] %v22994_v38  ;;  %v23057_v31 = vrot.slane %v10239_v51, %v17494_v44 }
 0x724   : > { %v22957_v63 = vpop.permute.xlu0 %10134  ;;  %v22959_v43 = vpop.permute.xlu1 %10136  ;;  %26907 = vst [vmem:[#allocation189_spill] sm:$0xff] %v22997_v56  ;;  %26909 = vst [vmem:[#allocation54_spill] sm:$0xff] %v23008_v1  ;;  %v23072_v51 = vrot.slane %v10255_v45, %v17507_v58  ;;  %v10287_v45 = vcombine.high %v22906_v12, %v22909_v54 }
 0x725   : > { %v23005_v55 = vrot.slane %v11092_v22, %v17507_v58  ;;  %v23020_v34 = vrot.slane %v11093_v30, %v17507_v58  ;;  %v23023_v22 = vrot.slane %v10191_v5, %v17494_v44  ;;  %v10223_v30 = vcombine.high %v22859_v0, %v22871_v25 }
 0x726   : > { %v23039_v5 = vrot.slane %v11013_v24, %v17494_v44  ;;  %v23054_v25 = vrot.slane %v10479_v14, %v17494_v44  ;;  %v10326_v24 = vcombine.low %v22919_v8, %v22957_v63  ;;  %v10327_v18 = vcombine.high %v22919_v8, %v22957_v63 }
 0x727   : > { %26908 = vst [vmem:[#allocation22_spill] sm:$0xff] %v23005_v55  ;;  %26911 = vst [vmem:[#allocation60_spill] sm:$0xff] %v23020_v34  ;;  %v10270_v46 = vcombine.low %v23023_v22, %v23002_v49  ;;  %v10271_v27 = vcombine.high %v23023_v22, %v23002_v49  ;;  %v10237_v49 = vrot.slane %v10223_v30, %v17494_v44 }
 0x728   : > { %v22974_v57 = vpop.permute.xlu0 %10138  ;;  %v22976_v62 = vpop.permute.xlu1 %10140  ;;  %26913 = vst [vmem:[#allocation171_spill] sm:$0xff] %v23039_v5  ;;  %v10598_v8 = vcombine.low %v22921_v7, %v22959_v43 }
 0x729   : > { %v10342_v50 = vcombine.low %v22939_v28, %v22974_v57  ;;  %v10614_v35 = vcombine.low %v22941_v52, %v22976_v62  ;;  %v10343_v22 = vcombine.high %v22939_v28, %v22974_v57  ;;  %v23080_v42 = vrot.slane %v10270_v46, %v17507_v58 }
 0x72a   : > { %v10302_v48 = vcombine.low %v10237_v49, %v23057_v31  ;;  %v10303_v30 = vcombine.high %v10237_v49, %v23057_v31  ;;  %v10334_v57 = vrot.slane %v10326_v24, %v17494_v44  ;;  %v10341_v28 = vrot.slane %v10327_v18, %v17494_v44 }
 0x72b   : > { %v10350_v63 = vrot.slane %v10342_v50, %v17494_v44  ;;  %v23094_v46 = vrot.slane %v10614_v35, %v17494_v44  ;;  %v10357_v12 = vrot.slane %v10343_v22, %v17494_v44  ;;  %v10301_v22 = vrot.slane %v10287_v45, %v17507_v58 }
 0x72c   : > { %v22989_v3 = vpop.permute.xlu0 %10142  ;;  %v22991_v26 = vpop.permute.xlu1 %10144 }
 0x72d   : > { %v10390_v24 = vcombine.low %v10334_v57, %v10350_v63  ;;  %v10407_v1 = vcombine.high %v10341_v28, %v10357_v12 }
 0x730   : > { %v10147_v21 = vpop.permute.xlu0 %10146  ;;  %v23025_v20 = vpop.permute.xlu1 %10148 }
 0x734   : > { %v10151_v14 = vpop.permute.xlu0 %10150  ;;  %v23069_v2 = vpop.permute.xlu1 %10152 }
 0x735   : > { %v10358_v9 = vcombine.low %v22989_v3, %v10151_v14  ;;  %v10359_v17 = vcombine.high %v22989_v3, %v10151_v14  ;;  %v10630_v50 = vcombine.low %v22991_v26, %v23069_v2  ;;  %v23101_v3 = vrot.slane %v10598_v8, %v17494_v44 }
 0x736   : > { %v10391_v14 = vcombine.high %v10334_v57, %v10350_v63  ;;  %v10406_v63 = vcombine.low %v10341_v28, %v10357_v12 }
 0x737   : > { %v10366_v18 = vrot.slane %v10358_v9, %v17494_v44  ;;  %v10373_v35 = vrot.slane %v10359_v17, %v17494_v44  ;;  %v10638_v8 = vrot.slane %v10630_v50, %v17494_v44  ;;  %v23114_v17 = vrot.slane %v10390_v24, %v17507_v58 }
 0x738   : > { %v10155_v0 = vpop.permute.xlu0 %10154  ;;  %v10157_v56 = vpop.permute.xlu1 %10156  ;;  %v10405_v45 = vrot.slane %v10391_v14, %v17507_v58  ;;  %v26915_v14 = vld [vmem:[#allocation190_spill] sm:$0xff] }
 0x739   : > { %v10374_v54 = vcombine.low %v10147_v21, %v10155_v0  ;;  %v10375_v34 = vcombine.high %v10147_v21, %v10155_v0  ;;  %v10646_v31 = vcombine.low %v23025_v20, %v10157_v56  ;;  %v10310_v21 = vrot.slane %v10302_v48, %v17507_v58 }
 0x73a   : > { %v10662_v0 = vcombine.low %v23101_v3, %v23094_v46  ;;  %v10647_v12 = vcombine.high %v23025_v20, %v10157_v56  ;;  %v10511_v59 = vcombine.high %v26916_v32, %v26915_v14  ;;  %v10615_v56 = vcombine.high %v22941_v52, %v22976_v62  ;;  %v26917_v20 = vld [vmem:[#allocation81_spill] sm:$0xff]  ;;  %v26919_v52 = vld [vmem:[#allocation70_spill] sm:$0xff] }
 0x73b   : > { %v10382_v49 = vrot.slane %v10374_v54, %v17494_v44  ;;  %v10389_v5 = vrot.slane %v10375_v34, %v17494_v44  ;;  %v10654_v16 = vrot.slane %v10646_v31, %v17494_v44  ;;  %v10319_v31 = vcombine.high %v22928_v29, %v22931_v41 }
 0x73c   : > { %v10317_v29 = vrot.slane %v10303_v30, %v17507_v58  ;;  %v26918_v30 = vld [vmem:[#allocation77_spill] sm:$0xff]  ;;  %v10599_v32 = vcombine.high %v22921_v7, %v22959_v43  ;;  %v10525_v62 = vrot.slane %v10511_v59, %v17494_v44  ;;  %v10663_v7 = vcombine.high %v23101_v3, %v23094_v46 }
 0x73d   : > { %v10422_v57 = vcombine.low %v10366_v18, %v10382_v49  ;;  %v10423_v9 = vcombine.high %v10366_v18, %v10382_v49  ;;  %v10438_v38 = vcombine.low %v10373_v35, %v10389_v5  ;;  %v10439_v54 = vcombine.high %v10373_v35, %v10389_v5 }
 0x73e   : > { %v10694_v34 = vcombine.low %v10638_v8, %v10654_v16  ;;  %v23125_v18 = vrot.slane %v10662_v0, %v17507_v58  ;;  %v10320_v5 = vcombine.low %v23072_v51, %v10301_v22  ;;  %v10414_v35 = vrot.slane %v10406_v63, %v17507_v58 }
 0x73f   : > { %v23120_v48 = vrot.slane %v10422_v57, %v17507_v58  ;;  %v10437_v55 = vrot.slane %v10423_v9, %v17507_v58  ;;  %v10446_v50 = vrot.slane %v10438_v38, %v17507_v58  ;;  %v10285_v38 = vrot.slane %v10271_v27, %v17507_v58 }
 0x740   : > { %v23128_v24 = vrot.slane %v10694_v34, %v17507_v58  ;;  %v10453_v28 = vrot.slane %v10439_v54, %v17507_v58  ;;  %v10321_v27 = vcombine.high %v23072_v51, %v10301_v22  ;;  %v10421_v54 = vrot.slane %v10407_v1, %v17507_v58 }
 0x741   : > { %26914 = vst [vmem:[#allocation180_spill] sm:$0xff] %v23120_v48  ;;  %v10455_v49 = vcombine.high %v23114_v17, %v23120_v48  ;;  %v10456_v57 = vcombine.low %v10405_v45, %v10437_v55  ;;  %v10457_v41 = vcombine.high %v10405_v45, %v10437_v55  ;;  %v10458_v63 = vcombine.low %v10414_v35, %v10446_v50 }
 0x742   : > { %v10631_v48 = vcombine.high %v22991_v26, %v23069_v2  ;;  %v10322_v55 = vcombine.low %v23080_v42, %v10310_v21  ;;  %v10661_v26 = vrot.slane %v10647_v12, %v17494_v44  ;;  %v10695_v2 = vcombine.high %v10638_v8, %v10654_v16 }
 0x743   : > { %v16487_v9 = vpack.i.bf16 %v10455_v49, %v10319_v31  ;;  %v16492_v34 = vpack.i.bf16 %v10456_v57, %v10320_v5  ;;  %v10495_v31 = vcombine.high %v26918_v30, %v26917_v20  ;;  %v16497_v51 = vpack.i.bf16 %v10457_v41, %v10321_v27  ;;  %v26920_v5 = vld [vmem:[#allocation233_spill] sm:$0xff] }
 0x744   : > { %v16502_v1 = vpack.i.bf16 %v10458_v63, %v10322_v55  ;;  %v10459_v22 = vcombine.high %v10414_v35, %v10446_v50  ;;  %v10460_v45 = vcombine.low %v10421_v54, %v10453_v28  ;;  %v10559_v14 = vcombine.high %v26920_v5, %v26919_v52 }
 0x745   : > { %16488 = vrot.lane.b32.xlu0 %v16487_v9, %s17206_s12  ;;  %16493 = vrot.lane.b32.xlu1 %v16492_v34, %s17205_s11  ;;  %v10645_v49 = vrot.slane %v10631_v48, %v17494_v44  ;;  %v10323_v57 = vcombine.high %v23080_v42, %v10310_v21  ;;  %v10629_v9 = vrot.slane %v10615_v56, %v17494_v44 }
 0x746   : > { %v10324_v41 = vcombine.low %v10285_v38, %v10317_v29  ;;  %v10509_v43 = vrot.slane %v10495_v31, %v17494_v44  ;;  %v10613_v59 = vrot.slane %v10599_v32, %v17494_v44  ;;  %v10709_v16 = vrot.slane %v10695_v2, %v17507_v58 }
 0x747   : > { %v10710_v8 = vcombine.low %v10645_v49, %v10661_v26  ;;  %v16507_v48 = vpack.i.bf16 %v10459_v22, %v10323_v57  ;;  %v10461_v42 = vcombine.high %v10421_v54, %v10453_v28  ;;  %v10727_v21 = vcombine.high %v23125_v18, %v23128_v24  ;;  %v26922_v28 = vld [vmem:[#allocation79_spill] sm:$0xff]  ;;  %v26923_v54 = vld [vmem:[#allocation142_spill] sm:$0xff]  ;;  %v26925_v22 = vld [vmem:[#allocation73_spill] sm:$0xff] }
 0x748   : > { %v16512_v50 = vpack.i.bf16 %v10460_v45, %v10324_v41  ;;  %v26921_v46 = vcombine.high %v22835_v53, %v22849_v13  ;;  %v10573_v35 = vrot.slane %v10559_v14, %v17507_v58  ;;  %v10574_v12 = vcombine.low %v10509_v43, %v10525_v62  ;;  %v26926_v45 = vld [vmem:[#allocation191_spill] sm:$0xff] }
 0x749   : > { %16498 = vrot.lane.b32.xlu0 %v16497_v51, %s17204_s10  ;;  %16503 = vrot.lane.b32.xlu1 %v16502_v1, %s17203_s9  ;;  %v10325_v34 = vcombine.high %v10285_v38, %v10317_v29  ;;  %v10677_v63 = vrot.slane %v10663_v7, %v17507_v58  ;;  %v10678_v27 = vcombine.low %v10613_v59, %v10629_v9 }
 0x74a   : > { %v10477_v3 = vrot.slane %v26921_v46, %v17494_v44  ;;  %v10591_v56 = vcombine.high %v26923_v54, %v26922_v28  ;;  %v26924_v55 = vcombine.high %v22901_v11, %v22885_v47  ;;  %v10711_v20 = vcombine.high %v10645_v49, %v10661_v26 }
 0x74b   : > { %v10718_v29 = vrot.slane %v10710_v8, %v17507_v58  ;;  %v16517_v38 = vpack.i.bf16 %v10461_v42, %v10325_v34  ;;  %v10728_v31 = vcombine.low %v10677_v63, %v10709_v16  ;;  %v10729_v32 = vcombine.high %v10677_v63, %v10709_v16  ;;  %v9863_v63 = vld [vmem:[#allocation3 + $0x98] sm:$0xff] }
 0x74c   : > { %v10541_v53 = vrot.slane %v26924_v55, %v17507_v58  ;;  %v10542_v13 = vcombine.low %v10477_v3, %v23054_v25  ;;  %v16522_v30 = vpack.i.bf16 %v10727_v21, %v10591_v56  ;;  %v10575_v2 = vcombine.high %v10509_v43, %v10525_v62  ;;  %15574 = vmatmul.mubr.msk.f32.gmra.mrb[8].mxu1 %vm2009_vm5, %v9863_v63  ;;  %v26946_v63 = vld [vmem:[#allocation210_spill] sm:$0xff] }
 0x74d   : > { %16508 = vrot.lane.b32.xlu0 %v16507_v48, %s17202_s8  ;;  %16513 = vrot.lane.b32.xlu1 %v16512_v50, %s17200_s30  ;;  %v10582_v51 = vrot.slane %v10574_v12, %v17507_v58  ;;  %v11165_v52 = vcombine.high %v26926_v45, %v26925_v22  ;;  %v10679_v5 = vcombine.high %v10613_v59, %v10629_v9 }
 0x74e   : > { %v10592_v1 = vcombine.low %v10541_v53, %v10573_v35  ;;  %v10686_v47 = vrot.slane %v10678_v27, %v17507_v58  ;;  %v10593_v11 = vcombine.high %v10541_v53, %v10573_v35  ;;  %v10543_v26 = vcombine.high %v10477_v3, %v23054_v25 }
 0x74f   : > { %v10550_v14 = vrot.slane %v10542_v13, %v17507_v58  ;;  %v10725_v62 = vrot.slane %v10711_v20, %v17507_v58  ;;  %v26927_v49 = vcombine.high %v22717_v40, %v22727_v61  ;;  %v10589_v59 = vrot.slane %v10575_v2, %v17507_v58  ;;  %v26935_v20 = vld [vmem:[#allocation42_spill] sm:$0xff] }
 0x750   : > { %v16527_v7 = vpack.i.bf16 %v10728_v31, %v10592_v1  ;;  %v16532_v9 = vpack.i.bf16 %v10729_v32, %v10593_v11  ;;  %v10730_v41 = vcombine.low %v10686_v47, %v10718_v29  ;;  %v10731_v43 = vcombine.high %v10686_v47, %v10718_v29  ;;  %v26936_v29 = vld [vmem:[#allocation54_spill] sm:$0xff]  ;;  %v26939_v31 = vld [vmem:[#allocation56_spill] sm:$0xff]  ;;  %v26940_v32 = vld [vmem:[#allocation171_spill] sm:$0xff] }
 0x751   : > { %16518 = vrot.lane.b32.xlu0 %v16517_v38, %s17201_s7  ;;  %16523 = vrot.lane.b32.xlu1 %v16522_v30, %s17206_s12  ;;  %v11195_v57 = vrot.slane %v26927_v49, %v17494_v44  ;;  %v26928_v16 = vcombine.high %v22677_v36, %v22687_v37  ;;  %v26929_v8 = vcombine.high %v22697_v4, %v22707_v6  ;;  %v26938_v38 = vld [vmem:[#allocation89_spill] sm:$0xff]  ;;  %v26941_v1 = vmov 0.0   ;;  %v26942_v11 = vld [vmem:[#allocation60_spill] sm:$0xff] }
 0x752   : > { %v11179_v40 = vrot.slane %v11165_v52, %v17494_v44  ;;  %v10693_v61 = vrot.slane %v10679_v5, %v17507_v58  ;;  %v10594_v50 = vcombine.low %v10550_v14, %v10582_v51  ;;  %v10595_v42 = vcombine.high %v10550_v14, %v10582_v51  ;;  %10017 = vmatprep.mubr.f32.mxu1 %v26941_v1  ;;  %v9175_v47 = vld [vmem:[#allocation3 + $0x80] sm:$0xff] }
 0x753   : > { %v11059_v25 = vrot.slane %v26928_v16, %v17494_v44  ;;  %v23211_v48 = vrot.slane %v26929_v8, %v17494_v44  ;;  %v10557_v21 = vrot.slane %v10543_v26, %v17507_v58  ;;  %v26930_v36 = vcombine.high %v22672_v15, %v22682_v23  ;;  %v26933_v15 = vld [vmem:[#allocation55_spill] sm:$0xff]  ;;  %v26943_v26 = vld [vmem:[#allocation189_spill] sm:$0xff]  ;;  %15575 = vmatmul.mubr.msk.f32.vlgmr.msra.gmra.mrb[6].mxu1 %vm2009_vm5, %v9175_v47 }
 0x754   : > { %v26931_v4 = vcombine.high %v22692_v39, %v22702_v33  ;;  %v11244_v46 = vcombine.low %v11179_v40, %v11195_v57  ;;  %v16537_v3 = vpack.i.bf16 %v10730_v41, %v10594_v50  ;;  %v16542_v35 = vpack.i.bf16 %v10731_v43, %v10595_v42  ;;  %10023 = vmatprep.mubr.f32.mxu1 %v26941_v1  ;;  %v26944_v50 = vld [vmem:[#allocation74_spill] sm:$0xff]  ;;  %v26951_v47 = vld [vmem:[#allocation201_spill] sm:$0xff] }
 0x755   : > { %16528 = vrot.lane.b32.xlu0 %v16527_v7, %s17205_s11  ;;  %16533 = vrot.lane.b32.xlu1 %v16532_v9, %s17204_s10  ;;  %v11043_v37 = vrot.slane %v26930_v36, %v17494_v44  ;;  %v10732_v12 = vcombine.low %v10693_v61, %v10725_v62  ;;  %v10733_v34 = vcombine.high %v10693_v61, %v10725_v62  ;;  %v17098_v61 = vld [vmem:[#allocation2 + $0x141] sm:$0xff] }
 0x756   : > { %v11147_v6 = vrot.slane %v26931_v4, %v17494_v44  ;;  %v26932_v27 = vcombine.high %v22980_v60, %v22970_v19  ;;  %v26934_v23 = vcombine.high %v22652_v10, %v26933_v15  ;;  %v10596_v33 = vcombine.low %v10557_v21, %v10589_v59  ;;  %v26937_v60 = vld [vmem:[#allocation22_spill] sm:$0xff] }
 0x757   : > { %v11108_v53 = vcombine.low %v11043_v37, %v11059_v25  ;;  %v10597_v13 = vcombine.high %v10557_v21, %v10589_v59  ;;  %v11261_v19 = vcombine.high %v26936_v29, %v26935_v20  ;;  %v11125_v30 = vcombine.high %v26938_v38, %v26937_v60  ;;  %v17005_v36 = vld [vmem:[#allocation2 + $0x85] ss:$48 sps:$4 sm:$0xff]   ;;  %v17004_v15 = vld [vmem:[#allocation2 + $0x6d] ss:$48 sps:$4 sm:$0xff]  }
 0x758   : > { %v11211_v56 = vrot.slane %v26932_v27, %v17507_v58  ;;  %v11011_v55 = vrot.slane %v26934_v23, %v17494_v44  ;;  %v11212_v39 = vcombine.low %v11147_v6, %v23211_v48  ;;  %v11252_v51 = vrot.slane %v11244_v46, %v17507_v58  ;;  %v17007_v46 = vld [vmem:[#allocation2 + $0xe5] ss:$48 sps:$4 sm:$0xff]  }
 0x759   : > { %16538 = vrot.lane.b32.xlu0 %v16537_v3, %s17203_s9  ;;  %16543 = vrot.lane.b32.xlu1 %v16542_v35, %s17202_s8  ;;  %v16547_v22 = vpack.i.bf16 %v10732_v12, %v10596_v33  ;;  %v16552_v45 = vpack.i.bf16 %v10733_v34, %v10597_v13  ;;  %v11109_v52 = vcombine.high %v11043_v37, %v11059_v25  ;;  %v17008_v3 = vld [vmem:[#allocation2 + $0x12d] ss:$48 sps:$4 sm:$0xff]  }
 0x75a   : > { %v11262_v10 = vcombine.low %v11211_v56, %v26939_v31  ;;  %v11076_v2 = vcombine.low %v11011_v55, %v26940_v32  ;;  %v11245_v5 = vcombine.high %v11179_v40, %v11195_v57  ;;  %v11126_v14 = vcombine.low %v26943_v26, %v26942_v11  ;;  %v26945_v34 = vld [vmem:[#allocation207_spill] sm:$0xff] }
 0x75b   : > { %v11116_v62 = vrot.slane %v11108_v53, %v17507_v58  ;;  %v11220_v49 = vrot.slane %v11212_v39, %v17507_v58  ;;  %v16557_v7 = vpack.i.bf16 %v11261_v19, %v11125_v30  ;;  %v11077_v9 = vcombine.high %v11011_v55, %v26940_v32  ;;  %v17006_v39 = vld [vmem:[#allocation2 + $0xcd] ss:$48 sps:$4 sm:$0xff]  }
 0x75c   : > { %v11213_v41 = vcombine.high %v11147_v6, %v23211_v48  ;;  %v16562_v57 = vpack.i.bf16 %v11262_v10, %v11126_v14  ;;  %v11263_v43 = vcombine.high %v11211_v56, %v26939_v31  ;;  %v11084_v59 = vrot.slane %v11076_v2, %v17507_v58  ;;  %v17003_v56 = vld [vmem:[#allocation2 + $0x25] ss:$48 sps:$4 sm:$0xff]  }
 0x75d   : > { %16548 = vrot.lane.b32.xlu0 %v16547_v22, %s17200_s30  ;;  %16553 = vrot.lane.b32.xlu1 %v16552_v45, %s17201_s7  ;;  %v11264_v16 = vcombine.low %v11220_v49, %v11252_v51  ;;  %v11265_v25 = vcombine.high %v11220_v49, %v11252_v51  ;;  %v11123_v8 = vrot.slane %v11109_v52, %v17507_v58  ;;  %v26947_v19 = vld [vmem:[#allocation196_spill] sm:$0xff]  ;;  %v26948_v30 = vld [vmem:[#allocation202_spill] sm:$0xff]  ;;  %v26949_v10 = vld [vmem:[#allocation209_spill] sm:$0xff] }
 0x75e   : > { %v11259_v40 = vrot.slane %v11245_v5, %v17507_v58  ;;  %v11453_v42 = vcombine.high %v17098_v61, %v26944_v50  ;;  %v11127_v21 = vcombine.high %v26943_v26, %v26942_v11  ;;  %v11128_v48 = vcombine.low %v11084_v59, %v11116_v62  ;;  %v26950_v32 = vld [vmem:[#allocation213_spill] sm:$0xff]  ;;  %v26952_v11 = vld [vmem:[#allocation203_spill] sm:$0xff]  ;;  %v26955_v61 = vld [vmem:[#allocation212_spill] sm:$0xff] }
 0x75f   : > { %v11129_v37 = vcombine.high %v11084_v59, %v11116_v62  ;;  %v11091_v4 = vrot.slane %v11077_v9, %v17507_v58  ;;  %v11227_v6 = vrot.slane %v11213_v41, %v17507_v58  ;;  %v11501_v27 = vcombine.high %v26946_v63, %v26945_v34  ;;  %v17002_v51 = vld [vmem:[#allocation2 + $0xd] ss:$48 sps:$4 sm:$0xff]  }
 0x760   : > { %v16567_v35 = vpack.i.bf16 %v11263_v43, %v11127_v21  ;;  %v16572_v12 = vpack.i.bf16 %v11264_v16, %v11128_v48  ;;  %v11467_v33 = vrot.slane %v11453_v42, %v17494_v44  ;;  %v11365_v31 = vcombine.high %v26948_v30, %v26947_v19  ;;  %v26953_v9 = vld [vmem:[#allocation219_spill] sm:$0xff]  ;;  %v26954_v41 = vld [vmem:[#allocation41_spill] sm:$0xff] }
 0x761   : > { %16558 = vrot.lane.b32.xlu0 %v16557_v7, %s17206_s12  ;;  %16563 = vrot.lane.b32.xlu1 %v16562_v57, %s17205_s11  ;;  %v16577_v23 = vpack.i.bf16 %v11265_v25, %v11129_v37  ;;  %v11130_v55 = vcombine.low %v11091_v4, %v11123_v8  ;;  %v11266_v53 = vcombine.low %v11227_v6, %v11259_v40  ;;  %v26956_v50 = vld [vmem:[#allocation217_spill] sm:$0xff] }
 0x762   : > { %v11131_v13 = vcombine.high %v11091_v4, %v11123_v8  ;;  %v11469_v2 = vcombine.high %v26950_v32, %v26949_v10  ;;  %v11331_v22 = vrot.slane %v17005_v36, %v17494_v44  ;;  %v11267_v45 = vcombine.high %v11227_v6, %v11259_v40 }
 0x763   : > { %v11435_v52 = vrot.slane %v17007_v46, %v17494_v44  ;;  %v11451_v5 = vrot.slane %v17008_v3, %v17494_v44  ;;  %v11333_v26 = vcombine.high %v26952_v11, %v26951_v47  ;;  %v11515_v14 = vrot.slane %v11501_v27, %v17507_v58 }
 0x764   : > { %v11299_v62 = vrot.slane %v17003_v56, %v17494_v44  ;;  %v11315_v49 = vrot.slane %v17004_v15, %v17494_v44  ;;  %v16582_v7 = vpack.i.bf16 %v11266_v53, %v11130_v55  ;;  %v11533_v57 = vcombine.high %v26954_v41, %v26953_v9 }
 0x765   : > { %16568 = vrot.lane.b32.xlu0 %v16567_v35, %s17204_s10  ;;  %16573 = vrot.lane.b32.xlu1 %v16572_v12, %s17203_s9  ;;  %v11419_v43 = vrot.slane %v17006_v39, %v17494_v44  ;;  %v11516_v59 = vcombine.low %v11451_v5, %v11467_v33  ;;  %v11379_v16 = vrot.slane %v11365_v31, %v17507_v58  ;;  %v9176_v12 = vld [vmem:[#allocation3 + $0x88] sm:$0xff] }
 0x766   : > { %v11483_v25 = vrot.slane %v11469_v2, %v17507_v58  ;;  %v11283_v8 = vrot.slane %v17002_v51, %v17494_v44  ;;  %v11380_v40 = vcombine.low %v11315_v49, %v11331_v22  ;;  %v11397_v42 = vcombine.high %v26956_v50, %v26955_v61  ;;  %15576 = vmatmul.mubr.msk.f32.gmra.mrb[8].mxu1 %vm2009_vm5, %v9176_v12  ;;  %v23393_v12 = vld [vmem:[#allocation2 + $0xf2] sm:$0xff] }
 0x767   : > { %v11484_v21 = vcombine.low %v11419_v43, %v11435_v52  ;;  %v16587_v48 = vpack.i.bf16 %v11267_v45, %v11131_v13  ;;  %v11347_v36 = vrot.slane %v11333_v26, %v17507_v58  ;;  %v11524_v3 = vrot.slane %v11516_v59, %v17507_v58  ;;  %10947 = vmatprep.mubr.f32.mxu1 %v26941_v1  ;;  %v23331_v59 = vld [vmem:[#allocation2 + $0x3a] sm:$0xff] }
 0x768   : > { %v11534_v37 = vcombine.low %v11483_v25, %v11515_v14  ;;  %v11348_v4 = vcombine.low %v11283_v8, %v11299_v62  ;;  %v16592_v6 = vpack.i.bf16 %v11533_v57, %v11397_v42  ;;  %v11535_v46 = vcombine.high %v11483_v25, %v11515_v14  ;;  %v23323_v57 = vld [vmem:[#allocation2 + $0x22] sm:$0xff]  ;;  %v23339_v25 = vld [vmem:[#allocation2 + $0x52] sm:$0xff]  ;;  %v23353_v42 = vld [vmem:[#allocation2 + $0x7a] sm:$0xff]  ;;  %26961 = vst [vmem:[#allocation135_spill] sm:$0xff] %v23393_v12 }
 0x769   : > { %16578 = vrot.lane.b32.xlu0 %v16577_v23, %s17202_s8  ;;  %16583 = vrot.lane.b32.xlu1 %v16582_v7, %s17200_s30  ;;  %v11517_v35 = vcombine.high %v11451_v5, %v11467_v33  ;;  %v11398_v34 = vcombine.low %v11347_v36, %v11379_v16  ;;  %v11399_v63 = vcombine.high %v11347_v36, %v11379_v16  ;;  %v23321_v7 = vld [vmem:[#allocation2 + $0x1a] sm:$0xff]  ;;  %v23337_v16 = vld [vmem:[#allocation2 + $0x4a] sm:$0xff] }
 0x76a   : > { %v11388_v27 = vrot.slane %v11380_v40, %v17507_v58  ;;  %v11492_v56 = vrot.slane %v11484_v21, %v17507_v58  ;;  %v11381_v15 = vcombine.high %v11315_v49, %v11331_v22  ;;  %v11485_v23 = vcombine.high %v11419_v43, %v11435_v52  ;;  %v23315_v49 = vld [vmem:[#allocation2 + $0xa] sm:$0xff]  ;;  %v23329_v43 = vld [vmem:[#allocation2 + $0x32] sm:$0xff]  ;;  %v23355_v21 = vld [vmem:[#allocation2 + $0x82] sm:$0xff] }
 0x76b   : > { %v16597_v55 = vpack.i.bf16 %v11534_v37, %v11398_v34  ;;  %v11356_v53 = vrot.slane %v11348_v4, %v17507_v58  ;;  %v11349_v39 = vcombine.high %v11283_v8, %v11299_v62  ;;  %v16602_v33 = vpack.i.bf16 %v11535_v46, %v11399_v63  ;;  %v23313_v62 = vld [vmem:[#allocation2 + $0x2] sm:$0xff]  ;;  %v23347_v40 = vld [vmem:[#allocation2 + $0x6a] sm:$0xff]  ;;  %v23363_v36 = vld [vmem:[#allocation2 + $0x9a] sm:$0xff] }
 0x76c   : > { %v11536_v13 = vcombine.low %v11492_v56, %v11524_v3  ;;  %v11537_v19 = vcombine.high %v11492_v56, %v11524_v3  ;;  %v11531_v30 = vrot.slane %v11517_v35, %v17507_v58  ;;  %v11395_v32 = vrot.slane %v11381_v15, %v17507_v58  ;;  %v23345_v8 = vld [vmem:[#allocation2 + $0x62] sm:$0xff]  ;;  %v23369_v37 = vld [vmem:[#allocation2 + $0xaa] sm:$0xff]  ;;  %v23371_v4 = vld [vmem:[#allocation2 + $0xb2] sm:$0xff] }
 0x76d   : > { %16588 = vrot.lane.b32.xlu0 %v16587_v48, %s17201_s7  ;;  %16593 = vrot.lane.b32.xlu1 %v16592_v6, %s17206_s12  ;;  %v11400_v31 = vcombine.low %v11356_v53, %v11388_v27  ;;  %v11401_v10 = vcombine.high %v11356_v53, %v11388_v27  ;;  %v11499_v2 = vrot.slane %v11485_v23, %v17507_v58  ;;  %v23361_v48 = vld [vmem:[#allocation2 + $0x92] sm:$0xff]  ;;  %v23377_v6 = vld [vmem:[#allocation2 + $0xc2] sm:$0xff]  ;;  %v23379_v46 = vld [vmem:[#allocation2 + $0xca] sm:$0xff] }
 0x76e   : > { %v11363_v51 = vrot.slane %v11349_v39, %v17507_v58  ;;  %26957 = vst [vmem:[#allocation147_spill] sm:$0xff] %v23361_v48  ;;  %26958 = vst [vmem:[#allocation143_spill] sm:$0xff] %v23369_v37  ;;  %v23385_v3 = vld [vmem:[#allocation2 + $0xda] sm:$0xff]  ;;  %v23387_v35 = vld [vmem:[#allocation2 + $0xe2] sm:$0xff] }
 0x76f   : > { %v16607_v22 = vpack.i.bf16 %v11536_v13, %v11400_v31  ;;  %v16612_v45 = vpack.i.bf16 %v11537_v19, %v11401_v10  ;;  %v11538_v52 = vcombine.low %v11499_v2, %v11531_v30  ;;  %v11539_v5 = vcombine.high %v11499_v2, %v11531_v30  ;;  %26959 = vst [vmem:[#allocation141_spill] sm:$0xff] %v23377_v6  ;;  %v23395_v34 = vld [vmem:[#allocation2 + $0xfa] sm:$0xff]  ;;  %v23401_v63 = vld [vmem:[#allocation2 + $0x10a] sm:$0xff]  ;;  %v23403_v27 = vld [vmem:[#allocation2 + $0x112] sm:$0xff] }
 0x770   : > { %v11402_v47 = vcombine.low %v11363_v51, %v11395_v32  ;;  %v11403_v11 = vcombine.high %v11363_v51, %v11395_v32  ;;  %26960 = vst [vmem:[#allocation146_spill] sm:$0xff] %v23385_v3  ;;  %26962 = vst [vmem:[#allocation144_spill] sm:$0xff] %v23401_v63  ;;  %v23409_v56 = vld [vmem:[#allocation2 + $0x122] sm:$0xff]  ;;  %v23411_v15 = vld [vmem:[#allocation2 + $0x12a] sm:$0xff] }
 0x771   : > { %16598 = vrot.lane.b32.xlu0 %v16597_v55, %s17205_s11  ;;  %16603 = vrot.lane.b32.xlu1 %v16602_v33, %s17204_s10  ;;  %26963 = vst [vmem:[#allocation88_spill] sm:$0xff] %v23409_v56  ;;  %v23417_v23 = vld [vmem:[#allocation2 + $0x13a] sm:$0xff]  ;;  %v23419_v55 = vld [vmem:[#allocation2 + $0x142] sm:$0xff]  ;;  %v23425_v53 = vld [vmem:[#allocation2 + $0x152] sm:$0xff] }
 0x772   : > { %v16617_v26 = vpack.i.bf16 %v11538_v52, %v11402_v47  ;;  %v16622_v14 = vpack.i.bf16 %v11539_v5, %v11403_v11  ;;  %26964 = vst [vmem:[#allocation23_spill] sm:$0xff] %v23417_v23  ;;  %26965 = vst [vmem:[#allocation223_spill] sm:$0xff] %v23425_v53  ;;  %v23427_v39 = vld [vmem:[#allocation2 + $0x15a] sm:$0xff]  ;;  %v23433_v31 = vld [vmem:[#allocation2 + $0x16a] sm:$0xff] }
 0x773   : > { %26966 = vst [vmem:[#allocation40_spill] sm:$0xff] %v23433_v31  ;;  %v23435_v10 = vld [vmem:[#allocation2 + $0x172] sm:$0xff] }
 0x774   : > { %v26967_v51 = vld [vmem:[#allocation120_spill] sm:$0xff] }
 0x775   : > { %16608 = vrot.lane.b32.xlu0 %v16607_v22, %s17203_s9  ;;  %16613 = vrot.lane.b32.xlu1 %v16612_v45, %s17202_s8  ;;  %v26968_v22 = vld [vmem:[#allocation108_spill] sm:$0xff] }
 0x776   : > { %v26969_v45 = vcombine.low %v26967_v51, %v26968_v22  ;;  %v26970_v5 = vld [vmem:[#allocation180_spill] sm:$0xff] }
 0x777   : > { %v26971_v47 = vcombine.low %v23114_v17, %v26970_v5 }
 0x779   : > { %16618 = vrot.lane.b32.xlu0 %v16617_v26, %s17200_s30  ;;  %16623 = vrot.lane.b32.xlu1 %v16622_v14, %s17201_s7 }
 0x77d   : > { %11843 = vrot.lane.b32.xlu0 %v23313_v62, %s17211_s15  ;;  %11845 = vrot.lane.b32.xlu1 %v23315_v49, %s17211_s15 }
 0x781   : > { %11847 = vrot.lane.b32.xlu0 %v23321_v7, %s17211_s15  ;;  %11849 = vrot.lane.b32.xlu1 %v23323_v57, %s17211_s15 }
 0x785   : > { %11851 = vrot.lane.b32.xlu0 %v23329_v43, %s17211_s15  ;;  %11853 = vrot.lane.b32.xlu1 %v23331_v59, %s17211_s15 }
 0x789   : > { %11855 = vrot.lane.b32.xlu0 %v23337_v16, %s17211_s15  ;;  %11857 = vrot.lane.b32.xlu1 %v23339_v25, %s17211_s15 }
 0x78d   : > { %11859 = vrot.lane.b32.xlu0 %v23345_v8, %s17211_s15  ;;  %11861 = vrot.lane.b32.xlu1 %v23347_v40, %s17211_s15 }
 0x791   : > { %11863 = vrot.lane.b32.xlu0 %v23353_v42, %s17211_s15  ;;  %11865 = vrot.lane.b32.xlu1 %v23355_v21, %s17211_s15 }
 0x795   : > { %11867 = vrot.lane.b32.xlu0 %v23361_v48, %s17211_s15  ;;  %11869 = vrot.lane.b32.xlu1 %v23363_v36, %s17211_s15 }
 0x799   : > { %11871 = vrot.lane.b32.xlu0 %v23369_v37, %s17211_s15  ;;  %11873 = vrot.lane.b32.xlu1 %v23371_v4, %s17211_s15 }
 0x79d   : > { %11875 = vrot.lane.b32.xlu0 %v23377_v6, %s17211_s15  ;;  %11877 = vrot.lane.b32.xlu1 %v23379_v46, %s17211_s15 }
 0x7a1   : > { %11879 = vrot.lane.b32.xlu0 %v23385_v3, %s17211_s15  ;;  %11881 = vrot.lane.b32.xlu1 %v23387_v35, %s17211_s15 }
 0x7a5   : > { %11883 = vrot.lane.b32.xlu0 %v23393_v12, %s17211_s15  ;;  %11885 = vrot.lane.b32.xlu1 %v23395_v34, %s17211_s15 }
 0x7a9   : > { %11887 = vrot.lane.b32.xlu0 %v23401_v63, %s17211_s15  ;;  %11889 = vrot.lane.b32.xlu1 %v23403_v27, %s17211_s15 }
 0x7ad   : > { %11891 = vrot.lane.b32.xlu0 %v23409_v56, %s17211_s15  ;;  %11893 = vrot.lane.b32.xlu1 %v23411_v15, %s17211_s15 }
 0x7b1   : > { %11895 = vrot.lane.b32.xlu0 %v23417_v23, %s17211_s15  ;;  %11897 = vrot.lane.b32.xlu1 %v23419_v55, %s17211_s15 }
 0x7b5   : > { %11899 = vrot.lane.b32.xlu0 %v23425_v53, %s17211_s15  ;;  %11901 = vrot.lane.b32.xlu1 %v23427_v39, %s17211_s15 }
 0x7b7   : > { %v16489_v33 = vpop.permute.xlu0 %16488  ;;  %v16494_v13 = vpop.permute.xlu1 %16493 }
 0x7b8   : > { %v16491_v19 = vunpack.i.h.bf16 %v16489_v33  ;;  %v16490_v30 = vunpack.i.l.bf16 %v16489_v33  ;;  %v16496_v32 = vunpack.i.h.bf16 %v16494_v13  ;;  %v16495_v2 = vunpack.i.l.bf16 %v16494_v13 }
 0x7b9   : > { %11903 = vrot.lane.b32.xlu0 %v23433_v31, %s17211_s15  ;;  %11905 = vrot.lane.b32.xlu1 %v23435_v10, %s17211_s15 }
 0x7ba   : > { %v10846_v52 = vsel %vm2009_vm5, %v26969_v45, %v16490_v30  ;;  %v10847_v11 = vsel %vm2009_vm5, %v26971_v47, %v16491_v19 }
 0x7bb   : > { %v16499_v26 = vpop.permute.xlu0 %16498  ;;  %v16504_v14 = vpop.permute.xlu1 %16503  ;;  %v10849_v0 = vsel %vm2012_vm6, %v10847_v11, %v16496_v32  ;;  %v10848_v31 = vsel %vm2012_vm6, %v10846_v52, %v16495_v2 }
 0x7bc   : > { %v16501_v33 = vunpack.i.h.bf16 %v16499_v26  ;;  %v16500_v13 = vunpack.i.l.bf16 %v16499_v26  ;;  %v16506_v53 = vunpack.i.h.bf16 %v16504_v14  ;;  %v16505_v23 = vunpack.i.l.bf16 %v16504_v14 }
 0x7be   : > { %v10850_v56 = vsel %vm2015_vm7, %v10848_v31, %v16500_v13  ;;  %v10851_v51 = vsel %vm2015_vm7, %v10849_v0, %v16501_v33 }
 0x7bf   : > { %v16509_v30 = vpop.permute.xlu0 %16508  ;;  %v16514_v22 = vpop.permute.xlu1 %16513  ;;  %v10852_v19 = vsel %vm2018_vm8, %v10850_v56, %v16505_v23  ;;  %v10853_v5 = vsel %vm2018_vm8, %v10851_v51, %v16506_v53 }
 0x7c0   : > { %v16511_v45 = vunpack.i.h.bf16 %v16509_v30  ;;  %v16510_v17 = vunpack.i.l.bf16 %v16509_v30  ;;  %v16516_v47 = vunpack.i.h.bf16 %v16514_v22  ;;  %v16515_v26 = vunpack.i.l.bf16 %v16514_v22 }
 0x7c2   : > { %v10854_v32 = vsel %vm2021_vm9, %v10852_v19, %v16510_v17  ;;  %v10855_v2 = vsel %vm2021_vm9, %v10853_v5, %v16511_v45  ;;  %v26972_v45 = vcombine.low %v23125_v18, %v23128_v24 }
 0x7c3   : > { %v16519_v52 = vpop.permute.xlu0 %16518  ;;  %v16524_v11 = vpop.permute.xlu1 %16523  ;;  %v10856_v0 = vsel %vm2024_vm10, %v10854_v32, %v16515_v26  ;;  %v10857_v33 = vsel %vm2024_vm10, %v10855_v2, %v16516_v47  ;;  %v26973_v26 = vcombine.low %v26923_v54, %v26922_v28 }
 0x7c4   : > { %v16521_v14 = vunpack.i.h.bf16 %v16519_v52  ;;  %v16520_v31 = vunpack.i.l.bf16 %v16519_v52  ;;  %v16526_v13 = vunpack.i.h.bf16 %v16524_v11  ;;  %v16525_v30 = vunpack.i.l.bf16 %v16524_v11 }
 0x7c6   : > { %v10858_v56 = vsel %vm2027_vm11, %v10856_v0, %v16520_v31  ;;  %v10859_v23 = vsel %vm2027_vm11, %v10857_v33, %v16521_v14  ;;  %v10861_v5 = vsel %vm2009_vm5, %v26972_v45, %v16526_v13  ;;  %v10860_v47 = vsel %vm2009_vm5, %v26973_v26, %v16525_v30 }
 0x7c7   : > { %v16529_v53 = vpop.permute.xlu0 %16528  ;;  %v16534_v51 = vpop.permute.xlu1 %16533  ;;  %v15646_v22 = vpack.c.bf16 %v10859_v23, %v10858_v56 }
 0x7c8   : > { %v16531_v17 = vunpack.i.h.bf16 %v16529_v53  ;;  %v16530_v19 = vunpack.i.l.bf16 %v16529_v53  ;;  %v16536_v32 = vunpack.i.h.bf16 %v16534_v51  ;;  %v16535_v2 = vunpack.i.l.bf16 %v16534_v51 }
 0x7ca   : > { %v10862_v52 = vsel %vm2012_vm6, %v10860_v47, %v16530_v19  ;;  %v10863_v11 = vsel %vm2012_vm6, %v10861_v5, %v16531_v17 }
 0x7cb   : > { %v16539_v14 = vpop.permute.xlu0 %16538  ;;  %v16544_v31 = vpop.permute.xlu1 %16543  ;;  %v10864_v56 = vsel %vm2015_vm7, %v10862_v52, %v16535_v2  ;;  %v10865_v18 = vsel %vm2015_vm7, %v10863_v11, %v16536_v32 }
 0x7cc   : > { %v16541_v0 = vunpack.i.h.bf16 %v16539_v14  ;;  %v16540_v33 = vunpack.i.l.bf16 %v16539_v14  ;;  %v16546_v24 = vunpack.i.h.bf16 %v16544_v31  ;;  %v16545_v13 = vunpack.i.l.bf16 %v16544_v31 }
 0x7ce   : > { %v10866_v28 = vsel %vm2018_vm8, %v10864_v56, %v16540_v33  ;;  %v10867_v54 = vsel %vm2018_vm8, %v10865_v18, %v16541_v0  ;;  %v10875_v33 = vld [vmem:[#allocation3 + $0xa0] sm:$0xff] }
 0x7cf   : > { %v16549_v30 = vpop.permute.xlu0 %16548  ;;  %v16554_v23 = vpop.permute.xlu1 %16553  ;;  %v10868_v45 = vsel %vm2021_vm9, %v10866_v28, %v16545_v13  ;;  %v10869_v5 = vsel %vm2021_vm9, %v10867_v54, %v16546_v24  ;;  %v10876_v28 = vld [vmem:[#allocation3 + $0xa8] sm:$0xff]  ;;  %v11124_v54 = vcombine.low %v26938_v38, %v26937_v60 }
 0x7d0   : > { %v16551_v53 = vunpack.i.h.bf16 %v16549_v30  ;;  %v16550_v51 = vunpack.i.l.bf16 %v16549_v30  ;;  %v16556_v19 = vunpack.i.h.bf16 %v16554_v23  ;;  %v16555_v17 = vunpack.i.l.bf16 %v16554_v23 }
 0x7d1   : > { %v11260_v30 = vcombine.low %v26936_v29, %v26935_v20 }
 0x7d2   : > { %v10870_v26 = vsel %vm2024_vm10, %v10868_v45, %v16550_v51  ;;  %v10871_v47 = vsel %vm2024_vm10, %v10869_v5, %v16551_v53 }
 0x7d3   : > { %v16559_v32 = vpop.permute.xlu0 %16558  ;;  %v16564_v2 = vpop.permute.xlu1 %16563  ;;  %v10872_v52 = vsel %vm2027_vm11, %v10870_v26, %v16555_v17  ;;  %v10873_v11 = vsel %vm2027_vm11, %v10871_v47, %v16556_v19 }
 0x7d4   : > { %v15644_v14 = vpack.c.bf16 %v10873_v11, %v10872_v52  ;;  %v16561_v56 = vunpack.i.h.bf16 %v16559_v32  ;;  %v16560_v18 = vunpack.i.l.bf16 %v16559_v32  ;;  %v16566_v23 = vunpack.i.h.bf16 %v16564_v2 }
 0x7d5   : > { %v16565_v53 = vunpack.i.l.bf16 %v16564_v2 }
 0x7d6   : > { %15645 = vmatprep.subr.bf16.mxu1 %v15644_v14  ;;  %v11652_v51 = vsel %vm2009_vm5, %v11124_v54, %v16560_v18  ;;  %v26974_v18 = vcombine.low %v26954_v41, %v26953_v9  ;;  %v26975_v54 = vcombine.low %v26956_v50, %v26955_v61 }
 0x7d7   : > { %v16569_v31 = vpop.permute.xlu0 %16568  ;;  %v16574_v0 = vpop.permute.xlu1 %16573  ;;  %15647 = vmatpush1.bf16.msra.mxu1 %v15646_v22  ;;  %v11653_v22 = vsel %vm2009_vm5, %v11260_v30, %v16561_v56  ;;  %v11654_v20 = vsel %vm2012_vm6, %v11652_v51, %v16565_v53 }
 0x7d8   : > { %v16571_v19 = vunpack.i.h.bf16 %v16569_v31  ;;  %v16570_v17 = vunpack.i.l.bf16 %v16569_v31  ;;  %v11655_v60 = vsel %vm2012_vm6, %v11653_v22, %v16566_v23  ;;  %v16576_v32 = vunpack.i.h.bf16 %v16574_v0 }
 0x7d9   : > { %v16575_v2 = vunpack.i.l.bf16 %v16574_v0 }
 0x7da   : > { %15577 = vmatmul.mubr.msk.f32.vlgmr.msra.gmra.mrb[6].mxu1 %vm2009_vm5, %v10875_v33  ;;  %v11656_v29 = vsel %vm2015_vm7, %v11654_v20, %v16570_v17  ;;  %v11657_v38 = vsel %vm2015_vm7, %v11655_v60, %v16571_v19 }
 0x7db   : > { %v16579_v13 = vpop.permute.xlu0 %16578  ;;  %v23481_v24 = vpop.permute.xlu1 %16583  ;;  %10953 = vmatprep.mubr.f32.mxu1 %v26941_v1  ;;  %v11659_v51 = vsel %vm2018_vm8, %v11657_v38, %v16576_v32 }
 0x7dc   : > { %v16581_v14 = vunpack.i.h.bf16 %v16579_v13  ;;  %v16580_v31 = vunpack.i.l.bf16 %v16579_v13  ;;  %v11658_v13 = vsel %vm2018_vm8, %v11656_v29, %v16575_v2  ;;  %v16586_v19 = vunpack.i.h.bf16 %v23481_v24 }
 0x7dd   : > { %v16585_v9 = vunpack.i.l.bf16 %v23481_v24 }
 0x7de   : > { %15578 = vmatmul.mubr.msk.f32.gmra.mrb[8].mxu1 %vm2009_vm5, %v10876_v28  ;;  %v11660_v61 = vsel %vm2021_vm9, %v11658_v13, %v16580_v31  ;;  %v11661_v50 = vsel %vm2021_vm9, %v11659_v51, %v16581_v14 }
 0x7df   : > { %v16589_v45 = vpop.permute.xlu0 %16588  ;;  %v16594_v5 = vpop.permute.xlu1 %16593  ;;  %11753 = vmatprep.mubr.f32.mxu1 %v26941_v1 }
 0x7e0   : > { %v16596_v26 = vunpack.i.h.bf16 %v16594_v5  ;;  %v16595_v47 = vunpack.i.l.bf16 %v16594_v5  ;;  %v16591_v2 = vunpack.i.h.bf16 %v16589_v45  ;;  %v16590_v38 = vunpack.i.l.bf16 %v16589_v45 }
 0x7e2   : > { %v11667_v28 = vsel %vm2009_vm5, %v26974_v18, %v16596_v26  ;;  %v11666_v30 = vsel %vm2009_vm5, %v26975_v54, %v16595_v47  ;;  %v11662_v18 = vsel %vm2024_vm10, %v11660_v61, %v16585_v9 }
 0x7e3   : > { %v16599_v52 = vpop.permute.xlu0 %16598  ;;  %v16604_v11 = vpop.permute.xlu1 %16603  ;;  %v11664_v45 = vsel %vm2027_vm11, %v11662_v18, %v16590_v38 }
 0x7e4   : > { %v16601_v33 = vunpack.i.h.bf16 %v16599_v52  ;;  %v16600_v56 = vunpack.i.l.bf16 %v16599_v52  ;;  %v16606_v23 = vunpack.i.h.bf16 %v16604_v11  ;;  %v16605_v53 = vunpack.i.l.bf16 %v16604_v11 }
 0x7e6   : > { %v11668_v0 = vsel %vm2012_vm6, %v11666_v30, %v16600_v56  ;;  %v11669_v22 = vsel %vm2012_vm6, %v11667_v28, %v16601_v33  ;;  %v11663_v28 = vsel %vm2024_vm10, %v11661_v50, %v16586_v19  ;;  %v11681_v50 = vld [vmem:[#allocation3 + $0xb0] sm:$0xff] }
 0x7e7   : > { %v16609_v41 = vpop.permute.xlu0 %16608  ;;  %v16614_v17 = vpop.permute.xlu1 %16613  ;;  %v11670_v47 = vsel %vm2015_vm7, %v11668_v0, %v16605_v53  ;;  %v11671_v60 = vsel %vm2015_vm7, %v11669_v22, %v16606_v23  ;;  %v11665_v23 = vsel %vm2027_vm11, %v11663_v28, %v16591_v2 }
 0x7e8   : > { %v16611_v5 = vunpack.i.h.bf16 %v16609_v41  ;;  %v16610_v26 = vunpack.i.l.bf16 %v16609_v41  ;;  %v16616_v20 = vunpack.i.h.bf16 %v16614_v17  ;;  %v16615_v29 = vunpack.i.l.bf16 %v16614_v17 }
 0x7e9   : > { %v15650_v41 = vpack.c.bf16 %v11665_v23, %v11664_v45 }
 0x7ea   : > { %v11672_v32 = vsel %vm2018_vm8, %v11670_v47, %v16610_v26  ;;  %v11673_v24 = vsel %vm2018_vm8, %v11671_v60, %v16611_v5  ;;  %v11682_v47 = vld [vmem:[#allocation3 + $0xb8] sm:$0xff] }
 0x7eb   : > { %v16619_v52 = vpop.permute.xlu0 %16618  ;;  %v16624_v11 = vpop.permute.xlu1 %16623  ;;  %v11674_v54 = vsel %vm2021_vm9, %v11672_v32, %v16615_v29  ;;  %v11675_v30 = vsel %vm2021_vm9, %v11673_v24, %v16616_v20 }
 0x7ec   : > { %v16621_v33 = vunpack.i.h.bf16 %v16619_v52  ;;  %v16620_v31 = vunpack.i.l.bf16 %v16619_v52  ;;  %v16626_v56 = vunpack.i.h.bf16 %v16624_v11  ;;  %v16625_v14 = vunpack.i.l.bf16 %v16624_v11 }
 0x7ee   : > { %v11676_v53 = vsel %vm2024_vm10, %v11674_v54, %v16620_v31  ;;  %v11677_v0 = vsel %vm2024_vm10, %v11675_v30, %v16621_v33 }
 0x7ef   : > { %v23525_v22 = vpop.permute.xlu0 %11843  ;;  %v23527_v13 = vpop.permute.xlu1 %11845  ;;  %v11678_v51 = vsel %vm2027_vm11, %v11676_v53, %v16625_v14  ;;  %v11679_v19 = vsel %vm2027_vm11, %v11677_v0, %v16626_v56 }
 0x7f0   : > { %26976 = vst [vmem:[#allocation72_spill] sm:$0xff] %v23527_v13  ;;  %v15648_v9 = vpack.c.bf16 %v11679_v19, %v11678_v51 }
 0x7f2   : > { %15649 = vmatprep.subr.bf16.mxu1 %v15648_v9 }
 0x7f3   : > { %v11848_v17 = vpop.permute.xlu0 %11847  ;;  %v23531_v61 = vpop.permute.xlu1 %11849  ;;  %15651 = vmatpush1.bf16.msra.mxu1 %v15650_v41 }
 0x7f4   : > { %26977 = vst [vmem:[#allocation232_spill] sm:$0xff] %v23531_v61 }
 0x7f6   : > { %15579 = vmatmul.mubr.msk.f32.vlgmr.msra.gmra.mrb[6].mxu1 %vm2009_vm5, %v11681_v50 }
 0x7f7   : > { %v11852_v5 = vpop.permute.xlu0 %11851  ;;  %v23534_v26 = vpop.permute.xlu1 %11853  ;;  %11759 = vmatprep.mubr.f32.mxu1 %v26941_v1 }
 0x7f8   : > { %26978 = vst [vmem:[#allocation25_spill] sm:$0xff] %v23534_v26  ;;  %v11939_v33 = vcombine.low %v23525_v22, %v11852_v5 }
 0x7fa   : > { %15580 = vmatmul.mubr.msk.f32.gmra.mrb[8].mxu1 %vm2009_vm5, %v11682_v47  ;;  %v11947_v28 = vrot.slane %v11939_v33, %v17494_v44 }
 0x7fb   : > { %v11856_v60 = vpop.permute.xlu0 %11855  ;;  %v23538_v20 = vpop.permute.xlu1 %11857 }
 0x7fc   : > { %26979 = vst [vmem:[#allocation75_spill] sm:$0xff] %v23538_v20  ;;  %v11955_v24 = vcombine.low %v11848_v17, %v11856_v60  ;;  %v11956_v63 = vcombine.high %v11848_v17, %v11856_v60  ;;  %v12227_v6 = vcombine.low %v23531_v61, %v23538_v20 }
 0x7fe   : > { %v11963_v31 = vrot.slane %v11955_v24, %v17494_v44  ;;  %v23591_v17 = vrot.slane %v11956_v63, %v17494_v44  ;;  %v23598_v61 = vrot.slane %v12227_v6, %v17494_v44 }
 0x7ff   : > { %v11860_v29 = vpop.permute.xlu0 %11859  ;;  %v23540_v2 = vpop.permute.xlu1 %11861 }
 0x800   : > { %26980 = vst [vmem:[#allocation211_spill] sm:$0xff] %v23540_v2  ;;  %v12003_v30 = vcombine.low %v11947_v28, %v11963_v31 }
 0x802   : > { %v23558_v19 = vrot.slane %v12003_v30, %v17507_v58 }
 0x803   : > { %v11864_v38 = vpop.permute.xlu0 %11863  ;;  %v23542_v32 = vpop.permute.xlu1 %11865 }
 0x804   : > { %26981 = vst [vmem:[#allocation199_spill] sm:$0xff] %v23542_v32  ;;  %26985 = vst [vmem:[#allocation227_spill] sm:$0xff] %v23558_v19 }
 0x807   : > { %v11868_v52 = vpop.permute.xlu0 %11867  ;;  %v23544_v11 = vpop.permute.xlu1 %11869 }
 0x808   : > { %26982 = vst [vmem:[#allocation57_spill] sm:$0xff] %v23544_v11  ;;  %v11971_v56 = vcombine.low %v11860_v29, %v11868_v52 }
 0x80a   : > { %v11979_v45 = vrot.slane %v11971_v56, %v17494_v44 }
 0x80b   : > { %v11872_v14 = vpop.permute.xlu0 %11871  ;;  %v23548_v18 = vpop.permute.xlu1 %11873 }
 0x80c   : > { %26983 = vst [vmem:[#allocation218_spill] sm:$0xff] %v23548_v18  ;;  %v11987_v54 = vcombine.low %v11864_v38, %v11872_v14  ;;  %v12259_v60 = vcombine.low %v23542_v32, %v23548_v18 }
 0x80e   : > { %v11995_v23 = vrot.slane %v11987_v54, %v17494_v44 }
 0x80f   : > { %v23553_v53 = vpop.permute.xlu0 %11875  ;;  %v23555_v0 = vpop.permute.xlu1 %11877 }
 0x810   : > { %26984 = vst [vmem:[#allocation78_spill] sm:$0xff] %v23555_v0  ;;  %v12035_v51 = vcombine.low %v11979_v45, %v11995_v23  ;;  %v12036_v6 = vcombine.high %v11979_v45, %v11995_v23 }
 0x812   : > { %v23561_v9 = vrot.slane %v12035_v51, %v17507_v58  ;;  %v12050_v37 = vrot.slane %v12036_v6, %v17507_v58 }
 0x813   : > { %v11880_v41 = vpop.permute.xlu0 %11879  ;;  %v23563_v50 = vpop.permute.xlu1 %11881 }
 0x814   : > { %26986 = vst [vmem:[#allocation128_spill] sm:$0xff] %v23561_v9  ;;  %26987 = vst [vmem:[#allocation206_spill] sm:$0xff] %v23563_v50 }
 0x817   : > { %v11884_v24 = vpop.permute.xlu0 %11883  ;;  %v23567_v33 = vpop.permute.xlu1 %11885 }
 0x818   : > { %26988 = vst [vmem:[#allocation195_spill] sm:$0xff] %v23567_v33  ;;  %v12347_v56 = vcombine.low %v23555_v0, %v23567_v33  ;;  %v11940_v0 = vcombine.high %v23525_v22, %v11852_v5  ;;  %v11972_v22 = vcombine.high %v11860_v29, %v11868_v52  ;;  %v12243_v33 = vcombine.low %v23540_v2, %v23544_v11 }
 0x819   : > { %v23614_v29 = vrot.slane %v12259_v60, %v17494_v44  ;;  %v12075_v52 = vcombine.low %v23553_v53, %v11884_v24  ;;  %v12076_v45 = vcombine.high %v23553_v53, %v11884_v24 }
 0x81a   : > { %v23579_v12 = vrot.slane %v12347_v56, %v17494_v44  ;;  %v23601_v5 = vrot.slane %v11940_v0, %v17494_v44  ;;  %v23625_v2 = vrot.slane %v12243_v33, %v17494_v44 }
 0x81b   : > { %v11888_v54 = vpop.permute.xlu0 %11887  ;;  %v23571_v1 = vpop.permute.xlu1 %11889  ;;  %v12083_v33 = vrot.slane %v12075_v52, %v17494_v44 }
 0x81c   : > { %26989 = vst [vmem:[#allocation76_spill] sm:$0xff] %v23571_v1  ;;  %v12363_v30 = vcombine.low %v23563_v50, %v23571_v1  ;;  %v12211_v50 = vcombine.low %v23527_v13, %v23534_v26  ;;  %v12019_v26 = vcombine.low %v23601_v5, %v23591_v17 }
 0x81e   : > { %v23576_v51 = vrot.slane %v12363_v30, %v17494_v44  ;;  %v11988_v30 = vcombine.high %v11864_v38, %v11872_v14  ;;  %v12091_v38 = vcombine.low %v11880_v41, %v11888_v54  ;;  %v23606_v63 = vrot.slane %v12211_v50, %v17494_v44 }
 0x81f   : > { %v11892_v47 = vpop.permute.xlu0 %11891  ;;  %v23581_v3 = vpop.permute.xlu1 %11893  ;;  %v12004_v14 = vcombine.high %v11947_v28, %v11963_v31  ;;  %v11986_v28 = vrot.slane %v11972_v22, %v17494_v44 }
 0x820   : > { %26990 = vst [vmem:[#allocation80_spill] sm:$0xff] %v23581_v3  ;;  %v23609_v13 = vrot.slane %v11988_v30, %v17494_v44  ;;  %v12275_v31 = vcombine.low %v23606_v63, %v23598_v61  ;;  %v12092_v30 = vcombine.high %v11880_v41, %v11888_v54  ;;  %v12099_v23 = vrot.slane %v12091_v38, %v17494_v44 }
 0x821   : > { %v23630_v11 = vrot.slane %v12004_v14, %v17507_v58  ;;  %v12307_v41 = vcombine.low %v23625_v2, %v23614_v29 }
 0x822   : > { %v12051_v18 = vcombine.low %v11986_v28, %v23609_v13  ;;  %v12052_v50 = vcombine.high %v11986_v28, %v23609_v13  ;;  %v12106_v22 = vrot.slane %v12092_v30, %v17494_v44  ;;  %v12139_v6 = vcombine.low %v12083_v33, %v12099_v23 }
 0x823   : > { %v11896_v56 = vpop.permute.xlu0 %11895  ;;  %v23595_v1 = vpop.permute.xlu1 %11897  ;;  %v12411_v30 = vcombine.low %v23579_v12, %v23576_v51 }
 0x824   : > { %26991 = vst [vmem:[#allocation119_spill] sm:$0xff] %v23595_v1 }
 0x827   : > { %v11900_v0 = vpop.permute.xlu0 %11899  ;;  %v23617_v32 = vpop.permute.xlu1 %11901 }
 0x828   : > { %26992 = vst [vmem:[#allocation45_spill] sm:$0xff] %v23617_v32  ;;  %v12107_v60 = vcombine.low %v11892_v47, %v11900_v0  ;;  %v12108_v20 = vcombine.high %v11892_v47, %v11900_v0  ;;  %v12379_v53 = vcombine.low %v23581_v3, %v23617_v32  ;;  %v12090_v47 = vrot.slane %v12076_v45, %v17494_v44 }
 0x829   : > { %v12140_v0 = vcombine.high %v12083_v33, %v12099_v23  ;;  %v12068_v23 = vcombine.high %v23558_v19, %v23561_v9 }
 0x82a   : > { %v12115_v28 = vrot.slane %v12107_v60, %v17494_v44  ;;  %v12122_v52 = vrot.slane %v12108_v20, %v17494_v44  ;;  %v23657_v45 = vrot.slane %v12379_v53, %v17494_v44  ;;  %v12155_v60 = vcombine.low %v12090_v47, %v12106_v22 }
 0x82b   : > { %v11904_v24 = vpop.permute.xlu0 %11903  ;;  %v23640_v54 = vpop.permute.xlu1 %11905  ;;  %v12154_v53 = vrot.slane %v12140_v0, %v17507_v58  ;;  %v23694_v0 = vrot.slane %v12275_v31, %v17507_v58 }
 0x82c   : > { %26993 = vst [vmem:[#allocation46_spill] sm:$0xff] %v23640_v54  ;;  %v12123_v38 = vcombine.low %v11896_v56, %v11904_v24  ;;  %v12124_v14 = vcombine.high %v11896_v56, %v11904_v24  ;;  %v12395_v13 = vcombine.low %v23595_v1, %v23640_v54  ;;  %v12059_v56 = vrot.slane %v12051_v18, %v17507_v58 }
 0x82d   : > { %26999 = vst [vmem:[#allocation124_spill] sm:$0xff] %v23694_v0 }
 0x82e   : > { %v12131_v3 = vrot.slane %v12123_v38, %v17494_v44  ;;  %v12138_v32 = vrot.slane %v12124_v14, %v17494_v44  ;;  %v23651_v48 = vrot.slane %v12395_v13, %v17494_v44  ;;  %v23662_v38 = vrot.slane %v12139_v6, %v17507_v58 }
 0x82f   : > { %v23675_v6 = vrot.slane %v12411_v30, %v17507_v58  ;;  %v12163_v13 = vrot.slane %v12155_v60, %v17507_v58 }
 0x830   : > { %v12171_v20 = vcombine.low %v12115_v28, %v12131_v3  ;;  %v12172_v33 = vcombine.high %v12115_v28, %v12131_v3  ;;  %v12187_v24 = vcombine.low %v12122_v52, %v12138_v32  ;;  %26994 = vst [vmem:[#allocation69_spill] sm:$0xff] %v23662_v38  ;;  %v12188_v14 = vcombine.high %v12122_v52, %v12138_v32 }
 0x831   : > { %v12443_v18 = vcombine.low %v23657_v45, %v23651_v48  ;;  %v12156_v28 = vcombine.high %v12090_v47, %v12106_v22  ;;  %26996 = vst [vmem:[#allocation52_spill] sm:$0xff] %v23675_v6  ;;  %v12069_v52 = vcombine.low %v23630_v11, %v12050_v37  ;;  %v23688_v22 = vrot.slane %v12307_v41, %v17507_v58 }
 0x832   : > { %v23670_v1 = vrot.slane %v12171_v20, %v17507_v58  ;;  %v12186_v9 = vrot.slane %v12172_v33, %v17507_v58  ;;  %v12195_v3 = vrot.slane %v12187_v24, %v17507_v58  ;;  %v12027_v24 = vrot.slane %v12019_v26, %v17507_v58 }
 0x833   : > { %v23678_v32 = vrot.slane %v12443_v18, %v17507_v58  ;;  %26998 = vst [vmem:[#allocation125_spill] sm:$0xff] %v23688_v22  ;;  %v12202_v47 = vrot.slane %v12188_v14, %v17507_v58  ;;  %v12070_v26 = vcombine.high %v23630_v11, %v12050_v37  ;;  %v12308_v37 = vcombine.high %v23625_v2, %v23614_v29 }
 0x834   : > { %26995 = vst [vmem:[#allocation82_spill] sm:$0xff] %v23670_v1  ;;  %v12204_v20 = vcombine.high %v23662_v38, %v23670_v1  ;;  %v12205_v33 = vcombine.low %v12154_v53, %v12186_v9  ;;  %v12206_v60 = vcombine.high %v12154_v53, %v12186_v9  ;;  %v12207_v54 = vcombine.low %v12163_v13, %v12195_v3 }
 0x835   : > { %26997 = vst [vmem:[#allocation224_spill] sm:$0xff] %v23678_v32  ;;  %v12066_v1 = vrot.slane %v12052_v50, %v17507_v58  ;;  %v12170_v38 = vrot.slane %v12156_v28, %v17507_v58  ;;  %v12071_v41 = vcombine.low %v12027_v24, %v12059_v56  ;;  %v12208_v14 = vcombine.high %v12163_v13, %v12195_v3 }
 0x836   : > { %v16627_v18 = vpack.i.bf16 %v12204_v20, %v12068_v23  ;;  %v16632_v19 = vpack.i.bf16 %v12205_v33, %v12069_v52  ;;  %v27000_v23 = vcombine.high %v23601_v5, %v23591_v17  ;;  %v16637_v53 = vpack.i.bf16 %v12206_v60, %v12070_v26  ;;  %v23872_v60 = vld [vmem:[#allocation2 + $0x1] sm:$0xff] }
 0x837   : > { %v16642_v31 = vpack.i.bf16 %v12207_v54, %v12071_v41  ;;  %v12209_v52 = vcombine.low %v12170_v38, %v12202_v47  ;;  %v12210_v17 = vcombine.high %v12170_v38, %v12202_v47  ;;  %v12476_v5 = vcombine.high %v23675_v6, %v23678_v32  ;;  %v23864_v47 = vld [vmem:[#allocation2 + $0x159] sm:$0xff] }
 0x838   : > { %16628 = vrot.lane.b32.xlu0 %v16627_v18, %s17206_s12  ;;  %16633 = vrot.lane.b32.xlu1 %v16632_v19, %s17205_s11  ;;  %v12034_v9 = vrot.slane %v27000_v23, %v17507_v58  ;;  %v12072_v19 = vcombine.high %v12027_v24, %v12059_v56  ;;  %v12276_v54 = vcombine.high %v23606_v63, %v23598_v61  ;;  %v23842_v63 = vld [vmem:[#allocation2 + $0xe1] sm:$0xff]  ;;  %v23854_v24 = vld [vmem:[#allocation2 + $0x111] sm:$0xff]  ;;  %v23882_v23 = vld [vmem:[#allocation2 + $0x19] sm:$0xff] }
 0x839   : > { %v12340_v56 = vcombine.high %v23694_v0, %v23688_v22  ;;  %v23720_v2 = vrot.slane %v12308_v37, %v17507_v58  ;;  %v23870_v18 = vld [vmem:[#allocation2 + $0x171] sm:$0xff]  ;;  %v23906_v37 = vld [vmem:[#allocation2 + $0x79] sm:$0xff] }
 0x83a   : > { %v12073_v28 = vcombine.low %v12034_v9, %v12066_v1  ;;  %v16647_v11 = vpack.i.bf16 %v12208_v14, %v12072_v19  ;;  %v12074_v13 = vcombine.high %v12034_v9, %v12066_v1  ;;  %v23725_v29 = vrot.slane %v12276_v54, %v17507_v58  ;;  %v27003_v1 = vld [vmem:[#allocation147_spill] sm:$0xff]  ;;  %v23920_v54 = vld [vmem:[#allocation2 + $0xc1] sm:$0xff] }
 0x83b   : > { %v16662_v33 = vpack.i.bf16 %v12476_v5, %v12340_v56  ;;  %27001 = vst [vmem:[#allocation114_spill] sm:$0xff] %v23720_v2  ;;  %v23884_v9 = vld [vmem:[#allocation2 + $0x31] sm:$0xff]  ;;  %v23918_v5 = vld [vmem:[#allocation2 + $0xa9] sm:$0xff]  ;;  %v27025_v32 = vld [vmem:[#allocation9_spill] sm:$0xff] }
 0x83c   : > { %16638 = vrot.lane.b32.xlu0 %v16637_v53, %s17204_s10  ;;  %16643 = vrot.lane.b32.xlu1 %v16642_v31, %s17203_s9  ;;  %v16652_v20 = vpack.i.bf16 %v12209_v52, %v12073_v28  ;;  %v16657_v3 = vpack.i.bf16 %v12210_v17, %v12074_v13  ;;  %27002 = vst [vmem:[#allocation86_spill] sm:$0xff] %v23725_v29  ;;  %v23894_v31 = vld [vmem:[#allocation2 + $0x49] sm:$0xff]  ;;  %v23896_v52 = vld [vmem:[#allocation2 + $0x61] sm:$0xff] }
 0x83d   : > { %v12341_v61 = vcombine.low %v23725_v29, %v23720_v2 }
 0x840   : > { %16648 = vrot.lane.b32.xlu0 %v16647_v11, %s17202_s8  ;;  %16653 = vrot.lane.b32.xlu1 %v16652_v20, %s17200_s30  ;;  %v23908_v11 = vld [vmem:[#allocation2 + $0x91] sm:$0xff] }
 0x844   : > { %16658 = vrot.lane.b32.xlu0 %v16657_v3, %s17201_s7  ;;  %16663 = vrot.lane.b32.xlu1 %v16662_v33, %s17206_s12  ;;  %v23930_v3 = vld [vmem:[#allocation2 + $0xd9] sm:$0xff]  ;;  %v23932_v33 = vld [vmem:[#allocation2 + $0xf1] sm:$0xff] }
 0x848   : > { %12549 = vrot.lane.b32.xlu0 %v12341_v61, %s17205_s11  ;;  %12628 = vrot.lane.b32.xlu1 %v23315_v49, %s17210_s14  ;;  %v27005_v49 = vld [vmem:[#allocation141_spill] sm:$0xff] }
 0x84c   : > { %12632 = vrot.lane.b32.xlu0 %v23323_v57, %s17210_s14  ;;  %12636 = vrot.lane.b32.xlu1 %v23331_v59, %s17210_s14  ;;  %v27007_v57 = vld [vmem:[#allocation135_spill] sm:$0xff]  ;;  %v27009_v59 = vld [vmem:[#allocation88_spill] sm:$0xff] }
 0x850   : > { %12640 = vrot.lane.b32.xlu0 %v23339_v25, %s17210_s14  ;;  %12644 = vrot.lane.b32.xlu1 %v23347_v40, %s17210_s14  ;;  %v27011_v25 = vld [vmem:[#allocation223_spill] sm:$0xff]  ;;  %v27012_v40 = vld [vmem:[#allocation40_spill] sm:$0xff] }
 0x854   : > { %12648 = vrot.lane.b32.xlu0 %v23355_v21, %s17210_s14  ;;  %12652 = vrot.lane.b32.xlu1 %v23363_v36, %s17210_s14  ;;  %v23800_v21 = vld [vmem:[#allocation2 + $0x39] sm:$0xff]  ;;  %v23806_v36 = vld [vmem:[#allocation2 + $0x51] sm:$0xff] }
 0x858   : > { %12656 = vrot.lane.b32.xlu0 %v23371_v4, %s17210_s14  ;;  %12660 = vrot.lane.b32.xlu1 %v23379_v46, %s17210_s14  ;;  %v23808_v4 = vld [vmem:[#allocation2 + $0x69] sm:$0xff]  ;;  %v23814_v46 = vld [vmem:[#allocation2 + $0x81] sm:$0xff] }
 0x85c   : > { %12664 = vrot.lane.b32.xlu0 %v23387_v35, %s17210_s14  ;;  %12668 = vrot.lane.b32.xlu1 %v23395_v34, %s17210_s14  ;;  %v23816_v35 = vld [vmem:[#allocation2 + $0x99] sm:$0xff]  ;;  %v27013_v34 = vcombine.high %v23657_v45, %v23651_v48 }
 0x85d   : > { %v23844_v48 = vld [vmem:[#allocation2 + $0xf9] sm:$0xff] }
 0x860   : > { %12672 = vrot.lane.b32.xlu0 %v23403_v27, %s17210_s14  ;;  %12676 = vrot.lane.b32.xlu1 %v23411_v15, %s17210_s14  ;;  %v23826_v27 = vrot.slane %v27013_v34, %v17507_v58  ;;  %v23828_v15 = vld [vmem:[#allocation2 + $0xb1] sm:$0xff] }
 0x862   : > { %27014 = vst [vmem:[#allocation98_spill] sm:$0xff] %v23826_v27 }
 0x864   : > { %12680 = vrot.lane.b32.xlu0 %v23419_v55, %s17210_s14  ;;  %12684 = vrot.lane.b32.xlu1 %v23427_v39, %s17210_s14  ;;  %v23830_v55 = vld [vmem:[#allocation2 + $0xc9] sm:$0xff]  ;;  %v27015_v39 = vcombine.high %v23579_v12, %v23576_v51  ;;  %v23862_v51 = vld [vmem:[#allocation2 + $0x141] sm:$0xff] }
 0x865   : > { %v23856_v12 = vld [vmem:[#allocation2 + $0x129] sm:$0xff] }
 0x868   : > { %12688 = vrot.lane.b32.xlu0 %v23435_v10, %s17210_s14  ;;  %12626 = vrot.lane.b32.xlu1 %v23313_v62, %s17210_s14  ;;  %v27004_v62 = vld [vmem:[#allocation143_spill] sm:$0xff]  ;;  %v23840_v10 = vrot.slane %v27015_v39, %v17507_v58  ;;  %v27024_v39 = vld [vmem:[#allocation10_spill] sm:$0xff] }
 0x86a   : > { %27016 = vst [vmem:[#allocation122_spill] sm:$0xff] %v23840_v10 }
 0x86c   : > { %12630 = vrot.lane.b32.xlu0 %v23321_v7, %s17210_s14  ;;  %12634 = vrot.lane.b32.xlu1 %v23329_v43, %s17210_s14  ;;  %v27006_v7 = vld [vmem:[#allocation146_spill] sm:$0xff]  ;;  %v27008_v43 = vld [vmem:[#allocation144_spill] sm:$0xff] }
 0x870   : > { %12638 = vrot.lane.b32.xlu0 %v23337_v16, %s17210_s14  ;;  %12642 = vrot.lane.b32.xlu1 %v23345_v8, %s17210_s14  ;;  %v27010_v16 = vld [vmem:[#allocation23_spill] sm:$0xff] }
 0x871   : > { %v23792_v8 = vld [vmem:[#allocation2 + $0x9] sm:$0xff] }
 0x874   : > { %12646 = vrot.lane.b32.xlu0 %v23353_v42, %s17210_s14  ;;  %12650 = vrot.lane.b32.xlu1 %v27003_v1, %s17210_s14  ;;  %v23798_v42 = vld [vmem:[#allocation2 + $0x21] sm:$0xff] }
 0x878   : > { %12654 = vrot.lane.b32.xlu0 %v27004_v62, %s17210_s14  ;;  %12658 = vrot.lane.b32.xlu1 %v27005_v49, %s17210_s14  ;;  %v23942_v62 = vld [vmem:[#allocation2 + $0x109] sm:$0xff]  ;;  %v23944_v49 = vld [vmem:[#allocation2 + $0x121] sm:$0xff] }
 0x87c   : > { %12662 = vrot.lane.b32.xlu0 %v27006_v7, %s17210_s14  ;;  %12666 = vrot.lane.b32.xlu1 %v27007_v57, %s17210_s14 }
 0x880   : > { %12670 = vrot.lane.b32.xlu0 %v27008_v43, %s17210_s14  ;;  %12674 = vrot.lane.b32.xlu1 %v27009_v59, %s17210_s14  ;;  %v23954_v43 = vld [vmem:[#allocation2 + $0x139] sm:$0xff]  ;;  %v23956_v59 = vld [vmem:[#allocation2 + $0x151] sm:$0xff] }
 0x881   : > { %27021 = vst [vmem:[#allocation140_spill] sm:$0xff] %v23954_v43  ;;  %27022 = vst [vmem:[#allocation185_spill] sm:$0xff] %v23956_v59 }
 0x884   : > { %12678 = vrot.lane.b32.xlu0 %v27010_v16, %s17210_s14  ;;  %12682 = vrot.lane.b32.xlu1 %v27011_v25, %s17210_s14 }
 0x888   : > { %12686 = vrot.lane.b32.xlu0 %v27012_v40, %s17210_s14  ;;  %13641 = vrot.lane.b32.xlu1 %v23792_v8, %s17211_s15  ;;  %v23966_v40 = vld [vmem:[#allocation2 + $0x169] sm:$0xff] }
 0x889   : > { %27023 = vst [vmem:[#allocation133_spill] sm:$0xff] %v23966_v40 }
 0x88c   : > { %13645 = vrot.lane.b32.xlu0 %v23798_v42, %s17211_s15  ;;  %13649 = vrot.lane.b32.xlu1 %v23800_v21, %s17211_s15 }
 0x890   : > { %13653 = vrot.lane.b32.xlu0 %v23806_v36, %s17211_s15  ;;  %13657 = vrot.lane.b32.xlu1 %v23808_v4, %s17211_s15 }
 0x894   : > { %13661 = vrot.lane.b32.xlu0 %v23814_v46, %s17211_s15  ;;  %13665 = vrot.lane.b32.xlu1 %v23816_v35, %s17211_s15 }
 0x898   : > { %13669 = vrot.lane.b32.xlu0 %v23828_v15, %s17211_s15  ;;  %13673 = vrot.lane.b32.xlu1 %v23830_v55, %s17211_s15 }
 0x89c   : > { %13677 = vrot.lane.b32.xlu0 %v23842_v63, %s17211_s15  ;;  %13681 = vrot.lane.b32.xlu1 %v23844_v48, %s17211_s15 }
 0x8a0   : > { %13685 = vrot.lane.b32.xlu0 %v23854_v24, %s17211_s15  ;;  %13689 = vrot.lane.b32.xlu1 %v23856_v12, %s17211_s15 }
 0x8a4   : > { %13693 = vrot.lane.b32.xlu0 %v23862_v51, %s17211_s15  ;;  %13697 = vrot.lane.b32.xlu1 %v23864_v47, %s17211_s15 }
 0x8a8   : > { %13701 = vrot.lane.b32.xlu0 %v23870_v18, %s17211_s15  ;;  %13639 = vrot.lane.b32.xlu1 %v23872_v60, %s17211_s15 }
 0x8aa   : > { %v23878_v26 = vpop.permute.xlu0 %16628  ;;  %v23880_v41 = vpop.permute.xlu1 %16633 }
 0x8ac   : > { %13643 = vrot.lane.b32.xlu0 %v23882_v23, %s17211_s15  ;;  %13647 = vrot.lane.b32.xlu1 %v23884_v9, %s17211_s15 }
 0x8ae   : > { %v23890_v14 = vpop.permute.xlu0 %16638  ;;  %v23892_v53 = vpop.permute.xlu1 %16643 }
 0x8b0   : > { %13651 = vrot.lane.b32.xlu0 %v23894_v31, %s17211_s15  ;;  %13655 = vrot.lane.b32.xlu1 %v23896_v52, %s17211_s15 }
 0x8b2   : > { %v23902_v19 = vpop.permute.xlu0 %16648  ;;  %v23904_v28 = vpop.permute.xlu1 %16653 }
 0x8b3   : > { %27017 = vst [vmem:[#allocation109_spill] sm:$0xff] %v23904_v28  ;;  %v16630_v28 = vunpack.i.l.bf16 %v23878_v26 }
 0x8b4   : > { %13659 = vrot.lane.b32.xlu0 %v23906_v37, %s17211_s15  ;;  %13663 = vrot.lane.b32.xlu1 %v23908_v11, %s17211_s15 }
 0x8b6   : > { %v23914_v20 = vpop.permute.xlu0 %16658  ;;  %v23916_v17 = vpop.permute.xlu1 %16663 }
 0x8b7   : > { %27018 = vst [vmem:[#allocation126_spill] sm:$0xff] %v23914_v20  ;;  %27019 = vst [vmem:[#allocation188_spill] sm:$0xff] %v23916_v17  ;;  %v27033_v17 = vld [vmem:[#allocation211_spill] sm:$0xff] }
 0x8b8   : > { %13667 = vrot.lane.b32.xlu0 %v23918_v5, %s17211_s15  ;;  %13671 = vrot.lane.b32.xlu1 %v23920_v54, %s17211_s15 }
 0x8ba   : > { %v23926_v13 = vpop.permute.xlu0 %12549  ;;  %v23928_v56 = vpop.permute.xlu1 %12628 }
 0x8bb   : > { %27020 = vst [vmem:[#allocation123_spill] sm:$0xff] %v23926_v13 }
 0x8bc   : > { %13675 = vrot.lane.b32.xlu0 %v23930_v3, %s17211_s15  ;;  %13679 = vrot.lane.b32.xlu1 %v23932_v33, %s17211_s15 }
 0x8be   : > { %v23938_v61 = vpop.permute.xlu0 %12632  ;;  %v23940_v1 = vpop.permute.xlu1 %12636 }
 0x8c0   : > { %13683 = vrot.lane.b32.xlu0 %v23942_v62, %s17211_s15  ;;  %13687 = vrot.lane.b32.xlu1 %v23944_v49, %s17211_s15 }
 0x8c2   : > { %v23950_v7 = vpop.permute.xlu0 %12640  ;;  %v23952_v57 = vpop.permute.xlu1 %12644 }
 0x8c4   : > { %13691 = vrot.lane.b32.xlu0 %v23954_v43, %s17211_s15  ;;  %13695 = vrot.lane.b32.xlu1 %v23956_v59, %s17211_s15  ;;  %v27040_v59 = vld [vmem:[#allocation45_spill] sm:$0xff] }
 0x8c6   : > { %v23962_v16 = vpop.permute.xlu0 %12648  ;;  %v23964_v25 = vpop.permute.xlu1 %12652 }
 0x8c8   : > { %13699 = vrot.lane.b32.xlu0 %v23966_v40, %s17211_s15  ;;  %14575 = vrot.lane.b32.xlu1 %v23792_v8, %s17210_s14  ;;  %v27039_v40 = vld [vmem:[#allocation78_spill] sm:$0xff] }
 0x8c9   : > { %v11755_v34 = vpop.f32.mrb[6].mxu1 }
 0x8ca   : > { %v11770_v30 = vadd.f32 %v11755_v34, %v27024_v39  ;;  %v23973_v50 = vpop.permute.xlu0 %12656  ;;  %v23975_v38 = vpop.permute.xlu1 %12660 }
 0x8cb   : > { %v11757_v45 = vpop.f32.mrb[7].mxu1 }
 0x8cc   : > { %15581 = vst [vmem:[%s21863_s23 + $0x40] sm:$0xff] %v11770_v30  ;;  %v11771_v13 = vadd.f32 %v11757_v45, %v27024_v39  ;;  %14579 = vrot.lane.b32.xlu0 %v23798_v42, %s17210_s14  ;;  %14583 = vrot.lane.b32.xlu1 %v23800_v21, %s17210_s14  ;;  %v27026_v45 = vld [vmem:[#allocation75_spill] sm:$0xff] }
 0x8cd   : > { %v11761_v8 = vpop.f32.mrb[8].mxu1 }
 0x8ce   : > { %15582 = vst [vmem:[%s21863_s23 + $0x48] sm:$0xff] %v11771_v13  ;;  %v11772_v6 = vadd.f32 %v11761_v8, %v27025_v32  ;;  %v23985_v34 = vpop.permute.xlu0 %12664  ;;  %v23987_v22 = vpop.permute.xlu1 %12668  ;;  %v27028_v8 = vld [vmem:[#allocation218_spill] sm:$0xff] }
 0x8cf   : > { %v11763_v0 = vpop.f32.mrb[9].mxu1 }
 0x8d0   : > { %15583 = vst [vmem:[%s21863_s23 + $0x50] sm:$0xff] %v11772_v6  ;;  %v11773_v30 = vadd.f32 %v11763_v0, %v27025_v32  ;;  %14587 = vrot.lane.b32.xlu0 %v23806_v36, %s17210_s14  ;;  %14591 = vrot.lane.b32.xlu1 %v23808_v4, %s17210_s14  ;;  %v27027_v36 = vld [vmem:[#allocation232_spill] sm:$0xff]  ;;  %v27029_v4 = vld [vmem:[#allocation199_spill] sm:$0xff] }
 0x8d1   : > { %v12228_v13 = vcombine.high %v27027_v36, %v27026_v45  ;;  %v27031_v32 = vld [vmem:[#allocation72_spill] sm:$0xff] }
 0x8d2   : > { %15584 = vst [vmem:[%s21863_s23 + $0x58] sm:$0xff] %v11773_v30  ;;  %v23996_v42 = vpop.permute.xlu0 %12672  ;;  %v23998_v21 = vpop.permute.xlu1 %12676  ;;  %v12260_v30 = vcombine.high %v27029_v4, %v27028_v8  ;;  %v27036_v4 = vld [vmem:[#allocation46_spill] sm:$0xff] }
 0x8d3   : > { %v12242_v45 = vrot.slane %v12228_v13, %v17494_v44 }
 0x8d4   : > { %14595 = vrot.lane.b32.xlu0 %v23814_v46, %s17210_s14  ;;  %14599 = vrot.lane.b32.xlu1 %v23816_v35, %s17210_s14  ;;  %v27030_v46 = vld [vmem:[#allocation25_spill] sm:$0xff]  ;;  %v12274_v36 = vrot.slane %v12260_v30, %v17494_v44 }
 0x8d5   : > { %v12212_v39 = vcombine.high %v27031_v32, %v27030_v46  ;;  %v27032_v35 = vld [vmem:[#allocation57_spill] sm:$0xff]  ;;  %v27037_v46 = vld [vmem:[#allocation119_spill] sm:$0xff] }
 0x8d6   : > { %v24004_v6 = vpop.permute.xlu0 %12680  ;;  %v24006_v0 = vpop.permute.xlu1 %12684  ;;  %v12244_v27 = vcombine.high %v27033_v17, %v27032_v35  ;;  %v27035_v17 = vld [vmem:[#allocation206_spill] sm:$0xff]  ;;  %v12396_v35 = vcombine.high %v27037_v46, %v27036_v4  ;;  %v16635_v4 = vunpack.i.l.bf16 %v23880_v41 }
 0x8d8   : > { %14603 = vrot.lane.b32.xlu0 %v23828_v15, %s17210_s14  ;;  %14607 = vrot.lane.b32.xlu1 %v23830_v55, %s17210_s14  ;;  %v12226_v15 = vrot.slane %v12212_v39, %v17494_v44  ;;  %v12258_v32 = vrot.slane %v12244_v27, %v17494_v44  ;;  %v27034_v55 = vld [vmem:[#allocation76_spill] sm:$0xff] }
 0x8d9   : > { %v12364_v8 = vcombine.high %v27035_v17, %v27034_v55  ;;  %v27041_v27 = vld [vmem:[#allocation80_spill] sm:$0xff]  ;;  %v16631_v17 = vunpack.i.h.bf16 %v23878_v26  ;;  %v27045_v26 = vld [vmem:[#allocation227_spill] sm:$0xff] }
 0x8da   : > { %v24020_v10 = vpop.permute.xlu0 %12688  ;;  %v24022_v29 = vpop.permute.xlu1 %12626  ;;  %v12291_v30 = vcombine.low %v12226_v15, %v12242_v45  ;;  %v12292_v20 = vcombine.high %v12226_v15, %v12242_v45  ;;  %v12380_v43 = vcombine.high %v27041_v27, %v27040_v59  ;;  %v12324_v55 = vcombine.high %v12258_v32, %v12274_v36 }
 0x8db   : > { %v24051_v45 = vrot.slane %v12364_v8, %v17494_v44  ;;  %v12410_v15 = vrot.slane %v12396_v35, %v17494_v44  ;;  %v16636_v27 = vunpack.i.h.bf16 %v23880_v41  ;;  %v13042_v41 = vcombine.low %v23962_v16, %v23973_v50 }
 0x8dc   : > { %14611 = vrot.lane.b32.xlu0 %v23842_v63, %s17210_s14  ;;  %14615 = vrot.lane.b32.xlu1 %v23844_v48, %s17210_s14  ;;  %v12323_v63 = vcombine.low %v12258_v32, %v12274_v36  ;;  %v27038_v48 = vld [vmem:[#allocation195_spill] sm:$0xff]  ;;  %v24060_v59 = vrot.slane %v12291_v30, %v17507_v58  ;;  %v27046_v36 = vld [vmem:[#allocation128_spill] sm:$0xff]  ;;  %v16640_v30 = vunpack.i.l.bf16 %v23890_v14 }
 0x8dd   : > { %v12348_v39 = vcombine.high %v27039_v40, %v27038_v48  ;;  %v27047_v32 = vcombine.low %v27045_v26, %v27046_v36  ;;  %v12394_v48 = vrot.slane %v12380_v43, %v17494_v44  ;;  %v13010_v43 = vcombine.low %v23938_v61, %v23950_v7 }
 0x8de   : > { %v24036_v2 = vpop.permute.xlu0 %12630  ;;  %v24038_v13 = vpop.permute.xlu1 %12634  ;;  %27042 = vst [vmem:[#allocation13_spill] sm:$0xff] %v24060_v59 }
 0x8df   : > { %v12595_v8 = vsel %vm2009_vm5, %v27047_v32, %v16630_v28  ;;  %v24073_v35 = vrot.slane %v12348_v39, %v17494_v44  ;;  %v27050_v28 = vld [vmem:[#allocation82_spill] sm:$0xff]  ;;  %v12459_v36 = vcombine.low %v12394_v48, %v12410_v15 }
 0x8e0   : > { %14619 = vrot.lane.b32.xlu0 %v23854_v24, %s17210_s14  ;;  %14623 = vrot.lane.b32.xlu1 %v23856_v12, %s17210_s14  ;;  %v24063_v24 = vrot.slane %v12292_v20, %v17507_v58  ;;  %v24066_v12 = vrot.slane %v12323_v63, %v17507_v58  ;;  %v24083_v20 = vrot.slane %v12324_v55, %v17507_v58  ;;  %v27049_v63 = vld [vmem:[#allocation69_spill] sm:$0xff]  ;;  %v16641_v55 = vunpack.i.h.bf16 %v23890_v14 }
 0x8e1   : > { %v27051_v26 = vcombine.low %v27049_v63, %v27050_v28  ;;  %v13011_v63 = vcombine.high %v23938_v61, %v23950_v7  ;;  %v13026_v28 = vcombine.low %v23952_v57, %v23964_v25  ;;  %v12995_v61 = vcombine.high %v23928_v56, %v23940_v1 }
 0x8e2   : > { %v24055_v40 = vpop.permute.xlu0 %12638  ;;  %v24057_v46 = vpop.permute.xlu1 %12642  ;;  %27043 = vst [vmem:[#allocation132_spill] sm:$0xff] %v24063_v24  ;;  %27044 = vst [vmem:[#allocation134_spill] sm:$0xff] %v24066_v12  ;;  %v13018_v7 = vrot.slane %v13010_v43, %v17494_v44 }
 0x8e3   : > { %27048 = vst [vmem:[#allocation61_spill] sm:$0xff] %v24083_v20  ;;  %v12596_v39 = vsel %vm2009_vm5, %v27051_v26, %v16631_v17  ;;  %v12994_v17 = vcombine.low %v23928_v56, %v23940_v1  ;;  %v13043_v26 = vcombine.high %v23962_v16, %v23973_v50  ;;  %v13027_v50 = vcombine.high %v23952_v57, %v23964_v25 }
 0x8e4   : > { %14627 = vrot.lane.b32.xlu0 %v23862_v51, %s17210_s14  ;;  %14631 = vrot.lane.b32.xlu1 %v23864_v47, %s17210_s14  ;;  %v12597_v47 = vsel %vm2012_vm6, %v12595_v8, %v16635_v4  ;;  %v12460_v51 = vcombine.high %v12394_v48, %v12410_v15  ;;  %v12598_v4 = vsel %vm2012_vm6, %v12596_v39, %v16636_v27  ;;  %v16645_v8 = vunpack.i.l.bf16 %v23892_v53 }
 0x8e5   : > { %v12599_v14 = vsel %vm2015_vm7, %v12597_v47, %v16640_v30  ;;  %v13050_v16 = vrot.slane %v13042_v41, %v17494_v44  ;;  %v12600_v15 = vsel %vm2015_vm7, %v12598_v4, %v16641_v55  ;;  %v16646_v48 = vunpack.i.h.bf16 %v23892_v53 }
 0x8e6   : > { %v24097_v32 = vpop.permute.xlu0 %12646  ;;  %v24099_v24 = vpop.permute.xlu1 %12650  ;;  %v16651_v27 = vunpack.i.h.bf16 %v23902_v19  ;;  %v13002_v56 = vrot.slane %v12994_v17, %v17494_v44  ;;  %v13025_v1 = vrot.slane %v13011_v63, %v17494_v44  ;;  %v13034_v57 = vrot.slane %v13026_v28, %v17494_v44 }
 0x8e7   : > { %v13057_v25 = vrot.slane %v13043_v26, %v17494_v44  ;;  %v24137_v53 = vrot.slane %v12459_v36, %v17507_v58  ;;  %v13009_v43 = vrot.slane %v12995_v61, %v17494_v44  ;;  %v13041_v47 = vrot.slane %v13027_v50, %v17494_v44 }
 0x8e8   : > { %14635 = vrot.lane.b32.xlu0 %v23870_v18, %s17210_s14  ;;  %14573 = vrot.lane.b32.xlu1 %v23872_v60, %s17210_s14  ;;  %v16650_v18 = vunpack.i.l.bf16 %v23902_v19  ;;  %v12601_v19 = vsel %vm2018_vm8, %v12599_v14, %v16645_v8  ;;  %v13058_v41 = vcombine.low %v13002_v56, %v13018_v7  ;;  %v13090_v55 = vcombine.low %v13034_v57, %v13050_v16 }
 0x8e9   : > { %v24147_v17 = vrot.slane %v12460_v51, %v17507_v58  ;;  %v12602_v36 = vsel %vm2018_vm8, %v12600_v15, %v16646_v48  ;;  %v13091_v28 = vcombine.high %v13034_v57, %v13050_v16  ;;  %v13059_v4 = vcombine.high %v13002_v56, %v13018_v7 }
 0x8ea   : > { %v24126_v30 = vpop.permute.xlu0 %12654  ;;  %v24128_v60 = vpop.permute.xlu1 %12658  ;;  %v24151_v63 = vsel %vm2021_vm9, %v12601_v19, %v16650_v18  ;;  %v13074_v14 = vcombine.low %v13009_v43, %v13025_v1  ;;  %v13106_v8 = vcombine.low %v13041_v47, %v13057_v25  ;;  %v13075_v61 = vcombine.high %v13009_v43, %v13025_v1 }
 0x8eb   : > { %v13107_v50 = vcombine.high %v13041_v47, %v13057_v25  ;;  %v13178_v51 = vcombine.low %v24004_v6, %v24020_v10  ;;  %v24167_v16 = vrot.slane %v13058_v41, %v17507_v58  ;;  %v24170_v15 = vrot.slane %v13090_v55, %v17507_v58 }
 0x8ec   : > { %14577 = vrot.lane.b32.xlu0 %v23882_v23, %s17210_s14  ;;  %14581 = vrot.lane.b32.xlu1 %v23884_v9, %s17210_s14  ;;  %v24158_v9 = vsel %vm2021_vm9, %v12602_v36, %v16651_v27  ;;  %v13130_v7 = vcombine.low %v23975_v38, %v23987_v22  ;;  %v13131_v48 = vcombine.high %v23975_v38, %v23987_v22 }
 0x8ed   : > { %27052 = vst [vmem:[#allocation11_spill] sm:$0xff] %v24170_v15  ;;  %v24177_v27 = vrot.slane %v13091_v28, %v17507_v58  ;;  %v13162_v18 = vcombine.low %v23998_v21, %v24006_v0  ;;  %v24190_v57 = vrot.slane %v13059_v4, %v17507_v58  ;;  %v24193_v22 = vrot.slane %v13074_v14, %v17507_v58 }
 0x8ee   : > { %v24153_v26 = vpop.permute.xlu0 %12662  ;;  %v24155_v23 = vpop.permute.xlu1 %12666  ;;  %v24196_v38 = vrot.slane %v13106_v8, %v17507_v58  ;;  %v13179_v25 = vcombine.high %v24004_v6, %v24020_v10  ;;  %v13186_v19 = vrot.slane %v13178_v51, %v17494_v44  ;;  %v13138_v43 = vrot.slane %v13130_v7, %v17494_v44 }
 0x8ef   : > { %v24213_v41 = vrot.slane %v13131_v48, %v17494_v44  ;;  %v13163_v10 = vcombine.high %v23998_v21, %v24006_v0  ;;  %v12770_v21 = vcombine.low %v24097_v32, %v24126_v30  ;;  %v12738_v7 = vcombine.low %v24036_v2, %v24055_v40 }
 0x8f0   : > { %14585 = vrot.lane.b32.xlu0 %v23894_v31, %s17210_s14  ;;  %14589 = vrot.lane.b32.xlu1 %v23896_v52, %s17210_s14  ;;  %v13146_v31 = vcombine.low %v23985_v34, %v23996_v42  ;;  %v13147_v52 = vcombine.high %v23985_v34, %v23996_v42  ;;  %v24201_v34 = vrot.slane %v13075_v61, %v17507_v58 }
 0x8f1   : > { %v24204_v42 = vrot.slane %v13107_v50, %v17507_v58  ;;  %v24231_v4 = vrot.slane %v13179_v25, %v17494_v44  ;;  %v24246_v51 = vrot.slane %v13163_v10, %v17494_v44  ;;  %v12754_v48 = vcombine.low %v24057_v46, %v24099_v24 }
 0x8f2   : > { %v24185_v56 = vpop.permute.xlu0 %12670  ;;  %v24187_v1 = vpop.permute.xlu1 %12674  ;;  %v13154_v47 = vrot.slane %v13146_v31, %v17494_v44  ;;  %v24221_v55 = vrot.slane %v13147_v52, %v17494_v44  ;;  %v12778_v39 = vrot.slane %v12770_v21, %v17494_v44 }
 0x8f3   : > { %v12874_v50 = vcombine.low %v24153_v26, %v24185_v56  ;;  %v13242_v10 = vcombine.low %v24246_v51, %v24231_v4  ;;  %v12762_v21 = vrot.slane %v12754_v48, %v17494_v44 }
 0x8f4   : > { %14593 = vrot.lane.b32.xlu0 %v23906_v37, %s17210_s14  ;;  %14597 = vrot.lane.b32.xlu1 %v23908_v11, %s17210_s14  ;;  %v13170_v37 = vrot.slane %v13162_v18, %v17494_v44  ;;  %v13194_v52 = vcombine.low %v13138_v43, %v13154_v47  ;;  %v13195_v18 = vcombine.high %v13138_v43, %v13154_v47 }
 0x8f5   : > { %v12882_v0 = vrot.slane %v12874_v50, %v17494_v44  ;;  %v24295_v48 = vrot.slane %v13242_v10, %v17507_v58  ;;  %v12819_v12 = vcombine.high %v12762_v21, %v12778_v39 }
 0x8f6   : > { %v24224_v36 = vpop.permute.xlu0 %12678  ;;  %v24226_v11 = vpop.permute.xlu1 %12682  ;;  %v13226_v8 = vcombine.low %v13170_v37, %v13186_v19  ;;  %v13227_v61 = vcombine.high %v13170_v37, %v13186_v19  ;;  %v12722_v37 = vcombine.low %v24022_v29, %v24038_v13  ;;  %v24282_v6 = vrot.slane %v13194_v52, %v17507_v58 }
 0x8f7   : > { %v12890_v31 = vcombine.low %v24187_v1, %v24226_v11 }
 0x8f8   : > { %14601 = vrot.lane.b32.xlu0 %v23918_v5, %s17210_s14  ;;  %14605 = vrot.lane.b32.xlu1 %v23920_v54, %s17210_s14  ;;  %v12858_v54 = vcombine.low %v24128_v60, %v24155_v23  ;;  %v24267_v43 = vrot.slane %v13226_v8, %v17507_v58  ;;  %v24270_v47 = vrot.slane %v13227_v61, %v17507_v58 }
 0x8f9   : > { %v12746_v5 = vrot.slane %v12738_v7, %v17494_v44  ;;  %v12898_v28 = vrot.slane %v12890_v31, %v17494_v44  ;;  %v24285_v61 = vrot.slane %v13195_v18, %v17507_v58  ;;  %v12818_v31 = vcombine.low %v12762_v21, %v12778_v39 }
 0x8fa   : > { %v12687_v25 = vpop.permute.xlu0 %12686  ;;  %v24258_v19 = vpop.permute.xlu1 %13641  ;;  %v12866_v50 = vrot.slane %v12858_v54, %v17494_v44  ;;  %v12739_v18 = vcombine.high %v24036_v2, %v24055_v40  ;;  %v12755_v39 = vcombine.high %v24057_v46, %v24099_v24 }
 0x8fb   : > { %v12906_v14 = vcombine.low %v24224_v36, %v12687_v25  ;;  %v12907_v54 = vcombine.high %v24224_v36, %v12687_v25  ;;  %v13260_v10 = vcombine.low %v24285_v61, %v24270_v47  ;;  %v12771_v25 = vcombine.high %v24097_v32, %v24126_v30  ;;  %v27057_v36 = vld [vmem:[#allocation185_spill] sm:$0xff] }
 0x8fc   : > { %14609 = vrot.lane.b32.xlu0 %v23930_v3, %s17210_s14  ;;  %14613 = vrot.lane.b32.xlu1 %v23932_v33, %s17210_s14  ;;  %v12723_v3 = vcombine.high %v24022_v29, %v24038_v13  ;;  %v12922_v20 = vcombine.low %v12866_v50, %v12882_v0  ;;  %v13259_v29 = vcombine.high %v24282_v6, %v24267_v43 }
 0x8fd   : > { %v12914_v8 = vrot.slane %v12906_v14, %v17494_v44  ;;  %v12730_v14 = vrot.slane %v12722_v37, %v17494_v44  ;;  %v13261_v37 = vcombine.high %v24285_v61, %v24270_v47  ;;  %v24325_v47 = vrot.slane %v12818_v31, %v17507_v58 }
 0x8fe   : > { %v24290_v33 = vpop.permute.xlu0 %13645  ;;  %v24292_v7 = vpop.permute.xlu1 %13649  ;;  %v24330_v61 = vrot.slane %v12922_v20, %v17507_v58  ;;  %v12859_v20 = vcombine.high %v24128_v60, %v24155_v23  ;;  %v24359_v46 = vrot.slane %v12739_v18, %v17494_v44  ;;  %v24362_v24 = vrot.slane %v12771_v25, %v17494_v44 }
 0x8ff   : > { %v12954_v52 = vcombine.low %v12898_v28, %v12914_v8  ;;  %v12786_v13 = vcombine.low %v12730_v14, %v12746_v5  ;;  %v12955_v2 = vcombine.high %v12898_v28, %v12914_v8  ;;  %27054 = vst [vmem:[#allocation34_spill] sm:$0xff] %v24325_v47  ;;  %v12875_v28 = vcombine.high %v24153_v26, %v24185_v56 }
 0x900   : > { %14617 = vrot.lane.b32.xlu0 %v23942_v62, %s17210_s14  ;;  %14621 = vrot.lane.b32.xlu1 %v23944_v49, %s17210_s14  ;;  %v12923_v8 = vcombine.high %v12866_v50, %v12882_v0  ;;  %27055 = vst [vmem:[#allocation31_spill] sm:$0xff] %v24330_v61  ;;  %v27056_v49 = vld [vmem:[#allocation140_spill] sm:$0xff]  ;;  %v12787_v32 = vcombine.high %v12730_v14, %v12746_v5 }
 0x901   : > { %v24312_v40 = vrot.slane %v12954_v52, %v17507_v58  ;;  %v12891_v52 = vcombine.high %v24187_v1, %v24226_v11  ;;  %v24339_v30 = vrot.slane %v12786_v13, %v17507_v58  ;;  %v24346_v26 = vrot.slane %v12907_v54, %v17494_v44 }
 0x902   : > { %v24314_v62 = vpop.permute.xlu0 %13653  ;;  %v24316_v59 = vpop.permute.xlu1 %13657  ;;  %v12969_v56 = vrot.slane %v12955_v2, %v17507_v58  ;;  %v27059_v0 = vcombine.high %v24167_v16, %v24170_v15  ;;  %v12833_v60 = vrot.slane %v12819_v12, %v17507_v58  ;;  %v24368_v50 = vrot.slane %v12875_v28, %v17494_v44 }
 0x903   : > { %27053 = vst [vmem:[#allocation153_spill] sm:$0xff] %v24312_v40  ;;  %27058 = vst [vmem:[#allocation32_spill] sm:$0xff] %v24339_v30  ;;  %v12987_v21 = vcombine.high %v24330_v61, %v24312_v40  ;;  %v12851_v23 = vcombine.high %v24339_v30, %v24325_v47  ;;  %v12937_v14 = vrot.slane %v12923_v8, %v17507_v58 }
 0x904   : > { %14625 = vrot.lane.b32.xlu0 %v27056_v49, %s17210_s14  ;;  %14629 = vrot.lane.b32.xlu1 %v27057_v36, %s17210_s14  ;;  %v16667_v5 = vpack.i.bf16 %v13259_v29, %v27059_v0  ;;  %v24372_v31 = vrot.slane %v12891_v52, %v17494_v44  ;;  %v27060_v29 = vld [vmem:[#allocation133_spill] sm:$0xff]  ;;  %v12801_v18 = vrot.slane %v12787_v32, %v17507_v58 }
 0x905   : > { %v24379_v12 = vrot.slane %v12755_v39, %v17494_v44  ;;  %v24382_v13 = vrot.slane %v12859_v20, %v17494_v44  ;;  %v27061_v54 = vcombine.low %v24190_v57, %v24177_v27  ;;  %v16672_v28 = vpack.i.bf16 %v12987_v21, %v12851_v23 }
 0x906   : > { %v24349_v1 = vpop.permute.xlu0 %13661  ;;  %v24351_v11 = vpop.permute.xlu1 %13665  ;;  %v12970_v49 = vcombine.low %v24372_v31, %v24346_v26  ;;  %v12988_v8 = vcombine.low %v12937_v14, %v12969_v56  ;;  %v27062_v32 = vcombine.low %v24213_v41, %v24221_v55  ;;  %v24400_v20 = vrot.slane %v12723_v3, %v17494_v44 }
 0x907   : > { %v16677_v2 = vpack.i.bf16 %v13260_v10, %v27061_v54  ;;  %v12834_v10 = vcombine.low %v24379_v12, %v24362_v24  ;;  %v12852_v21 = vcombine.low %v12801_v18, %v12833_v60  ;;  %v13127_v23 = vcombine.high %v24193_v22, %v24196_v38 }
 0x908   : > { %14633 = vrot.lane.b32.xlu0 %v27060_v29, %s17210_s14  ;;  %16668 = vrot.lane.b32.xlu1 %v16667_v5, %s17206_s12  ;;  %v13218_v39 = vrot.slane %v27062_v32, %v17507_v58  ;;  %v12938_v5 = vcombine.low %v24382_v13, %v24368_v50  ;;  %v13243_v3 = vcombine.high %v24246_v51, %v24231_v4 }
 0x909   : > { %v12802_v29 = vcombine.low %v24400_v20, %v24359_v46  ;;  %v27063_v54 = vcombine.high %v24190_v57, %v24177_v27  ;;  %v16682_v4 = vpack.i.bf16 %v12988_v8, %v12852_v21  ;;  %v12989_v51 = vcombine.high %v12937_v14, %v12969_v56 }
 0x90a   : > { %v24389_v36 = vpop.permute.xlu0 %13669  ;;  %v24391_v25 = vpop.permute.xlu1 %13673  ;;  %v13262_v0 = vcombine.low %v13218_v39, %v24295_v48  ;;  %v13211_v61 = vcombine.high %v24213_v41, %v24221_v55  ;;  %v12842_v27 = vrot.slane %v12834_v10, %v17507_v58  ;;  %v12853_v57 = vcombine.high %v12801_v18, %v12833_v60 }
 0x90b   : > { %v16687_v32 = vpack.i.bf16 %v13261_v37, %v27063_v54  ;;  %v13263_v37 = vcombine.high %v13218_v39, %v24295_v48  ;;  %v27064_v54 = vld [vmem:[#allocation109_spill] sm:$0xff]  ;;  %v12946_v47 = vrot.slane %v12938_v5, %v17507_v58  ;;  %v14023_v30 = vcombine.low %v24290_v33, %v24314_v62 }
 0x90c   : > { %16678 = vrot.lane.b32.xlu1 %v16677_v2, %s17205_s11  ;;  %16673 = vrot.lane.b32.xlu0 %v16672_v28, %s17206_s12  ;;  %v24421_v2 = vrot.slane %v12970_v49, %v17507_v58  ;;  %v14055_v28 = vcombine.low %v24349_v1, %v24389_v36  ;;  %v16655_v49 = vunpack.i.l.bf16 %v27064_v54  ;;  %v14039_v15 = vcombine.low %v24316_v59, %v24351_v11 }
 0x90d   : > { %v24442_v41 = vrot.slane %v13243_v3, %v17507_v58  ;;  %v12810_v55 = vrot.slane %v12802_v29, %v17507_v58  ;;  %v12971_v48 = vcombine.high %v24372_v31, %v24346_v26  ;;  %v27065_v56 = vcombine.low %v24193_v22, %v24196_v38 }
 0x90e   : > { %v24425_v52 = vpop.permute.xlu0 %13677  ;;  %v24427_v40 = vpop.permute.xlu1 %13681  ;;  %v14007_v14 = vcombine.low %v24258_v19, %v24292_v7  ;;  %v24453_v18 = vrot.slane %v14055_v28, %v17494_v44  ;;  %v16692_v10 = vpack.i.bf16 %v12989_v51, %v12853_v57  ;;  %v12990_v5 = vcombine.low %v12946_v47, %v24421_v2 }
 0x90f   : > { %v16697_v60 = vpack.i.bf16 %v13262_v0, %v27065_v56  ;;  %v13225_v21 = vrot.slane %v13211_v61, %v17507_v58  ;;  %v12835_v26 = vcombine.high %v24379_v12, %v24362_v24  ;;  %v16707_v22 = vpack.i.bf16 %v13263_v37, %v13127_v23 }
 0x910   : > { %16688 = vrot.lane.b32.xlu1 %v16687_v32, %s17204_s10  ;;  %16683 = vrot.lane.b32.xlu0 %v16682_v4, %s17205_s11  ;;  %v12854_v38 = vcombine.low %v12810_v55, %v12842_v27  ;;  %v12939_v31 = vcombine.high %v24382_v13, %v24368_v50  ;;  %v24466_v0 = vrot.slane %v14023_v30, %v17494_v44  ;;  %v16656_v51 = vunpack.i.h.bf16 %v27064_v54 }
 0x911   : > { %v24469_v3 = vrot.slane %v14039_v15, %v17494_v44  ;;  %v12803_v61 = vcombine.high %v24400_v20, %v24359_v46  ;;  %v24476_v24 = vrot.slane %v12971_v48, %v17507_v58  ;;  %v13264_v50 = vcombine.low %v13225_v21, %v24442_v41 }
 0x912   : > { %v24455_v8 = vpop.permute.xlu0 %13685  ;;  %v24457_v39 = vpop.permute.xlu1 %13689  ;;  %v24482_v30 = vrot.slane %v14007_v14, %v17494_v44  ;;  %v16702_v29 = vpack.i.bf16 %v12990_v5, %v12854_v38  ;;  %v12991_v46 = vcombine.high %v12946_v47, %v24421_v2  ;;  %v12605_v20 = vsel %vm2024_vm10, %v24151_v63, %v16655_v49 }
 0x913   : > { %v14159_v12 = vcombine.low %v24425_v52, %v24455_v8  ;;  %v14104_v15 = vcombine.high %v24469_v3, %v24453_v18  ;;  %v12849_v32 = vrot.slane %v12835_v26, %v17507_v58  ;;  %v14143_v28 = vcombine.low %v24391_v25, %v24427_v40 }
 0x914   : > { %16698 = vrot.lane.b32.xlu1 %v16697_v60, %s17203_s9  ;;  %16693 = vrot.lane.b32.xlu0 %v16692_v10, %s17204_s10  ;;  %v13128_v4 = vcombine.low %v24201_v34, %v24204_v42  ;;  %v12953_v57 = vrot.slane %v12939_v31, %v17507_v58  ;;  %v14072_v37 = vcombine.high %v24482_v30, %v24466_v0 }
 0x915   : > { %v12855_v63 = vcombine.high %v12810_v55, %v12842_v27  ;;  %v12817_v47 = vrot.slane %v12803_v61, %v17507_v58  ;;  %v24506_v2 = vrot.slane %v14159_v12, %v17494_v44  ;;  %v24511_v54 = vrot.slane %v14104_v15, %v17507_v58  ;;  %v27066_v55 = vld [vmem:[#allocation126_spill] sm:$0xff] }
 0x916   : > { %v24486_v13 = vpop.permute.xlu0 %13693  ;;  %v24488_v23 = vpop.permute.xlu1 %13697  ;;  %v16717_v48 = vpack.i.bf16 %v13264_v50, %v13128_v4  ;;  %v13265_v10 = vcombine.high %v13225_v21, %v24442_v41  ;;  %v12992_v27 = vcombine.low %v12953_v57, %v24476_v24  ;;  %v16661_v5 = vunpack.i.h.bf16 %v27066_v55 }
 0x917   : > { %v14175_v49 = vcombine.low %v24457_v39, %v24488_v23  ;;  %v16712_v14 = vpack.i.bf16 %v12991_v46, %v12855_v63  ;;  %v16660_v26 = vunpack.i.l.bf16 %v27066_v55  ;;  %v24527_v31 = vrot.slane %v14072_v37, %v17507_v58 }
 0x918   : > { %16708 = vrot.lane.b32.xlu1 %v16707_v22, %s17202_s8  ;;  %16703 = vrot.lane.b32.xlu0 %v16702_v29, %s17203_s9  ;;  %v24522_v22 = vrot.slane %v14143_v28, %v17494_v44  ;;  %v13129_v41 = vcombine.high %v24201_v34, %v24204_v42  ;;  %v12856_v21 = vcombine.low %v12817_v47, %v12849_v32 }
 0x919   : > { %v12606_v61 = vsel %vm2024_vm10, %v24158_v9, %v16656_v51  ;;  %v24538_v50 = vrot.slane %v14175_v49, %v17494_v44  ;;  %v12993_v34 = vcombine.high %v12953_v57, %v24476_v24  ;;  %v14137_v9 = vcombine.low %v24527_v31, %v24511_v54 }
 0x91a   : > { %v24513_v56 = vpop.permute.xlu0 %13701  ;;  %v24515_v60 = vpop.permute.xlu1 %13639  ;;  %v14207_v12 = vcombine.low %v24522_v22, %v24506_v2  ;;  %v16727_v28 = vpack.i.bf16 %v13265_v10, %v13129_v41  ;;  %v16722_v4 = vpack.i.bf16 %v12992_v27, %v12856_v21  ;;  %v27067_v42 = vcombine.low %v24073_v35, %v24051_v45  ;;  %v27070_v10 = vld [vmem:[#allocation86_spill] sm:$0xff] }
 0x91b   : > { %v14191_v38 = vcombine.low %v24486_v13, %v24513_v56  ;;  %v24555_v37 = vsel %vm2027_vm11, %v12605_v20, %v16660_v26  ;;  %v24558_v63 = vsel %vm2027_vm11, %v12606_v61, %v16661_v5  ;;  %v27068_v24 = vcombine.high %v24073_v35, %v24051_v45  ;;  %v27071_v41 = vld [vmem:[#allocation122_spill] sm:$0xff] }
 0x91c   : > { %16718 = vrot.lane.b32.xlu1 %v16717_v48, %s17200_s30  ;;  %16713 = vrot.lane.b32.xlu0 %v16712_v14, %s17202_s8  ;;  %v12435_v51 = vrot.slane %v27067_v42, %v17507_v58  ;;  %v12857_v48 = vcombine.high %v12817_v47, %v12849_v32  ;;  %v27069_v14 = vld [vmem:[#allocation114_spill] sm:$0xff]  ;;  %v24571_v27 = vrot.slane %v14207_v12, %v17507_v58  ;;  %v27075_v42 = vld [vmem:[#allocation13_spill] sm:$0xff] }
 0x91d   : > { %v24541_v15 = vrot.slane %v14191_v38, %v17494_v44  ;;  %v12442_v57 = vrot.slane %v27068_v24, %v17507_v58  ;;  %v12342_v20 = vcombine.high %v27070_v10, %v27069_v14  ;;  %v27072_v32 = vld [vmem:[#allocation98_spill] sm:$0xff]  ;;  %v27076_v24 = vld [vmem:[#allocation61_spill] sm:$0xff] }
 0x91e   : > { %v24543_v29 = vpop.permute.xlu0 %13643  ;;  %v24545_v46 = vpop.permute.xlu1 %13647  ;;  %v12479_v5 = vcombine.low %v12435_v51, %v24137_v53  ;;  %v12480_v26 = vcombine.high %v12435_v51, %v24137_v53  ;;  %v16732_v38 = vpack.i.bf16 %v12993_v34, %v12857_v48  ;;  %v27073_v47 = vcombine.low %v27071_v41, %v27072_v32 }
 0x91f   : > { %v14239_v49 = vcombine.low %v24538_v50, %v24541_v15  ;;  %v12481_v61 = vcombine.low %v12442_v57, %v24147_v17  ;;  %v12482_v34 = vcombine.high %v12442_v57, %v24147_v17  ;;  %v14071_v48 = vcombine.low %v24482_v30, %v24466_v0 }
 0x920   : > { %16728 = vrot.lane.b32.xlu1 %v16727_v28, %s17201_s7  ;;  %16723 = vrot.lane.b32.xlu0 %v16722_v4, %s17200_s30  ;;  %v16737_v21 = vpack.i.bf16 %v14137_v9, %v27073_v47  ;;  %v14103_v28 = vcombine.low %v24469_v3, %v24453_v18  ;;  %v27074_v4 = vld [vmem:[#allocation134_spill] sm:$0xff]  ;;  %v27077_v18 = vld [vmem:[#allocation132_spill] sm:$0xff]  ;;  %v27078_v57 = vcombine.high %v27071_v41, %v27072_v32 }
 0x921   : > { %v24574_v55 = vrot.slane %v14239_v49, %v17507_v58  ;;  %v12343_v51 = vcombine.low %v27075_v42, %v27074_v4  ;;  %v14024_v49 = vcombine.high %v24290_v33, %v24314_v62  ;;  %v12344_v9 = vcombine.high %v27075_v42, %v27074_v4 }
 0x922   : > { %v24578_v45 = vpop.permute.xlu0 %13651  ;;  %v24580_v35 = vpop.permute.xlu1 %13655  ;;  %v12345_v3 = vcombine.low %v27077_v18, %v27076_v24  ;;  %v12346_v17 = vcombine.high %v27077_v18, %v27076_v24  ;;  %v16742_v10 = vpack.i.bf16 %v27078_v57, %v12342_v20  ;;  %v14008_v0 = vcombine.high %v24258_v19, %v24292_v7 }
 0x923   : > { %v13751_v14 = vcombine.low %v24543_v29, %v24578_v45  ;;  %v16752_v47 = vpack.i.bf16 %v12480_v26, %v12344_v9  ;;  %v24619_v30 = vrot.slane %v14103_v28, %v17507_v58  ;;  %v13735_v4 = vcombine.low %v24515_v60, %v24545_v46 }
 0x924   : > { %16733 = vrot.lane.b32.xlu0 %v16732_v38, %s17201_s7  ;;  %16738 = vrot.lane.b32.xlu1 %v16737_v21, %s17205_s11  ;;  %v16747_v38 = vpack.i.bf16 %v12479_v5, %v12343_v51  ;;  %v16757_v21 = vpack.i.bf16 %v12481_v61, %v12345_v3  ;;  %v16762_v42 = vpack.i.bf16 %v12482_v34, %v12346_v17 }
 0x925   : > { %v24624_v24 = vrot.slane %v14024_v49, %v17494_v44  ;;  %v14040_v41 = vcombine.high %v24316_v59, %v24351_v11  ;;  %v14192_v20 = vcombine.high %v24486_v13, %v24513_v56  ;;  %v24633_v19 = vrot.slane %v14071_v48, %v17507_v58 }
 0x926   : > { %v24609_v33 = vpop.permute.xlu0 %13659  ;;  %v24611_v62 = vpop.permute.xlu1 %13663  ;;  %v14056_v7 = vcombine.high %v24349_v1, %v24389_v36  ;;  %v13759_v5 = vrot.slane %v13751_v14, %v17494_v44  ;;  %v14144_v59 = vcombine.high %v24391_v25, %v24427_v40  ;;  %v14160_v11 = vcombine.high %v24425_v52, %v24455_v8 }
 0x927   : > { %v13767_v26 = vcombine.low %v24580_v35, %v24611_v62  ;;  %v14176_v13 = vcombine.high %v24457_v39, %v24488_v23  ;;  %v14272_v1 = vcombine.high %v24571_v27, %v24574_v55  ;;  %v14240_v36 = vcombine.high %v24538_v50, %v24541_v15 }
 0x928   : > { %16743 = vrot.lane.b32.xlu0 %v16742_v10, %s17204_s10  ;;  %16748 = vrot.lane.b32.xlu1 %v16747_v38, %s17203_s9  ;;  %v13743_v61 = vrot.slane %v13735_v4, %v17494_v44  ;;  %v14208_v52 = vcombine.high %v24522_v22, %v24506_v2  ;;  %v24662_v8 = vrot.slane %v14192_v20, %v17494_v44 }
 0x929   : > { %v14136_v39 = vcombine.high %v24633_v19, %v24619_v30  ;;  %v13775_v15 = vrot.slane %v13767_v26, %v17494_v44  ;;  %v24671_v51 = vrot.slane %v14040_v41, %v17494_v44  ;;  %v14070_v2 = vrot.slane %v14056_v7, %v17494_v44 }
 0x92a   : > { %v24646_v56 = vpop.permute.xlu0 %13667  ;;  %v24648_v32 = vpop.permute.xlu1 %13671  ;;  %v13799_v23 = vcombine.low %v13743_v61, %v13759_v5  ;;  %v13800_v50 = vcombine.high %v13743_v61, %v13759_v5  ;;  %v14190_v22 = vrot.slane %v14176_v13, %v17494_v44  ;;  %v14174_v18 = vrot.slane %v14160_v11, %v17494_v44 }
 0x92b   : > { %v13783_v40 = vcombine.low %v24609_v33, %v24646_v56  ;;  %v16767_v9 = vpack.i.bf16 %v14272_v1, %v14136_v39  ;;  %v14254_v3 = vrot.slane %v14240_v36, %v17507_v58  ;;  %v14158_v17 = vrot.slane %v14144_v59, %v17494_v44 }
 0x92c   : > { %16753 = vrot.lane.b32.xlu0 %v16752_v47, %s17202_s8  ;;  %16758 = vrot.lane.b32.xlu1 %v16757_v21, %s17200_s30  ;;  %v14222_v57 = vrot.slane %v14208_v52, %v17507_v58  ;;  %v14255_v10 = vcombine.low %v14190_v22, %v24662_v8  ;;  %v24687_v38 = vrot.slane %v13799_v23, %v17507_v58 }
 0x92d   : > { %v13791_v28 = vrot.slane %v13783_v40, %v17494_v44  ;;  %v24690_v47 = vrot.slane %v13800_v50, %v17507_v58  ;;  %v14022_v41 = vrot.slane %v14008_v0, %v17494_v44  ;;  %v14119_v20 = vcombine.low %v24671_v51, %v14070_v2 }
 0x92e   : > { %v24675_v34 = vpop.permute.xlu0 %13675  ;;  %v24677_v49 = vpop.permute.xlu1 %13679  ;;  %v14223_v5 = vcombine.low %v14158_v17, %v14174_v18  ;;  %v14273_v11 = vcombine.low %v14222_v57, %v14254_v3  ;;  %v14263_v1 = vrot.slane %v14255_v10, %v17507_v58  ;;  %v14274_v61 = vcombine.high %v14222_v57, %v14254_v3 }
 0x92f   : > { %v13831_v48 = vcombine.low %v13775_v15, %v13791_v28  ;;  %v13832_v14 = vcombine.high %v13775_v15, %v13791_v28  ;;  %v14087_v13 = vcombine.low %v14022_v41, %v24624_v24  ;;  %v14127_v39 = vrot.slane %v14119_v20, %v17507_v58 }
 0x930   : > { %16763 = vrot.lane.b32.xlu0 %v16762_v42, %s17201_s7  ;;  %16768 = vrot.lane.b32.xlu1 %v16767_v9, %s17206_s12  ;;  %v14231_v23 = vrot.slane %v14223_v5, %v17507_v58  ;;  %v13871_v50 = vcombine.low %v24648_v32, %v24677_v49  ;;  %v14138_v15 = vcombine.high %v24527_v31, %v24511_v54 }
 0x931   : > { %v24693_v21 = vrot.slane %v13831_v48, %v17507_v58  ;;  %v24696_v4 = vrot.slane %v13832_v14, %v17507_v58  ;;  %v14095_v28 = vrot.slane %v14087_v13, %v17507_v58  ;;  %v14256_v9 = vcombine.high %v14190_v22, %v24662_v8 }
 0x932   : > { %v24700_v7 = vpop.permute.xlu0 %13683  ;;  %v24702_v42 = vpop.permute.xlu1 %13687  ;;  %v16787_v14 = vpack.i.bf16 %v14274_v61, %v14138_v15  ;;  %v14275_v57 = vcombine.low %v14231_v23, %v14263_v1  ;;  %v14120_v10 = vcombine.high %v24671_v51, %v14070_v2  ;;  %v24734_v54 = vrot.slane %v13871_v50, %v17494_v44 }
 0x933   : > { %v13865_v59 = vcombine.low %v24690_v47, %v24696_v4  ;;  %v13887_v0 = vcombine.low %v24675_v34, %v24700_v7  ;;  %v14139_v8 = vcombine.low %v14095_v28, %v14127_v39  ;;  %v14088_v22 = vcombine.high %v14022_v41, %v24624_v24 }
 0x934   : > { %v14276_v13 = vcombine.high %v14231_v23, %v14263_v1  ;;  %v14134_v61 = vrot.slane %v14120_v10, %v17507_v58  ;;  %v14140_v41 = vcombine.high %v14095_v28, %v14127_v39  ;;  %v13864_v28 = vcombine.high %v24687_v38, %v24693_v21 }
 0x935   : > { %v16777_v36 = vpack.i.bf16 %v13865_v59, %v14273_v11  ;;  %v24726_v3 = vrot.slane %v13887_v0, %v17494_v44  ;;  %v14224_v59 = vcombine.high %v14158_v17, %v14174_v18  ;;  %v14270_v11 = vrot.slane %v14256_v9, %v17507_v58 }
 0x936   : > { %v24712_v40 = vpop.permute.xlu0 %13691  ;;  %v24714_v52 = vpop.permute.xlu1 %13695  ;;  %v16797_v17 = vpack.i.bf16 %v14275_v57, %v14139_v8  ;;  %v14102_v1 = vrot.slane %v14088_v22, %v17507_v58  ;;  %v16807_v9 = vpack.i.bf16 %v14276_v13, %v14140_v41 }
 0x937   : > { %16778 = vrot.lane.b32.xlu1 %v16777_v36, %s17205_s11  ;;  %v13903_v48 = vcombine.low %v24702_v42, %v24714_v52  ;;  %v13935_v51 = vcombine.low %v24734_v54, %v24726_v3  ;;  %v14238_v50 = vrot.slane %v14224_v59, %v17507_v58 }
 0x938   : > { %v14141_v39 = vcombine.low %v14102_v1, %v14134_v61  ;;  %v14142_v41 = vcombine.high %v14102_v1, %v14134_v61 }
 0x939   : > { %v13911_v2 = vrot.slane %v13903_v48, %v17494_v44  ;;  %v24753_v23 = vrot.slane %v13935_v51, %v17507_v58  ;;  %v14277_v48 = vcombine.low %v14238_v50, %v14270_v11  ;;  %v14278_v13 = vcombine.high %v14238_v50, %v14270_v11 }
 0x93a   : > { %v13700_v20 = vpop.permute.xlu0 %13699  ;;  %v24731_v5 = vpop.permute.xlu1 %14575  ;;  %v13752_v50 = vcombine.high %v24543_v29, %v24578_v45  ;;  %v13768_v29 = vcombine.high %v24580_v35, %v24611_v62  ;;  %v13872_v45 = vcombine.high %v24648_v32, %v24677_v49 }
 0x93b   : > { %v13919_v31 = vcombine.low %v24712_v40, %v13700_v20  ;;  %16788 = vrot.lane.b32.xlu1 %v16787_v14, %s17204_s10  ;;  %v16817_v8 = vpack.i.bf16 %v14277_v48, %v14141_v39  ;;  %v16827_v11 = vpack.i.bf16 %v14278_v13, %v14142_v41  ;;  %v13784_v39 = vcombine.high %v24609_v33, %v24646_v56 }
 0x93c   : > { %v13936_v33 = vcombine.high %v24734_v54, %v24726_v3 }
 0x93d   : > { %v13927_v18 = vrot.slane %v13919_v31, %v17494_v44  ;;  %v13798_v35 = vrot.slane %v13784_v39, %v17494_v44 }
 0x93e   : > { %v24744_v0 = vpop.permute.xlu0 %14579  ;;  %v24746_v36 = vpop.permute.xlu1 %14583 }
 0x93f   : > { %v13967_v24 = vcombine.low %v13911_v2, %v13927_v18  ;;  %16798 = vrot.lane.b32.xlu1 %v16797_v17, %s17203_s9  ;;  %v13968_v1 = vcombine.high %v13911_v2, %v13927_v18  ;;  %v13736_v2 = vcombine.high %v24515_v60, %v24545_v46  ;;  %v24811_v18 = vrot.slane %v13752_v50, %v17494_v44 }
 0x940   : > { %v13886_v60 = vrot.slane %v13872_v45, %v17494_v44  ;;  %v13950_v46 = vrot.slane %v13936_v33, %v17507_v58 }
 0x941   : > { %v24756_v15 = vrot.slane %v13967_v24, %v17507_v58  ;;  %v14941_v24 = vcombine.low %v24731_v5, %v24746_v36  ;;  %v13982_v54 = vrot.slane %v13968_v1, %v17507_v58 }
 0x942   : > { %v24758_v14 = vpop.permute.xlu0 %14587  ;;  %v24760_v57 = vpop.permute.xlu1 %14591 }
 0x943   : > { %27079 = vst [vmem:[#allocation19_spill] sm:$0xff] %v24756_v15  ;;  %16808 = vrot.lane.b32.xlu1 %v16807_v9, %s17202_s8  ;;  %v14000_v59 = vcombine.high %v24753_v23, %v24756_v15  ;;  %v14957_v31 = vcombine.low %v24744_v0, %v24758_v14  ;;  %v13920_v9 = vcombine.high %v24712_v40, %v13700_v20 }
 0x944   : > { %v13888_v20 = vcombine.high %v24675_v34, %v24700_v7 }
 0x945   : > { %v16772_v22 = vpack.i.bf16 %v14000_v59, %v13864_v28  ;;  %v14965_v10 = vrot.slane %v14957_v31, %v17494_v44  ;;  %v13904_v28 = vcombine.high %v24702_v42, %v24714_v52  ;;  %v14949_v59 = vrot.slane %v14941_v24, %v17494_v44 }
 0x946   : > { %v24771_v51 = vpop.permute.xlu0 %14595  ;;  %v24773_v17 = vpop.permute.xlu1 %14599  ;;  %v13934_v56 = vrot.slane %v13920_v9, %v17494_v44  ;;  %v13902_v3 = vrot.slane %v13888_v20, %v17494_v44 }
 0x947   : > { %16818 = vrot.lane.b32.xlu1 %v16817_v8, %s17200_s30  ;;  %16773 = vrot.lane.b32.xlu0 %v16772_v22, %s17206_s12  ;;  %v14973_v48 = vcombine.low %v24760_v57, %v24773_v17  ;;  %v15005_v34 = vcombine.low %v14949_v59, %v14965_v10  ;;  %v15006_v7 = vcombine.high %v14949_v59, %v14965_v10 }
 0x948   : > { %v13918_v62 = vrot.slane %v13904_v28, %v17494_v44  ;;  %v13782_v22 = vrot.slane %v13768_v29, %v17494_v44  ;;  %v13951_v20 = vcombine.low %v13886_v60, %v13902_v3  ;;  %v14001_v59 = vcombine.low %v13950_v46, %v13982_v54 }
 0x949   : > { %v14981_v42 = vrot.slane %v14973_v48, %v17494_v44  ;;  %v24825_v24 = vrot.slane %v15005_v34, %v17507_v58  ;;  %v24828_v41 = vrot.slane %v15006_v7, %v17507_v58  ;;  %v14002_v7 = vcombine.high %v13950_v46, %v13982_v54 }
 0x94a   : > { %v24789_v61 = vpop.permute.xlu0 %14603  ;;  %v24791_v40 = vpop.permute.xlu1 %14607  ;;  %v13983_v13 = vcombine.low %v13918_v62, %v13934_v56  ;;  %v13847_v50 = vcombine.low %v13782_v22, %v13798_v35 }
 0x94b   : > { %v14989_v31 = vcombine.low %v24771_v51, %v24789_v61  ;;  %16828 = vrot.lane.b32.xlu1 %v16827_v11, %s17201_s7  ;;  %27080 = vst [vmem:[#allocation20_spill] sm:$0xff] %v24825_v24  ;;  %v13750_v11 = vrot.slane %v13736_v2, %v17494_v44 }
 0x94c   : > { %v13991_v45 = vrot.slane %v13983_v13, %v17507_v58  ;;  %v13855_v2 = vrot.slane %v13847_v50, %v17507_v58  ;;  %v13866_v13 = vcombine.high %v24690_v47, %v24696_v4 }
 0x94d   : > { %v14997_v52 = vrot.slane %v14989_v31, %v17494_v44  ;;  %v13815_v29 = vcombine.low %v13750_v11, %v24811_v18 }
 0x94e   : > { %v24815_v32 = vpop.permute.xlu0 %14611  ;;  %v24817_v49 = vpop.permute.xlu1 %14615  ;;  %v16792_v50 = vpack.i.bf16 %v14002_v7, %v13866_v13 }
 0x94f   : > { %v15037_v10 = vcombine.low %v14981_v42, %v14997_v52  ;;  %v15038_v8 = vcombine.high %v14981_v42, %v14997_v52  ;;  %v13823_v1 = vrot.slane %v13815_v29, %v17507_v58 }
 0x951   : > { %v24831_v9 = vrot.slane %v15037_v10, %v17507_v58  ;;  %v24834_v48 = vrot.slane %v15038_v8, %v17507_v58  ;;  %v13959_v10 = vrot.slane %v13951_v20, %v17507_v58  ;;  %v15077_v8 = vcombine.low %v24791_v40, %v24817_v49 }
 0x952   : > { %v24837_v39 = vpop.permute.xlu0 %14619  ;;  %v24839_v28 = vpop.permute.xlu1 %14623  ;;  %v13848_v20 = vcombine.high %v13782_v22, %v13798_v35  ;;  %v13867_v4 = vcombine.low %v13823_v1, %v13855_v2 }
 0x953   : > { %27081 = vst [vmem:[#allocation33_spill] sm:$0xff] %v24831_v9  ;;  %v15071_v31 = vcombine.low %v24828_v41, %v24834_v48  ;;  %v15093_v33 = vcombine.low %v24815_v32, %v24837_v39  ;;  %v24871_v25 = vrot.slane %v15077_v8, %v17494_v44  ;;  %v14004_v29 = vcombine.high %v13959_v10, %v13991_v45 }
 0x954   : > { %v13862_v8 = vrot.slane %v13848_v20, %v17507_v58 }
 0x955   : > { %v16782_v34 = vpack.i.bf16 %v15071_v31, %v14001_v59  ;;  %v13984_v59 = vcombine.high %v13918_v62, %v13934_v56  ;;  %v24862_v54 = vrot.slane %v15093_v33, %v17494_v44  ;;  %v14003_v31 = vcombine.low %v13959_v10, %v13991_v45 }
 0x956   : > { %v24849_v42 = vpop.permute.xlu0 %14627  ;;  %v24851_v52 = vpop.permute.xlu1 %14631  ;;  %v13816_v56 = vcombine.high %v13750_v11, %v24811_v18  ;;  %v13868_v45 = vcombine.high %v13823_v1, %v13855_v2  ;;  %v15070_v2 = vcombine.high %v24825_v24, %v24831_v9 }
 0x957   : > { %16783 = vrot.lane.b32.xlu0 %v16782_v34, %s17205_s11  ;;  %v15109_v46 = vcombine.low %v24839_v28, %v24851_v52  ;;  %v13952_v34 = vcombine.high %v13886_v60, %v13902_v3  ;;  %v13998_v62 = vrot.slane %v13984_v59, %v17507_v58  ;;  %v15141_v35 = vcombine.low %v24871_v25, %v24862_v54 }
 0x958   : > { %v16802_v60 = vpack.i.bf16 %v14003_v31, %v13867_v4  ;;  %v13830_v10 = vrot.slane %v13816_v56, %v17507_v58 }
 0x959   : > { %v24881_v22 = vrot.slane %v15109_v46, %v17494_v44  ;;  %v13966_v18 = vrot.slane %v13952_v34, %v17507_v58  ;;  %v24897_v13 = vrot.slane %v15141_v35, %v17507_v58  ;;  %v16812_v46 = vpack.i.bf16 %v14004_v29, %v13868_v45 }
 0x95a   : > { %v24866_v26 = vpop.permute.xlu0 %14635  ;;  %v24868_v53 = vpop.permute.xlu1 %14573  ;;  %v13869_v1 = vcombine.low %v13830_v10, %v13862_v8  ;;  %v13870_v12 = vcombine.high %v13830_v10, %v13862_v8  ;;  %v15094_v8 = vcombine.high %v24815_v32, %v24837_v39  ;;  %v15078_v32 = vcombine.high %v24791_v40, %v24817_v49 }
 0x95b   : > { %v15125_v47 = vcombine.low %v24849_v42, %v24866_v26  ;;  %16793 = vrot.lane.b32.xlu0 %v16792_v50, %s17204_s10  ;;  %27082 = vst [vmem:[#allocation222_spill] sm:$0xff] %v24897_v13  ;;  %v14005_v50 = vcombine.low %v13966_v18, %v13998_v62  ;;  %v14006_v35 = vcombine.high %v13966_v18, %v13998_v62 }
 0x95c   : > { %v15126_v62 = vcombine.high %v24849_v42, %v24866_v26  ;;  %v14974_v18 = vcombine.high %v24760_v57, %v24773_v17  ;;  %v15142_v39 = vcombine.high %v24871_v25, %v24862_v54 }
 0x95d   : > { %v24884_v3 = vrot.slane %v15125_v47, %v17494_v44  ;;  %v16822_v56 = vpack.i.bf16 %v14005_v50, %v13869_v1  ;;  %v14990_v50 = vcombine.high %v24771_v51, %v24789_v61  ;;  %v15110_v51 = vcombine.high %v24839_v28, %v24851_v52 }
 0x95e   : > { %v24886_v33 = vpop.permute.xlu0 %14577  ;;  %v24888_v7 = vpop.permute.xlu1 %14581  ;;  %v15140_v28 = vrot.slane %v15126_v62, %v17494_v44 }
 0x95f   : > { %v15173_v11 = vcombine.low %v24881_v22, %v24884_v3  ;;  %16803 = vrot.lane.b32.xlu0 %v16802_v60, %s17203_s9  ;;  %v14942_v60 = vcombine.high %v24731_v5, %v24746_v36  ;;  %v14669_v34 = vcombine.low %v24868_v53, %v24888_v7  ;;  %v15004_v17 = vrot.slane %v14990_v50, %v17494_v44 }
 0x960   : > { %v15156_v50 = vrot.slane %v15142_v39, %v17507_v58  ;;  %v14670_v15 = vcombine.high %v24868_v53, %v24888_v7 }
 0x961   : > { %v24900_v59 = vrot.slane %v15173_v11, %v17507_v58  ;;  %v14677_v10 = vrot.slane %v14669_v34, %v17494_v44  ;;  %v27084_v34 = vld [vmem:[#allocation188_spill] sm:$0xff] }
 0x962   : > { %v24902_v31 = vpop.permute.xlu0 %14585  ;;  %v24904_v20 = vpop.permute.xlu1 %14589 }
 0x963   : > { %27083 = vst [vmem:[#allocation14_spill] sm:$0xff] %v24900_v59  ;;  %16813 = vrot.lane.b32.xlu0 %v16812_v46, %s17202_s8  ;;  %v15206_v47 = vcombine.high %v24897_v13, %v24900_v59  ;;  %v14685_v4 = vcombine.low %v24886_v33, %v24902_v31  ;;  %v14958_v46 = vcombine.high %v24744_v0, %v24758_v14 }
 0x964   : > { %v16832_v0 = vpack.i.bf16 %v14006_v35, %v13870_v12  ;;  %v14956_v14 = vrot.slane %v14942_v60, %v17494_v44  ;;  %v15174_v12 = vcombine.high %v24881_v22, %v24884_v3 }
 0x965   : > { %v16837_v29 = vpack.i.bf16 %v15206_v47, %v15070_v2  ;;  %v14693_v5 = vrot.slane %v14685_v4, %v17494_v44  ;;  %v14972_v42 = vrot.slane %v14958_v46, %v17494_v44  ;;  %v16665_v2 = vunpack.i.l.bf16 %v27084_v34 }
 0x966   : > { %v24917_v11 = vpop.permute.xlu0 %14593  ;;  %v24919_v45 = vpop.permute.xlu1 %14597  ;;  %v14988_v47 = vrot.slane %v14974_v18, %v17494_v44  ;;  %v15108_v4 = vrot.slane %v15094_v8, %v17494_v44  ;;  %v15188_v54 = vrot.slane %v15174_v12, %v17507_v58  ;;  %v15092_v46 = vrot.slane %v15078_v32, %v17494_v44 }
 0x967   : > { %16823 = vrot.lane.b32.xlu0 %v16822_v56, %s17200_s30  ;;  %16838 = vrot.lane.b32.xlu1 %v16837_v29, %s17206_s12  ;;  %v14701_v36 = vcombine.low %v24904_v20, %v24919_v45  ;;  %v14733_v52 = vcombine.low %v14677_v10, %v14693_v5  ;;  %v14734_v1 = vcombine.high %v14677_v10, %v14693_v5 }
 0x968   : > { %v15124_v56 = vrot.slane %v15110_v51, %v17494_v44  ;;  %v15021_v25 = vcombine.low %v14956_v14, %v14972_v42  ;;  %v15053_v60 = vcombine.low %v14988_v47, %v15004_v17  ;;  %v15157_v51 = vcombine.low %v15092_v46, %v15108_v4 }
 0x969   : > { %v14709_v22 = vrot.slane %v14701_v36, %v17494_v44  ;;  %v24972_v5 = vrot.slane %v14733_v52, %v17507_v58  ;;  %v24975_v36 = vrot.slane %v14734_v1, %v17507_v58  ;;  %v15207_v52 = vcombine.low %v15156_v50, %v15188_v54  ;;  %v27085_v1 = vld [vmem:[#allocation124_spill] sm:$0xff] }
 0x96a   : > { %v24941_v26 = vpop.permute.xlu0 %14601  ;;  %v24943_v61 = vpop.permute.xlu1 %14605  ;;  %v15189_v62 = vcombine.low %v15124_v56, %v15140_v28  ;;  %v15190_v8 = vcombine.high %v15124_v56, %v15140_v28  ;;  %v15029_v13 = vrot.slane %v15021_v25, %v17507_v58  ;;  %v15208_v32 = vcombine.high %v15156_v50, %v15188_v54 }
 0x96b   : > { %v14717_v57 = vcombine.low %v24917_v11, %v24941_v26  ;;  %16833 = vrot.lane.b32.xlu0 %v16832_v0, %s17201_s7  ;;  %v15158_v9 = vcombine.high %v15092_v46, %v15108_v4  ;;  %v15165_v24 = vrot.slane %v15157_v51, %v17507_v58  ;;  %v14718_v56 = vcombine.high %v24917_v11, %v24941_v26 }
 0x96c   : > { %v15197_v59 = vrot.slane %v15189_v62, %v17507_v58  ;;  %v15072_v4 = vcombine.high %v24828_v41, %v24834_v48  ;;  %v15204_v7 = vrot.slane %v15190_v8, %v17507_v58  ;;  %v14684_v46 = vrot.slane %v14670_v15, %v17494_v44 }
 0x96d   : > { %v14725_v3 = vrot.slane %v14717_v57, %v17494_v44  ;;  %v15022_v57 = vcombine.high %v14956_v14, %v14972_v42  ;;  %v15061_v14 = vrot.slane %v15053_v60, %v17507_v58  ;;  %v14702_v60 = vcombine.high %v24904_v20, %v24919_v45 }
 0x96e   : > { %v24964_v40 = vpop.permute.xlu0 %14609  ;;  %v24966_v49 = vpop.permute.xlu1 %14613  ;;  %v15209_v54 = vcombine.low %v15165_v24, %v15197_v59  ;;  %v15172_v26 = vrot.slane %v15158_v9, %v17507_v58  ;;  %v14732_v51 = vrot.slane %v14718_v56, %v17494_v44  ;;  %v15210_v20 = vcombine.high %v15165_v24, %v15197_v59 }
 0x96f   : > { %v14765_v29 = vcombine.low %v14709_v22, %v14725_v3  ;;  %v14766_v35 = vcombine.high %v14709_v22, %v14725_v3  ;;  %v27086_v22 = vld [vmem:[#allocation125_spill] sm:$0xff]  ;;  %v15036_v28 = vrot.slane %v15022_v57, %v17507_v58  ;;  %v14805_v25 = vcombine.low %v24943_v61, %v24966_v49 }
 0x970   : > { %v27087_v3 = vcombine.low %v27085_v1, %v27086_v22  ;;  %v15073_v11 = vcombine.low %v15029_v13, %v15061_v14  ;;  %v15074_v62 = vcombine.high %v15029_v13, %v15061_v14  ;;  %v14716_v15 = vrot.slane %v14702_v60, %v17494_v44 }
 0x971   : > { %v24978_v0 = vrot.slane %v14765_v29, %v17507_v58  ;;  %v24981_v18 = vrot.slane %v14766_v35, %v17507_v58  ;;  %v15054_v35 = vcombine.high %v14988_v47, %v15004_v17  ;;  %v14686_v47 = vcombine.high %v24886_v33, %v24902_v31 }
 0x972   : > { %v24984_v12 = vpop.permute.xlu0 %14617  ;;  %v24986_v10 = vpop.permute.xlu1 %14621  ;;  %v24996_v29 = vsel %vm2009_vm5, %v27087_v3, %v16665_v2  ;;  %v16852_v31 = vpack.i.bf16 %v15208_v32, %v15072_v4  ;;  %v14813_v45 = vrot.slane %v14805_v25, %v17494_v44  ;;  %v16862_v9 = vpack.i.bf16 %v15209_v54, %v15073_v11 }
 0x973   : > { %v14799_v39 = vcombine.low %v24975_v36, %v24981_v18  ;;  %v14821_v2 = vcombine.low %v24964_v40, %v24984_v12  ;;  %v15068_v53 = vrot.slane %v15054_v35, %v17507_v58  ;;  %v14700_v8 = vrot.slane %v14686_v47, %v17494_v44 }
 0x974   : > { %v14806_v47 = vcombine.high %v24943_v61, %v24966_v49  ;;  %v16872_v4 = vpack.i.bf16 %v15210_v20, %v15074_v62 }
 0x975   : > { %v16847_v42 = vpack.i.bf16 %v14799_v39, %v15207_v52  ;;  %v14829_v41 = vrot.slane %v14821_v2, %v17494_v44  ;;  %v15211_v39 = vcombine.low %v15172_v26, %v15204_v7  ;;  %v14822_v52 = vcombine.high %v24964_v40, %v24984_v12 }
 0x976   : > { %v14626_v1 = vpop.permute.xlu0 %14625  ;;  %v14630_v17 = vpop.permute.xlu1 %14629  ;;  %v15075_v59 = vcombine.low %v15036_v28, %v15068_v53  ;;  %v14749_v2 = vcombine.low %v14684_v46, %v14700_v8  ;;  %v14750_v40 = vcombine.high %v14684_v46, %v14700_v8  ;;  %v15076_v25 = vcombine.high %v15036_v28, %v15068_v53 }
 0x977   : > { %16848 = vrot.lane.b32.xlu1 %v16847_v42, %s17205_s11  ;;  %v14837_v33 = vcombine.low %v24986_v10, %v14630_v17  ;;  %v14869_v3 = vcombine.low %v14813_v45, %v14829_v41  ;;  %v14838_v35 = vcombine.high %v24986_v10, %v14630_v17  ;;  %v15212_v42 = vcombine.high %v15172_v26, %v15204_v7 }
 0x978   : > { %v14782_v10 = vcombine.high %v14716_v15, %v14732_v51  ;;  %v14836_v17 = vrot.slane %v14822_v52, %v17494_v44  ;;  %v16882_v7 = vpack.i.bf16 %v15211_v39, %v15075_v59  ;;  %v25057_v28 = vrot.slane %v14749_v2, %v17507_v58 }
 0x979   : > { %v14845_v13 = vrot.slane %v14837_v33, %v17494_v44  ;;  %v25049_v60 = vrot.slane %v14869_v3, %v17507_v58  ;;  %v14852_v61 = vrot.slane %v14838_v35, %v17494_v44  ;;  %v16892_v11 = vpack.i.bf16 %v15212_v42, %v15076_v25 }
 0x97a   : > { %v14634_v48 = vpop.permute.xlu0 %14633  ;;  %v25024_v50 = vpop.permute.xlu1 %16668  ;;  %v14820_v26 = vrot.slane %v14806_v47, %v17494_v44  ;;  %v14870_v46 = vcombine.high %v14813_v45, %v14829_v41  ;;  %v14798_v8 = vcombine.high %v24972_v5, %v24978_v0  ;;  %v14800_v52 = vcombine.high %v24975_v36, %v24981_v18 }
 0x97b   : > { %v14853_v57 = vcombine.low %v14626_v1, %v14634_v48  ;;  %16853 = vrot.lane.b32.xlu1 %v16852_v31, %s17204_s10  ;;  %v14854_v32 = vcombine.high %v14626_v1, %v14634_v48  ;;  %v14781_v1 = vcombine.low %v14716_v15, %v14732_v51  ;;  %v25065_v48 = vrot.slane %v14750_v40, %v17507_v58  ;;  %v27089_v40 = vld [vmem:[#allocation11_spill] sm:$0xff] }
 0x97c   : > { %v14885_v20 = vcombine.low %v14820_v26, %v14836_v17  ;;  %v16670_v45 = vunpack.i.l.bf16 %v25024_v50 }
 0x97d   : > { %v14861_v22 = vrot.slane %v14853_v57, %v17494_v44  ;;  %v14868_v12 = vrot.slane %v14854_v32, %v17494_v44  ;;  %v25060_v53 = vrot.slane %v14781_v1, %v17507_v58  ;;  %v25072_v57 = vrot.slane %v14782_v10, %v17507_v58 }
 0x97e   : > { %v25036_v14 = vpop.permute.xlu0 %16673  ;;  %v25038_v24 = vpop.permute.xlu1 %16678  ;;  %v14886_v32 = vcombine.high %v14820_v26, %v14836_v17  ;;  %v16671_v44 = vunpack.i.h.bf16 %v25024_v50  ;;  %v14893_v18 = vrot.slane %v14885_v20, %v17507_v58  ;;  %v27088_v1 = vcombine.low %v24282_v6, %v24267_v43 }
 0x97f   : > { %v14901_v56 = vcombine.low %v14845_v13, %v14861_v22  ;;  %16863 = vrot.lane.b32.xlu1 %v16862_v9, %s17203_s9  ;;  %v14902_v49 = vcombine.high %v14845_v13, %v14861_v22  ;;  %v14917_v62 = vcombine.low %v14852_v61, %v14868_v12  ;;  %v14884_v13 = vrot.slane %v14870_v46, %v17507_v58  ;;  %v27094_v46 = vld [vmem:[#allocation31_spill] sm:$0xff] }
 0x980   : > { %v14918_v22 = vcombine.high %v14852_v61, %v14868_v12  ;;  %v14801_v3 = vcombine.low %v25057_v28, %v25060_v53  ;;  %v14802_v35 = vcombine.high %v25057_v28, %v25060_v53  ;;  %v16676_v59 = vunpack.i.h.bf16 %v25036_v14  ;;  %v27091_v28 = vld [vmem:[#allocation32_spill] sm:$0xff]  ;;  %v27092_v53 = vld [vmem:[#allocation34_spill] sm:$0xff] }
 0x981   : > { %v25046_v54 = vrot.slane %v14901_v56, %v17507_v58  ;;  %v14916_v41 = vrot.slane %v14902_v49, %v17507_v58  ;;  %v14925_v50 = vrot.slane %v14917_v62, %v17507_v58  ;;  %v16675_v42 = vunpack.i.l.bf16 %v25036_v14  ;;  %v27095_v62 = vld [vmem:[#allocation153_spill] sm:$0xff] }
 0x982   : > { %v25052_v33 = vpop.permute.xlu0 %16683  ;;  %v25054_v31 = vpop.permute.xlu1 %16688  ;;  %v25095_v2 = vrot.slane %v14886_v32, %v17507_v58  ;;  %v13393_v47 = vsel %vm2009_vm5, %v27088_v1, %v16671_v44  ;;  %v16680_v56 = vunpack.i.l.bf16 %v25038_v24  ;;  %v27090_v14 = vcombine.low %v24167_v16, %v27089_v40 }
 0x983   : > { %16873 = vrot.lane.b32.xlu1 %v16872_v4, %s17202_s8  ;;  %v14934_v51 = vcombine.high %v25049_v60, %v25046_v54  ;;  %v14933_v36 = vcombine.low %v25049_v60, %v25046_v54  ;;  %v16681_v4 = vunpack.i.h.bf16 %v25038_v24  ;;  %v14935_v17 = vcombine.low %v14884_v13, %v14916_v41 }
 0x984   : > { %v13392_v12 = vsel %vm2009_vm5, %v27090_v14, %v16670_v45  ;;  %v16686_v61 = vunpack.i.h.bf16 %v25052_v33  ;;  %v16685_v49 = vunpack.i.l.bf16 %v25052_v33  ;;  %v16691_v6 = vunpack.i.h.bf16 %v25054_v31 }
 0x985   : > { %v16842_v15 = vpack.i.bf16 %v14934_v51, %v14798_v8  ;;  %v16690_v43 = vunpack.i.l.bf16 %v25054_v31  ;;  %v25113_v16 = vrot.slane %v14918_v22, %v17507_v58  ;;  %v27093_v24 = vcombine.low %v27091_v28, %v27092_v53 }
 0x986   : > { %v25077_v9 = vpop.permute.xlu0 %16693  ;;  %v16699_v39 = vpop.permute.xlu1 %16698  ;;  %v27096_v8 = vcombine.low %v27094_v46, %v27095_v62  ;;  %v14937_v33 = vcombine.low %v14893_v18, %v14925_v50  ;;  %v13394_v31 = vsel %vm2012_vm6, %v13392_v12, %v16680_v56  ;;  %v14938_v32 = vcombine.high %v14893_v18, %v14925_v50 }
 0x987   : > { %16883 = vrot.lane.b32.xlu1 %v16882_v7, %s17200_s30  ;;  %16843 = vrot.lane.b32.xlu0 %v16842_v15, %s17206_s12  ;;  %v14936_v7 = vcombine.high %v14884_v13, %v14916_v41  ;;  %v13378_v26 = vsel %vm2009_vm5, %v27093_v24, %v16675_v42  ;;  %v16701_v20 = vunpack.i.h.bf16 %v16699_v39  ;;  %v13395_v58 = vsel %vm2012_vm6, %v13393_v47, %v16681_v4 }
 0x988   : > { %v13379_v51 = vsel %vm2009_vm5, %v27096_v8, %v16676_v59  ;;  %v13380_v22 = vsel %vm2012_vm6, %v13378_v26, %v16685_v49  ;;  %v13396_v59 = vsel %vm2015_vm7, %v13394_v31, %v16690_v43  ;;  %v13397_v1 = vsel %vm2015_vm7, %v13395_v58, %v16691_v6 }
 0x989   : > { %v16857_v13 = vpack.i.bf16 %v14936_v7, %v14800_v52  ;;  %v13381_v42 = vsel %vm2012_vm6, %v13379_v51, %v16686_v61  ;;  %v16696_v56 = vunpack.i.h.bf16 %v25077_v9  ;;  %v16867_v50 = vpack.i.bf16 %v14937_v33, %v14801_v3 }
 0x98a   : > { %v16704_v25 = vpop.permute.xlu0 %16703  ;;  %v16709_v10 = vpop.permute.xlu1 %16708  ;;  %v16695_v18 = vunpack.i.l.bf16 %v25077_v9  ;;  %v13399_v52 = vsel %vm2018_vm8, %v13397_v1, %v16701_v20  ;;  %v16877_v14 = vpack.i.bf16 %v14938_v32, %v14802_v35  ;;  %v14939_v20 = vcombine.low %v25095_v2, %v25113_v16 }
 0x98b   : > { %16893 = vrot.lane.b32.xlu1 %v16892_v11, %s17201_s7  ;;  %15225 = vrot.lane.b32.xlu0 %v14935_v17, %s17205_s11  ;;  %v16700_v11 = vunpack.i.l.bf16 %v16699_v39  ;;  %v16711_v44 = vunpack.i.h.bf16 %v16709_v10  ;;  %v16710_v41 = vunpack.i.l.bf16 %v16709_v10  ;;  %v16706_v12 = vunpack.i.h.bf16 %v16704_v25 }
 0x98c   : > { %v16705_v4 = vunpack.i.l.bf16 %v16704_v25  ;;  %v13382_v35 = vsel %vm2015_vm7, %v13380_v22, %v16695_v18  ;;  %v13383_v25 = vsel %vm2015_vm7, %v13381_v42, %v16696_v56  ;;  %v27098_v18 = vld [vmem:[#allocation52_spill] sm:$0xff] }
 0x98d   : > { %v13398_v47 = vsel %vm2018_vm8, %v13396_v59, %v16700_v11  ;;  %v13401_v17 = vsel %vm2021_vm9, %v13399_v52, %v16711_v44  ;;  %v13385_v8 = vsel %vm2018_vm8, %v13383_v25, %v16706_v12  ;;  %v27101_v12 = vld [vmem:[#allocation123_spill] sm:$0xff] }
 0x98e   : > { %v16714_v45 = vpop.permute.xlu0 %16713  ;;  %v16719_v15 = vpop.permute.xlu1 %16718  ;;  %v13400_v10 = vsel %vm2021_vm9, %v13398_v47, %v16710_v41  ;;  %v13384_v62 = vsel %vm2018_vm8, %v13382_v35, %v16705_v4  ;;  %v27099_v47 = vld [vmem:[#allocation224_spill] sm:$0xff]  ;;  %v12611_v4 = vsel %vm2012_vm6, %v24996_v29, %v27101_v12  ;;  %v27105_v12 = vcombine.low %v24571_v27, %v24574_v55 }
 0x98f   : > { %v16721_v40 = vunpack.i.h.bf16 %v16719_v15  ;;  %v16720_v39 = vunpack.i.l.bf16 %v16719_v15  ;;  %16858 = vrot.lane.b32.xlu0 %v16857_v13, %s17204_s10  ;;  %v16716_v49 = vunpack.i.h.bf16 %v16714_v45  ;;  %v16715_v6 = vunpack.i.l.bf16 %v16714_v45 }
 0x990   : > { %v14803_v13 = vcombine.low %v25065_v48, %v25072_v57  ;;  %v27100_v52 = vcombine.low %v27098_v18, %v27099_v47 }
 0x991   : > { %v13402_v3 = vsel %vm2024_vm10, %v13400_v10, %v16720_v39  ;;  %v13403_v9 = vsel %vm2024_vm10, %v13401_v17, %v16721_v40  ;;  %v13386_v11 = vsel %vm2021_vm9, %v13384_v62, %v16715_v6  ;;  %v13387_v32 = vsel %vm2021_vm9, %v13385_v8, %v16716_v49 }
 0x992   : > { %v16724_v7 = vpop.permute.xlu0 %16723  ;;  %v16729_v61 = vpop.permute.xlu1 %16728  ;;  %v16887_v40 = vpack.i.bf16 %v14939_v20, %v14803_v13  ;;  %v14940_v39 = vcombine.high %v25095_v2, %v25113_v16  ;;  %v13407_v2 = vld [vmem:[#allocation3 + $0xd0] sm:$0xff] }
 0x993   : > { %v16731_v43 = vunpack.i.h.bf16 %v16729_v61  ;;  %v16730_v28 = vunpack.i.l.bf16 %v16729_v61  ;;  %v16726_v53 = vunpack.i.h.bf16 %v16724_v7  ;;  %v16725_v24 = vunpack.i.l.bf16 %v16724_v7  ;;  %16868 = vrot.lane.b32.xlu0 %v16867_v50, %s17203_s9  ;;  %s17212_s9 = smov [#allocation6]  }
 0x994   : > { %v27097_v50 = vunpack.i.h.bf16 %v27084_v34  ;;  %v14804_v34 = vcombine.high %v25065_v48, %v25072_v57  ;;  %v27102_v48 = vmov 0.0   ;;  %v13408_v57 = vld [vmem:[#allocation3 + $0xd8] sm:$0xff]  ;;  %s17131_s10 = sshll.u32 %s17212_s9, 4  ;;  %s17132_s10 = int_to_ptr.vmem [resolvable:$false] %s17131_s10 }
 0x995   : > { %v13404_v26 = vsel %vm2027_vm11, %v13402_v3, %v16730_v28  ;;  %v13405_v46 = vsel %vm2027_vm11, %v13403_v9, %v16731_v43  ;;  %v13388_v41 = vsel %vm2024_vm10, %v13386_v11, %v16725_v24  ;;  %v13389_v45 = vsel %vm2024_vm10, %v13387_v32, %v16726_v53  ;;  %s17133_s11 = scalar_lea.vmem %s17132_s10, 4096  ;;  %p17134_p2 = scmp.lt.s32.totalorder %s25306_s26, %s17132_s10 }
 0x996   : > { %v16734_v51 = vpop.permute.xlu0 %16733  ;;  %v25146_v33 = vpop.permute.xlu1 %16738  ;;  %v15652_v31 = vpack.c.bf16 %v13405_v46, %v13404_v26  ;;  %v16897_v29 = vpack.i.bf16 %v14940_v39, %v14804_v34 }
 0x997   : > { %v16736_v58 = vunpack.i.h.bf16 %v16734_v51  ;;  %v16735_v44 = vunpack.i.l.bf16 %v16734_v51  ;;  %v16740_v15 = vunpack.i.l.bf16 %v25146_v33  ;;  %16878 = vrot.lane.b32.xlu0 %v16877_v14, %s17202_s8  ;;  %v12610_v14 = vsel %vm2009_vm5, %v27100_v52, %v27097_v50  ;;  %s17127_s8 = scalar_lea.vmem %s25306_s26, 2048 }
 0x998   : > { %15653 = vmatprep.subr.bf16.mxu0 %v15652_v31  ;;  %v16741_v18 = vunpack.i.h.bf16 %v25146_v33  ;;  %p17128_p6 = scmp.ne.s32.totalorder %s25306_s26, %s17127_s8  ;;  %p17135_p3 = scmp.lt.s32.totalorder %s17133_s11, %s17127_s8 }
 0x999   : > { %v13390_v22 = vsel %vm2027_vm11, %v13388_v41, %v16735_v44  ;;  %v13391_v42 = vsel %vm2027_vm11, %v13389_v45, %v16736_v58  ;;  %v12612_v7 = vsel %vm2012_vm6, %v12610_v14, %v16740_v15  ;;  %v27103_v45 = vpack.c.bf16 %v24558_v63, %v24555_v37  ;;  %v12624_v15 = vld [vmem:[#allocation3 + $0xc0] sm:$0xff] }
 0x99a   : > { %v15654_v59 = vpack.c.bf16 %v13391_v42, %v13390_v22  ;;  %v16744_v1 = vpop.permute.xlu0 %16743  ;;  %v16749_v56 = vpop.permute.xlu1 %16748  ;;  %v12625_v22 = vld [vmem:[#allocation3 + $0xc8] sm:$0xff]  ;;  %v27104_v37 = vcombine.low %v24633_v19, %v24619_v30  ;;  %p17129_p10 = pnand %p17128_p6, %p27118_p9  ;;  %p17136_p4 = por %p17135_p3, %p17134_p2 }
 0x99b   : > { %v16746_v10 = vunpack.i.h.bf16 %v16744_v1  ;;  %v16745_v17 = vunpack.i.l.bf16 %v16744_v1  ;;  %v16751_v61 = vunpack.i.h.bf16 %v16749_v56  ;;  %v16750_v49 = vunpack.i.l.bf16 %v16749_v56  ;;  %16888 = vrot.lane.b32.xlu0 %v16887_v40, %s17200_s30 }
 0x99c   : > { %15655 = vmatpush1.bf16.msra.mxu0 %v15654_v59  ;;  %p17130_p12 = pneg %p17129_p10 }
 0x99d   : > { %v12613_v16 = vsel %vm2015_vm7, %v12611_v4, %v16745_v17  ;;  %v12614_v6 = vsel %vm2015_vm7, %v12612_v7, %v16746_v10 }
 0x99e   : > { %v16754_v43 = vpop.permute.xlu0 %16753  ;;  %v16759_v28 = vpop.permute.xlu1 %16758  ;;  %v12615_v53 = vsel %vm2018_vm8, %v12613_v16, %v16750_v49  ;;  %v12616_v24 = vsel %vm2018_vm8, %v12614_v6, %v16751_v61  ;;  %p17137_p7 = pnand %p17136_p4, %p17130_p12 }
 0x99f   : > { %v16756_v3 = vunpack.i.h.bf16 %v16754_v43  ;;  %v16755_v9 = vunpack.i.l.bf16 %v16754_v43  ;;  %15585 = vmatmul.mubr.msk.f32.vlgmr.msra.gmra.mrb[6].mxu0 %vm2009_vm5, %v13407_v2  ;;  %v16761_v35 = vunpack.i.h.bf16 %v16759_v28  ;;  %v16760_v25 = vunpack.i.l.bf16 %v16759_v28  ;;  %16898 = vrot.lane.b32.xlu0 %v16897_v29, %s17201_s7  ;;  %s25303_s7 = scalar_lea.hbm %s25359_s5, %s15603_s25 }
 0x9a0   : > { %13485 = vmatprep.mubr.f32.mxu0 %v27102_v48 }
 0x9a1   : > { %v12617_v26 = vsel %vm2021_vm9, %v12615_v53, %v16755_v9  ;;  %v12618_v46 = vsel %vm2021_vm9, %v12616_v24, %v16756_v3 }
 0x9a2   : > { %v16764_v62 = vpop.permute.xlu0 %16763  ;;  %v12619_v31 = vsel %vm2024_vm10, %v12617_v26, %v16760_v25  ;;  %v12620_v20 = vsel %vm2024_vm10, %v12618_v46, %v16761_v35  ;;  %v16769_v11 = vpop.permute.xlu1 %16768 }
 0x9a3   : > { %v16766_v8 = vunpack.i.h.bf16 %v16764_v62  ;;  %v16765_v51 = vunpack.i.l.bf16 %v16764_v62  ;;  %15586 = vmatmul.mubr.msk.f32.gmra.mrb[8].mxu0 %vm2009_vm5, %v13408_v57  ;;  %v16770_v59 = vunpack.i.l.bf16 %v16769_v11  ;;  %v16771_v56 = vunpack.i.h.bf16 %v16769_v11 }
 0x9a4   : > { %13562 = vmatprep.mubr.f32.mxu0 %v27102_v48 }
 0x9a5   : > { %v12621_v32 = vsel %vm2027_vm11, %v12619_v31, %v16765_v51  ;;  %v12622_v58 = vsel %vm2027_vm11, %v12620_v20, %v16766_v8  ;;  %v14405_v63 = vsel %vm2009_vm5, %v27104_v37, %v16770_v59  ;;  %v14406_v4 = vsel %vm2009_vm5, %v27105_v12, %v16771_v56 }
 0x9a6   : > { %v15656_v44 = vpack.c.bf16 %v12622_v58, %v12621_v32  ;;  %v14407_v30 = vsel %vm2012_vm6, %v14405_v63, %v16741_v18  ;;  %v27106_v51 = vcombine.low %v24687_v38, %v24693_v21 }
 0x9a8   : > { %15657 = vmatprep.subr.bf16.mxu0 %v15656_v44 }
 0x9a9   : > { %v25190_v41 = vpop.permute.xlu1 %16778  ;;  %15659 = vmatpush1.bf16.msra.mxu0 %v27103_v45 }
 0x9aa   : > { %v16780_v40 = vunpack.i.l.bf16 %v25190_v41  ;;  %v16781_v32 = vunpack.i.h.bf16 %v25190_v41 }
 0x9ac   : > { %15587 = vmatmul.mubr.msk.f32.vlgmr.msra.gmra.mrb[6].mxu0 %vm2009_vm5, %v12624_v15  ;;  %v14408_v7 = vsel %vm2012_vm6, %v14406_v4, %v16780_v40  ;;  %v27107_v15 = vld [vmem:[#allocation19_spill] sm:$0xff] }
 0x9ad   : > { %v16789_v13 = vpop.permute.xlu1 %16788  ;;  %13568 = vmatprep.mubr.f32.mxu0 %v27102_v48 }
 0x9ae   : > { %v16791_v39 = vunpack.i.h.bf16 %v16789_v13  ;;  %v16790_v50 = vunpack.i.l.bf16 %v16789_v13  ;;  %v27108_v13 = vcombine.low %v24753_v23, %v27107_v15 }
 0x9b0   : > { %15588 = vmatmul.mubr.msk.f32.gmra.mrb[8].mxu0 %vm2009_vm5, %v12625_v22  ;;  %v14409_v49 = vsel %vm2015_vm7, %v14407_v30, %v16790_v50  ;;  %v14410_v33 = vsel %vm2015_vm7, %v14408_v7, %v16791_v39  ;;  %v14421_v30 = vld [vmem:[#allocation3 + $0xe8] sm:$0xff] }
 0x9b1   : > { %v16799_v42 = vpop.permute.xlu1 %16798  ;;  %14492 = vmatprep.mubr.f32.mxu0 %v27102_v48 }
 0x9b2   : > { %v16801_v47 = vunpack.i.h.bf16 %v16799_v42  ;;  %v16800_v52 = vunpack.i.l.bf16 %v16799_v42 }
 0x9b4   : > { %v14411_v34 = vsel %vm2018_vm8, %v14409_v49, %v16800_v52  ;;  %v14412_v2 = vsel %vm2018_vm8, %v14410_v33, %v16801_v47 }
 0x9b5   : > { %v16809_v1 = vpop.permute.xlu1 %16808 }
 0x9b6   : > { %v16811_v10 = vunpack.i.h.bf16 %v16809_v1  ;;  %v16810_v17 = vunpack.i.l.bf16 %v16809_v1 }
 0x9b8   : > { %v14413_v27 = vsel %vm2021_vm9, %v14411_v34, %v16810_v17  ;;  %v14414_v55 = vsel %vm2021_vm9, %v14412_v2, %v16811_v10  ;;  %v14420_v17 = vld [vmem:[#allocation3 + $0xe0] sm:$0xff] }
 0x9b9   : > { %v16819_v14 = vpop.permute.xlu1 %16818  ;;  %v16774_v24 = vpop.permute.xlu0 %16773 }
 0x9ba   : > { %v16821_v19 = vunpack.i.h.bf16 %v16819_v14  ;;  %v16820_v61 = vunpack.i.l.bf16 %v16819_v14  ;;  %v16775_v26 = vunpack.i.l.bf16 %v16774_v24  ;;  %v16776_v62 = vunpack.i.h.bf16 %v16774_v24 }
 0x9bc   : > { %v14415_v28 = vsel %vm2024_vm10, %v14413_v27, %v16820_v61  ;;  %v14416_v29 = vsel %vm2024_vm10, %v14414_v55, %v16821_v19  ;;  %v14391_v31 = vsel %vm2009_vm5, %v27106_v51, %v16775_v26  ;;  %v14392_v22 = vsel %vm2009_vm5, %v27108_v13, %v16776_v62  ;;  %v27109_v27 = vld [vmem:[#allocation20_spill] sm:$0xff]  ;;  %v27110_v55 = vld [vmem:[#allocation33_spill] sm:$0xff] }
 0x9bd   : > { %v16829_v16 = vpop.permute.xlu1 %16828  ;;  %v14393_v38 = vsel %vm2012_vm6, %v14391_v31, %v16781_v32 }
 0x9be   : > { %v16831_v6 = vunpack.i.h.bf16 %v16829_v16  ;;  %v16830_v43 = vunpack.i.l.bf16 %v16829_v16 }
 0x9c0   : > { %v14417_v3 = vsel %vm2027_vm11, %v14415_v28, %v16830_v43  ;;  %v14418_v9 = vsel %vm2027_vm11, %v14416_v29, %v16831_v6  ;;  %v27111_v6 = vcombine.low %v27109_v27, %v27110_v55 }
 0x9c1   : > { %v15660_v53 = vpack.c.bf16 %v14418_v9, %v14417_v3 }
 0x9c3   : > { %15661 = vmatprep.subr.bf16.mxu0 %v15660_v53 }
 0x9c9   : > { %v25221_v35 = vpop.permute.xlu0 %16783 }
 0x9ca   : > { %v16785_v8 = vunpack.i.l.bf16 %v25221_v35  ;;  %v16786_v3 = vunpack.i.h.bf16 %v25221_v35 }
 0x9cc   : > { %v14394_v1 = vsel %vm2012_vm6, %v14392_v22, %v16785_v8 }
 0x9cd   : > { %v16794_v25 = vpop.permute.xlu0 %16793 }
 0x9ce   : > { %v16796_v20 = vunpack.i.h.bf16 %v16794_v25  ;;  %v16795_v11 = vunpack.i.l.bf16 %v16794_v25  ;;  %v27112_v25 = vld [vmem:[#allocation222_spill] sm:$0xff] }
 0x9d0   : > { %v14395_v40 = vsel %vm2015_vm7, %v14393_v38, %v16795_v11  ;;  %v14396_v41 = vsel %vm2015_vm7, %v14394_v1, %v16796_v20 }
 0x9d1   : > { %v16804_v57 = vpop.permute.xlu0 %16803 }
 0x9d2   : > { %v16806_v58 = vunpack.i.h.bf16 %v16804_v57  ;;  %v16805_v44 = vunpack.i.l.bf16 %v16804_v57  ;;  %v27113_v57 = vld [vmem:[#allocation14_spill] sm:$0xff] }
 0x9d3   : > { %v27114_v26 = vcombine.low %v27112_v25, %v27113_v57  ;;  %v27116_v25 = vld [vmem:[#allocation10_spill] sm:$0xff] }
 0x9d4   : > { %v14397_v37 = vsel %vm2018_vm8, %v14395_v40, %v16805_v44  ;;  %v14398_v63 = vsel %vm2018_vm8, %v14396_v41, %v16806_v58 }
 0x9d5   : > { %v16814_v46 = vpop.permute.xlu0 %16813 }
 0x9d6   : > { %v16816_v42 = vunpack.i.h.bf16 %v16814_v46  ;;  %v16815_v59 = vunpack.i.l.bf16 %v16814_v46 }
 0x9d8   : > { %v14399_v23 = vsel %vm2021_vm9, %v14397_v37, %v16815_v59  ;;  %v14400_v50 = vsel %vm2021_vm9, %v14398_v63, %v16816_v42 }
 0x9d9   : > { %v16824_v45 = vpop.permute.xlu0 %16823  ;;  %v16839_v7 = vpop.permute.xlu1 %16838 }
 0x9da   : > { %v16826_v21 = vunpack.i.h.bf16 %v16824_v45  ;;  %v16825_v56 = vunpack.i.l.bf16 %v16824_v45  ;;  %v16840_v33 = vunpack.i.l.bf16 %v16839_v7  ;;  %v16841_v2 = vunpack.i.h.bf16 %v16839_v7 }
 0x9dc   : > { %v14401_v52 = vsel %vm2024_vm10, %v14399_v23, %v16825_v56  ;;  %v14402_v14 = vsel %vm2024_vm10, %v14400_v50, %v16826_v21  ;;  %v15339_v43 = vsel %vm2009_vm5, %v27111_v6, %v16840_v33  ;;  %v15340_v46 = vsel %vm2009_vm5, %v27114_v26, %v16841_v2 }
 0x9dd   : > { %v16834_v39 = vpop.permute.xlu0 %16833  ;;  %v15341_v20 = vsel %vm2012_vm6, %v15339_v43, %v16786_v3 }
 0x9de   : > { %v16836_v18 = vunpack.i.h.bf16 %v16834_v39  ;;  %v16835_v47 = vunpack.i.l.bf16 %v16834_v39 }
 0x9e0   : > { %v14403_v12 = vsel %vm2027_vm11, %v14401_v52, %v16835_v47  ;;  %v14404_v4 = vsel %vm2027_vm11, %v14402_v14, %v16836_v18  ;;  %v27115_v18 = vcombine.low %v24972_v5, %v24978_v0 }
 0x9e1   : > { %v15662_v10 = vpack.c.bf16 %v14404_v4, %v14403_v12 }
 0x9e3   : > { %15663 = vmatpush1.bf16.msra.mxu0 %v15662_v10 }
 0x9e6   : > { %15589 = vmatmul.mubr.msk.f32.vlgmr.msra.gmra.mrb[6].mxu0 %vm2009_vm5, %v14420_v17 }
 0x9e7   : > { %14498 = vmatprep.mubr.f32.mxu0 %v27102_v48 }
 0x9e9   : > { %v16849_v19 = vpop.permute.xlu1 %16848 }
 0x9ea   : > { %15590 = vmatmul.mubr.msk.f32.gmra.mrb[8].mxu0 %vm2009_vm5, %v14421_v30  ;;  %v16850_v16 = vunpack.i.l.bf16 %v16849_v19  ;;  %v16851_v4 = vunpack.i.h.bf16 %v16849_v19 }
 0x9eb   : > { %15426 = vmatprep.mubr.f32.mxu0 %v27102_v48 }
 0x9ec   : > { %v15342_v31 = vsel %vm2012_vm6, %v15340_v46, %v16850_v16 }
 0x9ed   : > { %v16854_v61 = vpop.permute.xlu1 %16853 }
 0x9ee   : > { %v16856_v28 = vunpack.i.h.bf16 %v16854_v61  ;;  %v16855_v29 = vunpack.i.l.bf16 %v16854_v61 }
 0x9f0   : > { %v15343_v58 = vsel %vm2015_vm7, %v15341_v20, %v16855_v29  ;;  %v15344_v35 = vsel %vm2015_vm7, %v15342_v31, %v16856_v28 }
 0x9f1   : > { %v16864_v49 = vpop.permute.xlu1 %16863 }
 0x9f2   : > { %v16866_v9 = vunpack.i.h.bf16 %v16864_v49  ;;  %v16865_v53 = vunpack.i.l.bf16 %v16864_v49 }
 0x9f4   : > { %v15345_v44 = vsel %vm2018_vm8, %v15343_v58, %v16865_v53  ;;  %v15346_v45 = vsel %vm2018_vm8, %v15344_v35, %v16866_v9  ;;  %v15354_v9 = vld [vmem:[#allocation3 + $0xf0] sm:$0xff]  ;;  %v15355_v53 = vld [vmem:[#allocation3 + $0xf8] sm:$0xff] }
 0x9f5   : > { %v16874_v34 = vpop.permute.xlu1 %16873 }
 0x9f6   : > { %v16876_v62 = vunpack.i.h.bf16 %v16874_v34  ;;  %v16875_v8 = vunpack.i.l.bf16 %v16874_v34 }
 0x9f8   : > { %v15347_v13 = vsel %vm2021_vm9, %v15345_v44, %v16875_v8  ;;  %v15348_v22 = vsel %vm2021_vm9, %v15346_v45, %v16876_v62  ;;  %v27117_v8 = vld [vmem:[#allocation9_spill] sm:$0xff] }
 0x9f9   : > { %v16884_v24 = vpop.permute.xlu1 %16883  ;;  %v16844_v51 = vpop.permute.xlu0 %16843 }
 0x9fa   : > { %v16886_v11 = vunpack.i.h.bf16 %v16884_v24  ;;  %v16885_v32 = vunpack.i.l.bf16 %v16884_v24  ;;  %v16846_v39 = vunpack.i.h.bf16 %v16844_v51  ;;  %v16845_v23 = vunpack.i.l.bf16 %v16844_v51 }
 0x9fc   : > { %v15349_v38 = vsel %vm2024_vm10, %v15347_v13, %v16885_v32  ;;  %v15350_v21 = vsel %vm2024_vm10, %v15348_v22, %v16886_v11  ;;  %v15325_v47 = vsel %vm2009_vm5, %v27115_v18, %v16845_v23  ;;  %v15326_v52 = vsel %vm2009_vm5, %v14933_v36, %v16846_v39 }
 0x9fd   : > { %v16894_v15 = vpop.permute.xlu1 %16893  ;;  %v15226_v42 = vpop.permute.xlu0 %15225  ;;  %v15327_v33 = vsel %vm2012_vm6, %v15325_v47, %v16851_v4 }
 0x9fe   : > { %v16896_v59 = vunpack.i.h.bf16 %v16894_v15  ;;  %v16895_v1 = vunpack.i.l.bf16 %v16894_v15  ;;  %v15328_v49 = vsel %vm2012_vm6, %v15326_v52, %v15226_v42 }
 0xa00   : > { %v15351_v56 = vsel %vm2027_vm11, %v15349_v38, %v16895_v1  ;;  %v15352_v40 = vsel %vm2027_vm11, %v15350_v21, %v16896_v59 }
 0xa01   : > { %v15664_v41 = vpack.c.bf16 %v15352_v40, %v15351_v56  ;;  %v16859_v37 = vpop.permute.xlu0 %16858 }
 0xa02   : > { %v16861_v14 = vunpack.i.h.bf16 %v16859_v37  ;;  %v16860_v12 = vunpack.i.l.bf16 %v16859_v37 }
 0xa03   : > { %15665 = vmatprep.subr.bf16.mxu0 %v15664_v41 }
 0xa04   : > { %v15329_v34 = vsel %vm2015_vm7, %v15327_v33, %v16860_v12  ;;  %v15330_v54 = vsel %vm2015_vm7, %v15328_v49, %v16861_v14 }
 0xa05   : > { %v16869_v63 = vpop.permute.xlu0 %16868 }
 0xa06   : > { %v16871_v10 = vunpack.i.h.bf16 %v16869_v63  ;;  %v16870_v17 = vunpack.i.l.bf16 %v16869_v63 }
 0xa08   : > { %v15331_v60 = vsel %vm2018_vm8, %v15329_v34, %v16870_v17  ;;  %v15332_v36 = vsel %vm2018_vm8, %v15330_v54, %v16871_v10 }
 0xa09   : > { %v16879_v50 = vpop.permute.xlu0 %16878 }
 0xa0a   : > { %v16881_v30 = vunpack.i.h.bf16 %v16879_v50  ;;  %v16880_v61 = vunpack.i.l.bf16 %v16879_v50 }
 0xa0c   : > { %v15333_v2 = vsel %vm2021_vm9, %v15331_v60, %v16880_v61  ;;  %v15334_v16 = vsel %vm2021_vm9, %v15332_v36, %v16881_v30 }
 0xa0d   : > { %v16889_v7 = vpop.permute.xlu0 %16888 }
 0xa0e   : > { %v16891_v5 = vunpack.i.h.bf16 %v16889_v7  ;;  %v16890_v0 = vunpack.i.l.bf16 %v16889_v7 }
 0xa10   : > { %v15335_v6 = vsel %vm2024_vm10, %v15333_v2, %v16890_v0  ;;  %v15336_v43 = vsel %vm2024_vm10, %v15334_v16, %v16891_v5 }
 0xa11   : > { %v16899_v19 = vpop.permute.xlu0 %16898 }
 0xa12   : > { %v16901_v27 = vunpack.i.h.bf16 %v16899_v19  ;;  %v16900_v55 = vunpack.i.l.bf16 %v16899_v19 }
 0xa14   : > { %v15337_v28 = vsel %vm2027_vm11, %v15335_v6, %v16900_v55  ;;  %v15338_v29 = vsel %vm2027_vm11, %v15336_v43, %v16901_v27 }
 0xa15   : > { %v15666_v3 = vpack.c.bf16 %v15338_v29, %v15337_v28 }
 0xa17   : > { %15667 = vmatpush1.bf16.msra.mxu0 %v15666_v3 }
 0xa1a   : > { %15591 = vmatmul.mubr.msk.f32.vlgmr.msra.gmra.mrb[6].mxu0 %vm2009_vm5, %v15354_v9 }
 0xa1b   : > { %15432 = vmatprep.mubr.f32.mxu0 %v27102_v48 }
 0xa1e   : > { %15592 = vmatmul.mubr.msk.f32.gmra.mrb[8].mxu0 %vm2009_vm5, %v15355_v53 }
 0xaed   : > { %v15428_v24 = vpop.f32.mrb[6].mxu0 }
 0xaee   : > { %v15443_v57 = vadd.f32 %v15428_v24, %v27116_v25  ;;  %v15430_v26 = vpop.f32.mrb[7].mxu0 }
 0xaef   : > { %v15444_v46 = vadd.f32 %v15430_v26, %v27116_v25 }
 0xaf0   : > { %15593 = vst [vmem:[%s21863_s23 + $0x60] sm:$0xff] %v15443_v57 }
 0xaf1   : > { %15594 = vst [vmem:[%s21863_s23 + $0x68] sm:$0xff] %v15444_v46  ;;  %v15434_v62 = vpop.f32.mrb[8].mxu0 }
 0xaf2   : > { %v15445_v48 = vadd.f32 %v15434_v62, %v27117_v8  ;;  %v15436_v51 = vpop.f32.mrb[9].mxu0 }
 0xaf3   : > { %v15446_v31 = vadd.f32 %v15436_v51, %v27117_v8 }
 0xaf4   : > { %15595 = vst [vmem:[%s21863_s23 + $0x70] sm:$0xff] %v15445_v48 }
 0xaf5   : > { %15596 = vst [vmem:[%s21863_s23 + $0x78] sm:$0xff] %v15446_v31 }
 0xaf6   : > { %17140 = shalt.err (!%p17137_p7)
}
 0xaf7   : > { %s17141_s13 = scalar_lea.hbm %s25303_s7, 2048  ;;  %s17145_s16 = scalar_lea.hbm %s25359_s5, 4096 }
 0xaf8   : > { %p17142_p8 = scmp.ne.s32.totalorder %s25303_s7, %s17141_s13  ;;  %p17146_p1 = scmp.lt.u32.totalorder %s25303_s7, %s25359_s5 }
 0xaf9   : > { %p17147_p0 = scmp.lt.u32.totalorder %s17145_s16, %s17141_s13  ;;  %p17149_p6 = scmp.lt.u32.totalorder %s17141_s13, %s25303_s7 }
 0xafa   : > { %p17143_p11 = pnand %p17142_p8, %p27118_p9 }
 0xafb   : > { %p17148_p5 = por %p17147_p0, %p17146_p1 }
 0xafc   : > { %p17144_p13 = pneg %p17143_p11 }
 0xafd   : > { %p17150_p10 = por %p17149_p6, %p17148_p5 }
 0xaff   : > { %p17151_p12 = pnand %p17150_p10, %p17144_p13 }
 0xb01   : > { %17154 = shalt.err (!%p17151_p12)
}
 0xb02   : > { %s17213_s25 = smov 256  }
 0xb03   : > { %15722 = dma.vmem_to_hbm [thread:$0]  (%p27118_p9), %s25306_s26, 2048, %s25303_s7, %s25312_s22, %s17213_s25, %s17213_s25, %s17206_s12  }
 0xb04 PF: > { %p15734_p2 = scmp.ge.s32.totalorder %s17193_s21, 2  ;;  %s15481_s6 = sand.u32 1, %s17181_s18  }
 0xb05   : > { %p27119_p3 = scmp.ne.s32.totalorder %s25941_s29, 0  ;;  %s15482_s30 = scalar_lea.sflag [#allocation5], %s15481_s6 }
 0xb07   : > { %p15729_p4 = pnand %p15734_p2, %p27119_p3 }
 0xb09   : > { %17176 = dma.done.wait (!%p15729_p4), %s15482_s30, 2048  }
 0xb0a   : > { %17178 = vsyncadd (!%p15729_p4), %s15482_s30, 4294965248  ;;  %p16_p7 = scmp.ge.s32.totalorder %s17269_s24, 4   ;;  %s27120_s18 = smov %s17185_s19 }
 0xb0b   : > { %s27121_s19 = smov %s17189_s20  ;;  %s27122_s20 = smov %s17280_s27 }
 0xb0c   : > { %s27123_s21 = smov %s17269_s24  ;;  %18 = sbr.rel (!%p16_p7) target bundleno = 4 (0x4), region = 98 }
 0xb13   :  { %15487 = vsyncpa [#allocation4], 1 }
 0xb14   :  { %15489 = vsyncpa [#allocation4 + $0x1], 1 }
 0xb15   :  { %15490 = vsyncpa [#allocation5], 1 }
 0xb16   :  { %15492 = vsyncpa [#allocation5 + $0x1], 1 }

</bundles_post_ra>
